<compile_context>
chip_gen: v7x
topology: tpu7x:2x2x1
jax: 0.10.0
libtpu: 0.0.40
codegen_flags: <defaults>
</compile_context>

<pallas_src>
import math

import jax
import jax.numpy as jnp
from jax.experimental import pallas as pl
from jax.experimental.pallas import tpu as pltpu

NUM_CLASSES = 28
BN_EPS = 1e-5
# ResNet-34 layer configuration: (planes, num_blocks, first-block stride)
LAYER_CFGS = ((64, 3, 1), (128, 4, 2), (256, 6, 2), (512, 3, 2))


def _round_up(x, m):
    return ((x + m - 1) // m) * m


# ---------------------------------------------------------------------------
# Pallas kernels
# ---------------------------------------------------------------------------
def _make_fused_matmul_kernel(apply_relu, has_residual):
    """(tm,tk)x(tk,Np) MXU matmul accumulated over the K grid axis in an f32 VMEM
    scratch; epilogue adds folded-BN shift (+ residual), applies ReLU, stores."""
    def kernel(a_ref, b_ref, c_ref, *rest):
        if has_residual:
            r_ref, o_ref, acc_ref = rest
        else:
            r_ref = None
            o_ref, acc_ref = rest

        k = pl.program_id(1)

        @pl.when(k == 0)
        def _():
            acc_ref[...] = jnp.zeros_like(acc_ref)

        acc_ref[...] += jnp.dot(a_ref[...], b_ref[...],
                                preferred_element_type=jnp.float32)

        @pl.when(k == pl.num_programs(1) - 1)
        def _():
            acc = acc_ref[...] + c_ref[...]
            if has_residual:
                acc = acc + r_ref[...].astype(jnp.float32)
            if apply_relu:
                acc = jnp.maximum(acc, 0.0)
            o_ref[...] = acc.astype(o_ref.dtype)

    return kernel


def _maxpool_kernel(*refs):
    # refs = (v0..v8, o_ref): pairwise VPU max of 9 lane-aligned (tm, C) tiles.
    o_ref = refs[-1]
    m = refs[0][...]
    for r in refs[1:-1]:
        m = jnp.maximum(m, r[...])
    o_ref[...] = m


def _avgpool_kernel(x_ref, o_ref):
    # x_ref: (1, H*W, C) bf16 -> f32 mean over spatial axis, (1, 1, C) out.
    o_ref[...] = jnp.mean(x_ref[...].astype(jnp.float32), axis=1, keepdims=True)


# ---------------------------------------------------------------------------
# Pallas wrappers
# ---------------------------------------------------------------------------
def fused_matmul(a, b, shift, *, n_out, relu, residual=None, out_dtype=jnp.bfloat16):
    """out = maybe_relu(a @ b + shift [+ residual])[:, :n_out].

    a: (M, K); b: (K, Np) bf16 with Np a multiple of 128 (BN scale pre-folded);
    shift: (Np,) f32; residual: (M, n_out) or None.
    """
    M, K = a.shape
    Kb, Np = b.shape
    assert K == Kb and Np % 128 == 0

    # --- M tiling: real grid + pipelining; 256-wide tiles feed the 256x256 MXUs.
    if M > 128:
        tm = 256
        Mp = _round_up(M, tm)
    else:
        Mp = _round_up(max(M, 8), 8)
        tm = Mp

    # --- K tiling: largest MXU-friendly chunk that divides the padded K.
    Kp = _round_up(K, 128)
    tk = next(t for t in (512, 384, 256, 128) if Kp % t == 0)

    a_p = a.astype(jnp.bfloat16)
    if (Mp, Kp) != (M, K):
        a_p = jnp.pad(a_p, ((0, Mp - M), (0, Kp - K)))
    b_p = b.astype(jnp.bfloat16)
    if Kp != K:
        b_p = jnp.pad(b_p, ((0, Kp - K), (0, 0)))
    c2 = shift.reshape(1, Np).astype(jnp.float32)

    inputs = [a_p, b_p, c2]
    in_specs = [
        pl.BlockSpec((tm, tk), lambda i, k: (i, k)),
        pl.BlockSpec((tk, Np), lambda i, k: (k, 0)),
        pl.BlockSpec((1, Np), lambda i, k: (0, 0)),
    ]
    has_residual = residual is not None
    if has_residual:
        rM, rN = residual.shape
        r_p = residual.astype(jnp.bfloat16)
        if (Mp, Np) != (rM, rN):
            r_p = jnp.pad(r_p, ((0, Mp - rM), (0, Np - rN)))
        inputs.append(r_p)
        in_specs.append(pl.BlockSpec((tm, Np), lambda i, k: (i, 0)))

    out = pl.pallas_call(
        _make_fused_matmul_kernel(relu, has_residual),
        out_shape=jax.ShapeDtypeStruct((Mp, Np), out_dtype),
        grid=(Mp // tm, Kp // tk),
        in_specs=in_specs,
        out_specs=pl.BlockSpec((tm, Np), lambda i, k: (i, 0)),
        scratch_shapes=[pltpu.VMEM((tm, Np), jnp.float32)],
        compiler_params=pltpu.CompilerParams(
            dimension_semantics=("parallel", "arbitrary")),
    )(*inputs)
    return out[:M, :n_out]


def conv2d_bn(x, w_mat, shift, kh, kw, stride, padding, cout,
              relu=True, residual=None):
    """x: NHWC bf16; w_mat: (kh*kw*Cin, Np) bf16 with BN scale folded in and Cout
    padded to Np; shift: (Np,) f32 folded BN shift; residual added pre-ReLU."""
    N, H, W, Cin = x.shape
    K, Np = w_mat.shape
    assert K == kh * kw * Cin
    Ho = (H + 2 * padding - kh) // stride + 1
    Wo = (W + 2 * padding - kw) // stride + 1

    x = x.astype(jnp.bfloat16)
    if padding > 0:
        xp = jnp.pad(x, ((0, 0), (padding, padding), (padding, padding), (0, 0)))
    else:
        xp = x

    # TODO(synk): im2col A matrix is still materialized in HBM by XLA (kh*kw x the
    # activation volume); folding the tap loop into the K grid axis with element-
    # offset BlockSpecs would remove that round-trip.
    if kh == 1 and kw == 1:
        a = xp[:, ::stride, ::stride, :].reshape(N * Ho * Wo, Cin)
    else:
        patches = []
        for dh in range(kh):
            for dw in range(kw):
                patches.append(
                    xp[:, dh:dh + (Ho - 1) * stride + 1:stride,
                       dw:dw + (Wo - 1) * stride + 1:stride, :])
        a = jnp.stack(patches, axis=3).reshape(N * Ho * Wo, kh * kw * Cin)

    res_flat = None
    if residual is not None:
        res_flat = residual.reshape(N * Ho * Wo, cout)

    out = fused_matmul(a, w_mat, shift, n_out=cout, relu=relu,
                       residual=res_flat, out_dtype=jnp.bfloat16)
    return out.reshape(N, Ho, Wo, cout)


def maxpool_3x3_s2_p1(x):
    N, H, W, C = x.shape
    Ho = (H + 2 - 3) // 2 + 1
    Wo = (W + 2 - 3) // 2 + 1
    xp = jnp.pad(x, ((0, 0), (1, 1), (1, 1), (0, 0)), constant_values=-jnp.inf)
    M = N * Ho * Wo
    views = []
    for dh in range(3):
        for dw in range(3):
            views.append(
                xp[:, dh:dh + (Ho - 1) * 2 + 1:2,
                   dw:dw + (Wo - 1) * 2 + 1:2, :].reshape(M, C))

    if M % 8 == 0:
        tm = next(t for t in (512, 256, 128, 64, 32, 16, 8) if M % t == 0)
    else:
        tm = M  # full-dim block (exempt from the (8,128) rule)

    out = pl.pallas_call(
        _maxpool_kernel,
        out_shape=jax.ShapeDtypeStruct((M, C), x.dtype),
        grid=(M // tm,),
        in_specs=[pl.BlockSpec((tm, C), lambda i: (i, 0)) for _ in range(9)],
        out_specs=pl.BlockSpec((tm, C), lambda i: (i, 0)),
        compiler_params=pltpu.CompilerParams(dimension_semantics=("parallel",)),
    )(*views)
    return out.reshape(N, Ho, Wo, C)


def global_avgpool(x):
    N, H, W, C = x.shape
    xr = x.reshape(N, H * W, C)
    out = pl.pallas_call(
        _avgpool_kernel,
        out_shape=jax.ShapeDtypeStruct((N, 1, C), jnp.float32),
        grid=(N,),
        in_specs=[pl.BlockSpec((1, H * W, C), lambda i: (i, 0, 0))],
        out_specs=pl.BlockSpec((1, 1, C), lambda i: (i, 0, 0)),
        compiler_params=pltpu.CompilerParams(dimension_semantics=("parallel",)),
    )(xr)
    return out.reshape(N, C)


# ---------------------------------------------------------------------------
# Model definition (parameter init + forward)
# ---------------------------------------------------------------------------
class _KeyGen:
    def __init__(self, key):
        self.key = key

    def __call__(self):
        self.key, sub = jax.random.split(self.key)
        return sub


def _conv_w(kg, cout, cin, k):
    fan_in = cin * k * k
    return jax.random.normal(kg(), (cout, cin, k, k), jnp.float32) / math.sqrt(fan_in)


def _bn_fold(kg, c):
    gamma = 1.0 + 0.1 * jax.random.normal(kg(), (c,), jnp.float32)
    beta = 0.1 * jax.random.normal(kg(), (c,), jnp.float32)
    running_mean = 0.1 * jax.random.normal(kg(), (c,), jnp.float32)
    running_var = 1.0 + 0.1 * jax.random.uniform(kg(), (c,), jnp.float32)
    scale = gamma / jnp.sqrt(running_var + BN_EPS)
    shift = beta - running_mean * scale
    return scale, shift


def _prep_conv(w, scale, shift):
    """Fold BN scale into the weight matrix, pad Cout to a multiple of 128, bf16."""
    cout, cin, kh, kw = w.shape
    wm = jnp.transpose(w, (2, 3, 1, 0)).reshape(kh * kw * cin, cout)
    wm = wm * scale.reshape(1, cout)
    n_pad = _round_up(cout, 128) - cout
    return {
        'w': jnp.pad(wm, ((0, 0), (0, n_pad))).astype(jnp.bfloat16),
        'shift': jnp.pad(shift, (0, n_pad)).astype(jnp.float32),
    }


def _fold_conv_bn(kg, cout, cin, k):
    w = _conv_w(kg, cout, cin, k)
    scale, shift = _bn_fold(kg, cout)
    return _prep_conv(w, scale, shift)


def _make_block(kg, inplanes, planes, stride):
    blk = {
        'conv1': _fold_conv_bn(kg, planes, inplanes, 3),
        'conv2': _fold_conv_bn(kg, planes, planes, 3),
    }
    if stride != 1 or inplanes != planes:
        blk['down'] = _fold_conv_bn(kg, planes, inplanes, 1)
    return blk


def init_params(key, num_classes=NUM_CLASSES):
    kg = _KeyGen(key)
    params = {}
    # conv1: pretrained-style 3-channel weight concat with zero 4th channel.
    w3 = _conv_w(kg, 64, 3, 7)
    extra = jnp.zeros((64, 1, 7, 7), jnp.float32)   # copy_extra_channel=False
    w4 = jnp.concatenate([w3, extra], axis=1) * 1.0  # adjust_first_layer=False
    bn1_scale, bn1_shift = _bn_fold(kg, 64)
    params['conv1'] = _prep_conv(w4, bn1_scale, bn1_shift)

    inplanes = 64
    for li, (planes, nblocks, lstride) in enumerate(LAYER_CFGS):
        blocks = []
        for bi in range(nblocks):
            stride = lstride if bi == 0 else 1
            blocks.append(_make_block(kg, inplanes, planes, stride))
            inplanes = planes
        params['layer%d' % (li + 1)] = blocks

    fc_w = jax.random.normal(kg(), (num_classes, 512), jnp.float32) / math.sqrt(512)
    fc_b = 0.1 * jax.random.normal(kg(), (num_classes,), jnp.float32)
    n_pad = _round_up(num_classes, 128) - num_classes
    params['fc'] = {
        'w': jnp.pad(fc_w.T, ((0, 0), (0, n_pad))).astype(jnp.bfloat16),
        'shift': jnp.pad(fc_b, (0, n_pad)).astype(jnp.float32),
    }
    return params


def basic_block(x, p, planes, stride):
    identity = x
    out = conv2d_bn(x, p['conv1']['w'], p['conv1']['shift'],
                    3, 3, stride, 1, planes, relu=True)
    if 'down' in p:
        identity = conv2d_bn(x, p['down']['w'], p['down']['shift'],
                             1, 1, stride, 0, planes, relu=False)
    # out = relu(bn2(conv2(out)) + identity): residual + relu fused in the kernel.
    out = conv2d_bn(out, p['conv2']['w'], p['conv2']['shift'],
                    3, 3, 1, 1, planes, relu=True, residual=identity)
    return out


def resnet4channel_forward(params, x_nchw):
    # NCHW in (PyTorch), NHWC bf16 internally, (N, num_classes) f32 out.
    x = jnp.transpose(x_nchw, (0, 2, 3, 1)).astype(jnp.bfloat16)
    x = conv2d_bn(x, params['conv1']['w'], params['conv1']['shift'],
                  7, 7, 2, 3, 64, relu=True)
    x = maxpool_3x3_s2_p1(x)
    for li, (planes, nblocks, lstride) in enumerate(LAYER_CFGS):
        blocks = params['layer%d' % (li + 1)]
        for bi in range(nblocks):
            stride = lstride if bi == 0 else 1
            x = basic_block(x, blocks[bi], planes, stride)
    pooled = global_avgpool(x)                            # (N, 512) f32
    logits = fused_matmul(pooled, params['fc']['w'], params['fc']['shift'],
                          n_out=NUM_CLASSES, relu=False, out_dtype=jnp.float32)
    return logits


if __name__ == "__main__":
    key = jax.random.PRNGKey(0)
    kparams, kx = jax.random.split(key)
    params = init_params(kparams, NUM_CLASSES)
    # small input: batch=2, 4 channels, 32x32 spatial (so every ResNet stage has
    # nontrivial spatial extent before the 1x1 stage-4 output).
    x = jax.random.normal(kx, (2, 4, 32, 32), jnp.float32)

    forward = jax.jit(resnet4channel_forward)
    out = forward(params, x)
    out = jax.block_until_ready(out)

    assert out.shape == (2, NUM_CLASSES), out.shape
    assert bool(jnp.all(jnp.isfinite(out)))
    print("KERNEL_OK")
</pallas_src>

<mosaic_0001>
module attributes {stable_mosaic.version = 11 : i64} {
  func.func @kernel(%arg0: i32, %arg1: i32, %arg2: memref<256x256xbf16, #tpu.memory_space<vmem>>, %arg3: memref<256x128xbf16, #tpu.memory_space<vmem>>, %arg4: memref<1x128xf32, #tpu.memory_space<vmem>>, %arg5: memref<256x128xbf16, #tpu.memory_space<vmem>>, %arg6: memref<256x128xf32, #tpu.memory_space<vmem>>) attributes {dimension_semantics = [#tpu.dimension_semantics<parallel>, #tpu.dimension_semantics<arbitrary>], iteration_bounds = array<i64: 2, 1>, scalar_prefetch = 0 : i64, scratch_operands = 1 : i64, tpu.core_type = #tpu.core_type<tc>, window_params = [{transform_indices = @transform_0, window_bounds = array<i64: 256, 256>}, {transform_indices = @transform_1, window_bounds = array<i64: 256, 128>}, {pipeline_mode = #tpu.pipeline_mode<synchronous>, transform_indices = @transform_2, window_bounds = array<i64: 1, 128>}, {transform_indices = @transform_3, window_bounds = array<i64: 256, 128>}]} {
    %c0_i32 = arith.constant 0 : i32
    %0 = arith.cmpi eq, %arg1, %c0_i32 : i32
    %1 = arith.extui %0 : i1 to i32
    %c0_i32_0 = arith.constant 0 : i32
    %2 = arith.cmpi ne, %1, %c0_i32_0 : i32
    scf.if %2 {
      %cst_10 = arith.constant 0.000000e+00 : f32
      %12 = vector.broadcast %cst_10 : f32 to vector<256x128xf32>
      %c0_11 = arith.constant 0 : index
      %c0_12 = arith.constant 0 : index
      %13 = vector.load %arg6[%c0_11, %c0_12] : memref<256x128xf32, #tpu.memory_space<vmem>>, vector<256x128xf32>
      tpu.vector_store %arg6[%c0_11, %c0_12], %12 {strides = array<i32>} : memref<256x128xf32, #tpu.memory_space<vmem>>, vector<256x128xf32>,
    } else {
    }
    %c0 = arith.constant 0 : index
    %c0_1 = arith.constant 0 : index
    %3 = vector.load %arg6[%c0, %c0_1] : memref<256x128xf32, #tpu.memory_space<vmem>>, vector<256x128xf32>
    %c0_2 = arith.constant 0 : index
    %c0_3 = arith.constant 0 : index
    %4 = vector.load %arg2[%c0_2, %c0_3] : memref<256x256xbf16, #tpu.memory_space<vmem>>, vector<256x256xbf16>
    %c0_4 = arith.constant 0 : index
    %c0_5 = arith.constant 0 : index
    %5 = vector.load %arg3[%c0_4, %c0_5] : memref<256x128xbf16, #tpu.memory_space<vmem>>, vector<256x128xbf16>
    %cst = arith.constant dense<0.000000e+00> : vector<256x128xf32>
    %6 = tpu.matmul %4, %5, %cst {dimension_numbers = #tpu.dot_dimension_numbers<[1], [0], [0], [1], [0, 0, 1, 1], [], []>} : vector<256x256xbf16>, vector<256x128xbf16>, vector<256x128xf32> -> vector<256x128xf32>
    %7 = arith.addf %3, %6 : vector<256x128xf32>
    %c0_6 = arith.constant 0 : index
    %c0_7 = arith.constant 0 : index
    %8 = vector.load %arg6[%c0_6, %c0_7] : memref<256x128xf32, #tpu.memory_space<vmem>>, vector<256x128xf32>
    tpu.vector_store %arg6[%c0_6, %c0_7], %7 {strides = array<i32>} : memref<256x128xf32, #tpu.memory_space<vmem>>, vector<256x128xf32>,
    %c0_i32_8 = arith.constant 0 : i32
    %9 = arith.cmpi eq, %arg1, %c0_i32_8 : i32
    %10 = arith.extui %9 : i1 to i32
    %c0_i32_9 = arith.constant 0 : i32
    %11 = arith.cmpi ne, %10, %c0_i32_9 : i32
    scf.if %11 {
      %c0_10 = arith.constant 0 : index
      %c0_11 = arith.constant 0 : index
      %12 = vector.load %arg6[%c0_10, %c0_11] : memref<256x128xf32, #tpu.memory_space<vmem>>, vector<256x128xf32>
      %c0_12 = arith.constant 0 : index
      %c0_13 = arith.constant 0 : index
      %13 = vector.load %arg4[%c0_12, %c0_13] : memref<1x128xf32, #tpu.memory_space<vmem>>, vector<1x128xf32>
      %14 = vector.broadcast %13 : vector<1x128xf32> to vector<256x128xf32>
      %15 = arith.addf %12, %14 : vector<256x128xf32>
      %cst_14 = arith.constant 0.000000e+00 : f32
      %16 = vector.broadcast %cst_14 : f32 to vector<256x128xf32>
      %17 = arith.maximumf %15, %16 : vector<256x128xf32>
      %18 = arith.truncf %17 : vector<256x128xf32> to vector<256x128xbf16>
      %c0_15 = arith.constant 0 : index
      %c0_16 = arith.constant 0 : index
      %19 = vector.load %arg5[%c0_15, %c0_16] : memref<256x128xbf16, #tpu.memory_space<vmem>>, vector<256x128xbf16>
      tpu.vector_store %arg5[%c0_15, %c0_16], %18 {strides = array<i32>} : memref<256x128xbf16, #tpu.memory_space<vmem>>, vector<256x128xbf16>,
    } else {
    }
    return
  }
  func.func @transform_0(%arg0: i32, %arg1: i32) -> (i32, i32) {
    %c0_i32 = arith.constant 0 : i32
    return %arg0, %arg1 : i32, i32
  }
  func.func @transform_1(%arg0: i32, %arg1: i32) -> (i32, i32) {
    %c0_i32 = arith.constant 0 : i32
    %c0_i32_0 = arith.constant 0 : i32
    return %arg1, %c0_i32 : i32, i32
  }
  func.func @transform_2(%arg0: i32, %arg1: i32) -> (i32, i32) {
    %c0_i32 = arith.constant 0 : i32
    %c0_i32_0 = arith.constant 0 : i32
    %c0_i32_1 = arith.constant 0 : i32
    return %c0_i32, %c0_i32_0 : i32, i32
  }
  func.func @transform_3(%arg0: i32, %arg1: i32) -> (i32, i32) {
    %c0_i32 = arith.constant 0 : i32
    %c0_i32_0 = arith.constant 0 : i32
    return %arg0, %c0_i32 : i32, i32
  }
}

module attributes {stable_mosaic.version = 11 : i64} {
  func.func @_maxpool_kernel(%arg0: i32, %arg1: memref<128x64xbf16, #tpu.memory_space<vmem>>, %arg2: memref<128x64xbf16, #tpu.memory_space<vmem>>, %arg3: memref<128x64xbf16, #tpu.memory_space<vmem>>, %arg4: memref<128x64xbf16, #tpu.memory_space<vmem>>, %arg5: memref<128x64xbf16, #tpu.memory_space<vmem>>, %arg6: memref<128x64xbf16, #tpu.memory_space<vmem>>, %arg7: memref<128x64xbf16, #tpu.memory_space<vmem>>, %arg8: memref<128x64xbf16, #tpu.memory_space<vmem>>, %arg9: memref<128x64xbf16, #tpu.memory_space<vmem>>, %arg10: memref<128x64xbf16, #tpu.memory_space<vmem>>) attributes {dimension_semantics = [#tpu.dimension_semantics<parallel>], iteration_bounds = array<i64: 1>, scalar_prefetch = 0 : i64, scratch_operands = 0 : i64, tpu.core_type = #tpu.core_type<tc>, window_params = [{transform_indices = @transform_0, window_bounds = array<i64: 128, 64>}, {transform_indices = @transform_1, window_bounds = array<i64: 128, 64>}, {transform_indices = @transform_2, window_bounds = array<i64: 128, 64>}, {transform_indices = @transform_3, window_bounds = array<i64: 128, 64>}, {transform_indices = @transform_4, window_bounds = array<i64: 128, 64>}, {transform_indices = @transform_5, window_bounds = array<i64: 128, 64>}, {transform_indices = @transform_6, window_bounds = array<i64: 128, 64>}, {transform_indices = @transform_7, window_bounds = array<i64: 128, 64>}, {transform_indices = @transform_8, window_bounds = array<i64: 128, 64>}, {transform_indices = @transform_9, window_bounds = array<i64: 128, 64>}]} {
    %c0 = arith.constant 0 : index
    %c0_0 = arith.constant 0 : index
    %0 = vector.load %arg1[%c0, %c0_0] : memref<128x64xbf16, #tpu.memory_space<vmem>>, vector<128x64xbf16>
    %c0_1 = arith.constant 0 : index
    %c0_2 = arith.constant 0 : index
    %1 = vector.load %arg2[%c0_1, %c0_2] : memref<128x64xbf16, #tpu.memory_space<vmem>>, vector<128x64xbf16>
    %2 = arith.maximumf %0, %1 : vector<128x64xbf16>
    %c0_3 = arith.constant 0 : index
    %c0_4 = arith.constant 0 : index
    %3 = vector.load %arg3[%c0_3, %c0_4] : memref<128x64xbf16, #tpu.memory_space<vmem>>, vector<128x64xbf16>
    %4 = arith.maximumf %2, %3 : vector<128x64xbf16>
    %c0_5 = arith.constant 0 : index
    %c0_6 = arith.constant 0 : index
    %5 = vector.load %arg4[%c0_5, %c0_6] : memref<128x64xbf16, #tpu.memory_space<vmem>>, vector<128x64xbf16>
    %6 = arith.maximumf %4, %5 : vector<128x64xbf16>
    %c0_7 = arith.constant 0 : index
    %c0_8 = arith.constant 0 : index
    %7 = vector.load %arg5[%c0_7, %c0_8] : memref<128x64xbf16, #tpu.memory_space<vmem>>, vector<128x64xbf16>
    %8 = arith.maximumf %6, %7 : vector<128x64xbf16>
    %c0_9 = arith.constant 0 : index
    %c0_10 = arith.constant 0 : index
    %9 = vector.load %arg6[%c0_9, %c0_10] : memref<128x64xbf16, #tpu.memory_space<vmem>>, vector<128x64xbf16>
    %10 = arith.maximumf %8, %9 : vector<128x64xbf16>
    %c0_11 = arith.constant 0 : index
    %c0_12 = arith.constant 0 : index
    %11 = vector.load %arg7[%c0_11, %c0_12] : memref<128x64xbf16, #tpu.memory_space<vmem>>, vector<128x64xbf16>
    %12 = arith.maximumf %10, %11 : vector<128x64xbf16>
    %c0_13 = arith.constant 0 : index
    %c0_14 = arith.constant 0 : index
    %13 = vector.load %arg8[%c0_13, %c0_14] : memref<128x64xbf16, #tpu.memory_space<vmem>>, vector<128x64xbf16>
    %14 = arith.maximumf %12, %13 : vector<128x64xbf16>
    %c0_15 = arith.constant 0 : index
    %c0_16 = arith.constant 0 : index
    %15 = vector.load %arg9[%c0_15, %c0_16] : memref<128x64xbf16, #tpu.memory_space<vmem>>, vector<128x64xbf16>
    %16 = arith.maximumf %14, %15 : vector<128x64xbf16>
    %c0_17 = arith.constant 0 : index
    %c0_18 = arith.constant 0 : index
    %17 = vector.load %arg10[%c0_17, %c0_18] : memref<128x64xbf16, #tpu.memory_space<vmem>>, vector<128x64xbf16>
    tpu.vector_store %arg10[%c0_17, %c0_18], %16 {strides = array<i32>} : memref<128x64xbf16, #tpu.memory_space<vmem>>, vector<128x64xbf16>,
    return
  }
  func.func @transform_0(%arg0: i32) -> (i32, i32) {
    %c0_i32 = arith.constant 0 : i32
    %c0_i32_0 = arith.constant 0 : i32
    return %arg0, %c0_i32 : i32, i32
  }
  func.func @transform_1(%arg0: i32) -> (i32, i32) {
    %c0_i32 = arith.constant 0 : i32
    %c0_i32_0 = arith.constant 0 : i32
    return %arg0, %c0_i32 : i32, i32
  }
  func.func @transform_2(%arg0: i32) -> (i32, i32) {
    %c0_i32 = arith.constant 0 : i32
    %c0_i32_0 = arith.constant 0 : i32
    return %arg0, %c0_i32 : i32, i32
  }
  func.func @transform_3(%arg0: i32) -> (i32, i32) {
    %c0_i32 = arith.constant 0 : i32
    %c0_i32_0 = arith.constant 0 : i32
    return %arg0, %c0_i32 : i32, i32
  }
  func.func @transform_4(%arg0: i32) -> (i32, i32) {
    %c0_i32 = arith.constant 0 : i32
    %c0_i32_0 = arith.constant 0 : i32
    return %arg0, %c0_i32 : i32, i32
  }
  func.func @transform_5(%arg0: i32) -> (i32, i32) {
    %c0_i32 = arith.constant 0 : i32
    %c0_i32_0 = arith.constant 0 : i32
    return %arg0, %c0_i32 : i32, i32
  }
  func.func @transform_6(%arg0: i32) -> (i32, i32) {
    %c0_i32 = arith.constant 0 : i32
    %c0_i32_0 = arith.constant 0 : i32
    return %arg0, %c0_i32 : i32, i32
  }
  func.func @transform_7(%arg0: i32) -> (i32, i32) {
    %c0_i32 = arith.constant 0 : i32
    %c0_i32_0 = arith.constant 0 : i32
    return %arg0, %c0_i32 : i32, i32
  }
  func.func @transform_8(%arg0: i32) -> (i32, i32) {
    %c0_i32 = arith.constant 0 : i32
    %c0_i32_0 = arith.constant 0 : i32
    return %arg0, %c0_i32 : i32, i32
  }
  func.func @transform_9(%arg0: i32) -> (i32, i32) {
    %c0_i32 = arith.constant 0 : i32
    %c0_i32_0 = arith.constant 0 : i32
    return %arg0, %c0_i32 : i32, i32
  }
}

module attributes {stable_mosaic.version = 11 : i64} {
  func.func @kernel(%arg0: i32, %arg1: i32, %arg2: memref<128x128xbf16, #tpu.memory_space<vmem>>, %arg3: memref<128x128xbf16, #tpu.memory_space<vmem>>, %arg4: memref<1x128xf32, #tpu.memory_space<vmem>>, %arg5: memref<128x128xbf16, #tpu.memory_space<vmem>>, %arg6: memref<128x128xf32, #tpu.memory_space<vmem>>) attributes {dimension_semantics = [#tpu.dimension_semantics<parallel>, #tpu.dimension_semantics<arbitrary>], iteration_bounds = array<i64: 1, 5>, scalar_prefetch = 0 : i64, scratch_operands = 1 : i64, tpu.core_type = #tpu.core_type<tc>, window_params = [{transform_indices = @transform_0, window_bounds = array<i64: 128, 128>}, {transform_indices = @transform_1, window_bounds = array<i64: 128, 128>}, {pipeline_mode = #tpu.pipeline_mode<synchronous>, transform_indices = @transform_2, window_bounds = array<i64: 1, 128>}, {transform_indices = @transform_3, window_bounds = array<i64: 128, 128>}]} {
    %c0_i32 = arith.constant 0 : i32
    %0 = arith.cmpi eq, %arg1, %c0_i32 : i32
    %1 = arith.extui %0 : i1 to i32
    %c0_i32_0 = arith.constant 0 : i32
    %2 = arith.cmpi ne, %1, %c0_i32_0 : i32
    scf.if %2 {
      %cst_9 = arith.constant 0.000000e+00 : f32
      %12 = vector.broadcast %cst_9 : f32 to vector<128x128xf32>
      %c0_10 = arith.constant 0 : index
      %c0_11 = arith.constant 0 : index
      %13 = vector.load %arg6[%c0_10, %c0_11] : memref<128x128xf32, #tpu.memory_space<vmem>>, vector<128x128xf32>
      tpu.vector_store %arg6[%c0_10, %c0_11], %12 {strides = array<i32>} : memref<128x128xf32, #tpu.memory_space<vmem>>, vector<128x128xf32>,
    } else {
    }
    %c0 = arith.constant 0 : index
    %c0_1 = arith.constant 0 : index
    %3 = vector.load %arg6[%c0, %c0_1] : memref<128x128xf32, #tpu.memory_space<vmem>>, vector<128x128xf32>
    %c0_2 = arith.constant 0 : index
    %c0_3 = arith.constant 0 : index
    %4 = vector.load %arg2[%c0_2, %c0_3] : memref<128x128xbf16, #tpu.memory_space<vmem>>, vector<128x128xbf16>
    %c0_4 = arith.constant 0 : index
    %c0_5 = arith.constant 0 : index
    %5 = vector.load %arg3[%c0_4, %c0_5] : memref<128x128xbf16, #tpu.memory_space<vmem>>, vector<128x128xbf16>
    %cst = arith.constant dense<0.000000e+00> : vector<128x128xf32>
    %6 = tpu.matmul %4, %5, %cst {dimension_numbers = #tpu.dot_dimension_numbers<[1], [0], [0], [1], [0, 0, 1, 1], [], []>} : vector<128x128xbf16>, vector<128x128xbf16>, vector<128x128xf32> -> vector<128x128xf32>
    %7 = arith.addf %3, %6 : vector<128x128xf32>
    %c0_6 = arith.constant 0 : index
    %c0_7 = arith.constant 0 : index
    %8 = vector.load %arg6[%c0_6, %c0_7] : memref<128x128xf32, #tpu.memory_space<vmem>>, vector<128x128xf32>
    tpu.vector_store %arg6[%c0_6, %c0_7], %7 {strides = array<i32>} : memref<128x128xf32, #tpu.memory_space<vmem>>, vector<128x128xf32>,
    %c4_i32 = arith.constant 4 : i32
    %9 = arith.cmpi eq, %arg1, %c4_i32 : i32
    %10 = arith.extui %9 : i1 to i32
    %c0_i32_8 = arith.constant 0 : i32
    %11 = arith.cmpi ne, %10, %c0_i32_8 : i32
    scf.if %11 {
      %c0_9 = arith.constant 0 : index
      %c0_10 = arith.constant 0 : index
      %12 = vector.load %arg6[%c0_9, %c0_10] : memref<128x128xf32, #tpu.memory_space<vmem>>, vector<128x128xf32>
      %c0_11 = arith.constant 0 : index
      %c0_12 = arith.constant 0 : index
      %13 = vector.load %arg4[%c0_11, %c0_12] : memref<1x128xf32, #tpu.memory_space<vmem>>, vector<1x128xf32>
      %14 = vector.broadcast %13 : vector<1x128xf32> to vector<128x128xf32>
      %15 = arith.addf %12, %14 : vector<128x128xf32>
      %cst_13 = arith.constant 0.000000e+00 : f32
      %16 = vector.broadcast %cst_13 : f32 to vector<128x128xf32>
      %17 = arith.maximumf %15, %16 : vector<128x128xf32>
      %18 = arith.truncf %17 : vector<128x128xf32> to vector<128x128xbf16>
      %c0_14 = arith.constant 0 : index
      %c0_15 = arith.constant 0 : index
      %19 = vector.load %arg5[%c0_14, %c0_15] : memref<128x128xbf16, #tpu.memory_space<vmem>>, vector<128x128xbf16>
      tpu.vector_store %arg5[%c0_14, %c0_15], %18 {strides = array<i32>} : memref<128x128xbf16, #tpu.memory_space<vmem>>, vector<128x128xbf16>,
    } else {
    }
    return
  }
  func.func @transform_0(%arg0: i32, %arg1: i32) -> (i32, i32) {
    %c0_i32 = arith.constant 0 : i32
    return %arg0, %arg1 : i32, i32
  }
  func.func @transform_1(%arg0: i32, %arg1: i32) -> (i32, i32) {
    %c0_i32 = arith.constant 0 : i32
    %c0_i32_0 = arith.constant 0 : i32
    return %arg1, %c0_i32 : i32, i32
  }
  func.func @transform_2(%arg0: i32, %arg1: i32) -> (i32, i32) {
    %c0_i32 = arith.constant 0 : i32
    %c0_i32_0 = arith.constant 0 : i32
    %c0_i32_1 = arith.constant 0 : i32
    return %c0_i32, %c0_i32_0 : i32, i32
  }
  func.func @transform_3(%arg0: i32, %arg1: i32) -> (i32, i32) {
    %c0_i32 = arith.constant 0 : i32
    %c0_i32_0 = arith.constant 0 : i32
    return %arg0, %c0_i32 : i32, i32
  }
}

module attributes {stable_mosaic.version = 11 : i64} {
  func.func @kernel(%arg0: i32, %arg1: i32, %arg2: memref<128x128xbf16, #tpu.memory_space<vmem>>, %arg3: memref<128x128xbf16, #tpu.memory_space<vmem>>, %arg4: memref<1x128xf32, #tpu.memory_space<vmem>>, %arg5: memref<128x128xbf16, #tpu.memory_space<vmem>>, %arg6: memref<128x128xbf16, #tpu.memory_space<vmem>>, %arg7: memref<128x128xf32, #tpu.memory_space<vmem>>) attributes {dimension_semantics = [#tpu.dimension_semantics<parallel>, #tpu.dimension_semantics<arbitrary>], iteration_bounds = array<i64: 1, 5>, scalar_prefetch = 0 : i64, scratch_operands = 1 : i64, tpu.core_type = #tpu.core_type<tc>, window_params = [{transform_indices = @transform_0, window_bounds = array<i64: 128, 128>}, {transform_indices = @transform_1, window_bounds = array<i64: 128, 128>}, {pipeline_mode = #tpu.pipeline_mode<synchronous>, transform_indices = @transform_2, window_bounds = array<i64: 1, 128>}, {transform_indices = @transform_3, window_bounds = array<i64: 128, 128>}, {transform_indices = @transform_4, window_bounds = array<i64: 128, 128>}]} {
    %c0_i32 = arith.constant 0 : i32
    %0 = arith.cmpi eq, %arg1, %c0_i32 : i32
    %1 = arith.extui %0 : i1 to i32
    %c0_i32_0 = arith.constant 0 : i32
    %2 = arith.cmpi ne, %1, %c0_i32_0 : i32
    scf.if %2 {
      %cst_9 = arith.constant 0.000000e+00 : f32
      %12 = vector.broadcast %cst_9 : f32 to vector<128x128xf32>
      %c0_10 = arith.constant 0 : index
      %c0_11 = arith.constant 0 : index
      %13 = vector.load %arg7[%c0_10, %c0_11] : memref<128x128xf32, #tpu.memory_space<vmem>>, vector<128x128xf32>
      tpu.vector_store %arg7[%c0_10, %c0_11], %12 {strides = array<i32>} : memref<128x128xf32, #tpu.memory_space<vmem>>, vector<128x128xf32>,
    } else {
    }
    %c0 = arith.constant 0 : index
    %c0_1 = arith.constant 0 : index
    %3 = vector.load %arg7[%c0, %c0_1] : memref<128x128xf32, #tpu.memory_space<vmem>>, vector<128x128xf32>
    %c0_2 = arith.constant 0 : index
    %c0_3 = arith.constant 0 : index
    %4 = vector.load %arg2[%c0_2, %c0_3] : memref<128x128xbf16, #tpu.memory_space<vmem>>, vector<128x128xbf16>
    %c0_4 = arith.constant 0 : index
    %c0_5 = arith.constant 0 : index
    %5 = vector.load %arg3[%c0_4, %c0_5] : memref<128x128xbf16, #tpu.memory_space<vmem>>, vector<128x128xbf16>
    %cst = arith.constant dense<0.000000e+00> : vector<128x128xf32>
    %6 = tpu.matmul %4, %5, %cst {dimension_numbers = #tpu.dot_dimension_numbers<[1], [0], [0], [1], [0, 0, 1, 1], [], []>} : vector<128x128xbf16>, vector<128x128xbf16>, vector<128x128xf32> -> vector<128x128xf32>
    %7 = arith.addf %3, %6 : vector<128x128xf32>
    %c0_6 = arith.constant 0 : index
    %c0_7 = arith.constant 0 : index
    %8 = vector.load %arg7[%c0_6, %c0_7] : memref<128x128xf32, #tpu.memory_space<vmem>>, vector<128x128xf32>
    tpu.vector_store %arg7[%c0_6, %c0_7], %7 {strides = array<i32>} : memref<128x128xf32, #tpu.memory_space<vmem>>, vector<128x128xf32>,
    %c4_i32 = arith.constant 4 : i32
    %9 = arith.cmpi eq, %arg1, %c4_i32 : i32
    %10 = arith.extui %9 : i1 to i32
    %c0_i32_8 = arith.constant 0 : i32
    %11 = arith.cmpi ne, %10, %c0_i32_8 : i32
    scf.if %11 {
      %c0_9 = arith.constant 0 : index
      %c0_10 = arith.constant 0 : index
      %12 = vector.load %arg7[%c0_9, %c0_10] : memref<128x128xf32, #tpu.memory_space<vmem>>, vector<128x128xf32>
      %c0_11 = arith.constant 0 : index
      %c0_12 = arith.constant 0 : index
      %13 = vector.load %arg4[%c0_11, %c0_12] : memref<1x128xf32, #tpu.memory_space<vmem>>, vector<1x128xf32>
      %14 = vector.broadcast %13 : vector<1x128xf32> to vector<128x128xf32>
      %15 = arith.addf %12, %14 : vector<128x128xf32>
      %c0_13 = arith.constant 0 : index
      %c0_14 = arith.constant 0 : index
      %16 = vector.load %arg5[%c0_13, %c0_14] : memref<128x128xbf16, #tpu.memory_space<vmem>>, vector<128x128xbf16>
      %17 = arith.extf %16 : vector<128x128xbf16> to vector<128x128xf32>
      %18 = arith.addf %15, %17 : vector<128x128xf32>
      %cst_15 = arith.constant 0.000000e+00 : f32
      %19 = vector.broadcast %cst_15 : f32 to vector<128x128xf32>
      %20 = arith.maximumf %18, %19 : vector<128x128xf32>
      %21 = arith.truncf %20 : vector<128x128xf32> to vector<128x128xbf16>
      %c0_16 = arith.constant 0 : index
      %c0_17 = arith.constant 0 : index
      %22 = vector.load %arg6[%c0_16, %c0_17] : memref<128x128xbf16, #tpu.memory_space<vmem>>, vector<128x128xbf16>
      tpu.vector_store %arg6[%c0_16, %c0_17], %21 {strides = array<i32>} : memref<128x128xbf16, #tpu.memory_space<vmem>>, vector<128x128xbf16>,
    } else {
    }
    return
  }
  func.func @transform_0(%arg0: i32, %arg1: i32) -> (i32, i32) {
    %c0_i32 = arith.constant 0 : i32
    return %arg0, %arg1 : i32, i32
  }
  func.func @transform_1(%arg0: i32, %arg1: i32) -> (i32, i32) {
    %c0_i32 = arith.constant 0 : i32
    %c0_i32_0 = arith.constant 0 : i32
    return %arg1, %c0_i32 : i32, i32
  }
  func.func @transform_2(%arg0: i32, %arg1: i32) -> (i32, i32) {
    %c0_i32 = arith.constant 0 : i32
    %c0_i32_0 = arith.constant 0 : i32
    %c0_i32_1 = arith.constant 0 : i32
    return %c0_i32, %c0_i32_0 : i32, i32
  }
  func.func @transform_3(%arg0: i32, %arg1: i32) -> (i32, i32) {
    %c0_i32 = arith.constant 0 : i32
    %c0_i32_0 = arith.constant 0 : i32
    return %arg0, %c0_i32 : i32, i32
  }
  func.func @transform_4(%arg0: i32, %arg1: i32) -> (i32, i32) {
    %c0_i32 = arith.constant 0 : i32
    %c0_i32_0 = arith.constant 0 : i32
    return %arg0, %c0_i32 : i32, i32
  }
}

module attributes {stable_mosaic.version = 11 : i64} {
  func.func @kernel(%arg0: i32, %arg1: i32, %arg2: memref<32x128xbf16, #tpu.memory_space<vmem>>, %arg3: memref<128x128xbf16, #tpu.memory_space<vmem>>, %arg4: memref<1x128xf32, #tpu.memory_space<vmem>>, %arg5: memref<32x128xbf16, #tpu.memory_space<vmem>>, %arg6: memref<32x128xf32, #tpu.memory_space<vmem>>) attributes {dimension_semantics = [#tpu.dimension_semantics<parallel>, #tpu.dimension_semantics<arbitrary>], iteration_bounds = array<i64: 1, 5>, scalar_prefetch = 0 : i64, scratch_operands = 1 : i64, tpu.core_type = #tpu.core_type<tc>, window_params = [{transform_indices = @transform_0, window_bounds = array<i64: 32, 128>}, {transform_indices = @transform_1, window_bounds = array<i64: 128, 128>}, {pipeline_mode = #tpu.pipeline_mode<synchronous>, transform_indices = @transform_2, window_bounds = array<i64: 1, 128>}, {transform_indices = @transform_3, window_bounds = array<i64: 32, 128>}]} {
    %c0_i32 = arith.constant 0 : i32
    %0 = arith.cmpi eq, %arg1, %c0_i32 : i32
    %1 = arith.extui %0 : i1 to i32
    %c0_i32_0 = arith.constant 0 : i32
    %2 = arith.cmpi ne, %1, %c0_i32_0 : i32
    scf.if %2 {
      %cst_9 = arith.constant 0.000000e+00 : f32
      %12 = vector.broadcast %cst_9 : f32 to vector<32x128xf32>
      %c0_10 = arith.constant 0 : index
      %c0_11 = arith.constant 0 : index
      %13 = vector.load %arg6[%c0_10, %c0_11] : memref<32x128xf32, #tpu.memory_space<vmem>>, vector<32x128xf32>
      tpu.vector_store %arg6[%c0_10, %c0_11], %12 {strides = array<i32>} : memref<32x128xf32, #tpu.memory_space<vmem>>, vector<32x128xf32>,
    } else {
    }
    %c0 = arith.constant 0 : index
    %c0_1 = arith.constant 0 : index
    %3 = vector.load %arg6[%c0, %c0_1] : memref<32x128xf32, #tpu.memory_space<vmem>>, vector<32x128xf32>
    %c0_2 = arith.constant 0 : index
    %c0_3 = arith.constant 0 : index
    %4 = vector.load %arg2[%c0_2, %c0_3] : memref<32x128xbf16, #tpu.memory_space<vmem>>, vector<32x128xbf16>
    %c0_4 = arith.constant 0 : index
    %c0_5 = arith.constant 0 : index
    %5 = vector.load %arg3[%c0_4, %c0_5] : memref<128x128xbf16, #tpu.memory_space<vmem>>, vector<128x128xbf16>
    %cst = arith.constant dense<0.000000e+00> : vector<32x128xf32>
    %6 = tpu.matmul %4, %5, %cst {dimension_numbers = #tpu.dot_dimension_numbers<[1], [0], [0], [1], [0, 0, 1, 1], [], []>} : vector<32x128xbf16>, vector<128x128xbf16>, vector<32x128xf32> -> vector<32x128xf32>
    %7 = arith.addf %3, %6 : vector<32x128xf32>
    %c0_6 = arith.constant 0 : index
    %c0_7 = arith.constant 0 : index
    %8 = vector.load %arg6[%c0_6, %c0_7] : memref<32x128xf32, #tpu.memory_space<vmem>>, vector<32x128xf32>
    tpu.vector_store %arg6[%c0_6, %c0_7], %7 {strides = array<i32>} : memref<32x128xf32, #tpu.memory_space<vmem>>, vector<32x128xf32>,
    %c4_i32 = arith.constant 4 : i32
    %9 = arith.cmpi eq, %arg1, %c4_i32 : i32
    %10 = arith.extui %9 : i1 to i32
    %c0_i32_8 = arith.constant 0 : i32
    %11 = arith.cmpi ne, %10, %c0_i32_8 : i32
    scf.if %11 {
      %c0_9 = arith.constant 0 : index
      %c0_10 = arith.constant 0 : index
      %12 = vector.load %arg6[%c0_9, %c0_10] : memref<32x128xf32, #tpu.memory_space<vmem>>, vector<32x128xf32>
      %c0_11 = arith.constant 0 : index
      %c0_12 = arith.constant 0 : index
      %13 = vector.load %arg4[%c0_11, %c0_12] : memref<1x128xf32, #tpu.memory_space<vmem>>, vector<1x128xf32>
      %14 = vector.broadcast %13 : vector<1x128xf32> to vector<32x128xf32>
      %15 = arith.addf %12, %14 : vector<32x128xf32>
      %cst_13 = arith.constant 0.000000e+00 : f32
      %16 = vector.broadcast %cst_13 : f32 to vector<32x128xf32>
      %17 = arith.maximumf %15, %16 : vector<32x128xf32>
      %18 = arith.truncf %17 : vector<32x128xf32> to vector<32x128xbf16>
      %c0_14 = arith.constant 0 : index
      %c0_15 = arith.constant 0 : index
      %19 = vector.load %arg5[%c0_14, %c0_15] : memref<32x128xbf16, #tpu.memory_space<vmem>>, vector<32x128xbf16>
      tpu.vector_store %arg5[%c0_14, %c0_15], %18 {strides = array<i32>} : memref<32x128xbf16, #tpu.memory_space<vmem>>, vector<32x128xbf16>,
    } else {
    }
    return
  }
  func.func @transform_0(%arg0: i32, %arg1: i32) -> (i32, i32) {
    %c0_i32 = arith.constant 0 : i32
    return %arg0, %arg1 : i32, i32
  }
  func.func @transform_1(%arg0: i32, %arg1: i32) -> (i32, i32) {
    %c0_i32 = arith.constant 0 : i32
    %c0_i32_0 = arith.constant 0 : i32
    return %arg1, %c0_i32 : i32, i32
  }
  func.func @transform_2(%arg0: i32, %arg1: i32) -> (i32, i32) {
    %c0_i32 = arith.constant 0 : i32
    %c0_i32_0 = arith.constant 0 : i32
    %c0_i32_1 = arith.constant 0 : i32
    return %c0_i32, %c0_i32_0 : i32, i32
  }
  func.func @transform_3(%arg0: i32, %arg1: i32) -> (i32, i32) {
    %c0_i32 = arith.constant 0 : i32
    %c0_i32_0 = arith.constant 0 : i32
    return %arg0, %c0_i32 : i32, i32
  }
}

module attributes {stable_mosaic.version = 11 : i64} {
  func.func @kernel(%arg0: i32, %arg1: i32, %arg2: memref<32x128xbf16, #tpu.memory_space<vmem>>, %arg3: memref<128x128xbf16, #tpu.memory_space<vmem>>, %arg4: memref<1x128xf32, #tpu.memory_space<vmem>>, %arg5: memref<32x128xbf16, #tpu.memory_space<vmem>>, %arg6: memref<32x128xf32, #tpu.memory_space<vmem>>) attributes {dimension_semantics = [#tpu.dimension_semantics<parallel>, #tpu.dimension_semantics<arbitrary>], iteration_bounds = array<i64: 1, 1>, scalar_prefetch = 0 : i64, scratch_operands = 1 : i64, tpu.core_type = #tpu.core_type<tc>, window_params = [{transform_indices = @transform_0, window_bounds = array<i64: 32, 128>}, {transform_indices = @transform_1, window_bounds = array<i64: 128, 128>}, {pipeline_mode = #tpu.pipeline_mode<synchronous>, transform_indices = @transform_2, window_bounds = array<i64: 1, 128>}, {transform_indices = @transform_3, window_bounds = array<i64: 32, 128>}]} {
    %c0_i32 = arith.constant 0 : i32
    %0 = arith.cmpi eq, %arg1, %c0_i32 : i32
    %1 = arith.extui %0 : i1 to i32
    %c0_i32_0 = arith.constant 0 : i32
    %2 = arith.cmpi ne, %1, %c0_i32_0 : i32
    scf.if %2 {
      %cst_10 = arith.constant 0.000000e+00 : f32
      %12 = vector.broadcast %cst_10 : f32 to vector<32x128xf32>
      %c0_11 = arith.constant 0 : index
      %c0_12 = arith.constant 0 : index
      %13 = vector.load %arg6[%c0_11, %c0_12] : memref<32x128xf32, #tpu.memory_space<vmem>>, vector<32x128xf32>
      tpu.vector_store %arg6[%c0_11, %c0_12], %12 {strides = array<i32>} : memref<32x128xf32, #tpu.memory_space<vmem>>, vector<32x128xf32>,
    } else {
    }
    %c0 = arith.constant 0 : index
    %c0_1 = arith.constant 0 : index
    %3 = vector.load %arg6[%c0, %c0_1] : memref<32x128xf32, #tpu.memory_space<vmem>>, vector<32x128xf32>
    %c0_2 = arith.constant 0 : index
    %c0_3 = arith.constant 0 : index
    %4 = vector.load %arg2[%c0_2, %c0_3] : memref<32x128xbf16, #tpu.memory_space<vmem>>, vector<32x128xbf16>
    %c0_4 = arith.constant 0 : index
    %c0_5 = arith.constant 0 : index
    %5 = vector.load %arg3[%c0_4, %c0_5] : memref<128x128xbf16, #tpu.memory_space<vmem>>, vector<128x128xbf16>
    %cst = arith.constant dense<0.000000e+00> : vector<32x128xf32>
    %6 = tpu.matmul %4, %5, %cst {dimension_numbers = #tpu.dot_dimension_numbers<[1], [0], [0], [1], [0, 0, 1, 1], [], []>} : vector<32x128xbf16>, vector<128x128xbf16>, vector<32x128xf32> -> vector<32x128xf32>
    %7 = arith.addf %3, %6 : vector<32x128xf32>
    %c0_6 = arith.constant 0 : index
    %c0_7 = arith.constant 0 : index
    %8 = vector.load %arg6[%c0_6, %c0_7] : memref<32x128xf32, #tpu.memory_space<vmem>>, vector<32x128xf32>
    tpu.vector_store %arg6[%c0_6, %c0_7], %7 {strides = array<i32>} : memref<32x128xf32, #tpu.memory_space<vmem>>, vector<32x128xf32>,
    %c0_i32_8 = arith.constant 0 : i32
    %9 = arith.cmpi eq, %arg1, %c0_i32_8 : i32
    %10 = arith.extui %9 : i1 to i32
    %c0_i32_9 = arith.constant 0 : i32
    %11 = arith.cmpi ne, %10, %c0_i32_9 : i32
    scf.if %11 {
      %c0_10 = arith.constant 0 : index
      %c0_11 = arith.constant 0 : index
      %12 = vector.load %arg6[%c0_10, %c0_11] : memref<32x128xf32, #tpu.memory_space<vmem>>, vector<32x128xf32>
      %c0_12 = arith.constant 0 : index
      %c0_13 = arith.constant 0 : index
      %13 = vector.load %arg4[%c0_12, %c0_13] : memref<1x128xf32, #tpu.memory_space<vmem>>, vector<1x128xf32>
      %14 = vector.broadcast %13 : vector<1x128xf32> to vector<32x128xf32>
      %15 = arith.addf %12, %14 : vector<32x128xf32>
      %16 = arith.truncf %15 : vector<32x128xf32> to vector<32x128xbf16>
      %c0_14 = arith.constant 0 : index
      %c0_15 = arith.constant 0 : index
      %17 = vector.load %arg5[%c0_14, %c0_15] : memref<32x128xbf16, #tpu.memory_space<vmem>>, vector<32x128xbf16>
      tpu.vector_store %arg5[%c0_14, %c0_15], %16 {strides = array<i32>} : memref<32x128xbf16, #tpu.memory_space<vmem>>, vector<32x128xbf16>,
    } else {
    }
    return
  }
  func.func @transform_0(%arg0: i32, %arg1: i32) -> (i32, i32) {
    %c0_i32 = arith.constant 0 : i32
    return %arg0, %arg1 : i32, i32
  }
  func.func @transform_1(%arg0: i32, %arg1: i32) -> (i32, i32) {
    %c0_i32 = arith.constant 0 : i32
    %c0_i32_0 = arith.constant 0 : i32
    return %arg1, %c0_i32 : i32, i32
  }
  func.func @transform_2(%arg0: i32, %arg1: i32) -> (i32, i32) {
    %c0_i32 = arith.constant 0 : i32
    %c0_i32_0 = arith.constant 0 : i32
    %c0_i32_1 = arith.constant 0 : i32
    return %c0_i32, %c0_i32_0 : i32, i32
  }
  func.func @transform_3(%arg0: i32, %arg1: i32) -> (i32, i32) {
    %c0_i32 = arith.constant 0 : i32
    %c0_i32_0 = arith.constant 0 : i32
    return %arg0, %c0_i32 : i32, i32
  }
}

module attributes {stable_mosaic.version = 11 : i64} {
  func.func @kernel(%arg0: i32, %arg1: i32, %arg2: memref<32x384xbf16, #tpu.memory_space<vmem>>, %arg3: memref<384x128xbf16, #tpu.memory_space<vmem>>, %arg4: memref<1x128xf32, #tpu.memory_space<vmem>>, %arg5: memref<32x128xbf16, #tpu.memory_space<vmem>>, %arg6: memref<32x128xbf16, #tpu.memory_space<vmem>>, %arg7: memref<32x128xf32, #tpu.memory_space<vmem>>) attributes {dimension_semantics = [#tpu.dimension_semantics<parallel>, #tpu.dimension_semantics<arbitrary>], iteration_bounds = array<i64: 1, 3>, scalar_prefetch = 0 : i64, scratch_operands = 1 : i64, tpu.core_type = #tpu.core_type<tc>, window_params = [{transform_indices = @transform_0, window_bounds = array<i64: 32, 384>}, {transform_indices = @transform_1, window_bounds = array<i64: 384, 128>}, {pipeline_mode = #tpu.pipeline_mode<synchronous>, transform_indices = @transform_2, window_bounds = array<i64: 1, 128>}, {transform_indices = @transform_3, window_bounds = array<i64: 32, 128>}, {transform_indices = @transform_4, window_bounds = array<i64: 32, 128>}]} {
    %c0_i32 = arith.constant 0 : i32
    %0 = arith.cmpi eq, %arg1, %c0_i32 : i32
    %1 = arith.extui %0 : i1 to i32
    %c0_i32_0 = arith.constant 0 : i32
    %2 = arith.cmpi ne, %1, %c0_i32_0 : i32
    scf.if %2 {
      %cst_9 = arith.constant 0.000000e+00 : f32
      %12 = vector.broadcast %cst_9 : f32 to vector<32x128xf32>
      %c0_10 = arith.constant 0 : index
      %c0_11 = arith.constant 0 : index
      %13 = vector.load %arg7[%c0_10, %c0_11] : memref<32x128xf32, #tpu.memory_space<vmem>>, vector<32x128xf32>
      tpu.vector_store %arg7[%c0_10, %c0_11], %12 {strides = array<i32>} : memref<32x128xf32, #tpu.memory_space<vmem>>, vector<32x128xf32>,
    } else {
    }
    %c0 = arith.constant 0 : index
    %c0_1 = arith.constant 0 : index
    %3 = vector.load %arg7[%c0, %c0_1] : memref<32x128xf32, #tpu.memory_space<vmem>>, vector<32x128xf32>
    %c0_2 = arith.constant 0 : index
    %c0_3 = arith.constant 0 : index
    %4 = vector.load %arg2[%c0_2, %c0_3] : memref<32x384xbf16, #tpu.memory_space<vmem>>, vector<32x384xbf16>
    %c0_4 = arith.constant 0 : index
    %c0_5 = arith.constant 0 : index
    %5 = vector.load %arg3[%c0_4, %c0_5] : memref<384x128xbf16, #tpu.memory_space<vmem>>, vector<384x128xbf16>
    %cst = arith.constant dense<0.000000e+00> : vector<32x128xf32>
    %6 = tpu.matmul %4, %5, %cst {dimension_numbers = #tpu.dot_dimension_numbers<[1], [0], [0], [1], [0, 0, 1, 1], [], []>} : vector<32x384xbf16>, vector<384x128xbf16>, vector<32x128xf32> -> vector<32x128xf32>
    %7 = arith.addf %3, %6 : vector<32x128xf32>
    %c0_6 = arith.constant 0 : index
    %c0_7 = arith.constant 0 : index
    %8 = vector.load %arg7[%c0_6, %c0_7] : memref<32x128xf32, #tpu.memory_space<vmem>>, vector<32x128xf32>
    tpu.vector_store %arg7[%c0_6, %c0_7], %7 {strides = array<i32>} : memref<32x128xf32, #tpu.memory_space<vmem>>, vector<32x128xf32>,
    %c2_i32 = arith.constant 2 : i32
    %9 = arith.cmpi eq, %arg1, %c2_i32 : i32
    %10 = arith.extui %9 : i1 to i32
    %c0_i32_8 = arith.constant 0 : i32
    %11 = arith.cmpi ne, %10, %c0_i32_8 : i32
    scf.if %11 {
      %c0_9 = arith.constant 0 : index
      %c0_10 = arith.constant 0 : index
      %12 = vector.load %arg7[%c0_9, %c0_10] : memref<32x128xf32, #tpu.memory_space<vmem>>, vector<32x128xf32>
      %c0_11 = arith.constant 0 : index
      %c0_12 = arith.constant 0 : index
      %13 = vector.load %arg4[%c0_11, %c0_12] : memref<1x128xf32, #tpu.memory_space<vmem>>, vector<1x128xf32>
      %14 = vector.broadcast %13 : vector<1x128xf32> to vector<32x128xf32>
      %15 = arith.addf %12, %14 : vector<32x128xf32>
      %c0_13 = arith.constant 0 : index
      %c0_14 = arith.constant 0 : index
      %16 = vector.load %arg5[%c0_13, %c0_14] : memref<32x128xbf16, #tpu.memory_space<vmem>>, vector<32x128xbf16>
      %17 = arith.extf %16 : vector<32x128xbf16> to vector<32x128xf32>
      %18 = arith.addf %15, %17 : vector<32x128xf32>
      %cst_15 = arith.constant 0.000000e+00 : f32
      %19 = vector.broadcast %cst_15 : f32 to vector<32x128xf32>
      %20 = arith.maximumf %18, %19 : vector<32x128xf32>
      %21 = arith.truncf %20 : vector<32x128xf32> to vector<32x128xbf16>
      %c0_16 = arith.constant 0 : index
      %c0_17 = arith.constant 0 : index
      %22 = vector.load %arg6[%c0_16, %c0_17] : memref<32x128xbf16, #tpu.memory_space<vmem>>, vector<32x128xbf16>
      tpu.vector_store %arg6[%c0_16, %c0_17], %21 {strides = array<i32>} : memref<32x128xbf16, #tpu.memory_space<vmem>>, vector<32x128xbf16>,
    } else {
    }
    return
  }
  func.func @transform_0(%arg0: i32, %arg1: i32) -> (i32, i32) {
    %c0_i32 = arith.constant 0 : i32
    return %arg0, %arg1 : i32, i32
  }
  func.func @transform_1(%arg0: i32, %arg1: i32) -> (i32, i32) {
    %c0_i32 = arith.constant 0 : i32
    %c0_i32_0 = arith.constant 0 : i32
    return %arg1, %c0_i32 : i32, i32
  }
  func.func @transform_2(%arg0: i32, %arg1: i32) -> (i32, i32) {
    %c0_i32 = arith.constant 0 : i32
    %c0_i32_0 = arith.constant 0 : i32
    %c0_i32_1 = arith.constant 0 : i32
    return %c0_i32, %c0_i32_0 : i32, i32
  }
  func.func @transform_3(%arg0: i32, %arg1: i32) -> (i32, i32) {
    %c0_i32 = arith.constant 0 : i32
    %c0_i32_0 = arith.constant 0 : i32
    return %arg0, %c0_i32 : i32, i32
  }
  func.func @transform_4(%arg0: i32, %arg1: i32) -> (i32, i32) {
    %c0_i32 = arith.constant 0 : i32
    %c0_i32_0 = arith.constant 0 : i32
    return %arg0, %c0_i32 : i32, i32
  }
}

module attributes {stable_mosaic.version = 11 : i64} {
  func.func @kernel(%arg0: i32, %arg1: i32, %arg2: memref<32x384xbf16, #tpu.memory_space<vmem>>, %arg3: memref<384x128xbf16, #tpu.memory_space<vmem>>, %arg4: memref<1x128xf32, #tpu.memory_space<vmem>>, %arg5: memref<32x128xbf16, #tpu.memory_space<vmem>>, %arg6: memref<32x128xf32, #tpu.memory_space<vmem>>) attributes {dimension_semantics = [#tpu.dimension_semantics<parallel>, #tpu.dimension_semantics<arbitrary>], iteration_bounds = array<i64: 1, 3>, scalar_prefetch = 0 : i64, scratch_operands = 1 : i64, tpu.core_type = #tpu.core_type<tc>, window_params = [{transform_indices = @transform_0, window_bounds = array<i64: 32, 384>}, {transform_indices = @transform_1, window_bounds = array<i64: 384, 128>}, {pipeline_mode = #tpu.pipeline_mode<synchronous>, transform_indices = @transform_2, window_bounds = array<i64: 1, 128>}, {transform_indices = @transform_3, window_bounds = array<i64: 32, 128>}]} {
    %c0_i32 = arith.constant 0 : i32
    %0 = arith.cmpi eq, %arg1, %c0_i32 : i32
    %1 = arith.extui %0 : i1 to i32
    %c0_i32_0 = arith.constant 0 : i32
    %2 = arith.cmpi ne, %1, %c0_i32_0 : i32
    scf.if %2 {
      %cst_9 = arith.constant 0.000000e+00 : f32
      %12 = vector.broadcast %cst_9 : f32 to vector<32x128xf32>
      %c0_10 = arith.constant 0 : index
      %c0_11 = arith.constant 0 : index
      %13 = vector.load %arg6[%c0_10, %c0_11] : memref<32x128xf32, #tpu.memory_space<vmem>>, vector<32x128xf32>
      tpu.vector_store %arg6[%c0_10, %c0_11], %12 {strides = array<i32>} : memref<32x128xf32, #tpu.memory_space<vmem>>, vector<32x128xf32>,
    } else {
    }
    %c0 = arith.constant 0 : index
    %c0_1 = arith.constant 0 : index
    %3 = vector.load %arg6[%c0, %c0_1] : memref<32x128xf32, #tpu.memory_space<vmem>>, vector<32x128xf32>
    %c0_2 = arith.constant 0 : index
    %c0_3 = arith.constant 0 : index
    %4 = vector.load %arg2[%c0_2, %c0_3] : memref<32x384xbf16, #tpu.memory_space<vmem>>, vector<32x384xbf16>
    %c0_4 = arith.constant 0 : index
    %c0_5 = arith.constant 0 : index
    %5 = vector.load %arg3[%c0_4, %c0_5] : memref<384x128xbf16, #tpu.memory_space<vmem>>, vector<384x128xbf16>
    %cst = arith.constant dense<0.000000e+00> : vector<32x128xf32>
    %6 = tpu.matmul %4, %5, %cst {dimension_numbers = #tpu.dot_dimension_numbers<[1], [0], [0], [1], [0, 0, 1, 1], [], []>} : vector<32x384xbf16>, vector<384x128xbf16>, vector<32x128xf32> -> vector<32x128xf32>
    %7 = arith.addf %3, %6 : vector<32x128xf32>
    %c0_6 = arith.constant 0 : index
    %c0_7 = arith.constant 0 : index
    %8 = vector.load %arg6[%c0_6, %c0_7] : memref<32x128xf32, #tpu.memory_space<vmem>>, vector<32x128xf32>
    tpu.vector_store %arg6[%c0_6, %c0_7], %7 {strides = array<i32>} : memref<32x128xf32, #tpu.memory_space<vmem>>, vector<32x128xf32>,
    %c2_i32 = arith.constant 2 : i32
    %9 = arith.cmpi eq, %arg1, %c2_i32 : i32
    %10 = arith.extui %9 : i1 to i32
    %c0_i32_8 = arith.constant 0 : i32
    %11 = arith.cmpi ne, %10, %c0_i32_8 : i32
    scf.if %11 {
      %c0_9 = arith.constant 0 : index
      %c0_10 = arith.constant 0 : index
      %12 = vector.load %arg6[%c0_9, %c0_10] : memref<32x128xf32, #tpu.memory_space<vmem>>, vector<32x128xf32>
      %c0_11 = arith.constant 0 : index
      %c0_12 = arith.constant 0 : index
      %13 = vector.load %arg4[%c0_11, %c0_12] : memref<1x128xf32, #tpu.memory_space<vmem>>, vector<1x128xf32>
      %14 = vector.broadcast %13 : vector<1x128xf32> to vector<32x128xf32>
      %15 = arith.addf %12, %14 : vector<32x128xf32>
      %cst_13 = arith.constant 0.000000e+00 : f32
      %16 = vector.broadcast %cst_13 : f32 to vector<32x128xf32>
      %17 = arith.maximumf %15, %16 : vector<32x128xf32>
      %18 = arith.truncf %17 : vector<32x128xf32> to vector<32x128xbf16>
      %c0_14 = arith.constant 0 : index
      %c0_15 = arith.constant 0 : index
      %19 = vector.load %arg5[%c0_14, %c0_15] : memref<32x128xbf16, #tpu.memory_space<vmem>>, vector<32x128xbf16>
      tpu.vector_store %arg5[%c0_14, %c0_15], %18 {strides = array<i32>} : memref<32x128xbf16, #tpu.memory_space<vmem>>, vector<32x128xbf16>,
    } else {
    }
    return
  }
  func.func @transform_0(%arg0: i32, %arg1: i32) -> (i32, i32) {
    %c0_i32 = arith.constant 0 : i32
    return %arg0, %arg1 : i32, i32
  }
  func.func @transform_1(%arg0: i32, %arg1: i32) -> (i32, i32) {
    %c0_i32 = arith.constant 0 : i32
    %c0_i32_0 = arith.constant 0 : i32
    return %arg1, %c0_i32 : i32, i32
  }
  func.func @transform_2(%arg0: i32, %arg1: i32) -> (i32, i32) {
    %c0_i32 = arith.constant 0 : i32
    %c0_i32_0 = arith.constant 0 : i32
    %c0_i32_1 = arith.constant 0 : i32
    return %c0_i32, %c0_i32_0 : i32, i32
  }
  func.func @transform_3(%arg0: i32, %arg1: i32) -> (i32, i32) {
    %c0_i32 = arith.constant 0 : i32
    %c0_i32_0 = arith.constant 0 : i32
    return %arg0, %c0_i32 : i32, i32
  }
}

module attributes {stable_mosaic.version = 11 : i64} {
  func.func @kernel(%arg0: i32, %arg1: i32, %arg2: memref<8x384xbf16, #tpu.memory_space<vmem>>, %arg3: memref<384x256xbf16, #tpu.memory_space<vmem>>, %arg4: memref<1x256xf32, #tpu.memory_space<vmem>>, %arg5: memref<8x256xbf16, #tpu.memory_space<vmem>>, %arg6: memref<8x256xf32, #tpu.memory_space<vmem>>) attributes {dimension_semantics = [#tpu.dimension_semantics<parallel>, #tpu.dimension_semantics<arbitrary>], iteration_bounds = array<i64: 1, 3>, scalar_prefetch = 0 : i64, scratch_operands = 1 : i64, tpu.core_type = #tpu.core_type<tc>, window_params = [{transform_indices = @transform_0, window_bounds = array<i64: 8, 384>}, {transform_indices = @transform_1, window_bounds = array<i64: 384, 256>}, {pipeline_mode = #tpu.pipeline_mode<synchronous>, transform_indices = @transform_2, window_bounds = array<i64: 1, 256>}, {transform_indices = @transform_3, window_bounds = array<i64: 8, 256>}]} {
    %c0_i32 = arith.constant 0 : i32
    %0 = arith.cmpi eq, %arg1, %c0_i32 : i32
    %1 = arith.extui %0 : i1 to i32
    %c0_i32_0 = arith.constant 0 : i32
    %2 = arith.cmpi ne, %1, %c0_i32_0 : i32
    scf.if %2 {
      %cst_9 = arith.constant 0.000000e+00 : f32
      %12 = vector.broadcast %cst_9 : f32 to vector<8x256xf32>
      %c0_10 = arith.constant 0 : index
      %c0_11 = arith.constant 0 : index
      %13 = vector.load %arg6[%c0_10, %c0_11] : memref<8x256xf32, #tpu.memory_space<vmem>>, vector<8x256xf32>
      tpu.vector_store %arg6[%c0_10, %c0_11], %12 {strides = array<i32>} : memref<8x256xf32, #tpu.memory_space<vmem>>, vector<8x256xf32>,
    } else {
    }
    %c0 = arith.constant 0 : index
    %c0_1 = arith.constant 0 : index
    %3 = vector.load %arg6[%c0, %c0_1] : memref<8x256xf32, #tpu.memory_space<vmem>>, vector<8x256xf32>
    %c0_2 = arith.constant 0 : index
    %c0_3 = arith.constant 0 : index
    %4 = vector.load %arg2[%c0_2, %c0_3] : memref<8x384xbf16, #tpu.memory_space<vmem>>, vector<8x384xbf16>
    %c0_4 = arith.constant 0 : index
    %c0_5 = arith.constant 0 : index
    %5 = vector.load %arg3[%c0_4, %c0_5] : memref<384x256xbf16, #tpu.memory_space<vmem>>, vector<384x256xbf16>
    %cst = arith.constant dense<0.000000e+00> : vector<8x256xf32>
    %6 = tpu.matmul %4, %5, %cst {dimension_numbers = #tpu.dot_dimension_numbers<[1], [0], [0], [1], [0, 0, 1, 1], [], []>} : vector<8x384xbf16>, vector<384x256xbf16>, vector<8x256xf32> -> vector<8x256xf32>
    %7 = arith.addf %3, %6 : vector<8x256xf32>
    %c0_6 = arith.constant 0 : index
    %c0_7 = arith.constant 0 : index
    %8 = vector.load %arg6[%c0_6, %c0_7] : memref<8x256xf32, #tpu.memory_space<vmem>>, vector<8x256xf32>
    tpu.vector_store %arg6[%c0_6, %c0_7], %7 {strides = array<i32>} : memref<8x256xf32, #tpu.memory_space<vmem>>, vector<8x256xf32>,
    %c2_i32 = arith.constant 2 : i32
    %9 = arith.cmpi eq, %arg1, %c2_i32 : i32
    %10 = arith.extui %9 : i1 to i32
    %c0_i32_8 = arith.constant 0 : i32
    %11 = arith.cmpi ne, %10, %c0_i32_8 : i32
    scf.if %11 {
      %c0_9 = arith.constant 0 : index
      %c0_10 = arith.constant 0 : index
      %12 = vector.load %arg6[%c0_9, %c0_10] : memref<8x256xf32, #tpu.memory_space<vmem>>, vector<8x256xf32>
      %c0_11 = arith.constant 0 : index
      %c0_12 = arith.constant 0 : index
      %13 = vector.load %arg4[%c0_11, %c0_12] : memref<1x256xf32, #tpu.memory_space<vmem>>, vector<1x256xf32>
      %14 = vector.broadcast %13 : vector<1x256xf32> to vector<8x256xf32>
      %15 = arith.addf %12, %14 : vector<8x256xf32>
      %cst_13 = arith.constant 0.000000e+00 : f32
      %16 = vector.broadcast %cst_13 : f32 to vector<8x256xf32>
      %17 = arith.maximumf %15, %16 : vector<8x256xf32>
      %18 = arith.truncf %17 : vector<8x256xf32> to vector<8x256xbf16>
      %c0_14 = arith.constant 0 : index
      %c0_15 = arith.constant 0 : index
      %19 = vector.load %arg5[%c0_14, %c0_15] : memref<8x256xbf16, #tpu.memory_space<vmem>>, vector<8x256xbf16>
      tpu.vector_store %arg5[%c0_14, %c0_15], %18 {strides = array<i32>} : memref<8x256xbf16, #tpu.memory_space<vmem>>, vector<8x256xbf16>,
    } else {
    }
    return
  }
  func.func @transform_0(%arg0: i32, %arg1: i32) -> (i32, i32) {
    %c0_i32 = arith.constant 0 : i32
    return %arg0, %arg1 : i32, i32
  }
  func.func @transform_1(%arg0: i32, %arg1: i32) -> (i32, i32) {
    %c0_i32 = arith.constant 0 : i32
    %c0_i32_0 = arith.constant 0 : i32
    return %arg1, %c0_i32 : i32, i32
  }
  func.func @transform_2(%arg0: i32, %arg1: i32) -> (i32, i32) {
    %c0_i32 = arith.constant 0 : i32
    %c0_i32_0 = arith.constant 0 : i32
    %c0_i32_1 = arith.constant 0 : i32
    return %c0_i32, %c0_i32_0 : i32, i32
  }
  func.func @transform_3(%arg0: i32, %arg1: i32) -> (i32, i32) {
    %c0_i32 = arith.constant 0 : i32
    %c0_i32_0 = arith.constant 0 : i32
    return %arg0, %c0_i32 : i32, i32
  }
}

module attributes {stable_mosaic.version = 11 : i64} {
  func.func @kernel(%arg0: i32, %arg1: i32, %arg2: memref<8x128xbf16, #tpu.memory_space<vmem>>, %arg3: memref<128x256xbf16, #tpu.memory_space<vmem>>, %arg4: memref<1x256xf32, #tpu.memory_space<vmem>>, %arg5: memref<8x256xbf16, #tpu.memory_space<vmem>>, %arg6: memref<8x256xf32, #tpu.memory_space<vmem>>) attributes {dimension_semantics = [#tpu.dimension_semantics<parallel>, #tpu.dimension_semantics<arbitrary>], iteration_bounds = array<i64: 1, 1>, scalar_prefetch = 0 : i64, scratch_operands = 1 : i64, tpu.core_type = #tpu.core_type<tc>, window_params = [{transform_indices = @transform_0, window_bounds = array<i64: 8, 128>}, {transform_indices = @transform_1, window_bounds = array<i64: 128, 256>}, {pipeline_mode = #tpu.pipeline_mode<synchronous>, transform_indices = @transform_2, window_bounds = array<i64: 1, 256>}, {transform_indices = @transform_3, window_bounds = array<i64: 8, 256>}]} {
    %c0_i32 = arith.constant 0 : i32
    %0 = arith.cmpi eq, %arg1, %c0_i32 : i32
    %1 = arith.extui %0 : i1 to i32
    %c0_i32_0 = arith.constant 0 : i32
    %2 = arith.cmpi ne, %1, %c0_i32_0 : i32
    scf.if %2 {
      %cst_10 = arith.constant 0.000000e+00 : f32
      %12 = vector.broadcast %cst_10 : f32 to vector<8x256xf32>
      %c0_11 = arith.constant 0 : index
      %c0_12 = arith.constant 0 : index
      %13 = vector.load %arg6[%c0_11, %c0_12] : memref<8x256xf32, #tpu.memory_space<vmem>>, vector<8x256xf32>
      tpu.vector_store %arg6[%c0_11, %c0_12], %12 {strides = array<i32>} : memref<8x256xf32, #tpu.memory_space<vmem>>, vector<8x256xf32>,
    } else {
    }
    %c0 = arith.constant 0 : index
    %c0_1 = arith.constant 0 : index
    %3 = vector.load %arg6[%c0, %c0_1] : memref<8x256xf32, #tpu.memory_space<vmem>>, vector<8x256xf32>
    %c0_2 = arith.constant 0 : index
    %c0_3 = arith.constant 0 : index
    %4 = vector.load %arg2[%c0_2, %c0_3] : memref<8x128xbf16, #tpu.memory_space<vmem>>, vector<8x128xbf16>
    %c0_4 = arith.constant 0 : index
    %c0_5 = arith.constant 0 : index
    %5 = vector.load %arg3[%c0_4, %c0_5] : memref<128x256xbf16, #tpu.memory_space<vmem>>, vector<128x256xbf16>
    %cst = arith.constant dense<0.000000e+00> : vector<8x256xf32>
    %6 = tpu.matmul %4, %5, %cst {dimension_numbers = #tpu.dot_dimension_numbers<[1], [0], [0], [1], [0, 0, 1, 1], [], []>} : vector<8x128xbf16>, vector<128x256xbf16>, vector<8x256xf32> -> vector<8x256xf32>
    %7 = arith.addf %3, %6 : vector<8x256xf32>
    %c0_6 = arith.constant 0 : index
    %c0_7 = arith.constant 0 : index
    %8 = vector.load %arg6[%c0_6, %c0_7] : memref<8x256xf32, #tpu.memory_space<vmem>>, vector<8x256xf32>
    tpu.vector_store %arg6[%c0_6, %c0_7], %7 {strides = array<i32>} : memref<8x256xf32, #tpu.memory_space<vmem>>, vector<8x256xf32>,
    %c0_i32_8 = arith.constant 0 : i32
    %9 = arith.cmpi eq, %arg1, %c0_i32_8 : i32
    %10 = arith.extui %9 : i1 to i32
    %c0_i32_9 = arith.constant 0 : i32
    %11 = arith.cmpi ne, %10, %c0_i32_9 : i32
    scf.if %11 {
      %c0_10 = arith.constant 0 : index
      %c0_11 = arith.constant 0 : index
      %12 = vector.load %arg6[%c0_10, %c0_11] : memref<8x256xf32, #tpu.memory_space<vmem>>, vector<8x256xf32>
      %c0_12 = arith.constant 0 : index
      %c0_13 = arith.constant 0 : index
      %13 = vector.load %arg4[%c0_12, %c0_13] : memref<1x256xf32, #tpu.memory_space<vmem>>, vector<1x256xf32>
      %14 = vector.broadcast %13 : vector<1x256xf32> to vector<8x256xf32>
      %15 = arith.addf %12, %14 : vector<8x256xf32>
      %16 = arith.truncf %15 : vector<8x256xf32> to vector<8x256xbf16>
      %c0_14 = arith.constant 0 : index
      %c0_15 = arith.constant 0 : index
      %17 = vector.load %arg5[%c0_14, %c0_15] : memref<8x256xbf16, #tpu.memory_space<vmem>>, vector<8x256xbf16>
      tpu.vector_store %arg5[%c0_14, %c0_15], %16 {strides = array<i32>} : memref<8x256xbf16, #tpu.memory_space<vmem>>, vector<8x256xbf16>,
    } else {
    }
    return
  }
  func.func @transform_0(%arg0: i32, %arg1: i32) -> (i32, i32) {
    %c0_i32 = arith.constant 0 : i32
    return %arg0, %arg1 : i32, i32
  }
  func.func @transform_1(%arg0: i32, %arg1: i32) -> (i32, i32) {
    %c0_i32 = arith.constant 0 : i32
    %c0_i32_0 = arith.constant 0 : i32
    return %arg1, %c0_i32 : i32, i32
  }
  func.func @transform_2(%arg0: i32, %arg1: i32) -> (i32, i32) {
    %c0_i32 = arith.constant 0 : i32
    %c0_i32_0 = arith.constant 0 : i32
    %c0_i32_1 = arith.constant 0 : i32
    return %c0_i32, %c0_i32_0 : i32, i32
  }
  func.func @transform_3(%arg0: i32, %arg1: i32) -> (i32, i32) {
    %c0_i32 = arith.constant 0 : i32
    %c0_i32_0 = arith.constant 0 : i32
    return %arg0, %c0_i32 : i32, i32
  }
}

module attributes {stable_mosaic.version = 11 : i64} {
  func.func @kernel(%arg0: i32, %arg1: i32, %arg2: memref<8x384xbf16, #tpu.memory_space<vmem>>, %arg3: memref<384x256xbf16, #tpu.memory_space<vmem>>, %arg4: memref<1x256xf32, #tpu.memory_space<vmem>>, %arg5: memref<8x256xbf16, #tpu.memory_space<vmem>>, %arg6: memref<8x256xbf16, #tpu.memory_space<vmem>>, %arg7: memref<8x256xf32, #tpu.memory_space<vmem>>) attributes {dimension_semantics = [#tpu.dimension_semantics<parallel>, #tpu.dimension_semantics<arbitrary>], iteration_bounds = array<i64: 1, 6>, scalar_prefetch = 0 : i64, scratch_operands = 1 : i64, tpu.core_type = #tpu.core_type<tc>, window_params = [{transform_indices = @transform_0, window_bounds = array<i64: 8, 384>}, {transform_indices = @transform_1, window_bounds = array<i64: 384, 256>}, {pipeline_mode = #tpu.pipeline_mode<synchronous>, transform_indices = @transform_2, window_bounds = array<i64: 1, 256>}, {transform_indices = @transform_3, window_bounds = array<i64: 8, 256>}, {transform_indices = @transform_4, window_bounds = array<i64: 8, 256>}]} {
    %c0_i32 = arith.constant 0 : i32
    %0 = arith.cmpi eq, %arg1, %c0_i32 : i32
    %1 = arith.extui %0 : i1 to i32
    %c0_i32_0 = arith.constant 0 : i32
    %2 = arith.cmpi ne, %1, %c0_i32_0 : i32
    scf.if %2 {
      %cst_9 = arith.constant 0.000000e+00 : f32
      %12 = vector.broadcast %cst_9 : f32 to vector<8x256xf32>
      %c0_10 = arith.constant 0 : index
      %c0_11 = arith.constant 0 : index
      %13 = vector.load %arg7[%c0_10, %c0_11] : memref<8x256xf32, #tpu.memory_space<vmem>>, vector<8x256xf32>
      tpu.vector_store %arg7[%c0_10, %c0_11], %12 {strides = array<i32>} : memref<8x256xf32, #tpu.memory_space<vmem>>, vector<8x256xf32>,
    } else {
    }
    %c0 = arith.constant 0 : index
    %c0_1 = arith.constant 0 : index
    %3 = vector.load %arg7[%c0, %c0_1] : memref<8x256xf32, #tpu.memory_space<vmem>>, vector<8x256xf32>
    %c0_2 = arith.constant 0 : index
    %c0_3 = arith.constant 0 : index
    %4 = vector.load %arg2[%c0_2, %c0_3] : memref<8x384xbf16, #tpu.memory_space<vmem>>, vector<8x384xbf16>
    %c0_4 = arith.constant 0 : index
    %c0_5 = arith.constant 0 : index
    %5 = vector.load %arg3[%c0_4, %c0_5] : memref<384x256xbf16, #tpu.memory_space<vmem>>, vector<384x256xbf16>
    %cst = arith.constant dense<0.000000e+00> : vector<8x256xf32>
    %6 = tpu.matmul %4, %5, %cst {dimension_numbers = #tpu.dot_dimension_numbers<[1], [0], [0], [1], [0, 0, 1, 1], [], []>} : vector<8x384xbf16>, vector<384x256xbf16>, vector<8x256xf32> -> vector<8x256xf32>
    %7 = arith.addf %3, %6 : vector<8x256xf32>
    %c0_6 = arith.constant 0 : index
    %c0_7 = arith.constant 0 : index
    %8 = vector.load %arg7[%c0_6, %c0_7] : memref<8x256xf32, #tpu.memory_space<vmem>>, vector<8x256xf32>
    tpu.vector_store %arg7[%c0_6, %c0_7], %7 {strides = array<i32>} : memref<8x256xf32, #tpu.memory_space<vmem>>, vector<8x256xf32>,
    %c5_i32 = arith.constant 5 : i32
    %9 = arith.cmpi eq, %arg1, %c5_i32 : i32
    %10 = arith.extui %9 : i1 to i32
    %c0_i32_8 = arith.constant 0 : i32
    %11 = arith.cmpi ne, %10, %c0_i32_8 : i32
    scf.if %11 {
      %c0_9 = arith.constant 0 : index
      %c0_10 = arith.constant 0 : index
      %12 = vector.load %arg7[%c0_9, %c0_10] : memref<8x256xf32, #tpu.memory_space<vmem>>, vector<8x256xf32>
      %c0_11 = arith.constant 0 : index
      %c0_12 = arith.constant 0 : index
      %13 = vector.load %arg4[%c0_11, %c0_12] : memref<1x256xf32, #tpu.memory_space<vmem>>, vector<1x256xf32>
      %14 = vector.broadcast %13 : vector<1x256xf32> to vector<8x256xf32>
      %15 = arith.addf %12, %14 : vector<8x256xf32>
      %c0_13 = arith.constant 0 : index
      %c0_14 = arith.constant 0 : index
      %16 = vector.load %arg5[%c0_13, %c0_14] : memref<8x256xbf16, #tpu.memory_space<vmem>>, vector<8x256xbf16>
      %17 = arith.extf %16 : vector<8x256xbf16> to vector<8x256xf32>
      %18 = arith.addf %15, %17 : vector<8x256xf32>
      %cst_15 = arith.constant 0.000000e+00 : f32
      %19 = vector.broadcast %cst_15 : f32 to vector<8x256xf32>
      %20 = arith.maximumf %18, %19 : vector<8x256xf32>
      %21 = arith.truncf %20 : vector<8x256xf32> to vector<8x256xbf16>
      %c0_16 = arith.constant 0 : index
      %c0_17 = arith.constant 0 : index
      %22 = vector.load %arg6[%c0_16, %c0_17] : memref<8x256xbf16, #tpu.memory_space<vmem>>, vector<8x256xbf16>
      tpu.vector_store %arg6[%c0_16, %c0_17], %21 {strides = array<i32>} : memref<8x256xbf16, #tpu.memory_space<vmem>>, vector<8x256xbf16>,
    } else {
    }
    return
  }
  func.func @transform_0(%arg0: i32, %arg1: i32) -> (i32, i32) {
    %c0_i32 = arith.constant 0 : i32
    return %arg0, %arg1 : i32, i32
  }
  func.func @transform_1(%arg0: i32, %arg1: i32) -> (i32, i32) {
    %c0_i32 = arith.constant 0 : i32
    %c0_i32_0 = arith.constant 0 : i32
    return %arg1, %c0_i32 : i32, i32
  }
  func.func @transform_2(%arg0: i32, %arg1: i32) -> (i32, i32) {
    %c0_i32 = arith.constant 0 : i32
    %c0_i32_0 = arith.constant 0 : i32
    %c0_i32_1 = arith.constant 0 : i32
    return %c0_i32, %c0_i32_0 : i32, i32
  }
  func.func @transform_3(%arg0: i32, %arg1: i32) -> (i32, i32) {
    %c0_i32 = arith.constant 0 : i32
    %c0_i32_0 = arith.constant 0 : i32
    return %arg0, %c0_i32 : i32, i32
  }
  func.func @transform_4(%arg0: i32, %arg1: i32) -> (i32, i32) {
    %c0_i32 = arith.constant 0 : i32
    %c0_i32_0 = arith.constant 0 : i32
    return %arg0, %c0_i32 : i32, i32
  }
}

module attributes {stable_mosaic.version = 11 : i64} {
  func.func @kernel(%arg0: i32, %arg1: i32, %arg2: memref<8x384xbf16, #tpu.memory_space<vmem>>, %arg3: memref<384x256xbf16, #tpu.memory_space<vmem>>, %arg4: memref<1x256xf32, #tpu.memory_space<vmem>>, %arg5: memref<8x256xbf16, #tpu.memory_space<vmem>>, %arg6: memref<8x256xf32, #tpu.memory_space<vmem>>) attributes {dimension_semantics = [#tpu.dimension_semantics<parallel>, #tpu.dimension_semantics<arbitrary>], iteration_bounds = array<i64: 1, 6>, scalar_prefetch = 0 : i64, scratch_operands = 1 : i64, tpu.core_type = #tpu.core_type<tc>, window_params = [{transform_indices = @transform_0, window_bounds = array<i64: 8, 384>}, {transform_indices = @transform_1, window_bounds = array<i64: 384, 256>}, {pipeline_mode = #tpu.pipeline_mode<synchronous>, transform_indices = @transform_2, window_bounds = array<i64: 1, 256>}, {transform_indices = @transform_3, window_bounds = array<i64: 8, 256>}]} {
    %c0_i32 = arith.constant 0 : i32
    %0 = arith.cmpi eq, %arg1, %c0_i32 : i32
    %1 = arith.extui %0 : i1 to i32
    %c0_i32_0 = arith.constant 0 : i32
    %2 = arith.cmpi ne, %1, %c0_i32_0 : i32
    scf.if %2 {
      %cst_9 = arith.constant 0.000000e+00 : f32
      %12 = vector.broadcast %cst_9 : f32 to vector<8x256xf32>
      %c0_10 = arith.constant 0 : index
      %c0_11 = arith.constant 0 : index
      %13 = vector.load %arg6[%c0_10, %c0_11] : memref<8x256xf32, #tpu.memory_space<vmem>>, vector<8x256xf32>
      tpu.vector_store %arg6[%c0_10, %c0_11], %12 {strides = array<i32>} : memref<8x256xf32, #tpu.memory_space<vmem>>, vector<8x256xf32>,
    } else {
    }
    %c0 = arith.constant 0 : index
    %c0_1 = arith.constant 0 : index
    %3 = vector.load %arg6[%c0, %c0_1] : memref<8x256xf32, #tpu.memory_space<vmem>>, vector<8x256xf32>
    %c0_2 = arith.constant 0 : index
    %c0_3 = arith.constant 0 : index
    %4 = vector.load %arg2[%c0_2, %c0_3] : memref<8x384xbf16, #tpu.memory_space<vmem>>, vector<8x384xbf16>
    %c0_4 = arith.constant 0 : index
    %c0_5 = arith.constant 0 : index
    %5 = vector.load %arg3[%c0_4, %c0_5] : memref<384x256xbf16, #tpu.memory_space<vmem>>, vector<384x256xbf16>
    %cst = arith.constant dense<0.000000e+00> : vector<8x256xf32>
    %6 = tpu.matmul %4, %5, %cst {dimension_numbers = #tpu.dot_dimension_numbers<[1], [0], [0], [1], [0, 0, 1, 1], [], []>} : vector<8x384xbf16>, vector<384x256xbf16>, vector<8x256xf32> -> vector<8x256xf32>
    %7 = arith.addf %3, %6 : vector<8x256xf32>
    %c0_6 = arith.constant 0 : index
    %c0_7 = arith.constant 0 : index
    %8 = vector.load %arg6[%c0_6, %c0_7] : memref<8x256xf32, #tpu.memory_space<vmem>>, vector<8x256xf32>
    tpu.vector_store %arg6[%c0_6, %c0_7], %7 {strides = array<i32>} : memref<8x256xf32, #tpu.memory_space<vmem>>, vector<8x256xf32>,
    %c5_i32 = arith.constant 5 : i32
    %9 = arith.cmpi eq, %arg1, %c5_i32 : i32
    %10 = arith.extui %9 : i1 to i32
    %c0_i32_8 = arith.constant 0 : i32
    %11 = arith.cmpi ne, %10, %c0_i32_8 : i32
    scf.if %11 {
      %c0_9 = arith.constant 0 : index
      %c0_10 = arith.constant 0 : index
      %12 = vector.load %arg6[%c0_9, %c0_10] : memref<8x256xf32, #tpu.memory_space<vmem>>, vector<8x256xf32>
      %c0_11 = arith.constant 0 : index
      %c0_12 = arith.constant 0 : index
      %13 = vector.load %arg4[%c0_11, %c0_12] : memref<1x256xf32, #tpu.memory_space<vmem>>, vector<1x256xf32>
      %14 = vector.broadcast %13 : vector<1x256xf32> to vector<8x256xf32>
      %15 = arith.addf %12, %14 : vector<8x256xf32>
      %cst_13 = arith.constant 0.000000e+00 : f32
      %16 = vector.broadcast %cst_13 : f32 to vector<8x256xf32>
      %17 = arith.maximumf %15, %16 : vector<8x256xf32>
      %18 = arith.truncf %17 : vector<8x256xf32> to vector<8x256xbf16>
      %c0_14 = arith.constant 0 : index
      %c0_15 = arith.constant 0 : index
      %19 = vector.load %arg5[%c0_14, %c0_15] : memref<8x256xbf16, #tpu.memory_space<vmem>>, vector<8x256xbf16>
      tpu.vector_store %arg5[%c0_14, %c0_15], %18 {strides = array<i32>} : memref<8x256xbf16, #tpu.memory_space<vmem>>, vector<8x256xbf16>,
    } else {
    }
    return
  }
  func.func @transform_0(%arg0: i32, %arg1: i32) -> (i32, i32) {
    %c0_i32 = arith.constant 0 : i32
    return %arg0, %arg1 : i32, i32
  }
  func.func @transform_1(%arg0: i32, %arg1: i32) -> (i32, i32) {
    %c0_i32 = arith.constant 0 : i32
    %c0_i32_0 = arith.constant 0 : i32
    return %arg1, %c0_i32 : i32, i32
  }
  func.func @transform_2(%arg0: i32, %arg1: i32) -> (i32, i32) {
    %c0_i32 = arith.constant 0 : i32
    %c0_i32_0 = arith.constant 0 : i32
    %c0_i32_1 = arith.constant 0 : i32
    return %c0_i32, %c0_i32_0 : i32, i32
  }
  func.func @transform_3(%arg0: i32, %arg1: i32) -> (i32, i32) {
    %c0_i32 = arith.constant 0 : i32
    %c0_i32_0 = arith.constant 0 : i32
    return %arg0, %c0_i32 : i32, i32
  }
}

module attributes {stable_mosaic.version = 11 : i64} {
  func.func @kernel(%arg0: i32, %arg1: i32, %arg2: memref<8x384xbf16, #tpu.memory_space<vmem>>, %arg3: memref<384x512xbf16, #tpu.memory_space<vmem>>, %arg4: memref<1x512xf32, #tpu.memory_space<vmem>>, %arg5: memref<8x512xbf16, #tpu.memory_space<vmem>>, %arg6: memref<8x512xf32, #tpu.memory_space<vmem>>) attributes {dimension_semantics = [#tpu.dimension_semantics<parallel>, #tpu.dimension_semantics<arbitrary>], iteration_bounds = array<i64: 1, 6>, scalar_prefetch = 0 : i64, scratch_operands = 1 : i64, tpu.core_type = #tpu.core_type<tc>, window_params = [{transform_indices = @transform_0, window_bounds = array<i64: 8, 384>}, {transform_indices = @transform_1, window_bounds = array<i64: 384, 512>}, {pipeline_mode = #tpu.pipeline_mode<synchronous>, transform_indices = @transform_2, window_bounds = array<i64: 1, 512>}, {transform_indices = @transform_3, window_bounds = array<i64: 8, 512>}]} {
    %c0_i32 = arith.constant 0 : i32
    %0 = arith.cmpi eq, %arg1, %c0_i32 : i32
    %1 = arith.extui %0 : i1 to i32
    %c0_i32_0 = arith.constant 0 : i32
    %2 = arith.cmpi ne, %1, %c0_i32_0 : i32
    scf.if %2 {
      %cst_9 = arith.constant 0.000000e+00 : f32
      %12 = vector.broadcast %cst_9 : f32 to vector<8x512xf32>
      %c0_10 = arith.constant 0 : index
      %c0_11 = arith.constant 0 : index
      %13 = vector.load %arg6[%c0_10, %c0_11] : memref<8x512xf32, #tpu.memory_space<vmem>>, vector<8x512xf32>
      tpu.vector_store %arg6[%c0_10, %c0_11], %12 {strides = array<i32>} : memref<8x512xf32, #tpu.memory_space<vmem>>, vector<8x512xf32>,
    } else {
    }
    %c0 = arith.constant 0 : index
    %c0_1 = arith.constant 0 : index
    %3 = vector.load %arg6[%c0, %c0_1] : memref<8x512xf32, #tpu.memory_space<vmem>>, vector<8x512xf32>
    %c0_2 = arith.constant 0 : index
    %c0_3 = arith.constant 0 : index
    %4 = vector.load %arg2[%c0_2, %c0_3] : memref<8x384xbf16, #tpu.memory_space<vmem>>, vector<8x384xbf16>
    %c0_4 = arith.constant 0 : index
    %c0_5 = arith.constant 0 : index
    %5 = vector.load %arg3[%c0_4, %c0_5] : memref<384x512xbf16, #tpu.memory_space<vmem>>, vector<384x512xbf16>
    %cst = arith.constant dense<0.000000e+00> : vector<8x512xf32>
    %6 = tpu.matmul %4, %5, %cst {dimension_numbers = #tpu.dot_dimension_numbers<[1], [0], [0], [1], [0, 0, 1, 1], [], []>} : vector<8x384xbf16>, vector<384x512xbf16>, vector<8x512xf32> -> vector<8x512xf32>
    %7 = arith.addf %3, %6 : vector<8x512xf32>
    %c0_6 = arith.constant 0 : index
    %c0_7 = arith.constant 0 : index
    %8 = vector.load %arg6[%c0_6, %c0_7] : memref<8x512xf32, #tpu.memory_space<vmem>>, vector<8x512xf32>
    tpu.vector_store %arg6[%c0_6, %c0_7], %7 {strides = array<i32>} : memref<8x512xf32, #tpu.memory_space<vmem>>, vector<8x512xf32>,
    %c5_i32 = arith.constant 5 : i32
    %9 = arith.cmpi eq, %arg1, %c5_i32 : i32
    %10 = arith.extui %9 : i1 to i32
    %c0_i32_8 = arith.constant 0 : i32
    %11 = arith.cmpi ne, %10, %c0_i32_8 : i32
    scf.if %11 {
      %c0_9 = arith.constant 0 : index
      %c0_10 = arith.constant 0 : index
      %12 = vector.load %arg6[%c0_9, %c0_10] : memref<8x512xf32, #tpu.memory_space<vmem>>, vector<8x512xf32>
      %c0_11 = arith.constant 0 : index
      %c0_12 = arith.constant 0 : index
      %13 = vector.load %arg4[%c0_11, %c0_12] : memref<1x512xf32, #tpu.memory_space<vmem>>, vector<1x512xf32>
      %14 = vector.broadcast %13 : vector<1x512xf32> to vector<8x512xf32>
      %15 = arith.addf %12, %14 : vector<8x512xf32>
      %cst_13 = arith.constant 0.000000e+00 : f32
      %16 = vector.broadcast %cst_13 : f32 to vector<8x512xf32>
      %17 = arith.maximumf %15, %16 : vector<8x512xf32>
      %18 = arith.truncf %17 : vector<8x512xf32> to vector<8x512xbf16>
      %c0_14 = arith.constant 0 : index
      %c0_15 = arith.constant 0 : index
      %19 = vector.load %arg5[%c0_14, %c0_15] : memref<8x512xbf16, #tpu.memory_space<vmem>>, vector<8x512xbf16>
      tpu.vector_store %arg5[%c0_14, %c0_15], %18 {strides = array<i32>} : memref<8x512xbf16, #tpu.memory_space<vmem>>, vector<8x512xbf16>,
    } else {
    }
    return
  }
  func.func @transform_0(%arg0: i32, %arg1: i32) -> (i32, i32) {
    %c0_i32 = arith.constant 0 : i32
    return %arg0, %arg1 : i32, i32
  }
  func.func @transform_1(%arg0: i32, %arg1: i32) -> (i32, i32) {
    %c0_i32 = arith.constant 0 : i32
    %c0_i32_0 = arith.constant 0 : i32
    return %arg1, %c0_i32 : i32, i32
  }
  func.func @transform_2(%arg0: i32, %arg1: i32) -> (i32, i32) {
    %c0_i32 = arith.constant 0 : i32
    %c0_i32_0 = arith.constant 0 : i32
    %c0_i32_1 = arith.constant 0 : i32
    return %c0_i32, %c0_i32_0 : i32, i32
  }
  func.func @transform_3(%arg0: i32, %arg1: i32) -> (i32, i32) {
    %c0_i32 = arith.constant 0 : i32
    %c0_i32_0 = arith.constant 0 : i32
    return %arg0, %c0_i32 : i32, i32
  }
}

module attributes {stable_mosaic.version = 11 : i64} {
  func.func @kernel(%arg0: i32, %arg1: i32, %arg2: memref<8x256xbf16, #tpu.memory_space<vmem>>, %arg3: memref<256x512xbf16, #tpu.memory_space<vmem>>, %arg4: memref<1x512xf32, #tpu.memory_space<vmem>>, %arg5: memref<8x512xbf16, #tpu.memory_space<vmem>>, %arg6: memref<8x512xf32, #tpu.memory_space<vmem>>) attributes {dimension_semantics = [#tpu.dimension_semantics<parallel>, #tpu.dimension_semantics<arbitrary>], iteration_bounds = array<i64: 1, 1>, scalar_prefetch = 0 : i64, scratch_operands = 1 : i64, tpu.core_type = #tpu.core_type<tc>, window_params = [{transform_indices = @transform_0, window_bounds = array<i64: 8, 256>}, {transform_indices = @transform_1, window_bounds = array<i64: 256, 512>}, {pipeline_mode = #tpu.pipeline_mode<synchronous>, transform_indices = @transform_2, window_bounds = array<i64: 1, 512>}, {transform_indices = @transform_3, window_bounds = array<i64: 8, 512>}]} {
    %c0_i32 = arith.constant 0 : i32
    %0 = arith.cmpi eq, %arg1, %c0_i32 : i32
    %1 = arith.extui %0 : i1 to i32
    %c0_i32_0 = arith.constant 0 : i32
    %2 = arith.cmpi ne, %1, %c0_i32_0 : i32
    scf.if %2 {
      %cst_10 = arith.constant 0.000000e+00 : f32
      %12 = vector.broadcast %cst_10 : f32 to vector<8x512xf32>
      %c0_11 = arith.constant 0 : index
      %c0_12 = arith.constant 0 : index
      %13 = vector.load %arg6[%c0_11, %c0_12] : memref<8x512xf32, #tpu.memory_space<vmem>>, vector<8x512xf32>
      tpu.vector_store %arg6[%c0_11, %c0_12], %12 {strides = array<i32>} : memref<8x512xf32, #tpu.memory_space<vmem>>, vector<8x512xf32>,
    } else {
    }
    %c0 = arith.constant 0 : index
    %c0_1 = arith.constant 0 : index
    %3 = vector.load %arg6[%c0, %c0_1] : memref<8x512xf32, #tpu.memory_space<vmem>>, vector<8x512xf32>
    %c0_2 = arith.constant 0 : index
    %c0_3 = arith.constant 0 : index
    %4 = vector.load %arg2[%c0_2, %c0_3] : memref<8x256xbf16, #tpu.memory_space<vmem>>, vector<8x256xbf16>
    %c0_4 = arith.constant 0 : index
    %c0_5 = arith.constant 0 : index
    %5 = vector.load %arg3[%c0_4, %c0_5] : memref<256x512xbf16, #tpu.memory_space<vmem>>, vector<256x512xbf16>
    %cst = arith.constant dense<0.000000e+00> : vector<8x512xf32>
    %6 = tpu.matmul %4, %5, %cst {dimension_numbers = #tpu.dot_dimension_numbers<[1], [0], [0], [1], [0, 0, 1, 1], [], []>} : vector<8x256xbf16>, vector<256x512xbf16>, vector<8x512xf32> -> vector<8x512xf32>
    %7 = arith.addf %3, %6 : vector<8x512xf32>
    %c0_6 = arith.constant 0 : index
    %c0_7 = arith.constant 0 : index
    %8 = vector.load %arg6[%c0_6, %c0_7] : memref<8x512xf32, #tpu.memory_space<vmem>>, vector<8x512xf32>
    tpu.vector_store %arg6[%c0_6, %c0_7], %7 {strides = array<i32>} : memref<8x512xf32, #tpu.memory_space<vmem>>, vector<8x512xf32>,
    %c0_i32_8 = arith.constant 0 : i32
    %9 = arith.cmpi eq, %arg1, %c0_i32_8 : i32
    %10 = arith.extui %9 : i1 to i32
    %c0_i32_9 = arith.constant 0 : i32
    %11 = arith.cmpi ne, %10, %c0_i32_9 : i32
    scf.if %11 {
      %c0_10 = arith.constant 0 : index
      %c0_11 = arith.constant 0 : index
      %12 = vector.load %arg6[%c0_10, %c0_11] : memref<8x512xf32, #tpu.memory_space<vmem>>, vector<8x512xf32>
      %c0_12 = arith.constant 0 : index
      %c0_13 = arith.constant 0 : index
      %13 = vector.load %arg4[%c0_12, %c0_13] : memref<1x512xf32, #tpu.memory_space<vmem>>, vector<1x512xf32>
      %14 = vector.broadcast %13 : vector<1x512xf32> to vector<8x512xf32>
      %15 = arith.addf %12, %14 : vector<8x512xf32>
      %16 = arith.truncf %15 : vector<8x512xf32> to vector<8x512xbf16>
      %c0_14 = arith.constant 0 : index
      %c0_15 = arith.constant 0 : index
      %17 = vector.load %arg5[%c0_14, %c0_15] : memref<8x512xbf16, #tpu.memory_space<vmem>>, vector<8x512xbf16>
      tpu.vector_store %arg5[%c0_14, %c0_15], %16 {strides = array<i32>} : memref<8x512xbf16, #tpu.memory_space<vmem>>, vector<8x512xbf16>,
    } else {
    }
    return
  }
  func.func @transform_0(%arg0: i32, %arg1: i32) -> (i32, i32) {
    %c0_i32 = arith.constant 0 : i32
    return %arg0, %arg1 : i32, i32
  }
  func.func @transform_1(%arg0: i32, %arg1: i32) -> (i32, i32) {
    %c0_i32 = arith.constant 0 : i32
    %c0_i32_0 = arith.constant 0 : i32
    return %arg1, %c0_i32 : i32, i32
  }
  func.func @transform_2(%arg0: i32, %arg1: i32) -> (i32, i32) {
    %c0_i32 = arith.constant 0 : i32
    %c0_i32_0 = arith.constant 0 : i32
    %c0_i32_1 = arith.constant 0 : i32
    return %c0_i32, %c0_i32_0 : i32, i32
  }
  func.func @transform_3(%arg0: i32, %arg1: i32) -> (i32, i32) {
    %c0_i32 = arith.constant 0 : i32
    %c0_i32_0 = arith.constant 0 : i32
    return %arg0, %c0_i32 : i32, i32
  }
}

module attributes {stable_mosaic.version = 11 : i64} {
  func.func @kernel(%arg0: i32, %arg1: i32, %arg2: memref<8x512xbf16, #tpu.memory_space<vmem>>, %arg3: memref<512x512xbf16, #tpu.memory_space<vmem>>, %arg4: memref<1x512xf32, #tpu.memory_space<vmem>>, %arg5: memref<8x512xbf16, #tpu.memory_space<vmem>>, %arg6: memref<8x512xbf16, #tpu.memory_space<vmem>>, %arg7: memref<8x512xf32, #tpu.memory_space<vmem>>) attributes {dimension_semantics = [#tpu.dimension_semantics<parallel>, #tpu.dimension_semantics<arbitrary>], iteration_bounds = array<i64: 1, 9>, scalar_prefetch = 0 : i64, scratch_operands = 1 : i64, tpu.core_type = #tpu.core_type<tc>, window_params = [{transform_indices = @transform_0, window_bounds = array<i64: 8, 512>}, {transform_indices = @transform_1, window_bounds = array<i64: 512, 512>}, {pipeline_mode = #tpu.pipeline_mode<synchronous>, transform_indices = @transform_2, window_bounds = array<i64: 1, 512>}, {transform_indices = @transform_3, window_bounds = array<i64: 8, 512>}, {transform_indices = @transform_4, window_bounds = array<i64: 8, 512>}]} {
    %c0_i32 = arith.constant 0 : i32
    %0 = arith.cmpi eq, %arg1, %c0_i32 : i32
    %1 = arith.extui %0 : i1 to i32
    %c0_i32_0 = arith.constant 0 : i32
    %2 = arith.cmpi ne, %1, %c0_i32_0 : i32
    scf.if %2 {
      %cst_9 = arith.constant 0.000000e+00 : f32
      %12 = vector.broadcast %cst_9 : f32 to vector<8x512xf32>
      %c0_10 = arith.constant 0 : index
      %c0_11 = arith.constant 0 : index
      %13 = vector.load %arg7[%c0_10, %c0_11] : memref<8x512xf32, #tpu.memory_space<vmem>>, vector<8x512xf32>
      tpu.vector_store %arg7[%c0_10, %c0_11], %12 {strides = array<i32>} : memref<8x512xf32, #tpu.memory_space<vmem>>, vector<8x512xf32>,
    } else {
    }
    %c0 = arith.constant 0 : index
    %c0_1 = arith.constant 0 : index
    %3 = vector.load %arg7[%c0, %c0_1] : memref<8x512xf32, #tpu.memory_space<vmem>>, vector<8x512xf32>
    %c0_2 = arith.constant 0 : index
    %c0_3 = arith.constant 0 : index
    %4 = vector.load %arg2[%c0_2, %c0_3] : memref<8x512xbf16, #tpu.memory_space<vmem>>, vector<8x512xbf16>
    %c0_4 = arith.constant 0 : index
    %c0_5 = arith.constant 0 : index
    %5 = vector.load %arg3[%c0_4, %c0_5] : memref<512x512xbf16, #tpu.memory_space<vmem>>, vector<512x512xbf16>
    %cst = arith.constant dense<0.000000e+00> : vector<8x512xf32>
    %6 = tpu.matmul %4, %5, %cst {dimension_numbers = #tpu.dot_dimension_numbers<[1], [0], [0], [1], [0, 0, 1, 1], [], []>} : vector<8x512xbf16>, vector<512x512xbf16>, vector<8x512xf32> -> vector<8x512xf32>
    %7 = arith.addf %3, %6 : vector<8x512xf32>
    %c0_6 = arith.constant 0 : index
    %c0_7 = arith.constant 0 : index
    %8 = vector.load %arg7[%c0_6, %c0_7] : memref<8x512xf32, #tpu.memory_space<vmem>>, vector<8x512xf32>
    tpu.vector_store %arg7[%c0_6, %c0_7], %7 {strides = array<i32>} : memref<8x512xf32, #tpu.memory_space<vmem>>, vector<8x512xf32>,
    %c8_i32 = arith.constant 8 : i32
    %9 = arith.cmpi eq, %arg1, %c8_i32 : i32
    %10 = arith.extui %9 : i1 to i32
    %c0_i32_8 = arith.constant 0 : i32
    %11 = arith.cmpi ne, %10, %c0_i32_8 : i32
    scf.if %11 {
      %c0_9 = arith.constant 0 : index
      %c0_10 = arith.constant 0 : index
      %12 = vector.load %arg7[%c0_9, %c0_10] : memref<8x512xf32, #tpu.memory_space<vmem>>, vector<8x512xf32>
      %c0_11 = arith.constant 0 : index
      %c0_12 = arith.constant 0 : index
      %13 = vector.load %arg4[%c0_11, %c0_12] : memref<1x512xf32, #tpu.memory_space<vmem>>, vector<1x512xf32>
      %14 = vector.broadcast %13 : vector<1x512xf32> to vector<8x512xf32>
      %15 = arith.addf %12, %14 : vector<8x512xf32>
      %c0_13 = arith.constant 0 : index
      %c0_14 = arith.constant 0 : index
      %16 = vector.load %arg5[%c0_13, %c0_14] : memref<8x512xbf16, #tpu.memory_space<vmem>>, vector<8x512xbf16>
      %17 = arith.extf %16 : vector<8x512xbf16> to vector<8x512xf32>
      %18 = arith.addf %15, %17 : vector<8x512xf32>
      %cst_15 = arith.constant 0.000000e+00 : f32
      %19 = vector.broadcast %cst_15 : f32 to vector<8x512xf32>
      %20 = arith.maximumf %18, %19 : vector<8x512xf32>
      %21 = arith.truncf %20 : vector<8x512xf32> to vector<8x512xbf16>
      %c0_16 = arith.constant 0 : index
      %c0_17 = arith.constant 0 : index
      %22 = vector.load %arg6[%c0_16, %c0_17] : memref<8x512xbf16, #tpu.memory_space<vmem>>, vector<8x512xbf16>
      tpu.vector_store %arg6[%c0_16, %c0_17], %21 {strides = array<i32>} : memref<8x512xbf16, #tpu.memory_space<vmem>>, vector<8x512xbf16>,
    } else {
    }
    return
  }
  func.func @transform_0(%arg0: i32, %arg1: i32) -> (i32, i32) {
    %c0_i32 = arith.constant 0 : i32
    return %arg0, %arg1 : i32, i32
  }
  func.func @transform_1(%arg0: i32, %arg1: i32) -> (i32, i32) {
    %c0_i32 = arith.constant 0 : i32
    %c0_i32_0 = arith.constant 0 : i32
    return %arg1, %c0_i32 : i32, i32
  }
  func.func @transform_2(%arg0: i32, %arg1: i32) -> (i32, i32) {
    %c0_i32 = arith.constant 0 : i32
    %c0_i32_0 = arith.constant 0 : i32
    %c0_i32_1 = arith.constant 0 : i32
    return %c0_i32, %c0_i32_0 : i32, i32
  }
  func.func @transform_3(%arg0: i32, %arg1: i32) -> (i32, i32) {
    %c0_i32 = arith.constant 0 : i32
    %c0_i32_0 = arith.constant 0 : i32
    return %arg0, %c0_i32 : i32, i32
  }
  func.func @transform_4(%arg0: i32, %arg1: i32) -> (i32, i32) {
    %c0_i32 = arith.constant 0 : i32
    %c0_i32_0 = arith.constant 0 : i32
    return %arg0, %c0_i32 : i32, i32
  }
}

module attributes {stable_mosaic.version = 11 : i64} {
  func.func @kernel(%arg0: i32, %arg1: i32, %arg2: memref<8x512xbf16, #tpu.memory_space<vmem>>, %arg3: memref<512x512xbf16, #tpu.memory_space<vmem>>, %arg4: memref<1x512xf32, #tpu.memory_space<vmem>>, %arg5: memref<8x512xbf16, #tpu.memory_space<vmem>>, %arg6: memref<8x512xf32, #tpu.memory_space<vmem>>) attributes {dimension_semantics = [#tpu.dimension_semantics<parallel>, #tpu.dimension_semantics<arbitrary>], iteration_bounds = array<i64: 1, 9>, scalar_prefetch = 0 : i64, scratch_operands = 1 : i64, tpu.core_type = #tpu.core_type<tc>, window_params = [{transform_indices = @transform_0, window_bounds = array<i64: 8, 512>}, {transform_indices = @transform_1, window_bounds = array<i64: 512, 512>}, {pipeline_mode = #tpu.pipeline_mode<synchronous>, transform_indices = @transform_2, window_bounds = array<i64: 1, 512>}, {transform_indices = @transform_3, window_bounds = array<i64: 8, 512>}]} {
    %c0_i32 = arith.constant 0 : i32
    %0 = arith.cmpi eq, %arg1, %c0_i32 : i32
    %1 = arith.extui %0 : i1 to i32
    %c0_i32_0 = arith.constant 0 : i32
    %2 = arith.cmpi ne, %1, %c0_i32_0 : i32
    scf.if %2 {
      %cst_9 = arith.constant 0.000000e+00 : f32
      %12 = vector.broadcast %cst_9 : f32 to vector<8x512xf32>
      %c0_10 = arith.constant 0 : index
      %c0_11 = arith.constant 0 : index
      %13 = vector.load %arg6[%c0_10, %c0_11] : memref<8x512xf32, #tpu.memory_space<vmem>>, vector<8x512xf32>
      tpu.vector_store %arg6[%c0_10, %c0_11], %12 {strides = array<i32>} : memref<8x512xf32, #tpu.memory_space<vmem>>, vector<8x512xf32>,
    } else {
    }
    %c0 = arith.constant 0 : index
    %c0_1 = arith.constant 0 : index
    %3 = vector.load %arg6[%c0, %c0_1] : memref<8x512xf32, #tpu.memory_space<vmem>>, vector<8x512xf32>
    %c0_2 = arith.constant 0 : index
    %c0_3 = arith.constant 0 : index
    %4 = vector.load %arg2[%c0_2, %c0_3] : memref<8x512xbf16, #tpu.memory_space<vmem>>, vector<8x512xbf16>
    %c0_4 = arith.constant 0 : index
    %c0_5 = arith.constant 0 : index
    %5 = vector.load %arg3[%c0_4, %c0_5] : memref<512x512xbf16, #tpu.memory_space<vmem>>, vector<512x512xbf16>
    %cst = arith.constant dense<0.000000e+00> : vector<8x512xf32>
    %6 = tpu.matmul %4, %5, %cst {dimension_numbers = #tpu.dot_dimension_numbers<[1], [0], [0], [1], [0, 0, 1, 1], [], []>} : vector<8x512xbf16>, vector<512x512xbf16>, vector<8x512xf32> -> vector<8x512xf32>
    %7 = arith.addf %3, %6 : vector<8x512xf32>
    %c0_6 = arith.constant 0 : index
    %c0_7 = arith.constant 0 : index
    %8 = vector.load %arg6[%c0_6, %c0_7] : memref<8x512xf32, #tpu.memory_space<vmem>>, vector<8x512xf32>
    tpu.vector_store %arg6[%c0_6, %c0_7], %7 {strides = array<i32>} : memref<8x512xf32, #tpu.memory_space<vmem>>, vector<8x512xf32>,
    %c8_i32 = arith.constant 8 : i32
    %9 = arith.cmpi eq, %arg1, %c8_i32 : i32
    %10 = arith.extui %9 : i1 to i32
    %c0_i32_8 = arith.constant 0 : i32
    %11 = arith.cmpi ne, %10, %c0_i32_8 : i32
    scf.if %11 {
      %c0_9 = arith.constant 0 : index
      %c0_10 = arith.constant 0 : index
      %12 = vector.load %arg6[%c0_9, %c0_10] : memref<8x512xf32, #tpu.memory_space<vmem>>, vector<8x512xf32>
      %c0_11 = arith.constant 0 : index
      %c0_12 = arith.constant 0 : index
      %13 = vector.load %arg4[%c0_11, %c0_12] : memref<1x512xf32, #tpu.memory_space<vmem>>, vector<1x512xf32>
      %14 = vector.broadcast %13 : vector<1x512xf32> to vector<8x512xf32>
      %15 = arith.addf %12, %14 : vector<8x512xf32>
      %cst_13 = arith.constant 0.000000e+00 : f32
      %16 = vector.broadcast %cst_13 : f32 to vector<8x512xf32>
      %17 = arith.maximumf %15, %16 : vector<8x512xf32>
      %18 = arith.truncf %17 : vector<8x512xf32> to vector<8x512xbf16>
      %c0_14 = arith.constant 0 : index
      %c0_15 = arith.constant 0 : index
      %19 = vector.load %arg5[%c0_14, %c0_15] : memref<8x512xbf16, #tpu.memory_space<vmem>>, vector<8x512xbf16>
      tpu.vector_store %arg5[%c0_14, %c0_15], %18 {strides = array<i32>} : memref<8x512xbf16, #tpu.memory_space<vmem>>, vector<8x512xbf16>,
    } else {
    }
    return
  }
  func.func @transform_0(%arg0: i32, %arg1: i32) -> (i32, i32) {
    %c0_i32 = arith.constant 0 : i32
    return %arg0, %arg1 : i32, i32
  }
  func.func @transform_1(%arg0: i32, %arg1: i32) -> (i32, i32) {
    %c0_i32 = arith.constant 0 : i32
    %c0_i32_0 = arith.constant 0 : i32
    return %arg1, %c0_i32 : i32, i32
  }
  func.func @transform_2(%arg0: i32, %arg1: i32) -> (i32, i32) {
    %c0_i32 = arith.constant 0 : i32
    %c0_i32_0 = arith.constant 0 : i32
    %c0_i32_1 = arith.constant 0 : i32
    return %c0_i32, %c0_i32_0 : i32, i32
  }
  func.func @transform_3(%arg0: i32, %arg1: i32) -> (i32, i32) {
    %c0_i32 = arith.constant 0 : i32
    %c0_i32_0 = arith.constant 0 : i32
    return %arg0, %c0_i32 : i32, i32
  }
}

module attributes {stable_mosaic.version = 11 : i64} {
  func.func @_avgpool_kernel(%arg0: i32, %arg1: memref<1x1x512xbf16, #tpu.memory_space<vmem>>, %arg2: memref<1x1x512xf32, #tpu.memory_space<vmem>>) attributes {dimension_semantics = [#tpu.dimension_semantics<parallel>], iteration_bounds = array<i64: 2>, scalar_prefetch = 0 : i64, scratch_operands = 0 : i64, tpu.core_type = #tpu.core_type<tc>, window_params = [{transform_indices = @transform_0, window_bounds = array<i64: 1, 1, 512>}, {transform_indices = @transform_1, window_bounds = array<i64: 1, 1, 512>}]} {
    %c0 = arith.constant 0 : index
    %c0_0 = arith.constant 0 : index
    %c0_1 = arith.constant 0 : index
    %0 = vector.load %arg1[%c0, %c0_0, %c0_1] : memref<1x1x512xbf16, #tpu.memory_space<vmem>>, vector<1x1x512xbf16>
    %1 = arith.extf %0 : vector<1x1x512xbf16> to vector<1x1x512xf32>
    %cst = arith.constant dense<0.000000e+00> : vector<1x512xf32>
    %2 = vector.multi_reduction <add>, %1, %cst [1] : vector<1x1x512xf32> to vector<1x512xf32>
    %3 = vector.shape_cast %2 : vector<1x512xf32> to vector<1x1x512xf32>
    %cst_2 = arith.constant 1.000000e+00 : f32
    %4 = vector.broadcast %cst_2 : f32 to vector<1x1x512xf32>
    %5 = arith.divf %3, %4 : vector<1x1x512xf32>
    %c0_3 = arith.constant 0 : index
    %c0_4 = arith.constant 0 : index
    %c0_5 = arith.constant 0 : index
    %6 = vector.load %arg2[%c0_3, %c0_4, %c0_5] : memref<1x1x512xf32, #tpu.memory_space<vmem>>, vector<1x1x512xf32>
    tpu.vector_store %arg2[%c0_3, %c0_4, %c0_5], %5 {strides = array<i32>} : memref<1x1x512xf32, #tpu.memory_space<vmem>>, vector<1x1x512xf32>,
    return
  }
  func.func @transform_0(%arg0: i32) -> (i32, i32, i32) {
    %c0_i32 = arith.constant 0 : i32
    %c0_i32_0 = arith.constant 0 : i32
    %c0_i32_1 = arith.constant 0 : i32
    return %arg0, %c0_i32, %c0_i32_0 : i32, i32, i32
  }
  func.func @transform_1(%arg0: i32) -> (i32, i32, i32) {
    %c0_i32 = arith.constant 0 : i32
    %c0_i32_0 = arith.constant 0 : i32
    %c0_i32_1 = arith.constant 0 : i32
    return %arg0, %c0_i32, %c0_i32_0 : i32, i32, i32
  }
}

module attributes {stable_mosaic.version = 11 : i64} {
  func.func @kernel(%arg0: i32, %arg1: i32, %arg2: memref<8x512xbf16, #tpu.memory_space<vmem>>, %arg3: memref<512x128xbf16, #tpu.memory_space<vmem>>, %arg4: memref<1x128xf32, #tpu.memory_space<vmem>>, %arg5: memref<8x128xf32, #tpu.memory_space<vmem>>, %arg6: memref<8x128xf32, #tpu.memory_space<vmem>>) attributes {dimension_semantics = [#tpu.dimension_semantics<parallel>, #tpu.dimension_semantics<arbitrary>], iteration_bounds = array<i64: 1, 1>, scalar_prefetch = 0 : i64, scratch_operands = 1 : i64, tpu.core_type = #tpu.core_type<tc>, window_params = [{transform_indices = @transform_0, window_bounds = array<i64: 8, 512>}, {transform_indices = @transform_1, window_bounds = array<i64: 512, 128>}, {pipeline_mode = #tpu.pipeline_mode<synchronous>, transform_indices = @transform_2, window_bounds = array<i64: 1, 128>}, {transform_indices = @transform_3, window_bounds = array<i64: 8, 128>}]} {
    %c0_i32 = arith.constant 0 : i32
    %0 = arith.cmpi eq, %arg1, %c0_i32 : i32
    %1 = arith.extui %0 : i1 to i32
    %c0_i32_0 = arith.constant 0 : i32
    %2 = arith.cmpi ne, %1, %c0_i32_0 : i32
    scf.if %2 {
      %cst_10 = arith.constant 0.000000e+00 : f32
      %12 = vector.broadcast %cst_10 : f32 to vector<8x128xf32>
      %c0_11 = arith.constant 0 : index
      %c0_12 = arith.constant 0 : index
      %13 = vector.load %arg6[%c0_11, %c0_12] : memref<8x128xf32, #tpu.memory_space<vmem>>, vector<8x128xf32>
      tpu.vector_store %arg6[%c0_11, %c0_12], %12 {strides = array<i32>} : memref<8x128xf32, #tpu.memory_space<vmem>>, vector<8x128xf32>,
    } else {
    }
    %c0 = arith.constant 0 : index
    %c0_1 = arith.constant 0 : index
    %3 = vector.load %arg6[%c0, %c0_1] : memref<8x128xf32, #tpu.memory_space<vmem>>, vector<8x128xf32>
    %c0_2 = arith.constant 0 : index
    %c0_3 = arith.constant 0 : index
    %4 = vector.load %arg2[%c0_2, %c0_3] : memref<8x512xbf16, #tpu.memory_space<vmem>>, vector<8x512xbf16>
    %c0_4 = arith.constant 0 : index
    %c0_5 = arith.constant 0 : index
    %5 = vector.load %arg3[%c0_4, %c0_5] : memref<512x128xbf16, #tpu.memory_space<vmem>>, vector<512x128xbf16>
    %cst = arith.constant dense<0.000000e+00> : vector<8x128xf32>
    %6 = tpu.matmul %4, %5, %cst {dimension_numbers = #tpu.dot_dimension_numbers<[1], [0], [0], [1], [0, 0, 1, 1], [], []>} : vector<8x512xbf16>, vector<512x128xbf16>, vector<8x128xf32> -> vector<8x128xf32>
    %7 = arith.addf %3, %6 : vector<8x128xf32>
    %c0_6 = arith.constant 0 : index
    %c0_7 = arith.constant 0 : index
    %8 = vector.load %arg6[%c0_6, %c0_7] : memref<8x128xf32, #tpu.memory_space<vmem>>, vector<8x128xf32>
    tpu.vector_store %arg6[%c0_6, %c0_7], %7 {strides = array<i32>} : memref<8x128xf32, #tpu.memory_space<vmem>>, vector<8x128xf32>,
    %c0_i32_8 = arith.constant 0 : i32
    %9 = arith.cmpi eq, %arg1, %c0_i32_8 : i32
    %10 = arith.extui %9 : i1 to i32
    %c0_i32_9 = arith.constant 0 : i32
    %11 = arith.cmpi ne, %10, %c0_i32_9 : i32
    scf.if %11 {
      %c0_10 = arith.constant 0 : index
      %c0_11 = arith.constant 0 : index
      %12 = vector.load %arg6[%c0_10, %c0_11] : memref<8x128xf32, #tpu.memory_space<vmem>>, vector<8x128xf32>
      %c0_12 = arith.constant 0 : index
      %c0_13 = arith.constant 0 : index
      %13 = vector.load %arg4[%c0_12, %c0_13] : memref<1x128xf32, #tpu.memory_space<vmem>>, vector<1x128xf32>
      %14 = vector.broadcast %13 : vector<1x128xf32> to vector<8x128xf32>
      %15 = arith.addf %12, %14 : vector<8x128xf32>
      %c0_14 = arith.constant 0 : index
      %c0_15 = arith.constant 0 : index
      %16 = vector.load %arg5[%c0_14, %c0_15] : memref<8x128xf32, #tpu.memory_space<vmem>>, vector<8x128xf32>
      tpu.vector_store %arg5[%c0_14, %c0_15], %15 {strides = array<i32>} : memref<8x128xf32, #tpu.memory_space<vmem>>, vector<8x128xf32>,
    } else {
    }
    return
  }
  func.func @transform_0(%arg0: i32, %arg1: i32) -> (i32, i32) {
    %c0_i32 = arith.constant 0 : i32
    return %arg0, %arg1 : i32, i32
  }
  func.func @transform_1(%arg0: i32, %arg1: i32) -> (i32, i32) {
    %c0_i32 = arith.constant 0 : i32
    %c0_i32_0 = arith.constant 0 : i32
    return %arg1, %c0_i32 : i32, i32
  }
  func.func @transform_2(%arg0: i32, %arg1: i32) -> (i32, i32) {
    %c0_i32 = arith.constant 0 : i32
    %c0_i32_0 = arith.constant 0 : i32
    %c0_i32_1 = arith.constant 0 : i32
    return %c0_i32, %c0_i32_0 : i32, i32
  }
  func.func @transform_3(%arg0: i32, %arg1: i32) -> (i32, i32) {
    %c0_i32 = arith.constant 0 : i32
    %c0_i32_0 = arith.constant 0 : i32
    return %arg0, %c0_i32 : i32, i32
  }
}

</mosaic_0001>

<bundles_post_ra>
// kernel: resnet4channel_forward.39
= control target key start
LH: loop header
LB: loop body
LE: loop exit
PB: predicated region body
PF: predicated region fallthrough
CT: control target
= control target key end

     0   :  { %s1675_s12 = smov 0   ;;  %s1677_s13 = smov 0   ;;  %s1849_s0 = inlined_call_operand.vmem [shape: bf16[512,256], index: 0, kind: input, shape index: {}]   ;;  %s1850_s1 = inlined_call_operand.vmem [shape: bf16[256,128], index: 1, kind: input, shape index: {}]   ;;  %s1851_s2 = inlined_call_operand.vmem [shape: f32[1,128], index: 2, kind: input, shape index: {}]   ;;  %s1852_s3 = inlined_call_operand.vmem [shape: bf16[512,128], index: 3, kind: output, shape index: {}]  }
   0x1   :  { %s1679_s14 = smov 0  }
   0x2 LB: > { %s25_s15 = sadd.s32 1, %s1649_s13  ;;  %p1198_p0 = scmp.ge.s32.totalorder %s1653_s14, 1  ;;  %s1653_s14 = sphi %s1679_s14, %s13_s14   ;;  %s1649_s13 = sphi %s1677_s13, %s1854_s13   ;;  %s1645_s12 = sphi %s1675_s12, %s1853_s12  }
   0x3   : > { %p27_p1 = scmp.ge.s32.totalorder %s25_s15, 2  ;;  %p169_p2 = scmp.lt.s32.totalorder %s1653_s14, 3 }
   0x5   : > { %s1856_s15 = smov (%p27_p1, %s25_s15), 0  ;;  %p170_p3 = pnand %p1198_p0, %p169_p2 }
   0x6   : > { %v1567_v0 = vld [vmem:[%s1850_s1 + $0x40] sm:$0xff] (!%p170_p3)   ;;  %s1199_s18 = sshll.u32 (!%p170_p3), %s1645_s12, 5  ;;  %v1569_v2 = vld [vmem:[%s1850_s1 + $0x48] sm:$0xff] (!%p170_p3)   ;;  %v1571_v4 = vld [vmem:[%s1850_s1 + $0x50] sm:$0xff] (!%p170_p3)  }
   0x7   : > { %173 = sbr.rel (%p170_p3) target bundleno = 320 (0x140), region = 32  ;;  %v1568_v1 = vld [vmem:[%s1850_s1] sm:$0xff] (!%p170_p3)   ;;  %1415 = vmatprep.subr.bf16.mxu0 (!%p170_p3), %v1567_v0  ;;  %1527 = vmatprep.subr.bf16.mxu1 (!%p170_p3), %v1567_v0  ;;  %v1570_v3 = vld [vmem:[%s1850_s1 + $0x8] sm:$0xff] (!%p170_p3)   ;;  %p205_p4 = scmp.lt.s32.totalorder (!%p170_p3), %s1199_s18, 63  ;;  %v1572_v5 = vld [vmem:[%s1850_s1 + $0x10] sm:$0xff] (!%p170_p3)  }
   0x8   : > { %1416 = vmatpush3.bf16.msra.mxu0 (!%p170_p3), %v1568_v1  ;;  %1535 = vmatpush3.bf16.msra.mxu1 (!%p170_p3), %v1568_v1  ;;  %v1573_v6 = vld [vmem:[%s1850_s1 + $0x58] sm:$0xff] (!%p170_p3)   ;;  %v1575_v8 = vld [vmem:[%s1850_s1 + $0x60] sm:$0xff] (!%p170_p3)   ;;  %v1577_v10 = vld [vmem:[%s1850_s1 + $0x68] sm:$0xff] (!%p170_p3)  }
   0x9   : > { %1417 = vmatprep.subr.bf16.mxu0 (!%p170_p3), %v1569_v2  ;;  %1528 = vmatprep.subr.bf16.mxu1 (!%p170_p3), %v1569_v2  ;;  %v1574_v7 = vld [vmem:[%s1850_s1 + $0x18] sm:$0xff] (!%p170_p3)   ;;  %v1576_v9 = vld [vmem:[%s1850_s1 + $0x20] sm:$0xff] (!%p170_p3)   ;;  %v1578_v13 = vld [vmem:[%s1850_s1 + $0x28] sm:$0xff] (!%p170_p3)  }
   0xa   : > { %v1579_v14 = vld [vmem:[%s1850_s1 + $0x70] sm:$0xff] (!%p170_p3)   ;;  %v1581_v16 = vld [vmem:[%s1850_s1 + $0x78] sm:$0xff] (!%p170_p3)   ;;  %v1784_v51 = vld [vmem:[%s1851_s2] ss:$0 sm:$0xff] (!%p170_p3) }
   0xb   : > { %v1580_v15 = vld [vmem:[%s1850_s1 + $0x30] sm:$0xff] (!%p170_p3)   ;;  %v1582_v17 = vld [vmem:[%s1850_s1 + $0x38] sm:$0xff] (!%p170_p3)  }
   0xc   : > { %1418 = vmatpush3.bf16.msra.mxu0 (!%p170_p3), %v1570_v3  ;;  %1536 = vmatpush3.bf16.msra.mxu1 (!%p170_p3), %v1570_v3 }
   0xd   : > { %1419 = vmatprep.subr.bf16.mxu0 (!%p170_p3), %v1571_v4  ;;  %1529 = vmatprep.subr.bf16.mxu1 (!%p170_p3), %v1571_v4 }
   0xe   : > { %s1858_s18 = smov (!%p205_p4, %s1199_s18), 63 }
   0xf   : > { %s1287_s6 = sshll.u32 %s1858_s18, 3  ;;  %s1203_s5 = sshll.u32 %s1858_s18, 2 }
  0x10   : > { %1420 = vmatpush3.bf16.msra.mxu0 %v1572_v5  ;;  %1537 = vmatpush3.bf16.msra.mxu1 %v1572_v5  ;;  %s1726_s11 = scalar_lea.vmem %s1849_s0, %s1287_s6  ;;  %s1794_s8 = scalar_lea.vmem %s1852_s3, %s1203_s5 }
  0x11   : > { %1421 = vmatprep.subr.bf16.mxu0 %v1573_v6  ;;  %1530 = vmatprep.subr.bf16.mxu1 %v1573_v6  ;;  %v1585_v11 = vld [vmem:[%s1726_s11 + $0x4] ss:$8 sps:$4 sm:$0xff]   ;;  %v1583_v18 = vld [vmem:[%s1726_s11] ss:$8 sps:$4 sm:$0xff]   ;;  %v1589_v20 = vld [vmem:[%s1726_s11 + $0x14] ss:$8 sps:$4 sm:$0xff]  }
  0x12   : > { %v1588_v12 = vld [vmem:[%s1726_s11 + $0x84] ss:$8 sps:$4 sm:$0xff]   ;;  %648 = vmatprep.mubr.bf16.mxu0 %v1585_v11  ;;  %v1586_v19 = vld [vmem:[%s1726_s11 + $0x80] ss:$8 sps:$4 sm:$0xff]   ;;  %v1591_v21 = vld [vmem:[%s1726_s11 + $0x94] ss:$8 sps:$4 sm:$0xff]  }
  0x13   : > { %712 = vmatprep.mubr.bf16.mxu1 %v1588_v12  ;;  %v1593_v22 = vld [vmem:[%s1726_s11 + $0x10] ss:$8 sps:$4 sm:$0xff]   ;;  %v1595_v24 = vld [vmem:[%s1726_s11 + $0x24] ss:$8 sps:$4 sm:$0xff]   ;;  %v1599_v26 = vld [vmem:[%s1726_s11 + $0x20] ss:$8 sps:$4 sm:$0xff]  }
  0x14   : > { %1422 = vmatpush3.bf16.msra.mxu0 %v1574_v7  ;;  %1538 = vmatpush3.bf16.msra.mxu1 %v1574_v7  ;;  %v1594_v23 = vld [vmem:[%s1726_s11 + $0x90] ss:$8 sps:$4 sm:$0xff]   ;;  %v1597_v25 = vld [vmem:[%s1726_s11 + $0xa4] ss:$8 sps:$4 sm:$0xff]   ;;  %v1600_v27 = vld [vmem:[%s1726_s11 + $0xa0] ss:$8 sps:$4 sm:$0xff]  }
  0x15   : > { %1423 = vmatprep.subr.bf16.mxu0 %v1575_v8  ;;  %1531 = vmatprep.subr.bf16.mxu1 %v1575_v8  ;;  %v1601_v28 = vld [vmem:[%s1726_s11 + $0x34] ss:$8 sps:$4 sm:$0xff]   ;;  %v1605_v30 = vld [vmem:[%s1726_s11 + $0x30] ss:$8 sps:$4 sm:$0xff]   ;;  %v1607_v32 = vld [vmem:[%s1726_s11 + $0x44] ss:$8 sps:$4 sm:$0xff]  }
  0x16   : > { %v1603_v29 = vld [vmem:[%s1726_s11 + $0xb4] ss:$8 sps:$4 sm:$0xff]   ;;  %v1606_v31 = vld [vmem:[%s1726_s11 + $0xb0] ss:$8 sps:$4 sm:$0xff]   ;;  %v1609_v33 = vld [vmem:[%s1726_s11 + $0xc4] ss:$8 sps:$4 sm:$0xff]  }
  0x17   : > { %v1611_v34 = vld [vmem:[%s1726_s11 + $0x40] ss:$8 sps:$4 sm:$0xff]   ;;  %v1613_v36 = vld [vmem:[%s1726_s11 + $0x54] ss:$8 sps:$4 sm:$0xff]   ;;  %v1617_v38 = vld [vmem:[%s1726_s11 + $0x50] ss:$8 sps:$4 sm:$0xff]  }
  0x18   : > { %1424 = vmatpush3.bf16.msra.mxu0 %v1576_v9  ;;  %1539 = vmatpush3.bf16.msra.mxu1 %v1576_v9  ;;  %v1612_v35 = vld [vmem:[%s1726_s11 + $0xc0] ss:$8 sps:$4 sm:$0xff]   ;;  %v1615_v37 = vld [vmem:[%s1726_s11 + $0xd4] ss:$8 sps:$4 sm:$0xff]   ;;  %v1618_v39 = vld [vmem:[%s1726_s11 + $0xd0] ss:$8 sps:$4 sm:$0xff]  }
  0x19   : > { %1425 = vmatprep.subr.bf16.mxu0 %v1577_v10  ;;  %1532 = vmatprep.subr.bf16.mxu1 %v1577_v10  ;;  %v1619_v40 = vld [vmem:[%s1726_s11 + $0x64] ss:$8 sps:$4 sm:$0xff]   ;;  %v1623_v42 = vld [vmem:[%s1726_s11 + $0x60] ss:$8 sps:$4 sm:$0xff]   ;;  %v1625_v44 = vld [vmem:[%s1726_s11 + $0x74] ss:$8 sps:$4 sm:$0xff]  }
  0x1a   : > { %v1621_v41 = vld [vmem:[%s1726_s11 + $0xe4] ss:$8 sps:$4 sm:$0xff]   ;;  %v1624_v43 = vld [vmem:[%s1726_s11 + $0xe0] ss:$8 sps:$4 sm:$0xff]   ;;  %v1627_v45 = vld [vmem:[%s1726_s11 + $0xf4] ss:$8 sps:$4 sm:$0xff]  }
  0x1b   : > { %v1629_v46 = vld [vmem:[%s1726_s11 + $0x70] ss:$8 sps:$4 sm:$0xff]  }
  0x1c   : > { %1426 = vmatpush3.bf16.msra.mxu0 %v1578_v13  ;;  %1540 = vmatpush3.bf16.msra.mxu1 %v1578_v13  ;;  %v1630_v47 = vld [vmem:[%s1726_s11 + $0xf0] ss:$8 sps:$4 sm:$0xff]  }
  0x1d   : > { %1427 = vmatprep.subr.bf16.mxu0 %v1579_v14  ;;  %1533 = vmatprep.subr.bf16.mxu1 %v1579_v14 }
  0x20   : > { %1428 = vmatpush3.bf16.msra.mxu0 %v1580_v15  ;;  %1541 = vmatpush3.bf16.msra.mxu1 %v1580_v15 }
  0x21   : > { %1429 = vmatprep.subr.bf16.mxu0 %v1581_v16  ;;  %1534 = vmatprep.subr.bf16.mxu1 %v1581_v16 }
  0x24   : > { %1430 = vmatpush3.bf16.msra.mxu0 %v1582_v17  ;;  %1542 = vmatpush3.bf16.msra.mxu1 %v1582_v17 }
  0x27   : > { %649 = vmatmul.mubr.bf16.vlgmr.msra.gmra.mrb[0].mxu0 %v1583_v18  ;;  %713 = vmatmul.mubr.bf16.vlgmr.msra.gmra.mrb[0].mxu1 %v1586_v19 }
  0x28   : > { %656 = vmatprep.mubr.bf16.mxu0 %v1589_v20  ;;  %720 = vmatprep.mubr.bf16.mxu1 %v1591_v21 }
  0x2f   : > { %657 = vmatmul.mubr.bf16.gmra.mrb[4].mxu0 %v1593_v22  ;;  %721 = vmatmul.mubr.bf16.gmra.mrb[4].mxu1 %v1594_v23 }
  0x30   : > { %664 = vmatprep.mubr.bf16.mxu0 %v1595_v24  ;;  %728 = vmatprep.mubr.bf16.mxu1 %v1597_v25 }
  0x37   : > { %665 = vmatmul.mubr.bf16.gmra.mrb[8].mxu0 %v1599_v26  ;;  %729 = vmatmul.mubr.bf16.gmra.mrb[8].mxu1 %v1600_v27 }
  0x38   : > { %672 = vmatprep.mubr.bf16.mxu0 %v1601_v28  ;;  %736 = vmatprep.mubr.bf16.mxu1 %v1603_v29 }
  0x3f   : > { %673 = vmatmul.mubr.bf16.gmra.mrb[12].mxu0 %v1605_v30  ;;  %737 = vmatmul.mubr.bf16.gmra.mrb[12].mxu1 %v1606_v31 }
  0x40   : > { %680 = vmatprep.mubr.bf16.mxu0 %v1607_v32  ;;  %744 = vmatprep.mubr.bf16.mxu1 %v1609_v33 }
  0x47   : > { %681 = vmatmul.mubr.bf16.gmra.mrb[16].mxu0 %v1611_v34  ;;  %745 = vmatmul.mubr.bf16.gmra.mrb[16].mxu1 %v1612_v35 }
  0x48   : > { %688 = vmatprep.mubr.bf16.mxu0 %v1613_v36  ;;  %752 = vmatprep.mubr.bf16.mxu1 %v1615_v37 }
  0x4f   : > { %689 = vmatmul.mubr.bf16.gmra.mrb[20].mxu0 %v1617_v38  ;;  %753 = vmatmul.mubr.bf16.gmra.mrb[20].mxu1 %v1618_v39 }
  0x50   : > { %696 = vmatprep.mubr.bf16.mxu0 %v1619_v40  ;;  %760 = vmatprep.mubr.bf16.mxu1 %v1621_v41 }
  0x57   : > { %697 = vmatmul.mubr.bf16.gmra.mrb[24].mxu0 %v1623_v42  ;;  %761 = vmatmul.mubr.bf16.gmra.mrb[24].mxu1 %v1624_v43 }
  0x58   : > { %704 = vmatprep.mubr.bf16.mxu0 %v1625_v44  ;;  %768 = vmatprep.mubr.bf16.mxu1 %v1627_v45 }
  0x5f   : > { %705 = vmatmul.mubr.bf16.gmra.mrb[28].mxu0 %v1629_v46  ;;  %769 = vmatmul.mubr.bf16.gmra.mrb[28].mxu1 %v1630_v47 }
  0xfa   : > { %v1431_v48 = vpop.f32.mrb[0].mxu0  ;;  %v1479_v49 = vpop.f32.mrb[0].mxu1 }
  0xfb   : > { %v1432_v50 = vpop.f32.mrb[1].mxu0  ;;  %v1480_v52 = vpop.f32.mrb[1].mxu1 }
  0xfc   : > { %v1433_v53 = vadd.f32 %v1432_v50, %v1431_v48  ;;  %v1481_v54 = vadd.f32 %v1480_v52, %v1479_v49  ;;  %v1434_v55 = vpop.f32.mrb[2].mxu0  ;;  %v1482_v56 = vpop.f32.mrb[2].mxu1 }
  0xfd   : > { %v1435_v57 = vpop.f32.mrb[3].mxu0  ;;  %v1483_v58 = vpop.f32.mrb[3].mxu1 }
  0xfe   : > { %v883_v59 = vadd.f32 %v1433_v53, %v1784_v51  ;;  %v899_v60 = vadd.f32 %v1481_v54, %v1784_v51  ;;  %v1436_v61 = vadd.f32 %v1435_v57, %v1434_v55  ;;  %v1484_v62 = vadd.f32 %v1483_v58, %v1482_v56 }
 0x100   : > { %v884_v63 = vadd.f32 %v1436_v61, %v1784_v51  ;;  %v900_v0 = vadd.f32 %v1484_v62, %v1784_v51  ;;  %v915_v1 = vmax.f32 %v883_v59, 0.0  ;;  %v931_v2 = vmax.f32 %v899_v60, 0.0 }
 0x102   : > { %v916_v3 = vmax.f32 %v884_v63, 0.0  ;;  %v932_v4 = vmax.f32 %v900_v0, 0.0  ;;  %v1437_v5 = vpop.f32.mrb[4].mxu0  ;;  %v1485_v6 = vpop.f32.mrb[4].mxu1 }
 0x103   : > { %v1438_v7 = vpop.f32.mrb[5].mxu0  ;;  %v1486_v8 = vpop.f32.mrb[5].mxu1 }
 0x104   : > { %v1323_v9 = vpack.c.bf16 %v916_v3, %v915_v1  ;;  %v1363_v10 = vpack.c.bf16 %v932_v4, %v931_v2  ;;  %v1439_v11 = vadd.f32 %v1438_v7, %v1437_v5  ;;  %v1487_v12 = vadd.f32 %v1486_v8, %v1485_v6  ;;  %v1440_v13 = vpop.f32.mrb[6].mxu0  ;;  %v1488_v14 = vpop.f32.mrb[6].mxu1 }
 0x105   : > { %v1441_v15 = vpop.f32.mrb[7].mxu0  ;;  %v1489_v16 = vpop.f32.mrb[7].mxu1 }
 0x106   : > { %1324 = vst [vmem:[%s1794_s8] sm:$0xff] %v1323_v9   ;;  %1407 = vst [vmem:[%s1794_s8 + $0x40] sm:$0xff] %v1363_v10   ;;  %v885_v17 = vadd.f32 %v1439_v11, %v1784_v51  ;;  %v901_v18 = vadd.f32 %v1487_v12, %v1784_v51  ;;  %v1442_v19 = vadd.f32 %v1441_v15, %v1440_v13 }
 0x107   : > { %v1490_v20 = vadd.f32 %v1489_v16, %v1488_v14 }
 0x108   : > { %v886_v21 = vadd.f32 %v1442_v19, %v1784_v51  ;;  %v917_v23 = vmax.f32 %v885_v17, 0.0  ;;  %v933_v24 = vmax.f32 %v901_v18, 0.0 }
 0x109   : > { %v902_v22 = vadd.f32 %v1490_v20, %v1784_v51 }
 0x10a   : > { %v918_v25 = vmax.f32 %v886_v21, 0.0  ;;  %v1443_v27 = vpop.f32.mrb[8].mxu0  ;;  %v1491_v28 = vpop.f32.mrb[8].mxu1 }
 0x10b   : > { %v934_v26 = vmax.f32 %v902_v22, 0.0  ;;  %v1444_v29 = vpop.f32.mrb[9].mxu0  ;;  %v1492_v30 = vpop.f32.mrb[9].mxu1 }
 0x10c   : > { %v1328_v31 = vpack.c.bf16 %v918_v25, %v917_v23  ;;  %v1445_v33 = vadd.f32 %v1444_v29, %v1443_v27  ;;  %v1493_v34 = vadd.f32 %v1492_v30, %v1491_v28  ;;  %v1446_v35 = vpop.f32.mrb[10].mxu0  ;;  %v1494_v36 = vpop.f32.mrb[10].mxu1 }
 0x10d   : > { %v1368_v32 = vpack.c.bf16 %v934_v26, %v933_v24  ;;  %v1447_v37 = vpop.f32.mrb[11].mxu0  ;;  %v1495_v38 = vpop.f32.mrb[11].mxu1 }
 0x10e   : > { %1400 = vst [vmem:[%s1794_s8 + $0x8] sm:$0xff] %v1328_v31   ;;  %v887_v39 = vadd.f32 %v1445_v33, %v1784_v51  ;;  %v903_v40 = vadd.f32 %v1493_v34, %v1784_v51  ;;  %v1448_v41 = vadd.f32 %v1447_v37, %v1446_v35  ;;  %v1496_v42 = vadd.f32 %v1495_v38, %v1494_v36 }
 0x10f   : > { %1408 = vst [vmem:[%s1794_s8 + $0x48] sm:$0xff] %v1368_v32  }
 0x110   : > { %v888_v43 = vadd.f32 %v1448_v41, %v1784_v51  ;;  %v904_v44 = vadd.f32 %v1496_v42, %v1784_v51  ;;  %v919_v45 = vmax.f32 %v887_v39, 0.0  ;;  %v935_v46 = vmax.f32 %v903_v40, 0.0 }
 0x112   : > { %v920_v47 = vmax.f32 %v888_v43, 0.0  ;;  %v936_v48 = vmax.f32 %v904_v44, 0.0  ;;  %v1449_v49 = vpop.f32.mrb[12].mxu0  ;;  %v1497_v50 = vpop.f32.mrb[12].mxu1 }
 0x113   : > { %v1450_v52 = vpop.f32.mrb[13].mxu0  ;;  %v1498_v53 = vpop.f32.mrb[13].mxu1 }
 0x114   : > { %v1333_v54 = vpack.c.bf16 %v920_v47, %v919_v45  ;;  %v1373_v55 = vpack.c.bf16 %v936_v48, %v935_v46  ;;  %v1451_v56 = vadd.f32 %v1450_v52, %v1449_v49  ;;  %v1499_v57 = vadd.f32 %v1498_v53, %v1497_v50  ;;  %v1452_v58 = vpop.f32.mrb[14].mxu0  ;;  %v1500_v59 = vpop.f32.mrb[14].mxu1 }
 0x115   : > { %v1453_v60 = vpop.f32.mrb[15].mxu0  ;;  %v1501_v61 = vpop.f32.mrb[15].mxu1 }
 0x116   : > { %1401 = vst [vmem:[%s1794_s8 + $0x10] sm:$0xff] %v1333_v54   ;;  %1409 = vst [vmem:[%s1794_s8 + $0x50] sm:$0xff] %v1373_v55   ;;  %v889_v62 = vadd.f32 %v1451_v56, %v1784_v51  ;;  %v905_v63 = vadd.f32 %v1499_v57, %v1784_v51  ;;  %v1454_v0 = vadd.f32 %v1453_v60, %v1452_v58 }
 0x117   : > { %v1502_v1 = vadd.f32 %v1501_v61, %v1500_v59 }
 0x118   : > { %v890_v2 = vadd.f32 %v1454_v0, %v1784_v51  ;;  %v921_v4 = vmax.f32 %v889_v62, 0.0  ;;  %v937_v5 = vmax.f32 %v905_v63, 0.0 }
 0x119   : > { %v906_v3 = vadd.f32 %v1502_v1, %v1784_v51 }
 0x11a   : > { %v922_v6 = vmax.f32 %v890_v2, 0.0  ;;  %v1455_v8 = vpop.f32.mrb[16].mxu0  ;;  %v1503_v9 = vpop.f32.mrb[16].mxu1 }
 0x11b   : > { %v938_v7 = vmax.f32 %v906_v3, 0.0  ;;  %v1456_v10 = vpop.f32.mrb[17].mxu0  ;;  %v1504_v11 = vpop.f32.mrb[17].mxu1 }
 0x11c   : > { %v1338_v12 = vpack.c.bf16 %v922_v6, %v921_v4  ;;  %v1457_v14 = vadd.f32 %v1456_v10, %v1455_v8  ;;  %v1505_v15 = vadd.f32 %v1504_v11, %v1503_v9  ;;  %v1458_v16 = vpop.f32.mrb[18].mxu0  ;;  %v1506_v17 = vpop.f32.mrb[18].mxu1 }
 0x11d   : > { %v1378_v13 = vpack.c.bf16 %v938_v7, %v937_v5  ;;  %v1459_v18 = vpop.f32.mrb[19].mxu0  ;;  %v1507_v19 = vpop.f32.mrb[19].mxu1 }
 0x11e   : > { %1402 = vst [vmem:[%s1794_s8 + $0x18] sm:$0xff] %v1338_v12   ;;  %v891_v20 = vadd.f32 %v1457_v14, %v1784_v51  ;;  %v907_v21 = vadd.f32 %v1505_v15, %v1784_v51  ;;  %v1460_v22 = vadd.f32 %v1459_v18, %v1458_v16  ;;  %v1508_v23 = vadd.f32 %v1507_v19, %v1506_v17 }
 0x11f   : > { %1410 = vst [vmem:[%s1794_s8 + $0x58] sm:$0xff] %v1378_v13  }
 0x120   : > { %v892_v24 = vadd.f32 %v1460_v22, %v1784_v51  ;;  %v908_v25 = vadd.f32 %v1508_v23, %v1784_v51  ;;  %v923_v26 = vmax.f32 %v891_v20, 0.0  ;;  %v939_v27 = vmax.f32 %v907_v21, 0.0 }
 0x122   : > { %v924_v28 = vmax.f32 %v892_v24, 0.0  ;;  %v940_v29 = vmax.f32 %v908_v25, 0.0  ;;  %v1461_v30 = vpop.f32.mrb[20].mxu0  ;;  %v1509_v31 = vpop.f32.mrb[20].mxu1 }
 0x123   : > { %v1462_v32 = vpop.f32.mrb[21].mxu0  ;;  %v1510_v33 = vpop.f32.mrb[21].mxu1 }
 0x124   : > { %v1343_v34 = vpack.c.bf16 %v924_v28, %v923_v26  ;;  %v1383_v35 = vpack.c.bf16 %v940_v29, %v939_v27  ;;  %v1463_v36 = vadd.f32 %v1462_v32, %v1461_v30  ;;  %v1511_v37 = vadd.f32 %v1510_v33, %v1509_v31  ;;  %v1464_v38 = vpop.f32.mrb[22].mxu0  ;;  %v1512_v39 = vpop.f32.mrb[22].mxu1 }
 0x125   : > { %v1465_v40 = vpop.f32.mrb[23].mxu0  ;;  %v1513_v41 = vpop.f32.mrb[23].mxu1 }
 0x126   : > { %1403 = vst [vmem:[%s1794_s8 + $0x20] sm:$0xff] %v1343_v34   ;;  %1411 = vst [vmem:[%s1794_s8 + $0x60] sm:$0xff] %v1383_v35   ;;  %v893_v42 = vadd.f32 %v1463_v36, %v1784_v51  ;;  %v909_v43 = vadd.f32 %v1511_v37, %v1784_v51  ;;  %v1466_v44 = vadd.f32 %v1465_v40, %v1464_v38 }
 0x127   : > { %v1514_v45 = vadd.f32 %v1513_v41, %v1512_v39 }
 0x128   : > { %v894_v46 = vadd.f32 %v1466_v44, %v1784_v51  ;;  %v925_v48 = vmax.f32 %v893_v42, 0.0  ;;  %v941_v49 = vmax.f32 %v909_v43, 0.0 }
 0x129   : > { %v910_v47 = vadd.f32 %v1514_v45, %v1784_v51 }
 0x12a   : > { %v926_v50 = vmax.f32 %v894_v46, 0.0  ;;  %v1467_v53 = vpop.f32.mrb[24].mxu0  ;;  %v1515_v54 = vpop.f32.mrb[24].mxu1 }
 0x12b   : > { %v942_v52 = vmax.f32 %v910_v47, 0.0  ;;  %v1468_v55 = vpop.f32.mrb[25].mxu0  ;;  %v1516_v56 = vpop.f32.mrb[25].mxu1 }
 0x12c   : > { %v1348_v57 = vpack.c.bf16 %v926_v50, %v925_v48  ;;  %v1469_v59 = vadd.f32 %v1468_v55, %v1467_v53  ;;  %v1517_v60 = vadd.f32 %v1516_v56, %v1515_v54  ;;  %v1470_v61 = vpop.f32.mrb[26].mxu0  ;;  %v1518_v62 = vpop.f32.mrb[26].mxu1 }
 0x12d   : > { %v1388_v58 = vpack.c.bf16 %v942_v52, %v941_v49  ;;  %v1471_v63 = vpop.f32.mrb[27].mxu0  ;;  %v1519_v0 = vpop.f32.mrb[27].mxu1 }
 0x12e   : > { %1404 = vst [vmem:[%s1794_s8 + $0x28] sm:$0xff] %v1348_v57   ;;  %v895_v1 = vadd.f32 %v1469_v59, %v1784_v51  ;;  %v911_v2 = vadd.f32 %v1517_v60, %v1784_v51  ;;  %v1472_v3 = vadd.f32 %v1471_v63, %v1470_v61  ;;  %v1520_v4 = vadd.f32 %v1519_v0, %v1518_v62 }
 0x12f   : > { %1412 = vst [vmem:[%s1794_s8 + $0x68] sm:$0xff] %v1388_v58  }
 0x130   : > { %v896_v5 = vadd.f32 %v1472_v3, %v1784_v51  ;;  %v912_v6 = vadd.f32 %v1520_v4, %v1784_v51  ;;  %v927_v7 = vmax.f32 %v895_v1, 0.0  ;;  %v943_v8 = vmax.f32 %v911_v2, 0.0 }
 0x132   : > { %v928_v9 = vmax.f32 %v896_v5, 0.0  ;;  %v944_v10 = vmax.f32 %v912_v6, 0.0  ;;  %v1473_v11 = vpop.f32.mrb[28].mxu0  ;;  %v1521_v12 = vpop.f32.mrb[28].mxu1 }
 0x133   : > { %v1474_v13 = vpop.f32.mrb[29].mxu0  ;;  %v1522_v14 = vpop.f32.mrb[29].mxu1 }
 0x134   : > { %v1353_v15 = vpack.c.bf16 %v928_v9, %v927_v7  ;;  %v1393_v16 = vpack.c.bf16 %v944_v10, %v943_v8  ;;  %v1475_v17 = vadd.f32 %v1474_v13, %v1473_v11  ;;  %v1523_v18 = vadd.f32 %v1522_v14, %v1521_v12  ;;  %v1476_v19 = vpop.f32.mrb[30].mxu0  ;;  %v1524_v20 = vpop.f32.mrb[30].mxu1 }
 0x135   : > { %v1477_v21 = vpop.f32.mrb[31].mxu0  ;;  %v1525_v22 = vpop.f32.mrb[31].mxu1 }
 0x136   : > { %1405 = vst [vmem:[%s1794_s8 + $0x30] sm:$0xff] %v1353_v15   ;;  %1413 = vst [vmem:[%s1794_s8 + $0x70] sm:$0xff] %v1393_v16   ;;  %v897_v23 = vadd.f32 %v1475_v17, %v1784_v51  ;;  %v913_v24 = vadd.f32 %v1523_v18, %v1784_v51  ;;  %v1478_v25 = vadd.f32 %v1477_v21, %v1476_v19 }
 0x137   : > { %v1526_v26 = vadd.f32 %v1525_v22, %v1524_v20 }
 0x138   : > { %v898_v27 = vadd.f32 %v1478_v25, %v1784_v51  ;;  %v929_v29 = vmax.f32 %v897_v23, 0.0  ;;  %v945_v30 = vmax.f32 %v913_v24, 0.0 }
 0x139   : > { %v914_v28 = vadd.f32 %v1526_v26, %v1784_v51 }
 0x13a   : > { %v930_v31 = vmax.f32 %v898_v27, 0.0 }
 0x13b   : > { %v946_v32 = vmax.f32 %v914_v28, 0.0 }
 0x13c   : > { %v1358_v33 = vpack.c.bf16 %v930_v31, %v929_v29 }
 0x13d   : > { %v1398_v34 = vpack.c.bf16 %v946_v32, %v945_v30 }
 0x13e   : > { %1406 = vst [vmem:[%s1794_s8 + $0x38] sm:$0xff] %v1358_v33  }
 0x13f   : > { %1414 = vst [vmem:[%s1794_s8 + $0x78] sm:$0xff] %v1398_v34  }
 0x140 PF: > { %s13_s14 = sadd.s32 1, %s1653_s14   ;;  %s1853_s12 = smov %s1649_s13 }
 0x141   : > { %p10_p5 = scmp.ge.s32.totalorder %s13_s14, 4   ;;  %s1854_s13 = smov %s1856_s15 }
 0x143   :  { %12 = sbr.rel (!%p10_p5) target bundleno = 2 (0x2), region = 73 }

// kernel: resnet4channel_forward.40
= control target key start
LH: loop header
LB: loop body
LE: loop exit
PB: predicated region body
PF: predicated region fallthrough
CT: control target
= control target key end

     0   :  { %vm304_vm0 = vcmask 519168   ;;  %s871_s0 = inlined_call_operand.vmem [shape: bf16[128,64], index: 0, kind: input, shape index: {}]   ;;  %s872_s1 = inlined_call_operand.vmem [shape: bf16[128,64], index: 1, kind: input, shape index: {}]   ;;  %s873_s2 = inlined_call_operand.vmem [shape: bf16[128,64], index: 2, kind: input, shape index: {}]   ;;  %s874_s3 = inlined_call_operand.vmem [shape: bf16[128,64], index: 3, kind: input, shape index: {}]   ;;  %s875_s4 = inlined_call_operand.vmem [shape: bf16[128,64], index: 4, kind: input, shape index: {}]   ;;  %s876_s5 = inlined_call_operand.vmem [shape: bf16[128,64], index: 5, kind: input, shape index: {}]   ;;  %s877_s6 = inlined_call_operand.vmem [shape: bf16[128,64], index: 6, kind: input, shape index: {}]   ;;  %s878_s7 = inlined_call_operand.vmem [shape: bf16[128,64], index: 7, kind: input, shape index: {}]   ;;  %s879_s8 = inlined_call_operand.vmem [shape: bf16[128,64], index: 8, kind: input, shape index: {}]   ;;  %s880_s9 = inlined_call_operand.vmem [shape: bf16[128,64], index: 9, kind: output, shape index: {}]  }
   0x1   :  { %v32_v0 = vld [vmem:[%s871_s0] sm:$0xf]  ;;  %v33_v6 = vld [vmem:[%s871_s0 + $0x4] sm:$0xf]  ;;  %v34_v15 = vld [vmem:[%s871_s0 + $0x8] sm:$0xf] }
   0x2   :  { %v48_v1 = vld [vmem:[%s872_s1] sm:$0xf]  ;;  %v49_v7 = vld [vmem:[%s872_s1 + $0x4] sm:$0xf]  ;;  %v50_v16 = vld [vmem:[%s872_s1 + $0x8] sm:$0xf] }
   0x3   :  { %v80_v2 = vld [vmem:[%s873_s2] sm:$0xf]  ;;  %v64_v3 = vmax.bf16 %v48_v1, %v32_v0  ;;  %v81_v8 = vld [vmem:[%s873_s2 + $0x4] sm:$0xf]  ;;  %v65_v10 = vmax.bf16 %v49_v7, %v33_v6  ;;  %v82_v17 = vld [vmem:[%s873_s2 + $0x8] sm:$0xf]  ;;  %v66_v20 = vmax.bf16 %v50_v16, %v34_v15 }
   0x4   :  { %v112_v4 = vld [vmem:[%s874_s3] sm:$0xf]  ;;  %v113_v13 = vld [vmem:[%s874_s3 + $0x4] sm:$0xf]  ;;  %v114_v24 = vld [vmem:[%s874_s3 + $0x8] sm:$0xf] }
   0x5   :  { %v96_v5 = vmax.bf16 %v80_v2, %v64_v3  ;;  %v144_v9 = vld [vmem:[%s875_s4] sm:$0xf]  ;;  %v97_v14 = vmax.bf16 %v81_v8, %v65_v10  ;;  %v145_v19 = vld [vmem:[%s875_s4 + $0x4] sm:$0xf]  ;;  %v98_v26 = vmax.bf16 %v82_v17, %v66_v20  ;;  %v35_v27 = vld [vmem:[%s871_s0 + $0xc] sm:$0xf] }
   0x6   :  { %v176_v12 = vld [vmem:[%s876_s5] sm:$0xf]  ;;  %v177_v23 = vld [vmem:[%s876_s5 + $0x4] sm:$0xf]  ;;  %v51_v28 = vld [vmem:[%s872_s1 + $0xc] sm:$0xf] }
   0x7   :  { %v128_v11 = vmax.bf16 %v112_v4, %v96_v5  ;;  %v208_v21 = vld [vmem:[%s877_s6] sm:$0xf]  ;;  %v129_v22 = vmax.bf16 %v113_v13, %v97_v14  ;;  %v83_v29 = vld [vmem:[%s873_s2 + $0xc] sm:$0xf]  ;;  %v146_v33 = vld [vmem:[%s875_s4 + $0x8] sm:$0xf]  ;;  %v67_v34 = vmax.bf16 %v51_v28, %v35_v27  ;;  %v130_v37 = vmax.bf16 %v114_v24, %v98_v26 }
   0x8   :  { %v240_v30 = vld [vmem:[%s878_s7] sm:$0xf]  ;;  %v209_v36 = vld [vmem:[%s877_s6 + $0x4] sm:$0xf]  ;;  %v178_v38 = vld [vmem:[%s876_s5 + $0x8] sm:$0xf] }
   0x9   :  { %v160_v18 = vmax.bf16 %v144_v9, %v128_v11  ;;  %v272_v31 = vld [vmem:[%s879_s8] sm:$0xf]  ;;  %v161_v32 = vmax.bf16 %v145_v19, %v129_v22  ;;  %v115_v39 = vld [vmem:[%s874_s3 + $0xc] sm:$0xf]  ;;  %v99_v41 = vmax.bf16 %v83_v29, %v67_v34  ;;  %v36_v42 = vld [vmem:[%s871_s0 + $0x10] sm:$0xf]  ;;  %v162_v48 = vmax.bf16 %v146_v33, %v130_v37 }
   0xa   :  { %v52_v43 = vld [vmem:[%s872_s1 + $0x10] sm:$0xf]  ;;  %v241_v46 = vld [vmem:[%s878_s7 + $0x4] sm:$0xf]  ;;  %v147_v49 = vld [vmem:[%s875_s4 + $0xc] sm:$0xf] }
   0xb   :  { %v192_v25 = vmax.bf16 %v176_v12, %v160_v18  ;;  %v193_v40 = vmax.bf16 %v177_v23, %v161_v32  ;;  %v84_v44 = vld [vmem:[%s873_s2 + $0x10] sm:$0xf]  ;;  %v273_v47 = vld [vmem:[%s879_s8 + $0x4] sm:$0xf]  ;;  %v68_v50 = vmax.bf16 %v52_v43, %v36_v42  ;;  %v210_v52 = vld [vmem:[%s877_s6 + $0x8] sm:$0xf]  ;;  %v131_v53 = vmax.bf16 %v115_v39, %v99_v41 }
   0xc   :  { %v179_v54 = vld [vmem:[%s876_s5 + $0xc] sm:$0xf]  ;;  %v116_v55 = vld [vmem:[%s874_s3 + $0x10] sm:$0xf]  ;;  %v194_v57 = vmax.bf16 %v178_v38, %v162_v48  ;;  %v37_v59 = vld [vmem:[%s871_s0 + $0x14] sm:$0xf] }
   0xd   :  { %v224_v35 = vmax.bf16 %v208_v21, %v192_v25  ;;  %v225_v51 = vmax.bf16 %v209_v36, %v193_v40  ;;  %v100_v58 = vmax.bf16 %v84_v44, %v68_v50  ;;  %v53_v60 = vld [vmem:[%s872_s1 + $0x14] sm:$0xf]  ;;  %v242_v63 = vld [vmem:[%s878_s7 + $0x8] sm:$0xf]  ;;  %v163_v1 = vmax.bf16 %v147_v49, %v131_v53  ;;  %v148_v2 = vld [vmem:[%s875_s4 + $0x10] sm:$0xf] }
   0xe   :  { %v85_v61 = vld [vmem:[%s873_s2 + $0x14] sm:$0xf]  ;;  %v274_v0 = vld [vmem:[%s879_s8 + $0x8] sm:$0xf]  ;;  %v69_v3 = vmax.bf16 %v53_v60, %v37_v59  ;;  %v226_v4 = vmax.bf16 %v210_v52, %v194_v57  ;;  %v211_v5 = vld [vmem:[%s877_s6 + $0xc] sm:$0xf] }
   0xf   :  { %v256_v45 = vmax.bf16 %v240_v30, %v224_v35  ;;  %v257_v62 = vmax.bf16 %v241_v46, %v225_v51  ;;  %v132_v6 = vmax.bf16 %v116_v55, %v100_v58  ;;  %v180_v7 = vld [vmem:[%s876_s5 + $0x10] sm:$0xf]  ;;  %v117_v8 = vld [vmem:[%s874_s3 + $0x14] sm:$0xf]  ;;  %v195_v10 = vmax.bf16 %v179_v54, %v163_v1  ;;  %v38_v12 = vld [vmem:[%s871_s0 + $0x18] sm:$0xf] }
  0x10   :  { %v101_v11 = vmax.bf16 %v85_v61, %v69_v3  ;;  %v54_v13 = vld [vmem:[%s872_s1 + $0x18] sm:$0xf]  ;;  %v258_v15 = vmax.bf16 %v242_v63, %v226_v4  ;;  %v243_v16 = vld [vmem:[%s878_s7 + $0xc] sm:$0xf]  ;;  %v149_v19 = vld [vmem:[%s875_s4 + $0x14] sm:$0xf] }
  0x11   :  { %v288_v56 = vmax.bf16 %v272_v31, %v256_v45  ;;  %v289_v9 = vmax.bf16 %v273_v47, %v257_v62  ;;  %v86_v14 = vld [vmem:[%s873_s2 + $0x18] sm:$0xf]  ;;  %v275_v17 = vld [vmem:[%s879_s8 + $0xc] sm:$0xf]  ;;  %v164_v18 = vmax.bf16 %v148_v2, %v132_v6  ;;  %v70_v20 = vmax.bf16 %v54_v13, %v38_v12  ;;  %v212_v22 = vld [vmem:[%s877_s6 + $0x10] sm:$0xf] }
  0x12   :  { %v227_v21 = vmax.bf16 %v211_v5, %v195_v10  ;;  %v133_v23 = vmax.bf16 %v117_v8, %v101_v11  ;;  %v181_v24 = vld [vmem:[%s876_s5 + $0x14] sm:$0xf]  ;;  %v118_v25 = vld [vmem:[%s874_s3 + $0x18] sm:$0xf]  ;;  %v290_v26 = vmax.bf16 %v274_v0, %v258_v15  ;;  %v39_v29 = vld [vmem:[%s871_s0 + $0x1c] sm:$0xf] }
  0x13   :  { %305 = vst.msk [vmem:[%s880_s9] sm:$0xf] %vm304_vm0, %v288_v56  ;;  %306 = vst.msk [vmem:[%s880_s9 + $0x4] sm:$0xf] %vm304_vm0, %v289_v9  ;;  %v196_v27 = vmax.bf16 %v180_v7, %v164_v18  ;;  %v102_v28 = vmax.bf16 %v86_v14, %v70_v20  ;;  %v55_v30 = vld [vmem:[%s872_s1 + $0x1c] sm:$0xf] }
  0x14   :  { %v87_v31 = vld [vmem:[%s873_s2 + $0x1c] sm:$0xf]  ;;  %v259_v32 = vmax.bf16 %v243_v16, %v227_v21  ;;  %v244_v33 = vld [vmem:[%s878_s7 + $0x10] sm:$0xf]  ;;  %v165_v35 = vmax.bf16 %v149_v19, %v133_v23  ;;  %v150_v36 = vld [vmem:[%s875_s4 + $0x18] sm:$0xf]  ;;  %v71_v37 = vmax.bf16 %v55_v30, %v39_v29 }
  0x15   :  { %v276_v34 = vld [vmem:[%s879_s8 + $0x10] sm:$0xf]  ;;  %307 = vst.msk [vmem:[%s880_s9 + $0x8] sm:$0xf] %vm304_vm0, %v290_v26  ;;  %v228_v38 = vmax.bf16 %v212_v22, %v196_v27  ;;  %v213_v39 = vld [vmem:[%s877_s6 + $0x14] sm:$0xf]  ;;  %v134_v40 = vmax.bf16 %v118_v25, %v102_v28 }
  0x16   :  { %v182_v41 = vld [vmem:[%s876_s5 + $0x18] sm:$0xf]  ;;  %v119_v42 = vld [vmem:[%s874_s3 + $0x1c] sm:$0xf]  ;;  %v291_v43 = vmax.bf16 %v275_v17, %v259_v32  ;;  %v197_v44 = vmax.bf16 %v181_v24, %v165_v35  ;;  %v103_v45 = vmax.bf16 %v87_v31, %v71_v37  ;;  %v40_v46 = vld [vmem:[%s871_s0 + $0x20] sm:$0xf] }
  0x17   :  { %v56_v47 = vld [vmem:[%s872_s1 + $0x20] sm:$0xf]  ;;  %v260_v49 = vmax.bf16 %v244_v33, %v228_v38  ;;  %v245_v50 = vld [vmem:[%s878_s7 + $0x14] sm:$0xf]  ;;  %v166_v52 = vmax.bf16 %v150_v36, %v134_v40  ;;  %v151_v53 = vld [vmem:[%s875_s4 + $0x1c] sm:$0xf] }
  0x18   :  { %v88_v48 = vld [vmem:[%s873_s2 + $0x20] sm:$0xf]  ;;  %v277_v51 = vld [vmem:[%s879_s8 + $0x14] sm:$0xf]  ;;  %v72_v54 = vmax.bf16 %v56_v47, %v40_v46  ;;  %308 = vst.msk [vmem:[%s880_s9 + $0xc] sm:$0xf] %vm304_vm0, %v291_v43  ;;  %v229_v55 = vmax.bf16 %v213_v39, %v197_v44  ;;  %v135_v57 = vmax.bf16 %v119_v42, %v103_v45 }
  0x19   :  { %v214_v56 = vld [vmem:[%s877_s6 + $0x18] sm:$0xf]  ;;  %v183_v58 = vld [vmem:[%s876_s5 + $0x1c] sm:$0xf]  ;;  %v120_v59 = vld [vmem:[%s874_s3 + $0x20] sm:$0xf]  ;;  %v292_v60 = vmax.bf16 %v276_v34, %v260_v49  ;;  %v198_v61 = vmax.bf16 %v182_v41, %v166_v52 }
  0x1a   :  { %v104_v62 = vmax.bf16 %v88_v48, %v72_v54  ;;  %v41_v63 = vld [vmem:[%s871_s0 + $0x24] sm:$0xf]  ;;  %v261_v2 = vmax.bf16 %v245_v50, %v229_v55  ;;  %v246_v3 = vld [vmem:[%s878_s7 + $0x18] sm:$0xf]  ;;  %v167_v5 = vmax.bf16 %v151_v53, %v135_v57  ;;  %v152_v6 = vld [vmem:[%s875_s4 + $0x20] sm:$0xf] }
  0x1b   :  { %v57_v0 = vld [vmem:[%s872_s1 + $0x24] sm:$0xf]  ;;  %v278_v4 = vld [vmem:[%s879_s8 + $0x18] sm:$0xf]  ;;  %309 = vst.msk [vmem:[%s880_s9 + $0x10] sm:$0xf] %vm304_vm0, %v292_v60  ;;  %v230_v8 = vmax.bf16 %v214_v56, %v198_v61 }
  0x1c   :  { %v89_v1 = vld [vmem:[%s873_s2 + $0x24] sm:$0xf]  ;;  %v73_v7 = vmax.bf16 %v57_v0, %v41_v63  ;;  %v215_v9 = vld [vmem:[%s877_s6 + $0x1c] sm:$0xf]  ;;  %v136_v10 = vmax.bf16 %v120_v59, %v104_v62  ;;  %v184_v11 = vld [vmem:[%s876_s5 + $0x20] sm:$0xf]  ;;  %v293_v13 = vmax.bf16 %v277_v51, %v261_v2  ;;  %v199_v14 = vmax.bf16 %v183_v58, %v167_v5 }
  0x1d   :  { %v121_v12 = vld [vmem:[%s874_s3 + $0x24] sm:$0xf]  ;;  %v42_v16 = vld [vmem:[%s871_s0 + $0x28] sm:$0xf]  ;;  %v262_v19 = vmax.bf16 %v246_v3, %v230_v8  ;;  %v247_v20 = vld [vmem:[%s878_s7 + $0x1c] sm:$0xf] }
  0x1e   :  { %v105_v15 = vmax.bf16 %v89_v1, %v73_v7  ;;  %v58_v17 = vld [vmem:[%s872_s1 + $0x28] sm:$0xf]  ;;  %v279_v21 = vld [vmem:[%s879_s8 + $0x1c] sm:$0xf]  ;;  %v168_v22 = vmax.bf16 %v152_v6, %v136_v10  ;;  %v153_v23 = vld [vmem:[%s875_s4 + $0x24] sm:$0xf]  ;;  %v231_v25 = vmax.bf16 %v215_v9, %v199_v14 }
  0x1f   :  { %v90_v18 = vld [vmem:[%s873_s2 + $0x28] sm:$0xf]  ;;  %v74_v24 = vmax.bf16 %v58_v17, %v42_v16  ;;  %310 = vst.msk [vmem:[%s880_s9 + $0x14] sm:$0xf] %vm304_vm0, %v293_v13  ;;  %v216_v26 = vld [vmem:[%s877_s6 + $0x20] sm:$0xf]  ;;  %v294_v30 = vmax.bf16 %v278_v4, %v262_v19 }
  0x20   :  { %v137_v27 = vmax.bf16 %v121_v12, %v105_v15  ;;  %v185_v28 = vld [vmem:[%s876_s5 + $0x24] sm:$0xf]  ;;  %v122_v29 = vld [vmem:[%s874_s3 + $0x28] sm:$0xf]  ;;  %v200_v31 = vmax.bf16 %v184_v11, %v168_v22  ;;  %v43_v33 = vld [vmem:[%s871_s0 + $0x2c] sm:$0xf]  ;;  %v263_v36 = vmax.bf16 %v247_v20, %v231_v25 }
  0x21   :  { %v106_v32 = vmax.bf16 %v90_v18, %v74_v24  ;;  %v59_v34 = vld [vmem:[%s872_s1 + $0x2c] sm:$0xf]  ;;  %v248_v37 = vld [vmem:[%s878_s7 + $0x20] sm:$0xf]  ;;  %v154_v40 = vld [vmem:[%s875_s4 + $0x28] sm:$0xf] }
  0x22   :  { %v91_v35 = vld [vmem:[%s873_s2 + $0x2c] sm:$0xf]  ;;  %v280_v38 = vld [vmem:[%s879_s8 + $0x20] sm:$0xf]  ;;  %v169_v39 = vmax.bf16 %v153_v23, %v137_v27  ;;  %v75_v41 = vmax.bf16 %v59_v34, %v43_v33  ;;  %311 = vst.msk [vmem:[%s880_s9 + $0x18] sm:$0xf] %vm304_vm0, %v294_v30  ;;  %v232_v42 = vmax.bf16 %v216_v26, %v200_v31  ;;  %v295_v47 = vmax.bf16 %v279_v21, %v263_v36 }
  0x23   :  { %v217_v43 = vld [vmem:[%s877_s6 + $0x24] sm:$0xf]  ;;  %v138_v44 = vmax.bf16 %v122_v29, %v106_v32  ;;  %v186_v45 = vld [vmem:[%s876_s5 + $0x28] sm:$0xf]  ;;  %v123_v46 = vld [vmem:[%s874_s3 + $0x2c] sm:$0xf] }
  0x24   :  { %v201_v48 = vmax.bf16 %v185_v28, %v169_v39  ;;  %v107_v49 = vmax.bf16 %v91_v35, %v75_v41  ;;  %v44_v50 = vld [vmem:[%s871_s0 + $0x30] sm:$0xf]  ;;  %v264_v53 = vmax.bf16 %v248_v37, %v232_v42  ;;  %v249_v54 = vld [vmem:[%s878_s7 + $0x24] sm:$0xf]  ;;  %v155_v57 = vld [vmem:[%s875_s4 + $0x2c] sm:$0xf] }
  0x25   :  { %v60_v51 = vld [vmem:[%s872_s1 + $0x30] sm:$0xf]  ;;  %v281_v55 = vld [vmem:[%s879_s8 + $0x24] sm:$0xf]  ;;  %v170_v56 = vmax.bf16 %v154_v40, %v138_v44  ;;  %312 = vst.msk [vmem:[%s880_s9 + $0x1c] sm:$0xf] %vm304_vm0, %v295_v47 }
  0x26   :  { %v92_v52 = vld [vmem:[%s873_s2 + $0x30] sm:$0xf]  ;;  %v76_v58 = vmax.bf16 %v60_v51, %v44_v50  ;;  %v233_v59 = vmax.bf16 %v217_v43, %v201_v48  ;;  %v218_v60 = vld [vmem:[%s877_s6 + $0x28] sm:$0xf]  ;;  %v139_v61 = vmax.bf16 %v123_v46, %v107_v49  ;;  %v187_v62 = vld [vmem:[%s876_s5 + $0x2c] sm:$0xf]  ;;  %v296_v0 = vmax.bf16 %v280_v38, %v264_v53 }
  0x27   :  { %v124_v63 = vld [vmem:[%s874_s3 + $0x30] sm:$0xf]  ;;  %v202_v1 = vmax.bf16 %v186_v45, %v170_v56  ;;  %v45_v3 = vld [vmem:[%s871_s0 + $0x34] sm:$0xf]  ;;  %v250_v7 = vld [vmem:[%s878_s7 + $0x28] sm:$0xf] }
  0x28   :  { %v108_v2 = vmax.bf16 %v92_v52, %v76_v58  ;;  %v61_v4 = vld [vmem:[%s872_s1 + $0x34] sm:$0xf]  ;;  %v265_v6 = vmax.bf16 %v249_v54, %v233_v59  ;;  %v282_v8 = vld [vmem:[%s879_s8 + $0x28] sm:$0xf]  ;;  %v171_v9 = vmax.bf16 %v155_v57, %v139_v61  ;;  %v156_v10 = vld [vmem:[%s875_s4 + $0x30] sm:$0xf] }
  0x29   :  { %v93_v5 = vld [vmem:[%s873_s2 + $0x34] sm:$0xf]  ;;  %v77_v11 = vmax.bf16 %v61_v4, %v45_v3  ;;  %313 = vst.msk [vmem:[%s880_s9 + $0x20] sm:$0xf] %vm304_vm0, %v296_v0  ;;  %v234_v12 = vmax.bf16 %v218_v60, %v202_v1  ;;  %v219_v13 = vld [vmem:[%s877_s6 + $0x2c] sm:$0xf] }
  0x2a   :  { %v140_v14 = vmax.bf16 %v124_v63, %v108_v2  ;;  %v188_v15 = vld [vmem:[%s876_s5 + $0x30] sm:$0xf]  ;;  %v125_v16 = vld [vmem:[%s874_s3 + $0x34] sm:$0xf]  ;;  %v297_v17 = vmax.bf16 %v281_v55, %v265_v6  ;;  %v203_v18 = vmax.bf16 %v187_v62, %v171_v9  ;;  %v46_v20 = vld [vmem:[%s871_s0 + $0x38] sm:$0xf] }
  0x2b   :  { %v109_v19 = vmax.bf16 %v93_v5, %v77_v11  ;;  %v62_v21 = vld [vmem:[%s872_s1 + $0x38] sm:$0xf]  ;;  %v266_v23 = vmax.bf16 %v250_v7, %v234_v12  ;;  %v251_v24 = vld [vmem:[%s878_s7 + $0x2c] sm:$0xf]  ;;  %v157_v27 = vld [vmem:[%s875_s4 + $0x34] sm:$0xf] }
  0x2c   :  { %v94_v22 = vld [vmem:[%s873_s2 + $0x38] sm:$0xf]  ;;  %v283_v25 = vld [vmem:[%s879_s8 + $0x2c] sm:$0xf]  ;;  %v172_v26 = vmax.bf16 %v156_v10, %v140_v14  ;;  %v78_v28 = vmax.bf16 %v62_v21, %v46_v20  ;;  %314 = vst.msk [vmem:[%s880_s9 + $0x24] sm:$0xf] %vm304_vm0, %v297_v17  ;;  %v235_v29 = vmax.bf16 %v219_v13, %v203_v18 }
  0x2d   :  { %v220_v30 = vld [vmem:[%s877_s6 + $0x30] sm:$0xf]  ;;  %v141_v31 = vmax.bf16 %v125_v16, %v109_v19  ;;  %v189_v32 = vld [vmem:[%s876_s5 + $0x34] sm:$0xf]  ;;  %v126_v33 = vld [vmem:[%s874_s3 + $0x38] sm:$0xf]  ;;  %v298_v34 = vmax.bf16 %v282_v8, %v266_v23 }
  0x2e   :  { %v204_v35 = vmax.bf16 %v188_v15, %v172_v26  ;;  %v110_v36 = vmax.bf16 %v94_v22, %v78_v28  ;;  %v47_v37 = vld [vmem:[%s871_s0 + $0x3c] sm:$0xf]  ;;  %v267_v40 = vmax.bf16 %v251_v24, %v235_v29  ;;  %v252_v41 = vld [vmem:[%s878_s7 + $0x30] sm:$0xf]  ;;  %v158_v43 = vld [vmem:[%s875_s4 + $0x38] sm:$0xf] }
  0x2f   :  { %v63_v38 = vld [vmem:[%s872_s1 + $0x3c] sm:$0xf]  ;;  %v173_v42 = vmax.bf16 %v157_v27, %v141_v31  ;;  %315 = vst.msk [vmem:[%s880_s9 + $0x28] sm:$0xf] %vm304_vm0, %v298_v34  ;;  %v221_v46 = vld [vmem:[%s877_s6 + $0x34] sm:$0xf] }
  0x30   :  { %v95_v39 = vld [vmem:[%s873_s2 + $0x3c] sm:$0xf]  ;;  %v79_v44 = vmax.bf16 %v63_v38, %v47_v37  ;;  %v236_v45 = vmax.bf16 %v220_v30, %v204_v35  ;;  %v142_v47 = vmax.bf16 %v126_v33, %v110_v36  ;;  %v299_v49 = vmax.bf16 %v283_v25, %v267_v40  ;;  %v284_v50 = vld [vmem:[%s879_s8 + $0x30] sm:$0xf]  ;;  %v190_v52 = vld [vmem:[%s876_s5 + $0x38] sm:$0xf] }
  0x31   :  { %v127_v48 = vld [vmem:[%s874_s3 + $0x3c] sm:$0xf]  ;;  %v205_v51 = vmax.bf16 %v189_v32, %v173_v42  ;;  %v253_v55 = vld [vmem:[%s878_s7 + $0x34] sm:$0xf]  ;;  %v222_v59 = vld [vmem:[%s877_s6 + $0x38] sm:$0xf] }
  0x32   :  { %v111_v53 = vmax.bf16 %v95_v39, %v79_v44  ;;  %v268_v54 = vmax.bf16 %v252_v41, %v236_v45  ;;  %v174_v56 = vmax.bf16 %v158_v43, %v142_v47  ;;  %v159_v57 = vld [vmem:[%s875_s4 + $0x3c] sm:$0xf]  ;;  %316 = vst.msk [vmem:[%s880_s9 + $0x2c] sm:$0xf] %vm304_vm0, %v299_v49  ;;  %v285_v62 = vld [vmem:[%s879_s8 + $0x34] sm:$0xf] }
  0x33   :  { %v237_v58 = vmax.bf16 %v221_v46, %v205_v51  ;;  %v191_v0 = vld [vmem:[%s876_s5 + $0x3c] sm:$0xf]  ;;  %v254_v2 = vld [vmem:[%s878_s7 + $0x38] sm:$0xf] }
  0x34   :  { %v143_v60 = vmax.bf16 %v127_v48, %v111_v53  ;;  %v300_v61 = vmax.bf16 %v284_v50, %v268_v54  ;;  %v206_v63 = vmax.bf16 %v190_v52, %v174_v56  ;;  %v223_v5 = vld [vmem:[%s877_s6 + $0x3c] sm:$0xf]  ;;  %v286_v7 = vld [vmem:[%s879_s8 + $0x38] sm:$0xf] }
  0x35   :  { %v269_v1 = vmax.bf16 %v253_v55, %v237_v58  ;;  %v255_v10 = vld [vmem:[%s878_s7 + $0x3c] sm:$0xf] }
  0x36   :  { %v175_v3 = vmax.bf16 %v159_v57, %v143_v60  ;;  %317 = vst.msk [vmem:[%s880_s9 + $0x30] sm:$0xf] %vm304_vm0, %v300_v61  ;;  %v238_v4 = vmax.bf16 %v222_v59, %v206_v63  ;;  %v287_v13 = vld [vmem:[%s879_s8 + $0x3c] sm:$0xf] }
  0x37   :  { %v301_v6 = vmax.bf16 %v285_v62, %v269_v1 }
  0x38   :  { %v207_v8 = vmax.bf16 %v191_v0, %v175_v3  ;;  %v270_v9 = vmax.bf16 %v254_v2, %v238_v4 }
  0x39   :  { %318 = vst.msk [vmem:[%s880_s9 + $0x34] sm:$0xf] %vm304_vm0, %v301_v6 }
  0x3a   :  { %v239_v11 = vmax.bf16 %v223_v5, %v207_v8  ;;  %v302_v12 = vmax.bf16 %v286_v7, %v270_v9 }
  0x3c   :  { %v271_v14 = vmax.bf16 %v255_v10, %v239_v11  ;;  %319 = vst.msk [vmem:[%s880_s9 + $0x38] sm:$0xf] %vm304_vm0, %v302_v12 }
  0x3e   :  { %v303_v15 = vmax.bf16 %v287_v13, %v271_v14 }
  0x40   :  { %320 = vst.msk [vmem:[%s880_s9 + $0x3c] sm:$0xf] %vm304_vm0, %v303_v15 }

// kernel: resnet4channel_forward.41
= control target key start
LH: loop header
LB: loop body
LE: loop exit
PB: predicated region body
PF: predicated region fallthrough
CT: control target
= control target key end

     0   :  { %s1121_s12 = smov 0   ;;  %s1123_s13 = smov 0   ;;  %s1253_s0 = inlined_call_operand.vmem [shape: bf16[128,640], index: 0, kind: input, shape index: {}]   ;;  %s1254_s1 = inlined_call_operand.vmem [shape: bf16[640,128], index: 1, kind: input, shape index: {}]   ;;  %s1255_s2 = inlined_call_operand.vmem [shape: f32[1,128], index: 2, kind: input, shape index: {}]   ;;  %s1256_s3 = inlined_call_operand.vmem [shape: bf16[128,128], index: 3, kind: output, shape index: {}]  }
   0x1   :  { %s1125_s14 = smov 0   ;;  %s1127_s15 = smov 0  }
   0x2   :  { %s1129_s16 = smov 0  }
   0x3 LB: > { %s22_s17 = sadd.s32 1, %s1094_s15  ;;  %p41_p1 = scmp.ne.s32.totalorder %s1086_s13, %s1082_s12  ;;  %s1098_s16 = sphi %s1129_s16, %s13_s16   ;;  %s1094_s15 = sphi %s1127_s15, %s1260_s15   ;;  %s1090_s14 = sphi %s1125_s14, %s1259_s14   ;;  %s1086_s13 = sphi %s1123_s13, %s1258_s13   ;;  %s1082_s12 = sphi %s1121_s12, %s1257_s12  }
   0x4   : > { %p23_p0 = scmp.ge.s32.totalorder %s22_s17, 5  ;;  %p42_p2 = scmp.eq.s32.totalorder %s1098_s16, 0 }
   0x5   : > { %s34_s19 = sadd.s32 1, %s1086_s13  ;;  %p830_p5 = scmp.ge.s32.totalorder %s1098_s16, 5 }
   0x6   : > { %s1262_s17 = smov (%p23_p0, %s22_s17), 0  ;;  %p43_p3 = por %p42_p2, %p41_p1 }
   0x7   : > { %s30_s18 = ssub.s32 %s1094_s15, %s1262_s17  ;;  %143 = sbr.rel (%p830_p5) target bundleno = 28 (0x1c), region = 20 }
   0x8   : > { %p32_p4 = scmp.eq.s32.totalorder %s30_s18, 0 }
   0xa   : > { %s1156_s20 = scalar_select %p32_p4, %s1086_s13, %s34_s19  }
   0xe   : > { %146 = sbr.rel (!%p43_p3) target bundleno = 28 (0x1c), region = 24  ;;  %s148_s21 = sand.u32 (%p43_p3), 1, %s1086_s13  }
   0xf   : > { %s832_s22 = sshll.u32 (%p43_p3), %s1094_s15, 2  ;;  %s831_s23 = sshll.u32 (%p43_p3), %s148_s21, 6 }
  0x10   : > { %s1164_s26 = scalar_lea.vmem (%p43_p3), %s1253_s0, %s832_s22  ;;  %s150_s27 = scalar_lea.vmem (%p43_p3), [#allocation3], %s831_s23 }
  0x11   : > { %v171_v0 = vld [vmem:[%s1164_s26] sm:$0xf] (%p43_p3)  ;;  %v173_v1 = vld [vmem:[%s1164_s26 + $0x14] sm:$0xf] (%p43_p3)  ;;  %v175_v2 = vld [vmem:[%s1164_s26 + $0x28] sm:$0xf] (%p43_p3) }
  0x12   : > { %172 = vst [vmem:[%s150_s27] sm:$0xf] (%p43_p3), %v171_v0  ;;  %174 = vst [vmem:[%s150_s27 + $0x4] sm:$0xf] (%p43_p3), %v173_v1  ;;  %v177_v3 = vld [vmem:[%s1164_s26 + $0x3c] sm:$0xf] (%p43_p3) }
  0x13   : > { %v179_v4 = vld [vmem:[%s1164_s26 + $0x50] sm:$0xf] (%p43_p3)  ;;  %176 = vst [vmem:[%s150_s27 + $0x8] sm:$0xf] (%p43_p3), %v175_v2  ;;  %178 = vst [vmem:[%s150_s27 + $0xc] sm:$0xf] (%p43_p3), %v177_v3 }
  0x14   : > { %180 = vst [vmem:[%s150_s27 + $0x10] sm:$0xf] (%p43_p3), %v179_v4  ;;  %v181_v5 = vld [vmem:[%s1164_s26 + $0x64] sm:$0xf] (%p43_p3)  ;;  %v183_v6 = vld [vmem:[%s1164_s26 + $0x78] sm:$0xf] (%p43_p3) }
  0x15   : > { %v185_v7 = vld [vmem:[%s1164_s26 + $0x8c] sm:$0xf]  ;;  %182 = vst [vmem:[%s150_s27 + $0x14] sm:$0xf] %v181_v5  ;;  %184 = vst [vmem:[%s150_s27 + $0x18] sm:$0xf] %v183_v6 }
  0x16   : > { %186 = vst [vmem:[%s150_s27 + $0x1c] sm:$0xf] %v185_v7  ;;  %v187_v8 = vld [vmem:[%s1164_s26 + $0xa0] sm:$0xf]  ;;  %v189_v9 = vld [vmem:[%s1164_s26 + $0xb4] sm:$0xf] }
  0x17   : > { %v191_v10 = vld [vmem:[%s1164_s26 + $0xc8] sm:$0xf]  ;;  %188 = vst [vmem:[%s150_s27 + $0x20] sm:$0xf] %v187_v8  ;;  %190 = vst [vmem:[%s150_s27 + $0x24] sm:$0xf] %v189_v9 }
  0x18   : > { %192 = vst [vmem:[%s150_s27 + $0x28] sm:$0xf] %v191_v10  ;;  %v193_v11 = vld [vmem:[%s1164_s26 + $0xdc] sm:$0xf]  ;;  %v195_v12 = vld [vmem:[%s1164_s26 + $0xf0] sm:$0xf] }
  0x19   : > { %v197_v13 = vld [vmem:[%s1164_s26 + $0x104] sm:$0xf]  ;;  %194 = vst [vmem:[%s150_s27 + $0x2c] sm:$0xf] %v193_v11  ;;  %196 = vst [vmem:[%s150_s27 + $0x30] sm:$0xf] %v195_v12 }
  0x1a   : > { %198 = vst [vmem:[%s150_s27 + $0x34] sm:$0xf] %v197_v13  ;;  %v199_v14 = vld [vmem:[%s1164_s26 + $0x118] sm:$0xf]  ;;  %v201_v15 = vld [vmem:[%s1164_s26 + $0x12c] sm:$0xf] }
  0x1b   : > { %200 = vst [vmem:[%s150_s27 + $0x38] sm:$0xf] %v199_v14  ;;  %202 = vst [vmem:[%s150_s27 + $0x3c] sm:$0xf] %v201_v15 }
  0x1c PF: > { %p833_p6 = scmp.ge.s32.totalorder %s1098_s16, 1  ;;  %p265_p7 = scmp.lt.s32.totalorder %s1098_s16, 6 }
  0x1e   : > { %p266_p8 = pnand %p833_p6, %p265_p7 }
  0x1f   : > { %s272_s28 = sand.u32 (!%p266_p8), 1, %s1082_s12   ;;  %s835_s29 = sshll.u32 (!%p266_p8), %s1090_s14, 4 }
  0x20   : > { %269 = sbr.rel (%p266_p8) target bundleno = 323 (0x143), region = 69  ;;  %s834_s30 = sshll.u32 (!%p266_p8), %s272_s28, 6 }
  0x21   : > { %p302_p9 = scmp.lt.s32.totalorder (!%p266_p8), %s835_s29, 79  ;;  %s1191_s8 = scalar_lea.vmem (!%p266_p8), [#allocation3], %s834_s30 }
  0x22   : > { %p837_p10 = scmp.ne.s32.totalorder (!%p266_p8), %s1090_s14, 0 }
  0x27   : > { %s1264_s29 = smov (!%p302_p9, %s835_s29), 79  ;;  %317 = sbr.rel (%p837_p10) target bundleno = 49 (0x31), region = 77 }
  0x28   : > { %s836_s4 = sshll.u32 %s1264_s29, 2  ;;  %v1100_v16 = vmov (!%p837_p10), 0.0  }
  0x29   : > { %s1189_s7 = scalar_lea.vmem %s1254_s1, %s836_s4  ;;  %318 = vst [vmem:[#allocation2] sm:$0xff] (!%p837_p10), %v1100_v16  ;;  %319 = vst [vmem:[#allocation2 + $0x8] sm:$0xff] (!%p837_p10), %v1100_v16 }
  0x2a   : > { %320 = vst [vmem:[#allocation2 + $0x10] sm:$0xff] (!%p837_p10), %v1100_v16  ;;  %321 = vst [vmem:[#allocation2 + $0x18] sm:$0xff] (!%p837_p10), %v1100_v16 }
  0x2b   : > { %322 = vst [vmem:[#allocation2 + $0x20] sm:$0xff] (!%p837_p10), %v1100_v16  ;;  %323 = vst [vmem:[#allocation2 + $0x28] sm:$0xff] (!%p837_p10), %v1100_v16 }
  0x2c   : > { %324 = vst [vmem:[#allocation2 + $0x30] sm:$0xff] (!%p837_p10), %v1100_v16  ;;  %325 = vst [vmem:[#allocation2 + $0x38] sm:$0xff] (!%p837_p10), %v1100_v16 }
  0x2d   : > { %326 = vst [vmem:[#allocation2 + $0x40] sm:$0xff] (!%p837_p10), %v1100_v16  ;;  %327 = vst [vmem:[#allocation2 + $0x48] sm:$0xff] (!%p837_p10), %v1100_v16 }
  0x2e   : > { %328 = vst [vmem:[#allocation2 + $0x50] sm:$0xff] %v1100_v16  ;;  %329 = vst [vmem:[#allocation2 + $0x58] sm:$0xff] %v1100_v16 }
  0x2f   : > { %330 = vst [vmem:[#allocation2 + $0x60] sm:$0xff] %v1100_v16  ;;  %331 = vst [vmem:[#allocation2 + $0x68] sm:$0xff] %v1100_v16 }
  0x30   : > { %332 = vst [vmem:[#allocation2 + $0x70] sm:$0xff] %v1100_v16  ;;  %333 = vst [vmem:[#allocation2 + $0x78] sm:$0xff] %v1100_v16 }
  0x31 PF: > { %v1044_v17 = vld [vmem:[%s1189_s7] sm:$0xff]   ;;  %v1045_v18 = vld [vmem:[%s1189_s7 + $0x8] sm:$0xff]   ;;  %v1046_v19 = vld [vmem:[%s1189_s7 + $0x10] sm:$0xff]   ;;  %p854_p11 = scmp.ne.s32.totalorder %s1090_s14, 4 }
  0x32   : > { %955 = vmatprep.subr.bf16.mxu0 %v1044_v17  ;;  %987 = vmatprep.subr.bf16.mxu1 %v1044_v17  ;;  %v1047_v20 = vld [vmem:[%s1189_s7 + $0x18] sm:$0xff]   ;;  %v1052_v21 = vld [vmem:[%s1191_s8] sm:$0xff]   ;;  %v1049_v24 = vld [vmem:[%s1189_s7 + $0x28] sm:$0xff]  }
  0x33   : > { %956 = vmatpush3.bf16.msra.mxu0 %v1044_v17  ;;  %995 = vmatpush3.bf16.msra.mxu1 %v1044_v17  ;;  %v1053_v22 = vld [vmem:[%s1191_s8 + $0x20] sm:$0xff]   ;;  %v1050_v25 = vld [vmem:[%s1189_s7 + $0x30] sm:$0xff]   ;;  %v1051_v26 = vld [vmem:[%s1189_s7 + $0x38] sm:$0xff]  }
  0x34   : > { %957 = vmatprep.subr.bf16.mxu0 %v1045_v18  ;;  %988 = vmatprep.subr.bf16.mxu1 %v1045_v18  ;;  %v1048_v23 = vld [vmem:[%s1189_s7 + $0x20] sm:$0xff]   ;;  %v1054_v27 = vld [vmem:[%s1191_s8 + $0x8] sm:$0xff]   ;;  %v1056_v29 = vld [vmem:[%s1191_s8 + $0x10] sm:$0xff]  }
  0x35   : > { %971 = vmatprep.mubr.bf16.mxu0 %v1052_v21  ;;  %979 = vmatprep.mubr.bf16.mxu1 %v1053_v22  ;;  %v1055_v28 = vld [vmem:[%s1191_s8 + $0x28] sm:$0xff]   ;;  %v1057_v30 = vld [vmem:[%s1191_s8 + $0x30] sm:$0xff]   ;;  %v1058_v31 = vld [vmem:[%s1191_s8 + $0x18] sm:$0xff]  }
  0x36   : > { %v1059_v32 = vld [vmem:[%s1191_s8 + $0x38] sm:$0xff]   ;;  %v336_v33 = vld [vmem:[#allocation2 + $0x10] sm:$0xff]  ;;  %v334_v35 = vld [vmem:[#allocation2] sm:$0xff] }
  0x37   : > { %958 = vmatpush3.bf16.msra.mxu0 %v1045_v18  ;;  %996 = vmatpush3.bf16.msra.mxu1 %v1045_v18  ;;  %v344_v34 = vld [vmem:[#allocation2 + $0x50] sm:$0xff]  ;;  %v342_v36 = vld [vmem:[#allocation2 + $0x40] sm:$0xff]  ;;  %v337_v39 = vld [vmem:[#allocation2 + $0x18] sm:$0xff] }
  0x38   : > { %959 = vmatprep.subr.bf16.mxu0 %v1046_v19  ;;  %989 = vmatprep.subr.bf16.mxu1 %v1046_v19  ;;  %v345_v40 = vld [vmem:[#allocation2 + $0x58] sm:$0xff]  ;;  %v335_v45 = vld [vmem:[#allocation2 + $0x8] sm:$0xff]  ;;  %v340_v57 = vld [vmem:[#allocation2 + $0x30] sm:$0xff] }
  0x39   : > { %v343_v46 = vld [vmem:[#allocation2 + $0x48] sm:$0xff]  ;;  %v348_v58 = vld [vmem:[#allocation2 + $0x70] sm:$0xff]  ;;  %v338_v59 = vld [vmem:[#allocation2 + $0x20] sm:$0xff] }
  0x3a   : > { %v346_v60 = vld [vmem:[#allocation2 + $0x60] sm:$0xff]  ;;  %v341_v63 = vld [vmem:[#allocation2 + $0x38] sm:$0xff]  ;;  %v339_v5 = vld [vmem:[#allocation2 + $0x28] sm:$0xff] }
  0x3b   : > { %960 = vmatpush3.bf16.msra.mxu0 %v1046_v19  ;;  %997 = vmatpush3.bf16.msra.mxu1 %v1046_v19  ;;  %v349_v0 = vld [vmem:[#allocation2 + $0x78] sm:$0xff]  ;;  %v347_v6 = vld [vmem:[#allocation2 + $0x68] sm:$0xff]  ;;  %v855_v19 = vld [vmem:[%s1255_s2] ss:$0 sm:$0xff] (!%p854_p11) }
  0x3c   : > { %961 = vmatprep.subr.bf16.mxu0 %v1047_v20  ;;  %990 = vmatprep.subr.bf16.mxu1 %v1047_v20 }
  0x3f   : > { %962 = vmatpush3.bf16.msra.mxu0 %v1047_v20  ;;  %998 = vmatpush3.bf16.msra.mxu1 %v1047_v20 }
  0x40   : > { %963 = vmatprep.subr.bf16.mxu0 %v1048_v23  ;;  %991 = vmatprep.subr.bf16.mxu1 %v1048_v23 }
  0x43   : > { %964 = vmatpush3.bf16.msra.mxu0 %v1048_v23  ;;  %999 = vmatpush3.bf16.msra.mxu1 %v1048_v23 }
  0x44   : > { %965 = vmatprep.subr.bf16.mxu0 %v1049_v24  ;;  %992 = vmatprep.subr.bf16.mxu1 %v1049_v24 }
  0x47   : > { %966 = vmatpush3.bf16.msra.mxu0 %v1049_v24  ;;  %1000 = vmatpush3.bf16.msra.mxu1 %v1049_v24 }
  0x48   : > { %967 = vmatprep.subr.bf16.mxu0 %v1050_v25  ;;  %993 = vmatprep.subr.bf16.mxu1 %v1050_v25 }
  0x4b   : > { %968 = vmatpush3.bf16.msra.mxu0 %v1050_v25  ;;  %1001 = vmatpush3.bf16.msra.mxu1 %v1050_v25 }
  0x4c   : > { %969 = vmatprep.subr.bf16.mxu0 %v1051_v26  ;;  %994 = vmatprep.subr.bf16.mxu1 %v1051_v26 }
  0x4f   : > { %970 = vmatpush3.bf16.msra.mxu0 %v1051_v26  ;;  %1002 = vmatpush3.bf16.msra.mxu1 %v1051_v26 }
  0x52   : > { %972 = vmatmul.mubr.bf16.vlgmr.msra.gmra.mrb[0].mxu0 %v1054_v27  ;;  %980 = vmatmul.mubr.bf16.vlgmr.msra.gmra.mrb[0].mxu1 %v1055_v28 }
  0x53   : > { %975 = vmatprep.mubr.bf16.mxu0 %v1056_v29  ;;  %983 = vmatprep.mubr.bf16.mxu1 %v1057_v30 }
  0x5a   : > { %976 = vmatmul.mubr.bf16.gmra.mrb[4].mxu0 %v1058_v31  ;;  %984 = vmatmul.mubr.bf16.gmra.mrb[4].mxu1 %v1059_v32 }
 0x125   : > { %v973_v37 = vpop.f32.mrb[0].mxu0  ;;  %v981_v38 = vpop.f32.mrb[0].mxu1 }
 0x126   : > { %v577_v41 = vadd.f32 %v973_v37, %v336_v33  ;;  %v585_v42 = vadd.f32 %v981_v38, %v344_v34  ;;  %v512_v43 = vpop.f32.mrb[1].mxu0  ;;  %v544_v44 = vpop.f32.mrb[1].mxu1 }
 0x127   : > { %v575_v47 = vadd.f32 %v512_v43, %v334_v35  ;;  %v583_v48 = vadd.f32 %v544_v44, %v342_v36  ;;  %v974_v49 = vpop.f32.mrb[2].mxu0  ;;  %v982_v50 = vpop.f32.mrb[2].mxu1 }
 0x128   : > { %593 = vst [vmem:[#allocation2 + $0x10] sm:$0xff] %v577_v41  ;;  %601 = vst [vmem:[#allocation2 + $0x50] sm:$0xff] %v585_v42  ;;  %v578_v51 = vadd.f32 %v974_v49, %v337_v39  ;;  %v586_v52 = vadd.f32 %v982_v50, %v345_v40  ;;  %v515_v53 = vpop.f32.mrb[3].mxu0  ;;  %v547_v54 = vpop.f32.mrb[3].mxu1 }
 0x129   : > { %591 = vst [vmem:[#allocation2] sm:$0xff] %v575_v47  ;;  %599 = vst [vmem:[#allocation2 + $0x40] sm:$0xff] %v583_v48  ;;  %v576_v55 = vadd.f32 %v515_v53, %v335_v45  ;;  %v584_v56 = vadd.f32 %v547_v54, %v343_v46 }
 0x12a   : > { %594 = vst [vmem:[#allocation2 + $0x18] sm:$0xff] %v578_v51  ;;  %602 = vst [vmem:[#allocation2 + $0x58] sm:$0xff] %v586_v52 }
 0x12b   : > { %592 = vst [vmem:[#allocation2 + $0x8] sm:$0xff] %v576_v55  ;;  %600 = vst [vmem:[#allocation2 + $0x48] sm:$0xff] %v584_v56 }
 0x12d   : > { %v977_v61 = vpop.f32.mrb[4].mxu0  ;;  %v985_v62 = vpop.f32.mrb[4].mxu1  ;;  %610 = sbr.rel (%p854_p11) target bundleno = 323 (0x143), region = 81 }
 0x12e   : > { %v581_v1 = vadd.f32 %v977_v61, %v340_v57  ;;  %v589_v2 = vadd.f32 %v985_v62, %v348_v58  ;;  %v528_v3 = vpop.f32.mrb[5].mxu0  ;;  %v560_v4 = vpop.f32.mrb[5].mxu1 }
 0x12f   : > { %v579_v7 = vadd.f32 %v528_v3, %v338_v59  ;;  %v587_v8 = vadd.f32 %v560_v4, %v346_v60  ;;  %v978_v9 = vpop.f32.mrb[6].mxu0  ;;  %v986_v10 = vpop.f32.mrb[6].mxu1  ;;  %v613_v22 = vld [vmem:[#allocation2 + $0x10] sm:$0xff] (!%p854_p11) }
 0x130   : > { %597 = vst [vmem:[#allocation2 + $0x30] sm:$0xff] %v581_v1  ;;  %605 = vst [vmem:[#allocation2 + $0x70] sm:$0xff] %v589_v2  ;;  %v582_v11 = vadd.f32 %v978_v9, %v341_v63  ;;  %v590_v12 = vadd.f32 %v986_v10, %v349_v0  ;;  %v531_v13 = vpop.f32.mrb[7].mxu0  ;;  %v563_v14 = vpop.f32.mrb[7].mxu1  ;;  %v611_v17 = vld [vmem:[#allocation2] sm:$0xff] (!%p854_p11)  ;;  %v636_v25 = vadd.f32 (!%p854_p11), %v855_v19, %v613_v22  ;;  %v621_v37 = vld [vmem:[#allocation2 + $0x50] sm:$0xff] (!%p854_p11) }
 0x131   : > { %595 = vst [vmem:[#allocation2 + $0x20] sm:$0xff] %v579_v7  ;;  %603 = vst [vmem:[#allocation2 + $0x60] sm:$0xff] %v587_v8  ;;  %v580_v15 = vadd.f32 %v531_v13, %v339_v5  ;;  %v588_v16 = vadd.f32 %v563_v14, %v347_v6  ;;  %v634_v20 = vadd.f32 (!%p854_p11), %v855_v19, %v611_v17  ;;  %v614_v23 = vld [vmem:[#allocation2 + $0x18] sm:$0xff] (!%p854_p11)  ;;  %v619_v35 = vld [vmem:[#allocation2 + $0x40] sm:$0xff] (!%p854_p11) }
 0x132   : > { %598 = vst [vmem:[#allocation2 + $0x38] sm:$0xff] %v582_v11  ;;  %606 = vst [vmem:[#allocation2 + $0x78] sm:$0xff] %v590_v12  ;;  %v612_v18 = vld [vmem:[#allocation2 + $0x8] sm:$0xff] (!%p854_p11)  ;;  %v637_v26 = vadd.f32 (!%p854_p11), %v855_v19, %v614_v23  ;;  %v652_v38 = vmax.f32 (!%p854_p11), %v636_v25, 0.0  ;;  %v622_v42 = vld [vmem:[#allocation2 + $0x58] sm:$0xff] (!%p854_p11)  ;;  %v642_v47 = vadd.f32 (!%p854_p11), %v855_v19, %v619_v35  ;;  %v644_v52 = vadd.f32 (!%p854_p11), %v855_v19, %v621_v37 }
 0x133   : > { %596 = vst [vmem:[#allocation2 + $0x28] sm:$0xff] %v580_v15  ;;  %604 = vst [vmem:[#allocation2 + $0x68] sm:$0xff] %v588_v16  ;;  %v635_v21 = vadd.f32 (!%p854_p11), %v855_v19, %v612_v18  ;;  %v650_v31 = vmax.f32 (!%p854_p11), %v634_v20, 0.0  ;;  %v620_v36 = vld [vmem:[#allocation2 + $0x48] sm:$0xff] (!%p854_p11)  ;;  %v645_v57 = vadd.f32 (!%p854_p11), %v855_v19, %v622_v42 }
 0x134   : > { %v653_v39 = vmax.f32 %v637_v26, 0.0  ;;  %v643_v51 = vadd.f32 %v855_v19, %v620_v36  ;;  %v658_v56 = vmax.f32 %v642_v47, 0.0  ;;  %v660_v61 = vmax.f32 %v644_v52, 0.0 }
 0x135   : > { %v651_v32 = vmax.f32 %v635_v21, 0.0  ;;  %v661_v63 = vmax.f32 %v645_v57, 0.0 }
 0x136   : > { %v900_v49 = vpack.c.bf16 %v653_v39, %v652_v38  ;;  %v659_v60 = vmax.f32 %v643_v51, 0.0 }
 0x137   : > { %v617_v29 = vld [vmem:[#allocation2 + $0x30] sm:$0xff]  ;;  %v895_v44 = vpack.c.bf16 %v651_v32, %v650_v31  ;;  %v920_v5 = vpack.c.bf16 %v661_v63, %v660_v61 }
 0x138   : > { %v615_v24 = vld [vmem:[#allocation2 + $0x20] sm:$0xff]  ;;  %v640_v34 = vadd.f32 %v855_v19, %v617_v29  ;;  %v625_v53 = vld [vmem:[#allocation2 + $0x70] sm:$0xff]  ;;  %932 = vst [vmem:[%s1256_s3 + $0x8] sm:$0xff] %v900_v49   ;;  %v915_v3 = vpack.c.bf16 %v659_v60, %v658_v56 }
 0x139   : > { %v638_v28 = vadd.f32 %v855_v19, %v615_v24  ;;  %v618_v30 = vld [vmem:[#allocation2 + $0x38] sm:$0xff]  ;;  %v623_v43 = vld [vmem:[#allocation2 + $0x60] sm:$0xff]  ;;  %896 = vst [vmem:[%s1256_s3] sm:$0xff] %v895_v44   ;;  %v648_v1 = vadd.f32 %v855_v19, %v625_v53  ;;  %936 = vst [vmem:[%s1256_s3 + $0x28] sm:$0xff] %v920_v5  }
 0x13a   : > { %v616_v27 = vld [vmem:[#allocation2 + $0x28] sm:$0xff]  ;;  %v641_v41 = vadd.f32 %v855_v19, %v618_v30  ;;  %v656_v46 = vmax.f32 %v640_v34, 0.0  ;;  %v626_v54 = vld [vmem:[#allocation2 + $0x78] sm:$0xff]  ;;  %v646_v58 = vadd.f32 %v855_v19, %v623_v43  ;;  %935 = vst [vmem:[%s1256_s3 + $0x20] sm:$0xff] %v915_v3  }
 0x13b   : > { %v639_v33 = vadd.f32 %v855_v19, %v616_v27  ;;  %v654_v40 = vmax.f32 %v638_v28, 0.0  ;;  %v624_v48 = vld [vmem:[#allocation2 + $0x68] sm:$0xff]  ;;  %v649_v2 = vadd.f32 %v855_v19, %v626_v54  ;;  %v664_v6 = vmax.f32 %v648_v1, 0.0 }
 0x13c   : > { %v657_v50 = vmax.f32 %v641_v41, 0.0  ;;  %v647_v62 = vadd.f32 %v855_v19, %v624_v48  ;;  %v662_v0 = vmax.f32 %v646_v58, 0.0 }
 0x13d   : > { %v655_v45 = vmax.f32 %v639_v33, 0.0  ;;  %v665_v7 = vmax.f32 %v649_v2, 0.0 }
 0x13e   : > { %v910_v59 = vpack.c.bf16 %v657_v50, %v656_v46  ;;  %v663_v4 = vmax.f32 %v647_v62, 0.0 }
 0x13f   : > { %v905_v55 = vpack.c.bf16 %v655_v45, %v654_v40  ;;  %v930_v9 = vpack.c.bf16 %v665_v7, %v664_v6 }
 0x140   : > { %934 = vst [vmem:[%s1256_s3 + $0x18] sm:$0xff] %v910_v59   ;;  %v925_v8 = vpack.c.bf16 %v663_v4, %v662_v0 }
 0x141   : > { %933 = vst [vmem:[%s1256_s3 + $0x10] sm:$0xff] %v905_v55   ;;  %938 = vst [vmem:[%s1256_s3 + $0x38] sm:$0xff] %v930_v9  }
 0x142   : > { %937 = vst [vmem:[%s1256_s3 + $0x30] sm:$0xff] %v925_v8  }
 0x143 PF: > { %s13_s16 = sadd.s32 1, %s1098_s16   ;;  %s1257_s12 = smov %s1086_s13 }
 0x144   : > { %p10_p12 = scmp.ge.s32.totalorder %s13_s16, 7   ;;  %s1258_s13 = smov %s1156_s20 }
 0x145   : > { %s1259_s14 = smov %s1094_s15  ;;  %s1260_s15 = smov %s1262_s17 }
 0x146   :  { %12 = sbr.rel (!%p10_p12) target bundleno = 3 (0x3), region = 119 }

// kernel: resnet4channel_forward.42
= control target key start
LH: loop header
LB: loop body
LE: loop exit
PB: predicated region body
PF: predicated region fallthrough
CT: control target
= control target key end

     0   :  { %s1278_s15 = smov 0   ;;  %s1280_s16 = smov 0   ;;  %s1452_s0 = inlined_call_operand.vmem [shape: bf16[128,640], index: 0, kind: input, shape index: {}]   ;;  %s1453_s1 = inlined_call_operand.vmem [shape: bf16[640,128], index: 1, kind: input, shape index: {}]   ;;  %s1454_s2 = inlined_call_operand.vmem [shape: f32[1,128], index: 2, kind: input, shape index: {}]   ;;  %s1455_s3 = inlined_call_operand.vmem [shape: bf16[128,128], index: 3, kind: input, shape index: {}]   ;;  %s1456_s4 = inlined_call_operand.vmem [shape: bf16[128,128], index: 4, kind: output, shape index: {}]  }
   0x1   :  { %s1282_s17 = smov 0   ;;  %s1284_s18 = smov 0  }
   0x2   :  { %s1286_s19 = smov 0  }
   0x3 LB: > { %s23_s20 = sadd.s32 1, %s1246_s18  ;;  %p42_p1 = scmp.ne.s32.totalorder %s1238_s16, %s1234_s15  ;;  %s1250_s19 = sphi %s1286_s19, %s14_s19   ;;  %s1246_s18 = sphi %s1284_s18, %s1460_s18   ;;  %s1242_s17 = sphi %s1282_s17, %s1459_s17   ;;  %s1238_s16 = sphi %s1280_s16, %s1458_s16   ;;  %s1234_s15 = sphi %s1278_s15, %s1457_s15  }
   0x4   : > { %p24_p0 = scmp.ge.s32.totalorder %s23_s20, 5  ;;  %p43_p2 = scmp.eq.s32.totalorder %s1250_s19, 0 }
   0x5   : > { %s35_s22 = sadd.s32 1, %s1238_s16  ;;  %p943_p5 = scmp.ge.s32.totalorder %s1250_s19, 5 }
   0x6   : > { %s1462_s20 = smov (%p24_p0, %s23_s20), 0  ;;  %p44_p3 = por %p43_p2, %p42_p1 }
   0x7   : > { %s31_s21 = ssub.s32 %s1246_s18, %s1462_s20  ;;  %179 = sbr.rel (%p943_p5) target bundleno = 28 (0x1c), region = 24 }
   0x8   : > { %p33_p4 = scmp.eq.s32.totalorder %s31_s21, 0 }
   0xa   : > { %s1313_s23 = scalar_select %p33_p4, %s1238_s16, %s35_s22  }
   0xe   : > { %182 = sbr.rel (!%p44_p3) target bundleno = 28 (0x1c), region = 28  ;;  %s184_s24 = sand.u32 (%p44_p3), 1, %s1238_s16  }
   0xf   : > { %s945_s25 = sshll.u32 (%p44_p3), %s1246_s18, 2  ;;  %s944_s26 = sshll.u32 (%p44_p3), %s184_s24, 6 }
  0x10   : > { %s1321_s29 = scalar_lea.vmem (%p44_p3), %s1452_s0, %s945_s25  ;;  %s186_s30 = scalar_lea.vmem (%p44_p3), [#allocation3], %s944_s26 }
  0x11   : > { %v207_v0 = vld [vmem:[%s1321_s29] sm:$0xf] (%p44_p3)  ;;  %v209_v1 = vld [vmem:[%s1321_s29 + $0x14] sm:$0xf] (%p44_p3)  ;;  %v211_v2 = vld [vmem:[%s1321_s29 + $0x28] sm:$0xf] (%p44_p3) }
  0x12   : > { %208 = vst [vmem:[%s186_s30] sm:$0xf] (%p44_p3), %v207_v0  ;;  %210 = vst [vmem:[%s186_s30 + $0x4] sm:$0xf] (%p44_p3), %v209_v1  ;;  %v213_v3 = vld [vmem:[%s1321_s29 + $0x3c] sm:$0xf] (%p44_p3) }
  0x13   : > { %v215_v4 = vld [vmem:[%s1321_s29 + $0x50] sm:$0xf] (%p44_p3)  ;;  %212 = vst [vmem:[%s186_s30 + $0x8] sm:$0xf] (%p44_p3), %v211_v2  ;;  %214 = vst [vmem:[%s186_s30 + $0xc] sm:$0xf] (%p44_p3), %v213_v3 }
  0x14   : > { %216 = vst [vmem:[%s186_s30 + $0x10] sm:$0xf] (%p44_p3), %v215_v4  ;;  %v217_v5 = vld [vmem:[%s1321_s29 + $0x64] sm:$0xf] (%p44_p3)  ;;  %v219_v6 = vld [vmem:[%s1321_s29 + $0x78] sm:$0xf] (%p44_p3) }
  0x15   : > { %v221_v7 = vld [vmem:[%s1321_s29 + $0x8c] sm:$0xf]  ;;  %218 = vst [vmem:[%s186_s30 + $0x14] sm:$0xf] %v217_v5  ;;  %220 = vst [vmem:[%s186_s30 + $0x18] sm:$0xf] %v219_v6 }
  0x16   : > { %222 = vst [vmem:[%s186_s30 + $0x1c] sm:$0xf] %v221_v7  ;;  %v223_v8 = vld [vmem:[%s1321_s29 + $0xa0] sm:$0xf]  ;;  %v225_v9 = vld [vmem:[%s1321_s29 + $0xb4] sm:$0xf] }
  0x17   : > { %v227_v10 = vld [vmem:[%s1321_s29 + $0xc8] sm:$0xf]  ;;  %224 = vst [vmem:[%s186_s30 + $0x20] sm:$0xf] %v223_v8  ;;  %226 = vst [vmem:[%s186_s30 + $0x24] sm:$0xf] %v225_v9 }
  0x18   : > { %228 = vst [vmem:[%s186_s30 + $0x28] sm:$0xf] %v227_v10  ;;  %v229_v11 = vld [vmem:[%s1321_s29 + $0xdc] sm:$0xf]  ;;  %v231_v12 = vld [vmem:[%s1321_s29 + $0xf0] sm:$0xf] }
  0x19   : > { %v233_v13 = vld [vmem:[%s1321_s29 + $0x104] sm:$0xf]  ;;  %230 = vst [vmem:[%s186_s30 + $0x2c] sm:$0xf] %v229_v11  ;;  %232 = vst [vmem:[%s186_s30 + $0x30] sm:$0xf] %v231_v12 }
  0x1a   : > { %234 = vst [vmem:[%s186_s30 + $0x34] sm:$0xf] %v233_v13  ;;  %v235_v14 = vld [vmem:[%s1321_s29 + $0x118] sm:$0xf]  ;;  %v237_v15 = vld [vmem:[%s1321_s29 + $0x12c] sm:$0xf] }
  0x1b   : > { %236 = vst [vmem:[%s186_s30 + $0x38] sm:$0xf] %v235_v14  ;;  %238 = vst [vmem:[%s186_s30 + $0x3c] sm:$0xf] %v237_v15 }
  0x1c PF: > { %p946_p6 = scmp.ge.s32.totalorder %s1250_s19, 1  ;;  %p301_p7 = scmp.lt.s32.totalorder %s1250_s19, 6 }
  0x1e   : > { %p302_p8 = pnand %p946_p6, %p301_p7 }
  0x1f   : > { %s308_s5 = sand.u32 (!%p302_p8), 1, %s1234_s15   ;;  %s948_s6 = sshll.u32 (!%p302_p8), %s1242_s17, 4 }
  0x20   : > { %305 = sbr.rel (%p302_p8) target bundleno = 328 (0x148), region = 73  ;;  %s947_s7 = sshll.u32 (!%p302_p8), %s308_s5, 6 }
  0x21   : > { %p345_p9 = scmp.lt.s32.totalorder (!%p302_p8), %s948_s6, 79  ;;  %s1348_s12 = scalar_lea.vmem (!%p302_p8), [#allocation3], %s947_s7 }
  0x22   : > { %p950_p10 = scmp.ne.s32.totalorder (!%p302_p8), %s1242_s17, 0 }
  0x27   : > { %s1464_s6 = smov (!%p345_p9, %s948_s6), 79  ;;  %366 = sbr.rel (%p950_p10) target bundleno = 49 (0x31), region = 81 }
  0x28   : > { %s949_s8 = sshll.u32 %s1464_s6, 2  ;;  %v1252_v16 = vmov (!%p950_p10), 0.0  }
  0x29   : > { %s1346_s11 = scalar_lea.vmem %s1453_s1, %s949_s8  ;;  %367 = vst [vmem:[#allocation2] sm:$0xff] (!%p950_p10), %v1252_v16  ;;  %368 = vst [vmem:[#allocation2 + $0x8] sm:$0xff] (!%p950_p10), %v1252_v16 }
  0x2a   : > { %369 = vst [vmem:[#allocation2 + $0x10] sm:$0xff] (!%p950_p10), %v1252_v16  ;;  %370 = vst [vmem:[#allocation2 + $0x18] sm:$0xff] (!%p950_p10), %v1252_v16 }
  0x2b   : > { %371 = vst [vmem:[#allocation2 + $0x20] sm:$0xff] (!%p950_p10), %v1252_v16  ;;  %372 = vst [vmem:[#allocation2 + $0x28] sm:$0xff] (!%p950_p10), %v1252_v16 }
  0x2c   : > { %373 = vst [vmem:[#allocation2 + $0x30] sm:$0xff] (!%p950_p10), %v1252_v16  ;;  %374 = vst [vmem:[#allocation2 + $0x38] sm:$0xff] (!%p950_p10), %v1252_v16 }
  0x2d   : > { %375 = vst [vmem:[#allocation2 + $0x40] sm:$0xff] (!%p950_p10), %v1252_v16  ;;  %376 = vst [vmem:[#allocation2 + $0x48] sm:$0xff] (!%p950_p10), %v1252_v16 }
  0x2e   : > { %377 = vst [vmem:[#allocation2 + $0x50] sm:$0xff] %v1252_v16  ;;  %378 = vst [vmem:[#allocation2 + $0x58] sm:$0xff] %v1252_v16 }
  0x2f   : > { %379 = vst [vmem:[#allocation2 + $0x60] sm:$0xff] %v1252_v16  ;;  %380 = vst [vmem:[#allocation2 + $0x68] sm:$0xff] %v1252_v16 }
  0x30   : > { %381 = vst [vmem:[#allocation2 + $0x70] sm:$0xff] %v1252_v16  ;;  %382 = vst [vmem:[#allocation2 + $0x78] sm:$0xff] %v1252_v16 }
  0x31 PF: > { %v1196_v17 = vld [vmem:[%s1346_s11] sm:$0xff]   ;;  %v1197_v18 = vld [vmem:[%s1346_s11 + $0x8] sm:$0xff]   ;;  %v1198_v19 = vld [vmem:[%s1346_s11 + $0x10] sm:$0xff]   ;;  %p967_p11 = scmp.ne.s32.totalorder %s1242_s17, 4 }
  0x32   : > { %1107 = vmatprep.subr.bf16.mxu0 %v1196_v17  ;;  %1139 = vmatprep.subr.bf16.mxu1 %v1196_v17  ;;  %v1199_v20 = vld [vmem:[%s1346_s11 + $0x18] sm:$0xff]   ;;  %v1204_v21 = vld [vmem:[%s1348_s12] sm:$0xff]   ;;  %v1201_v24 = vld [vmem:[%s1346_s11 + $0x28] sm:$0xff]  }
  0x33   : > { %1108 = vmatpush3.bf16.msra.mxu0 %v1196_v17  ;;  %1147 = vmatpush3.bf16.msra.mxu1 %v1196_v17  ;;  %v1205_v22 = vld [vmem:[%s1348_s12 + $0x20] sm:$0xff]   ;;  %v1202_v25 = vld [vmem:[%s1346_s11 + $0x30] sm:$0xff]   ;;  %v1203_v26 = vld [vmem:[%s1346_s11 + $0x38] sm:$0xff]  }
  0x34   : > { %1109 = vmatprep.subr.bf16.mxu0 %v1197_v18  ;;  %1140 = vmatprep.subr.bf16.mxu1 %v1197_v18  ;;  %v1200_v23 = vld [vmem:[%s1346_s11 + $0x20] sm:$0xff]   ;;  %v1206_v27 = vld [vmem:[%s1348_s12 + $0x8] sm:$0xff]   ;;  %v1208_v29 = vld [vmem:[%s1348_s12 + $0x10] sm:$0xff]  }
  0x35   : > { %1123 = vmatprep.mubr.bf16.mxu0 %v1204_v21  ;;  %1131 = vmatprep.mubr.bf16.mxu1 %v1205_v22  ;;  %v1207_v28 = vld [vmem:[%s1348_s12 + $0x28] sm:$0xff]   ;;  %v1209_v30 = vld [vmem:[%s1348_s12 + $0x30] sm:$0xff]   ;;  %v1210_v31 = vld [vmem:[%s1348_s12 + $0x18] sm:$0xff]  }
  0x36   : > { %v1211_v32 = vld [vmem:[%s1348_s12 + $0x38] sm:$0xff]   ;;  %v385_v33 = vld [vmem:[#allocation2 + $0x10] sm:$0xff]  ;;  %v383_v35 = vld [vmem:[#allocation2] sm:$0xff] }
  0x37   : > { %1110 = vmatpush3.bf16.msra.mxu0 %v1197_v18  ;;  %1148 = vmatpush3.bf16.msra.mxu1 %v1197_v18  ;;  %v393_v34 = vld [vmem:[#allocation2 + $0x50] sm:$0xff]  ;;  %v391_v36 = vld [vmem:[#allocation2 + $0x40] sm:$0xff]  ;;  %v386_v39 = vld [vmem:[#allocation2 + $0x18] sm:$0xff] }
  0x38   : > { %1111 = vmatprep.subr.bf16.mxu0 %v1198_v19  ;;  %1141 = vmatprep.subr.bf16.mxu1 %v1198_v19  ;;  %v394_v40 = vld [vmem:[#allocation2 + $0x58] sm:$0xff]  ;;  %v384_v45 = vld [vmem:[#allocation2 + $0x8] sm:$0xff]  ;;  %v389_v57 = vld [vmem:[#allocation2 + $0x30] sm:$0xff] }
  0x39   : > { %v392_v46 = vld [vmem:[#allocation2 + $0x48] sm:$0xff]  ;;  %v397_v58 = vld [vmem:[#allocation2 + $0x70] sm:$0xff]  ;;  %v387_v59 = vld [vmem:[#allocation2 + $0x20] sm:$0xff] }
  0x3a   : > { %v395_v60 = vld [vmem:[#allocation2 + $0x60] sm:$0xff]  ;;  %v390_v63 = vld [vmem:[#allocation2 + $0x38] sm:$0xff]  ;;  %v388_v5 = vld [vmem:[#allocation2 + $0x28] sm:$0xff] }
  0x3b   : > { %1112 = vmatpush3.bf16.msra.mxu0 %v1198_v19  ;;  %1149 = vmatpush3.bf16.msra.mxu1 %v1198_v19  ;;  %v398_v0 = vld [vmem:[#allocation2 + $0x78] sm:$0xff]  ;;  %v396_v6 = vld [vmem:[#allocation2 + $0x68] sm:$0xff]  ;;  %v1371_v19 = vld [vmem:[%s1454_s2] ss:$0 sm:$0xff] (!%p967_p11) }
  0x3c   : > { %1113 = vmatprep.subr.bf16.mxu0 %v1199_v20  ;;  %1142 = vmatprep.subr.bf16.mxu1 %v1199_v20  ;;  %v1006_v22 = vld [vmem:[%s1455_s3] sm:$0xff] (!%p967_p11)  }
  0x3f   : > { %1114 = vmatpush3.bf16.msra.mxu0 %v1199_v20  ;;  %1150 = vmatpush3.bf16.msra.mxu1 %v1199_v20 }
  0x40   : > { %1115 = vmatprep.subr.bf16.mxu0 %v1200_v23  ;;  %1143 = vmatprep.subr.bf16.mxu1 %v1200_v23 }
  0x43   : > { %1116 = vmatpush3.bf16.msra.mxu0 %v1200_v23  ;;  %1151 = vmatpush3.bf16.msra.mxu1 %v1200_v23 }
  0x44   : > { %1117 = vmatprep.subr.bf16.mxu0 %v1201_v24  ;;  %1144 = vmatprep.subr.bf16.mxu1 %v1201_v24 }
  0x47   : > { %1118 = vmatpush3.bf16.msra.mxu0 %v1201_v24  ;;  %1152 = vmatpush3.bf16.msra.mxu1 %v1201_v24 }
  0x48   : > { %1119 = vmatprep.subr.bf16.mxu0 %v1202_v25  ;;  %1145 = vmatprep.subr.bf16.mxu1 %v1202_v25 }
  0x4b   : > { %1120 = vmatpush3.bf16.msra.mxu0 %v1202_v25  ;;  %1153 = vmatpush3.bf16.msra.mxu1 %v1202_v25  ;;  %v1007_v25 = vunpack.c.l.bf16 (!%p967_p11), %v1006_v22 }
  0x4c   : > { %1121 = vmatprep.subr.bf16.mxu0 %v1203_v26  ;;  %1146 = vmatprep.subr.bf16.mxu1 %v1203_v26 }
  0x4f   : > { %1122 = vmatpush3.bf16.msra.mxu0 %v1203_v26  ;;  %1154 = vmatpush3.bf16.msra.mxu1 %v1203_v26  ;;  %v1008_v26 = vunpack.c.h.bf16 (!%p967_p11), %v1006_v22 }
  0x52   : > { %1124 = vmatmul.mubr.bf16.vlgmr.msra.gmra.mrb[0].mxu0 %v1206_v27  ;;  %1132 = vmatmul.mubr.bf16.vlgmr.msra.gmra.mrb[0].mxu1 %v1207_v28 }
  0x53   : > { %1127 = vmatprep.mubr.bf16.mxu0 %v1208_v29  ;;  %1135 = vmatprep.mubr.bf16.mxu1 %v1209_v30  ;;  %v1077_v29 = vld [vmem:[%s1455_s3 + $0x8] sm:$0xff] (!%p967_p11)  }
  0x5a   : > { %1128 = vmatmul.mubr.bf16.gmra.mrb[4].mxu0 %v1210_v31  ;;  %1136 = vmatmul.mubr.bf16.gmra.mrb[4].mxu1 %v1211_v32  ;;  %v1011_v32 = vunpack.c.l.bf16 (!%p967_p11), %v1077_v29 }
 0x125   : > { %v1125_v37 = vpop.f32.mrb[0].mxu0  ;;  %v1133_v38 = vpop.f32.mrb[0].mxu1 }
 0x126   : > { %v626_v41 = vadd.f32 %v1125_v37, %v385_v33  ;;  %v634_v42 = vadd.f32 %v1133_v38, %v393_v34  ;;  %v561_v43 = vpop.f32.mrb[1].mxu0  ;;  %v593_v44 = vpop.f32.mrb[1].mxu1  ;;  %v1012_v33 = vunpack.c.h.bf16 (!%p967_p11), %v1077_v29 }
 0x127   : > { %v624_v47 = vadd.f32 %v561_v43, %v383_v35  ;;  %v632_v48 = vadd.f32 %v593_v44, %v391_v36  ;;  %v1126_v49 = vpop.f32.mrb[2].mxu0  ;;  %v1134_v50 = vpop.f32.mrb[2].mxu1  ;;  %v1078_v36 = vld [vmem:[%s1455_s3 + $0x10] sm:$0xff] (!%p967_p11)   ;;  %v1079_v43 = vld [vmem:[%s1455_s3 + $0x18] sm:$0xff] (!%p967_p11)  }
 0x128   : > { %642 = vst [vmem:[#allocation2 + $0x10] sm:$0xff] %v626_v41  ;;  %650 = vst [vmem:[#allocation2 + $0x50] sm:$0xff] %v634_v42  ;;  %v627_v51 = vadd.f32 %v1126_v49, %v386_v39  ;;  %v635_v52 = vadd.f32 %v1134_v50, %v394_v40  ;;  %v564_v53 = vpop.f32.mrb[3].mxu0  ;;  %v596_v54 = vpop.f32.mrb[3].mxu1  ;;  %v1015_v41 = vunpack.c.l.bf16 (!%p967_p11), %v1078_v36  ;;  %v1016_v42 = vunpack.c.h.bf16 (!%p967_p11), %v1078_v36 }
 0x129   : > { %640 = vst [vmem:[#allocation2] sm:$0xff] %v624_v47  ;;  %648 = vst [vmem:[#allocation2 + $0x40] sm:$0xff] %v632_v48  ;;  %v625_v55 = vadd.f32 %v564_v53, %v384_v45  ;;  %v633_v56 = vadd.f32 %v596_v54, %v392_v46 }
 0x12a   : > { %643 = vst [vmem:[#allocation2 + $0x18] sm:$0xff] %v627_v51  ;;  %651 = vst [vmem:[#allocation2 + $0x58] sm:$0xff] %v635_v52 }
 0x12b   : > { %641 = vst [vmem:[#allocation2 + $0x8] sm:$0xff] %v625_v55  ;;  %649 = vst [vmem:[#allocation2 + $0x48] sm:$0xff] %v633_v56  ;;  %v1019_v56 = vunpack.c.l.bf16 (!%p967_p11), %v1079_v43 }
 0x12d   : > { %v1129_v61 = vpop.f32.mrb[4].mxu0  ;;  %v1137_v62 = vpop.f32.mrb[4].mxu1  ;;  %659 = sbr.rel (%p967_p11) target bundleno = 328 (0x148), region = 85 }
 0x12e   : > { %v630_v1 = vadd.f32 %v1129_v61, %v389_v57  ;;  %v638_v2 = vadd.f32 %v1137_v62, %v397_v58  ;;  %v577_v3 = vpop.f32.mrb[5].mxu0  ;;  %v609_v4 = vpop.f32.mrb[5].mxu1  ;;  %v1020_v57 = vunpack.c.h.bf16 (!%p967_p11), %v1079_v43  ;;  %v1080_v58 = vld [vmem:[%s1455_s3 + $0x20] sm:$0xff] (!%p967_p11)  }
 0x12f   : > { %v628_v7 = vadd.f32 %v577_v3, %v387_v59  ;;  %v636_v8 = vadd.f32 %v609_v4, %v395_v60  ;;  %v1130_v9 = vpop.f32.mrb[6].mxu0  ;;  %v1138_v10 = vpop.f32.mrb[6].mxu1  ;;  %v662_v23 = vld [vmem:[#allocation2 + $0x10] sm:$0xff] (!%p967_p11) }
 0x130   : > { %646 = vst [vmem:[#allocation2 + $0x30] sm:$0xff] %v630_v1  ;;  %654 = vst [vmem:[#allocation2 + $0x70] sm:$0xff] %v638_v2  ;;  %v631_v11 = vadd.f32 %v1130_v9, %v390_v63  ;;  %v639_v12 = vadd.f32 %v1138_v10, %v398_v0  ;;  %v580_v13 = vpop.f32.mrb[7].mxu0  ;;  %v612_v14 = vpop.f32.mrb[7].mxu1  ;;  %v660_v17 = vld [vmem:[#allocation2] sm:$0xff] (!%p967_p11)  ;;  %v685_v27 = vadd.f32 (!%p967_p11), %v1371_v19, %v662_v23  ;;  %v670_v59 = vld [vmem:[#allocation2 + $0x50] sm:$0xff] (!%p967_p11)  ;;  %v1024_v9 = vunpack.c.h.bf16 (!%p967_p11), %v1080_v58 }
 0x131   : > { %644 = vst [vmem:[#allocation2 + $0x20] sm:$0xff] %v628_v7  ;;  %652 = vst [vmem:[#allocation2 + $0x60] sm:$0xff] %v636_v8  ;;  %v629_v15 = vadd.f32 %v580_v13, %v388_v5  ;;  %v637_v16 = vadd.f32 %v612_v14, %v396_v6  ;;  %v683_v20 = vadd.f32 (!%p967_p11), %v1371_v19, %v660_v17  ;;  %v663_v24 = vld [vmem:[#allocation2 + $0x18] sm:$0xff] (!%p967_p11)  ;;  %v668_v48 = vld [vmem:[#allocation2 + $0x40] sm:$0xff] (!%p967_p11)  ;;  %v1023_v8 = vunpack.c.l.bf16 (!%p967_p11), %v1080_v58 }
 0x132   : > { %647 = vst [vmem:[#allocation2 + $0x38] sm:$0xff] %v631_v11  ;;  %655 = vst [vmem:[#allocation2 + $0x78] sm:$0xff] %v639_v12  ;;  %v661_v18 = vld [vmem:[#allocation2 + $0x8] sm:$0xff] (!%p967_p11)  ;;  %v686_v28 = vadd.f32 (!%p967_p11), %v1371_v19, %v663_v24  ;;  %v733_v44 = vadd.f32 (!%p967_p11), %v1011_v32, %v685_v27  ;;  %v691_v63 = vadd.f32 (!%p967_p11), %v1371_v19, %v668_v48  ;;  %v671_v0 = vld [vmem:[#allocation2 + $0x58] sm:$0xff] (!%p967_p11) }
 0x133   : > { %645 = vst [vmem:[#allocation2 + $0x28] sm:$0xff] %v629_v15  ;;  %653 = vst [vmem:[#allocation2 + $0x68] sm:$0xff] %v637_v16  ;;  %v684_v21 = vadd.f32 (!%p967_p11), %v1371_v19, %v661_v18  ;;  %v731_v39 = vadd.f32 (!%p967_p11), %v1007_v25, %v683_v20  ;;  %v669_v53 = vld [vmem:[#allocation2 + $0x48] sm:$0xff] (!%p967_p11)  ;;  %v693_v10 = vadd.f32 (!%p967_p11), %v1371_v19, %v670_v59  ;;  %v1082_v12 = vld [vmem:[%s1455_s3 + $0x30] sm:$0xff] (!%p967_p11)  }
 0x134   : > { %v734_v45 = vadd.f32 %v1012_v33, %v686_v28  ;;  %v749_v54 = vmax.f32 %v733_v44, 0.0  ;;  %v1081_v1 = vld [vmem:[%s1455_s3 + $0x28] sm:$0xff]   ;;  %v692_v5 = vadd.f32 %v1371_v19, %v669_v53  ;;  %v694_v15 = vadd.f32 %v1371_v19, %v671_v0  ;;  %v1083_v28 = vld [vmem:[%s1455_s3 + $0x38] sm:$0xff]  }
 0x135   : > { %v732_v40 = vadd.f32 %v1008_v26, %v684_v21  ;;  %v747_v49 = vmax.f32 %v731_v39, 0.0  ;;  %v1027_v16 = vunpack.c.l.bf16 %v1081_v1  ;;  %v739_v17 = vadd.f32 %v1023_v8, %v691_v63 }
 0x136   : > { %v750_v55 = vmax.f32 %v734_v45, 0.0  ;;  %v740_v18 = vadd.f32 %v1024_v9, %v692_v5  ;;  %v1028_v20 = vunpack.c.h.bf16 %v1081_v1  ;;  %v1031_v27 = vunpack.c.l.bf16 %v1082_v12 }
 0x137   : > { %v666_v37 = vld [vmem:[#allocation2 + $0x30] sm:$0xff]  ;;  %v748_v50 = vmax.f32 %v732_v40, 0.0  ;;  %v741_v25 = vadd.f32 %v1027_v16, %v693_v10  ;;  %v755_v29 = vmax.f32 %v739_v17, 0.0  ;;  %v1032_v32 = vunpack.c.h.bf16 %v1082_v12 }
 0x138   : > { %v664_v30 = vld [vmem:[#allocation2 + $0x20] sm:$0xff]  ;;  %v689_v46 = vadd.f32 %v1371_v19, %v666_v37  ;;  %v1045_v2 = vpack.c.bf16 %v750_v55, %v749_v54  ;;  %v674_v22 = vld [vmem:[#allocation2 + $0x70] sm:$0xff]  ;;  %v1035_v40 = vunpack.c.l.bf16 %v1083_v28 }
 0x139   : > { %v687_v34 = vadd.f32 %v1371_v19, %v664_v30  ;;  %v667_v38 = vld [vmem:[#allocation2 + $0x38] sm:$0xff]  ;;  %v1040_v60 = vpack.c.bf16 %v748_v50, %v747_v49  ;;  %v672_v6 = vld [vmem:[#allocation2 + $0x60] sm:$0xff]  ;;  %v756_v30 = vmax.f32 %v740_v18, 0.0  ;;  %v757_v33 = vmax.f32 %v741_v25, 0.0 }
 0x13a   : > { %v665_v31 = vld [vmem:[#allocation2 + $0x28] sm:$0xff]  ;;  %v690_v47 = vadd.f32 %v1371_v19, %v667_v38  ;;  %v737_v3 = vadd.f32 %v1019_v56, %v689_v46  ;;  %1084 = vst [vmem:[%s1456_s4 + $0x8] sm:$0xff] %v1045_v2   ;;  %v695_v21 = vadd.f32 %v1371_v19, %v672_v6  ;;  %v675_v23 = vld [vmem:[#allocation2 + $0x78] sm:$0xff] }
 0x13b   : > { %v688_v35 = vadd.f32 %v1371_v19, %v665_v31  ;;  %v735_v51 = vadd.f32 %v1015_v41, %v687_v34  ;;  %1041 = vst [vmem:[%s1456_s4] sm:$0xff] %v1040_v60   ;;  %v673_v11 = vld [vmem:[#allocation2 + $0x68] sm:$0xff]  ;;  %v742_v31 = vadd.f32 %v1028_v20, %v694_v15  ;;  %v698_v36 = vadd.f32 %v1371_v19, %v675_v23 }
 0x13c   : > { %v738_v4 = vadd.f32 %v1020_v57, %v690_v47  ;;  %v753_v13 = vmax.f32 %v737_v3, 0.0  ;;  %v696_v26 = vadd.f32 %v1371_v19, %v673_v11  ;;  %v743_v34 = vadd.f32 %v1031_v27, %v695_v21 }
 0x13d   : > { %v736_v52 = vadd.f32 %v1016_v42, %v688_v35  ;;  %v751_v61 = vmax.f32 %v735_v51, 0.0  ;;  %v697_v35 = vadd.f32 %v1371_v19, %v674_v22  ;;  %v1060_v37 = vpack.c.bf16 %v756_v30, %v755_v29 }
 0x13e   : > { %v754_v14 = vmax.f32 %v738_v4, 0.0  ;;  %v758_v38 = vmax.f32 %v742_v31, 0.0  ;;  %v744_v39 = vadd.f32 %v1032_v32, %v696_v26  ;;  %v759_v41 = vmax.f32 %v743_v34, 0.0 }
 0x13f   : > { %v752_v62 = vmax.f32 %v736_v52, 0.0  ;;  %v1036_v42 = vunpack.c.h.bf16 %v1083_v28  ;;  %1087 = vst [vmem:[%s1456_s4 + $0x20] sm:$0xff] %v1060_v37   ;;  %v745_v45 = vadd.f32 %v1035_v40, %v697_v35 }
 0x140   : > { %v1055_v24 = vpack.c.bf16 %v754_v14, %v753_v13  ;;  %v1065_v43 = vpack.c.bf16 %v758_v38, %v757_v33  ;;  %v760_v44 = vmax.f32 %v744_v39, 0.0 }
 0x141   : > { %v1050_v7 = vpack.c.bf16 %v752_v62, %v751_v61  ;;  %v746_v46 = vadd.f32 %v1036_v42, %v698_v36  ;;  %v761_v19 = vmax.f32 %v745_v45, 0.0 }
 0x142   : > { %1086 = vst [vmem:[%s1456_s4 + $0x18] sm:$0xff] %v1055_v24   ;;  %1088 = vst [vmem:[%s1456_s4 + $0x28] sm:$0xff] %v1065_v43   ;;  %v1070_v47 = vpack.c.bf16 %v760_v44, %v759_v41 }
 0x143   : > { %1085 = vst [vmem:[%s1456_s4 + $0x10] sm:$0xff] %v1050_v7   ;;  %v762_v48 = vmax.f32 %v746_v46, 0.0 }
 0x144   : > { %1089 = vst [vmem:[%s1456_s4 + $0x30] sm:$0xff] %v1070_v47  }
 0x145   : > { %v1075_v49 = vpack.c.bf16 %v762_v48, %v761_v19 }
 0x147   : > { %1090 = vst [vmem:[%s1456_s4 + $0x38] sm:$0xff] %v1075_v49  }
 0x148 PF: > { %s14_s19 = sadd.s32 1, %s1250_s19   ;;  %s1457_s15 = smov %s1238_s16 }
 0x149   : > { %p11_p12 = scmp.ge.s32.totalorder %s14_s19, 7   ;;  %s1458_s16 = smov %s1313_s23 }
 0x14a   : > { %s1459_s17 = smov %s1246_s18  ;;  %s1460_s18 = smov %s1462_s20 }
 0x14b   :  { %13 = sbr.rel (!%p11_p12) target bundleno = 3 (0x3), region = 126 }

// kernel: resnet4channel_forward.47
= control target key start
LH: loop header
LB: loop body
LE: loop exit
PB: predicated region body
PF: predicated region fallthrough
CT: control target
= control target key end

     0   :  { %s727_s12 = smov 0   ;;  %s729_s13 = smov 0   ;;  %s820_s0 = inlined_call_operand.vmem [shape: bf16[32,640], index: 0, kind: input, shape index: {}]   ;;  %s821_s1 = inlined_call_operand.vmem [shape: bf16[640,128], index: 1, kind: input, shape index: {}]   ;;  %s822_s2 = inlined_call_operand.vmem [shape: f32[1,128], index: 2, kind: input, shape index: {}]   ;;  %s823_s3 = inlined_call_operand.vmem [shape: bf16[32,128], index: 3, kind: output, shape index: {}]  }
   0x1   :  { %s731_s14 = smov 0   ;;  %s733_s15 = smov 0  }
   0x2   :  { %s735_s16 = smov 0  }
   0x3 LB: > { %s22_s17 = sadd.s32 1, %s700_s15  ;;  %p41_p1 = scmp.ne.s32.totalorder %s692_s13, %s688_s12  ;;  %s704_s16 = sphi %s735_s16, %s13_s16   ;;  %s700_s15 = sphi %s733_s15, %s827_s15   ;;  %s696_s14 = sphi %s731_s14, %s826_s14   ;;  %s692_s13 = sphi %s729_s13, %s825_s13   ;;  %s688_s12 = sphi %s727_s12, %s824_s12  }
   0x4   : > { %p23_p0 = scmp.ge.s32.totalorder %s22_s17, 5  ;;  %p42_p2 = scmp.eq.s32.totalorder %s704_s16, 0 }
   0x5   : > { %s34_s19 = sadd.s32 1, %s692_s13  ;;  %p542_p5 = scmp.ge.s32.totalorder %s704_s16, 5 }
   0x6   : > { %s829_s17 = smov (%p23_p0, %s22_s17), 0  ;;  %p43_p3 = por %p42_p2, %p41_p1 }
   0x7   : > { %s30_s18 = ssub.s32 %s700_s15, %s829_s17  ;;  %143 = sbr.rel (%p542_p5) target bundleno = 21 (0x15), region = 20 }
   0x8   : > { %p32_p4 = scmp.eq.s32.totalorder %s30_s18, 0 }
   0xa   : > { %s762_s20 = scalar_select %p32_p4, %s692_s13, %s34_s19  }
   0xe   : > { %146 = sbr.rel (!%p43_p3) target bundleno = 21 (0x15), region = 24  ;;  %s148_s21 = sand.u32 (%p43_p3), 1, %s692_s13  }
   0xf   : > { %s544_s22 = sshll.u32 (%p43_p3), %s700_s15, 2  ;;  %s543_s23 = sshll.u32 (%p43_p3), %s148_s21, 4 }
  0x10   : > { %s155_s26 = scalar_lea.vmem (%p43_p3), %s820_s0, %s544_s22  ;;  %s150_s27 = scalar_lea.vmem (%p43_p3), [#allocation3], %s543_s23 }
  0x11   : > { %v171_v0 = vld [vmem:[%s155_s26] sm:$0xf] (%p43_p3)  ;;  %v173_v1 = vld [vmem:[%s155_s26 + $0x14] sm:$0xf] (%p43_p3)  ;;  %v175_v2 = vld [vmem:[%s155_s26 + $0x28] sm:$0xf] (%p43_p3) }
  0x12   : > { %172 = vst [vmem:[%s150_s27] sm:$0xf] (%p43_p3), %v171_v0  ;;  %174 = vst [vmem:[%s150_s27 + $0x4] sm:$0xf] (%p43_p3), %v173_v1  ;;  %v177_v3 = vld [vmem:[%s155_s26 + $0x3c] sm:$0xf] (%p43_p3) }
  0x13   : > { %176 = vst [vmem:[%s150_s27 + $0x8] sm:$0xf] (%p43_p3), %v175_v2  ;;  %178 = vst [vmem:[%s150_s27 + $0xc] sm:$0xf] (%p43_p3), %v177_v3 }
  0x15 PF: > { %p545_p6 = scmp.ge.s32.totalorder %s704_s16, 1  ;;  %p217_p7 = scmp.lt.s32.totalorder %s704_s16, 6 }
  0x17   : > { %p218_p8 = pnand %p545_p6, %p217_p7 }
  0x18   : > { %s224_s28 = sand.u32 (!%p218_p8), 1, %s688_s12   ;;  %s547_s29 = sshll.u32 (!%p218_p8), %s696_s14, 4 }
  0x19   : > { %221 = sbr.rel (%p218_p8) target bundleno = 304 (0x130), region = 69  ;;  %s774_s30 = sshll.u32 (!%p218_p8), %s224_s28, 4 }
  0x1a   : > { %p254_p9 = scmp.lt.s32.totalorder (!%p218_p8), %s547_s29, 79  ;;  %s226_s8 = scalar_lea.vmem (!%p218_p8), [#allocation3], %s774_s30 }
  0x1b   : > { %p549_p10 = scmp.ne.s32.totalorder (!%p218_p8), %s696_s14, 0 }
  0x20   : > { %s831_s29 = smov (!%p254_p9, %s547_s29), 79  ;;  %269 = sbr.rel (%p549_p10) target bundleno = 39 (0x27), region = 77 }
  0x21   : > { %s548_s4 = sshll.u32 %s831_s29, 2  ;;  %v706_v4 = vmov (!%p549_p10), 0.0  }
  0x22   : > { %s779_s7 = scalar_lea.vmem %s821_s1, %s548_s4  ;;  %270 = vst [vmem:[#allocation2] sm:$0xff] (!%p549_p10), %v706_v4  ;;  %271 = vst [vmem:[#allocation2 + $0x8] sm:$0xff] (!%p549_p10), %v706_v4 }
  0x23   : > { %272 = vst [vmem:[#allocation2 + $0x10] sm:$0xff] (!%p549_p10), %v706_v4  ;;  %273 = vst [vmem:[#allocation2 + $0x18] sm:$0xff] (!%p549_p10), %v706_v4 }
  0x27 PF: > { %v656_v5 = vld [vmem:[%s779_s7] sm:$0xff]   ;;  %v657_v6 = vld [vmem:[%s779_s7 + $0x8] sm:$0xff]   ;;  %v658_v7 = vld [vmem:[%s779_s7 + $0x10] sm:$0xff]   ;;  %p560_p11 = scmp.ne.s32.totalorder %s696_s14, 4 }
  0x28   : > { %595 = vmatprep.subr.bf16.mxu0 %v656_v5  ;;  %v659_v8 = vld [vmem:[%s779_s7 + $0x18] sm:$0xff]   ;;  %v664_v9 = vld [vmem:[%s226_s8] sm:$0xff]   ;;  %v661_v11 = vld [vmem:[%s779_s7 + $0x28] sm:$0xff]  }
  0x29   : > { %596 = vmatpush3.bf16.msra.mxu0 %v656_v5  ;;  %611 = vmatprep.mubr.bf16.mxu0 %v664_v9  ;;  %v660_v10 = vld [vmem:[%s779_s7 + $0x20] sm:$0xff]   ;;  %v662_v12 = vld [vmem:[%s779_s7 + $0x30] sm:$0xff]   ;;  %v663_v13 = vld [vmem:[%s779_s7 + $0x38] sm:$0xff]  }
  0x2a   : > { %597 = vmatprep.subr.bf16.mxu0 %v657_v6  ;;  %v665_v14 = vld [vmem:[%s226_s8 + $0x8] sm:$0xff]   ;;  %v276_v15 = vld [vmem:[#allocation2 + $0x10] sm:$0xff]  ;;  %v274_v16 = vld [vmem:[#allocation2] sm:$0xff] }
  0x2b   : > { %v277_v18 = vld [vmem:[#allocation2 + $0x18] sm:$0xff]  ;;  %v275_v21 = vld [vmem:[#allocation2 + $0x8] sm:$0xff]  ;;  %v561_v29 = vld [vmem:[%s822_s2] ss:$0 sm:$0xff] (!%p560_p11) }
  0x2d   : > { %598 = vmatpush3.bf16.msra.mxu0 %v657_v6 }
  0x2e   : > { %599 = vmatprep.subr.bf16.mxu0 %v658_v7 }
  0x31   : > { %600 = vmatpush3.bf16.msra.mxu0 %v658_v7 }
  0x32   : > { %601 = vmatprep.subr.bf16.mxu0 %v659_v8 }
  0x35   : > { %602 = vmatpush3.bf16.msra.mxu0 %v659_v8 }
  0x36   : > { %603 = vmatprep.subr.bf16.mxu0 %v660_v10 }
  0x39   : > { %604 = vmatpush3.bf16.msra.mxu0 %v660_v10 }
  0x3a   : > { %605 = vmatprep.subr.bf16.mxu0 %v661_v11 }
  0x3d   : > { %606 = vmatpush3.bf16.msra.mxu0 %v661_v11 }
  0x3e   : > { %607 = vmatprep.subr.bf16.mxu0 %v662_v12 }
  0x41   : > { %608 = vmatpush3.bf16.msra.mxu0 %v662_v12 }
  0x42   : > { %609 = vmatprep.subr.bf16.mxu0 %v663_v13 }
  0x45   : > { %610 = vmatpush3.bf16.msra.mxu0 %v663_v13 }
  0x48   : > { %612 = vmatmul.mubr.bf16.vlgmr.msra.gmra.mrb[0].mxu0 %v665_v14 }
 0x11b   : > { %v613_v17 = vpop.f32.mrb[0].mxu0  ;;  %418 = sbr.rel (%p560_p11) target bundleno = 304 (0x130), region = 81 }
 0x11c   : > { %v409_v19 = vadd.f32 %v613_v17, %v276_v15  ;;  %v392_v20 = vpop.f32.mrb[1].mxu0 }
 0x11d   : > { %v407_v22 = vadd.f32 %v392_v20, %v274_v16  ;;  %v614_v23 = vpop.f32.mrb[2].mxu0 }
 0x11e   : > { %413 = vst [vmem:[#allocation2 + $0x10] sm:$0xff] %v409_v19  ;;  %v410_v24 = vadd.f32 %v614_v23, %v277_v18  ;;  %v395_v25 = vpop.f32.mrb[3].mxu0 }
 0x11f   : > { %411 = vst [vmem:[#allocation2] sm:$0xff] %v407_v22  ;;  %v408_v26 = vadd.f32 %v395_v25, %v275_v21 }
 0x120   : > { %414 = vst [vmem:[#allocation2 + $0x18] sm:$0xff] %v410_v24 }
 0x121   : > { %412 = vst [vmem:[#allocation2 + $0x8] sm:$0xff] %v408_v26 }
 0x125   : > { %v421_v32 = vld [vmem:[#allocation2 + $0x10] sm:$0xff] }
 0x126   : > { %v419_v27 = vld [vmem:[#allocation2] sm:$0xff]  ;;  %v432_v34 = vadd.f32 %v561_v29, %v421_v32 }
 0x127   : > { %v430_v30 = vadd.f32 %v561_v29, %v419_v27  ;;  %v422_v33 = vld [vmem:[#allocation2 + $0x18] sm:$0xff] }
 0x128   : > { %v420_v28 = vld [vmem:[#allocation2 + $0x8] sm:$0xff]  ;;  %v433_v35 = vadd.f32 %v561_v29, %v422_v33  ;;  %v436_v38 = vmax.f32 %v432_v34, 0.0 }
 0x129   : > { %v431_v31 = vadd.f32 %v561_v29, %v420_v28  ;;  %v434_v36 = vmax.f32 %v430_v30, 0.0 }
 0x12a   : > { %v437_v39 = vmax.f32 %v433_v35, 0.0 }
 0x12b   : > { %v435_v37 = vmax.f32 %v431_v31, 0.0 }
 0x12c   : > { %v582_v41 = vpack.c.bf16 %v437_v39, %v436_v38 }
 0x12d   : > { %v577_v40 = vpack.c.bf16 %v435_v37, %v434_v36 }
 0x12e   : > { %584 = vst [vmem:[%s823_s3 + $0x8] sm:$0xff] %v582_v41  }
 0x12f   : > { %578 = vst [vmem:[%s823_s3] sm:$0xff] %v577_v40  }
 0x130 PF: > { %s13_s16 = sadd.s32 1, %s704_s16   ;;  %s824_s12 = smov %s692_s13 }
 0x131   : > { %p10_p12 = scmp.ge.s32.totalorder %s13_s16, 7   ;;  %s825_s13 = smov %s762_s20 }
 0x132   : > { %s826_s14 = smov %s700_s15  ;;  %s827_s15 = smov %s829_s17 }
 0x133   :  { %12 = sbr.rel (!%p10_p12) target bundleno = 3 (0x3), region = 119 }

// kernel: resnet4channel_forward.48
= control target key start
LH: loop header
LB: loop body
LE: loop exit
PB: predicated region body
PF: predicated region fallthrough
CT: control target
= control target key end

     0   :  { %s335_s1 = inlined_call_operand.vmem [shape: bf16[128,128], index: 1, kind: input, shape index: {}]   ;;  %s336_s0 = inlined_call_operand.vmem [shape: bf16[32,128], index: 0, kind: input, shape index: {}]   ;;  %s337_s2 = inlined_call_operand.vmem [shape: f32[1,128], index: 2, kind: input, shape index: {}]   ;;  %s338_s3 = inlined_call_operand.vmem [shape: bf16[32,128], index: 3, kind: output, shape index: {}]  }
   0x1   :  { %v266_v0 = vld [vmem:[%s335_s1] sm:$0xff]   ;;  %v267_v1 = vld [vmem:[%s335_s1 + $0x8] sm:$0xff]   ;;  %v268_v2 = vld [vmem:[%s335_s1 + $0x10] sm:$0xff]  }
   0x2   :  { %246 = vmatprep.subr.bf16.mxu0 %v266_v0  ;;  %v269_v3 = vld [vmem:[%s335_s1 + $0x18] sm:$0xff]   ;;  %v274_v4 = vld [vmem:[%s336_s0] sm:$0xff]   ;;  %v271_v6 = vld [vmem:[%s335_s1 + $0x28] sm:$0xff]  }
   0x3   :  { %247 = vmatpush3.bf16.msra.mxu0 %v266_v0  ;;  %262 = vmatprep.mubr.bf16.mxu0 %v274_v4  ;;  %v270_v5 = vld [vmem:[%s335_s1 + $0x20] sm:$0xff]   ;;  %v272_v7 = vld [vmem:[%s335_s1 + $0x30] sm:$0xff]   ;;  %v273_v8 = vld [vmem:[%s335_s1 + $0x38] sm:$0xff]  }
   0x4   :  { %248 = vmatprep.subr.bf16.mxu0 %v267_v1  ;;  %v275_v9 = vld [vmem:[%s336_s0 + $0x8] sm:$0xff]   ;;  %v216_v11 = vld [vmem:[%s337_s2] ss:$0 sm:$0xff] }
   0x7   :  { %249 = vmatpush3.bf16.msra.mxu0 %v267_v1 }
   0x8   :  { %250 = vmatprep.subr.bf16.mxu0 %v268_v2 }
   0xb   :  { %251 = vmatpush3.bf16.msra.mxu0 %v268_v2 }
   0xc   :  { %252 = vmatprep.subr.bf16.mxu0 %v269_v3 }
   0xf   :  { %253 = vmatpush3.bf16.msra.mxu0 %v269_v3 }
  0x10   :  { %254 = vmatprep.subr.bf16.mxu0 %v270_v5 }
  0x13   :  { %255 = vmatpush3.bf16.msra.mxu0 %v270_v5 }
  0x14   :  { %256 = vmatprep.subr.bf16.mxu0 %v271_v6 }
  0x17   :  { %257 = vmatpush3.bf16.msra.mxu0 %v271_v6 }
  0x18   :  { %258 = vmatprep.subr.bf16.mxu0 %v272_v7 }
  0x1b   :  { %259 = vmatpush3.bf16.msra.mxu0 %v272_v7 }
  0x1c   :  { %260 = vmatprep.subr.bf16.mxu0 %v273_v8 }
  0x1f   :  { %261 = vmatpush3.bf16.msra.mxu0 %v273_v8 }
  0x22   :  { %263 = vmatmul.mubr.bf16.vlgmr.msra.gmra.mrb[0].mxu0 %v275_v9 }
  0xf5   :  { %v264_v10 = vpop.f32.mrb[0].mxu0 }
  0xf6   :  { %v141_v12 = vpop.f32.mrb[1].mxu0  ;;  %v180_v14 = vadd.f32 %v264_v10, %v216_v11 }
  0xf7   :  { %v265_v13 = vpop.f32.mrb[2].mxu0  ;;  %v178_v17 = vadd.f32 %v216_v11, %v141_v12 }
  0xf8   :  { %v181_v15 = vadd.f32 %v265_v13, %v216_v11  ;;  %v144_v16 = vpop.f32.mrb[3].mxu0 }
  0xf9   :  { %v179_v18 = vadd.f32 %v216_v11, %v144_v16 }
  0xfa   :  { %v233_v19 = vpack.c.bf16 %v181_v15, %v180_v14 }
  0xfb   :  { %v228_v20 = vpack.c.bf16 %v179_v18, %v178_v17 }
  0xfc   :  { %235 = vst [vmem:[%s338_s3 + $0x8] sm:$0xff] %v233_v19  }
  0xfd   :  { %229 = vst [vmem:[%s338_s3] sm:$0xff] %v228_v20  }

// kernel: resnet4channel_forward.49
= control target key start
LH: loop header
LB: loop body
LE: loop exit
PB: predicated region body
PF: predicated region fallthrough
CT: control target
= control target key end

     0   :  { %s1093_s15 = smov 0   ;;  %s1095_s16 = smov 0   ;;  %s1209_s0 = inlined_call_operand.vmem [shape: bf16[32,1152], index: 0, kind: input, shape index: {}]   ;;  %s1210_s1 = inlined_call_operand.vmem [shape: bf16[1152,128], index: 1, kind: input, shape index: {}]   ;;  %s1211_s2 = inlined_call_operand.vmem [shape: f32[1,128], index: 2, kind: input, shape index: {}]   ;;  %s1212_s3 = inlined_call_operand.vmem [shape: bf16[32,128], index: 3, kind: input, shape index: {}]   ;;  %s1213_s4 = inlined_call_operand.vmem [shape: bf16[32,128], index: 4, kind: output, shape index: {}]  }
   0x1   :  { %s1097_s17 = smov 0   ;;  %s1099_s18 = smov 0  }
   0x2   :  { %s1101_s19 = smov 0  }
   0x3 LB: > { %s23_s20 = sadd.s32 1, %s1061_s18  ;;  %p42_p1 = scmp.ne.s32.totalorder %s1053_s16, %s1049_s15  ;;  %s1065_s19 = sphi %s1101_s19, %s14_s19   ;;  %s1061_s18 = sphi %s1099_s18, %s1217_s18   ;;  %s1057_s17 = sphi %s1097_s17, %s1216_s17   ;;  %s1053_s16 = sphi %s1095_s16, %s1215_s16   ;;  %s1049_s15 = sphi %s1093_s15, %s1214_s15  }
   0x4   : > { %p24_p0 = scmp.ge.s32.totalorder %s23_s20, 3  ;;  %p43_p2 = scmp.eq.s32.totalorder %s1065_s19, 0 }
   0x5   : > { %s35_s22 = sadd.s32 1, %s1053_s16  ;;  %p816_p5 = scmp.ge.s32.totalorder %s1065_s19, 3 }
   0x6   : > { %s1219_s20 = smov (%p24_p0, %s23_s20), 0  ;;  %p44_p3 = por %p43_p2, %p42_p1 }
   0x7   : > { %s31_s21 = ssub.s32 %s1061_s18, %s1219_s20  ;;  %179 = sbr.rel (%p816_p5) target bundleno = 23 (0x17), region = 24 }
   0x8   : > { %p33_p4 = scmp.eq.s32.totalorder %s31_s21, 0 }
   0xa   : > { %s1128_s23 = scalar_select %p33_p4, %s1053_s16, %s35_s22  }
   0xe   : > { %182 = sbr.rel (!%p44_p3) target bundleno = 23 (0x17), region = 28  ;;  %s184_s24 = sand.u32 (%p44_p3), 1, %s1053_s16  }
   0xf   : > { %s869_s25 = smul.u32 (%p44_p3), 12, %s1061_s18 }
  0x10   : > { %s952_s26 = smul.u32 (%p44_p3), 48, %s184_s24 }
  0x11   : > { %s192_s29 = scalar_lea.vmem (%p44_p3), %s1209_s0, %s869_s25 }
  0x12   : > { %v207_v0 = vld [vmem:[%s192_s29] sm:$0xff] (%p44_p3)  ;;  %v211_v2 = vld [vmem:[%s192_s29 + $0x48] sm:$0xff] (%p44_p3)  ;;  %s186_s30 = scalar_lea.vmem (%p44_p3), [#allocation3], %s952_s26  ;;  %v822_v6 = vld [vmem:[%s192_s29 + $0x50] sm:$0xf] (%p44_p3) }
  0x13   : > { %v209_v1 = vld [vmem:[%s192_s29 + $0x24] sm:$0xff] (%p44_p3)  ;;  %208 = vst [vmem:[%s186_s30] sm:$0xff] (%p44_p3), %v207_v0  ;;  %212 = vst [vmem:[%s186_s30 + $0x18] sm:$0xff] (%p44_p3), %v211_v2  ;;  %v213_v3 = vld [vmem:[%s192_s29 + $0x6c] sm:$0xff] (%p44_p3) }
  0x14   : > { %210 = vst [vmem:[%s186_s30 + $0xc] sm:$0xff] (%p44_p3), %v209_v1  ;;  %v818_v4 = vld [vmem:[%s192_s29 + $0x8] sm:$0xf] (%p44_p3)  ;;  %v820_v5 = vld [vmem:[%s192_s29 + $0x2c] sm:$0xf] (%p44_p3)  ;;  %214 = vst [vmem:[%s186_s30 + $0x24] sm:$0xff] (%p44_p3), %v213_v3 }
  0x15   : > { %819 = vst [vmem:[%s186_s30 + $0x8] sm:$0xf] %v818_v4  ;;  %821 = vst [vmem:[%s186_s30 + $0x14] sm:$0xf] %v820_v5  ;;  %v824_v7 = vld [vmem:[%s192_s29 + $0x74] sm:$0xf] }
  0x16   : > { %823 = vst [vmem:[%s186_s30 + $0x20] sm:$0xf] %v822_v6  ;;  %825 = vst [vmem:[%s186_s30 + $0x2c] sm:$0xf] %v824_v7 }
  0x17 PF: > { %p826_p6 = scmp.ge.s32.totalorder %s1065_s19, 1  ;;  %p243_p7 = scmp.lt.s32.totalorder %s1065_s19, 4 }
  0x19   : > { %p244_p8 = pnand %p826_p6, %p243_p7 }
  0x1a   : > { %s250_s5 = sand.u32 (!%p244_p8), 1, %s1049_s15   ;;  %s287_s6 = smul.u32 (!%p244_p8), 48, %s1057_s17 }
  0x1b   : > { %247 = sbr.rel (%p244_p8) target bundleno = 320 (0x140), region = 58  ;;  %p828_p10 = scmp.ne.s32.totalorder (!%p244_p8), %s1057_s17, 0 }
  0x1c   : > { %s953_s7 = smul.u32 (!%p244_p8), 48, %s250_s5  ;;  %p288_p9 = scmp.lt.s32.totalorder (!%p244_p8), %s287_s6, 143 }
  0x1e   : > { %s1145_s12 = scalar_lea.vmem (!%p244_p8), [#allocation3], %s953_s7 }
  0x22   : > { %s1221_s6 = smov (!%p288_p9, %s287_s6), 143  ;;  %309 = sbr.rel (%p828_p10) target bundleno = 41 (0x29), region = 66 }
  0x23   : > { %s827_s8 = sshll.u32 %s1221_s6, 2  ;;  %v1067_v8 = vmov (!%p828_p10), 0.0  }
  0x24   : > { %s1143_s11 = scalar_lea.vmem %s1210_s1, %s827_s8  ;;  %310 = vst [vmem:[#allocation2] sm:$0xff] (!%p828_p10), %v1067_v8  ;;  %311 = vst [vmem:[#allocation2 + $0x8] sm:$0xff] (!%p828_p10), %v1067_v8 }
  0x25   : > { %312 = vst [vmem:[#allocation2 + $0x10] sm:$0xff] (!%p828_p10), %v1067_v8  ;;  %313 = vst [vmem:[#allocation2 + $0x18] sm:$0xff] (!%p828_p10), %v1067_v8 }
  0x29 PF: > { %v995_v9 = vld [vmem:[%s1143_s11 + $0x40] sm:$0xff]   ;;  %v998_v12 = vld [vmem:[%s1143_s11 + $0x48] sm:$0xff]   ;;  %v1001_v15 = vld [vmem:[%s1143_s11 + $0x50] sm:$0xff]   ;;  %p859_p11 = scmp.ne.s32.totalorder %s1057_s17, 2 }
  0x2a   : > { %v996_v10 = vld [vmem:[%s1143_s11] sm:$0xff]   ;;  %894 = vmatprep.subr.bf16.mxu0 %v995_v9  ;;  %v999_v13 = vld [vmem:[%s1143_s11 + $0x8] sm:$0xff]   ;;  %v1002_v16 = vld [vmem:[%s1143_s11 + $0x10] sm:$0xff]  }
  0x2b   : > { %v997_v11 = vld [vmem:[%s1143_s11 + $0x80] sm:$0xff]   ;;  %895 = vmatpush3.bf16.msra.mxu0 %v996_v10  ;;  %v1000_v14 = vld [vmem:[%s1143_s11 + $0x88] sm:$0xff]   ;;  %v1003_v17 = vld [vmem:[%s1143_s11 + $0x90] sm:$0xff]  }
  0x2c   : > { %932 = vmatprep.subr.bf16.mxu1 %v997_v11  ;;  %896 = vmatprep.subr.bf16.mxu0 %v998_v12  ;;  %v1004_v18 = vld [vmem:[%s1143_s11 + $0x58] sm:$0xff]   ;;  %v1007_v21 = vld [vmem:[%s1143_s11 + $0x60] sm:$0xff]   ;;  %v1010_v24 = vld [vmem:[%s1143_s11 + $0x68] sm:$0xff]  }
  0x2d   : > { %933 = vmatpush3.bf16.msra.mxu1 %v997_v11  ;;  %v1005_v19 = vld [vmem:[%s1143_s11 + $0x18] sm:$0xff]   ;;  %v1009_v22 = vld [vmem:[%s1143_s11 + $0xa0] sm:$0xff]   ;;  %v1012_v25 = vld [vmem:[%s1143_s11 + $0xa8] sm:$0xff]  }
  0x2e   : > { %934 = vmatprep.subr.bf16.mxu1 %v1000_v14  ;;  %v1006_v20 = vld [vmem:[%s1143_s11 + $0x98] sm:$0xff]   ;;  %v1008_v23 = vld [vmem:[%s1143_s11 + $0x20] sm:$0xff]   ;;  %v1011_v26 = vld [vmem:[%s1143_s11 + $0x28] sm:$0xff]  }
  0x2f   : > { %897 = vmatpush3.bf16.msra.mxu0 %v999_v13  ;;  %v1013_v27 = vld [vmem:[%s1143_s11 + $0x70] sm:$0xff]   ;;  %v1016_v30 = vld [vmem:[%s1143_s11 + $0x78] sm:$0xff]   ;;  %v314_v45 = vld [vmem:[#allocation2] sm:$0xff] }
  0x30   : > { %898 = vmatprep.subr.bf16.mxu0 %v1001_v15  ;;  %v1014_v28 = vld [vmem:[%s1143_s11 + $0x30] sm:$0xff]   ;;  %v1018_v31 = vld [vmem:[%s1143_s11 + $0xb8] sm:$0xff]   ;;  %v315_v50 = vld [vmem:[#allocation2 + $0x8] sm:$0xff] }
  0x31   : > { %935 = vmatpush3.bf16.msra.mxu1 %v1000_v14  ;;  %v1015_v29 = vld [vmem:[%s1143_s11 + $0xb0] sm:$0xff]   ;;  %v1017_v34 = vld [vmem:[%s1143_s11 + $0x38] sm:$0xff]   ;;  %v860_v5 = vld [vmem:[%s1211_s2] ss:$0 sm:$0xff] (!%p859_p11) }
  0x32   : > { %936 = vmatprep.subr.bf16.mxu1 %v1003_v17  ;;  %v1021_v32 = vld [vmem:[%s1145_s12 + $0x4] ss:$12 sps:$4 sm:$0xff]   ;;  %v1022_v33 = vld [vmem:[%s1145_s12 + $0x8] ss:$12 sps:$4 sm:$0xff]   ;;  %v1019_v35 = vld [vmem:[%s1145_s12] ss:$12 sps:$4 sm:$0xff]  }
  0x33   : > { %899 = vmatpush3.bf16.msra.mxu0 %v1002_v16  ;;  %582 = vmatprep.mubr.bf16.mxu0 %v1021_v32  ;;  %v1024_v36 = vld [vmem:[%s1145_s12 + $0x1c] ss:$12 sps:$4 sm:$0xff]   ;;  %v1023_v37 = vld [vmem:[%s1145_s12 + $0x20] ss:$12 sps:$4 sm:$0xff]   ;;  %v1026_v38 = vld [vmem:[%s1145_s12 + $0x18] ss:$12 sps:$4 sm:$0xff]  }
  0x34   : > { %900 = vmatprep.subr.bf16.mxu0 %v1004_v18  ;;  %948 = vmatprep.mubr.bf16.mxu1 %v1022_v33  ;;  %v316_v59 = vld [vmem:[#allocation2 + $0x10] sm:$0xff]  ;;  %v317_v63 = vld [vmem:[#allocation2 + $0x18] sm:$0xff]  ;;  %v875_v8 = vld [vmem:[%s1212_s3] sm:$0xff] (!%p859_p11)  }
  0x35   : > { %937 = vmatpush3.bf16.msra.mxu1 %v1003_v17  ;;  %v876_v11 = vunpack.c.l.bf16 (!%p859_p11), %v875_v8  ;;  %v877_v12 = vunpack.c.h.bf16 (!%p859_p11), %v875_v8  ;;  %v892_v15 = vld [vmem:[%s1212_s3 + $0x8] sm:$0xff] (!%p859_p11)  }
  0x36   : > { %938 = vmatprep.subr.bf16.mxu1 %v1006_v20  ;;  %v880_v16 = vunpack.c.l.bf16 (!%p859_p11), %v892_v15  ;;  %v881_v17 = vunpack.c.h.bf16 (!%p859_p11), %v892_v15 }
  0x37   : > { %901 = vmatpush3.bf16.msra.mxu0 %v1005_v19 }
  0x38   : > { %902 = vmatprep.subr.bf16.mxu0 %v1007_v21 }
  0x39   : > { %939 = vmatpush3.bf16.msra.mxu1 %v1006_v20 }
  0x3a   : > { %940 = vmatprep.subr.bf16.mxu1 %v1009_v22 }
  0x3b   : > { %903 = vmatpush3.bf16.msra.mxu0 %v1008_v23 }
  0x3c   : > { %904 = vmatprep.subr.bf16.mxu0 %v1010_v24 }
  0x3d   : > { %941 = vmatpush3.bf16.msra.mxu1 %v1009_v22 }
  0x3e   : > { %942 = vmatprep.subr.bf16.mxu1 %v1012_v25 }
  0x3f   : > { %905 = vmatpush3.bf16.msra.mxu0 %v1011_v26 }
  0x40   : > { %906 = vmatprep.subr.bf16.mxu0 %v1013_v27 }
  0x41   : > { %943 = vmatpush3.bf16.msra.mxu1 %v1012_v25 }
  0x42   : > { %944 = vmatprep.subr.bf16.mxu1 %v1015_v29 }
  0x43   : > { %907 = vmatpush3.bf16.msra.mxu0 %v1014_v28 }
  0x44   : > { %908 = vmatprep.subr.bf16.mxu0 %v1016_v30 }
  0x45   : > { %945 = vmatpush3.bf16.msra.mxu1 %v1015_v29 }
  0x46   : > { %946 = vmatprep.subr.bf16.mxu1 %v1018_v31 }
  0x47   : > { %909 = vmatpush3.bf16.msra.mxu0 %v1017_v34 }
  0x49   : > { %947 = vmatpush3.bf16.msra.mxu1 %v1018_v31 }
  0x4a   : > { %583 = vmatmul.mubr.bf16.vlgmr.msra.gmra.mrb[0].mxu0 %v1019_v35 }
  0x4b   : > { %590 = vmatprep.mubr.bf16.mxu0 %v1024_v36 }
  0x4c   : > { %949 = vmatmul.mubr.bf16.vlgmr.msra.gmra.mrb[0].mxu1 %v1023_v37 }
  0x52   : > { %591 = vmatmul.mubr.bf16.gmra.mrb[4].mxu0 %v1026_v38 }
 0x11d   : > { %v910_v39 = vpop.f32.mrb[0].mxu0 }
 0x11e   : > { %v911_v40 = vpop.f32.mrb[1].mxu0 }
 0x11f   : > { %v912_v41 = vadd.f32 %v911_v40, %v910_v39  ;;  %v913_v42 = vpop.f32.mrb[2].mxu0  ;;  %v950_v43 = vpop.f32.mrb[0].mxu1 }
 0x120   : > { %v914_v44 = vpop.f32.mrb[3].mxu0  ;;  %v633_v46 = vpop.f32.mrb[1].mxu1 }
 0x121   : > { %v915_v47 = vadd.f32 %v914_v44, %v913_v42  ;;  %v634_v48 = vadd.f32 %v912_v41, %v633_v46  ;;  %v951_v49 = vpop.f32.mrb[2].mxu1 }
 0x122   : > { %v636_v51 = vpop.f32.mrb[3].mxu1 }
 0x123   : > { %v648_v52 = vadd.f32 %v634_v48, %v314_v45  ;;  %v637_v53 = vadd.f32 %v915_v47, %v636_v51 }
 0x125   : > { %652 = vst [vmem:[#allocation2] sm:$0xff] %v648_v52  ;;  %v649_v54 = vadd.f32 %v637_v53, %v315_v50  ;;  %v916_v55 = vpop.f32.mrb[4].mxu0 }
 0x126   : > { %v917_v56 = vpop.f32.mrb[5].mxu0 }
 0x127   : > { %653 = vst [vmem:[#allocation2 + $0x8] sm:$0xff] %v649_v54  ;;  %v918_v57 = vadd.f32 %v917_v56, %v916_v55  ;;  %v919_v58 = vpop.f32.mrb[6].mxu0 }
 0x128   : > { %v920_v60 = vpop.f32.mrb[7].mxu0 }
 0x129   : > { %v642_v61 = vadd.f32 %v950_v43, %v918_v57  ;;  %v921_v62 = vadd.f32 %v920_v60, %v919_v58  ;;  %659 = sbr.rel (%p859_p11) target bundleno = 320 (0x140), region = 70 }
 0x12b   : > { %v650_v0 = vadd.f32 %v642_v61, %v316_v59  ;;  %v645_v1 = vadd.f32 %v951_v49, %v921_v62 }
 0x12c   : > { %v660_v3 = vld [vmem:[#allocation2] sm:$0xff] (!%p859_p11) }
 0x12d   : > { %654 = vst [vmem:[#allocation2 + $0x10] sm:$0xff] %v650_v0  ;;  %v651_v2 = vadd.f32 %v645_v1, %v317_v63  ;;  %v671_v6 = vadd.f32 (!%p859_p11), %v860_v5, %v660_v3 }
 0x12e   : > { %v661_v4 = vld [vmem:[#allocation2 + $0x8] sm:$0xff] (!%p859_p11) }
 0x12f   : > { %655 = vst [vmem:[#allocation2 + $0x18] sm:$0xff] %v651_v2  ;;  %v672_v7 = vadd.f32 (!%p859_p11), %v860_v5, %v661_v4  ;;  %v683_v18 = vadd.f32 (!%p859_p11), %v876_v11, %v671_v6 }
 0x131   : > { %v684_v19 = vadd.f32 %v877_v12, %v672_v7  ;;  %v687_v22 = vmax.f32 %v683_v18, 0.0 }
 0x133   : > { %v688_v23 = vmax.f32 %v684_v19, 0.0 }
 0x134   : > { %v662_v9 = vld [vmem:[#allocation2 + $0x10] sm:$0xff] }
 0x135   : > { %v673_v13 = vadd.f32 %v860_v5, %v662_v9  ;;  %v885_v26 = vpack.c.bf16 %v688_v23, %v687_v22 }
 0x136   : > { %v663_v10 = vld [vmem:[#allocation2 + $0x18] sm:$0xff] }
 0x137   : > { %v674_v14 = vadd.f32 %v860_v5, %v663_v10  ;;  %v685_v20 = vadd.f32 %v880_v16, %v673_v13  ;;  %886 = vst [vmem:[%s1213_s4] sm:$0xff] %v885_v26  }
 0x139   : > { %v686_v21 = vadd.f32 %v881_v17, %v674_v14  ;;  %v689_v24 = vmax.f32 %v685_v20, 0.0 }
 0x13b   : > { %v690_v25 = vmax.f32 %v686_v21, 0.0 }
 0x13d   : > { %v890_v27 = vpack.c.bf16 %v690_v25, %v689_v24 }
 0x13f   : > { %893 = vst [vmem:[%s1213_s4 + $0x8] sm:$0xff] %v890_v27  }
 0x140 PF: > { %s14_s19 = sadd.s32 1, %s1065_s19   ;;  %s1214_s15 = smov %s1053_s16 }
 0x141   : > { %p11_p12 = scmp.ge.s32.totalorder %s14_s19, 5   ;;  %s1215_s16 = smov %s1128_s23 }
 0x142   : > { %s1216_s17 = smov %s1061_s18  ;;  %s1217_s18 = smov %s1219_s20 }
 0x143   :  { %13 = sbr.rel (!%p11_p12) target bundleno = 3 (0x3), region = 117 }

// kernel: resnet4channel_forward.50
= control target key start
LH: loop header
LB: loop body
LE: loop exit
PB: predicated region body
PF: predicated region fallthrough
CT: control target
= control target key end

     0   :  { %s1002_s12 = smov 0   ;;  %s1004_s13 = smov 0   ;;  %s1112_s0 = inlined_call_operand.vmem [shape: bf16[32,1152], index: 0, kind: input, shape index: {}]   ;;  %s1113_s1 = inlined_call_operand.vmem [shape: bf16[1152,128], index: 1, kind: input, shape index: {}]   ;;  %s1114_s2 = inlined_call_operand.vmem [shape: f32[1,128], index: 2, kind: input, shape index: {}]   ;;  %s1115_s3 = inlined_call_operand.vmem [shape: bf16[32,128], index: 3, kind: output, shape index: {}]  }
   0x1   :  { %s1006_s14 = smov 0   ;;  %s1008_s15 = smov 0  }
   0x2   :  { %s1010_s16 = smov 0  }
   0x3 LB: > { %s22_s17 = sadd.s32 1, %s975_s15  ;;  %p41_p1 = scmp.ne.s32.totalorder %s967_s13, %s963_s12  ;;  %s979_s16 = sphi %s1010_s16, %s13_s16   ;;  %s975_s15 = sphi %s1008_s15, %s1119_s15   ;;  %s971_s14 = sphi %s1006_s14, %s1118_s14   ;;  %s967_s13 = sphi %s1004_s13, %s1117_s13   ;;  %s963_s12 = sphi %s1002_s12, %s1116_s12  }
   0x4   : > { %p23_p0 = scmp.ge.s32.totalorder %s22_s17, 3  ;;  %p42_p2 = scmp.eq.s32.totalorder %s979_s16, 0 }
   0x5   : > { %s34_s19 = sadd.s32 1, %s967_s13  ;;  %p739_p5 = scmp.ge.s32.totalorder %s979_s16, 3 }
   0x6   : > { %s1121_s17 = smov (%p23_p0, %s22_s17), 0  ;;  %p43_p3 = por %p42_p2, %p41_p1 }
   0x7   : > { %s30_s18 = ssub.s32 %s975_s15, %s1121_s17  ;;  %143 = sbr.rel (%p739_p5) target bundleno = 23 (0x17), region = 20 }
   0x8   : > { %p32_p4 = scmp.eq.s32.totalorder %s30_s18, 0 }
   0xa   : > { %s1037_s20 = scalar_select %p32_p4, %s967_s13, %s34_s19  }
   0xe   : > { %146 = sbr.rel (!%p43_p3) target bundleno = 23 (0x17), region = 24  ;;  %s148_s21 = sand.u32 (%p43_p3), 1, %s967_s13  }
   0xf   : > { %s792_s22 = smul.u32 (%p43_p3), 12, %s975_s15 }
  0x10   : > { %s866_s23 = smul.u32 (%p43_p3), 48, %s148_s21 }
  0x11   : > { %s156_s26 = scalar_lea.vmem (%p43_p3), %s1112_s0, %s792_s22 }
  0x12   : > { %v171_v0 = vld [vmem:[%s156_s26] sm:$0xff] (%p43_p3)  ;;  %v175_v2 = vld [vmem:[%s156_s26 + $0x48] sm:$0xff] (%p43_p3)  ;;  %s150_s27 = scalar_lea.vmem (%p43_p3), [#allocation3], %s866_s23  ;;  %v745_v6 = vld [vmem:[%s156_s26 + $0x50] sm:$0xf] (%p43_p3) }
  0x13   : > { %v173_v1 = vld [vmem:[%s156_s26 + $0x24] sm:$0xff] (%p43_p3)  ;;  %172 = vst [vmem:[%s150_s27] sm:$0xff] (%p43_p3), %v171_v0  ;;  %176 = vst [vmem:[%s150_s27 + $0x18] sm:$0xff] (%p43_p3), %v175_v2  ;;  %v177_v3 = vld [vmem:[%s156_s26 + $0x6c] sm:$0xff] (%p43_p3) }
  0x14   : > { %174 = vst [vmem:[%s150_s27 + $0xc] sm:$0xff] (%p43_p3), %v173_v1  ;;  %v741_v4 = vld [vmem:[%s156_s26 + $0x8] sm:$0xf] (%p43_p3)  ;;  %v743_v5 = vld [vmem:[%s156_s26 + $0x2c] sm:$0xf] (%p43_p3)  ;;  %178 = vst [vmem:[%s150_s27 + $0x24] sm:$0xff] (%p43_p3), %v177_v3 }
  0x15   : > { %742 = vst [vmem:[%s150_s27 + $0x8] sm:$0xf] %v741_v4  ;;  %744 = vst [vmem:[%s150_s27 + $0x14] sm:$0xf] %v743_v5  ;;  %v747_v7 = vld [vmem:[%s156_s26 + $0x74] sm:$0xf] }
  0x16   : > { %746 = vst [vmem:[%s150_s27 + $0x20] sm:$0xf] %v745_v6  ;;  %748 = vst [vmem:[%s150_s27 + $0x2c] sm:$0xf] %v747_v7 }
  0x17 PF: > { %p749_p6 = scmp.ge.s32.totalorder %s979_s16, 1  ;;  %p207_p7 = scmp.lt.s32.totalorder %s979_s16, 4 }
  0x19   : > { %p208_p8 = pnand %p749_p6, %p207_p7 }
  0x1a   : > { %s214_s28 = sand.u32 (!%p208_p8), 1, %s963_s12   ;;  %s244_s29 = smul.u32 (!%p208_p8), 48, %s971_s14 }
  0x1b   : > { %211 = sbr.rel (%p208_p8) target bundleno = 318 (0x13e), region = 54  ;;  %p751_p10 = scmp.ne.s32.totalorder (!%p208_p8), %s971_s14, 0 }
  0x1c   : > { %s867_s30 = smul.u32 (!%p208_p8), 48, %s214_s28  ;;  %p245_p9 = scmp.lt.s32.totalorder (!%p208_p8), %s244_s29, 143 }
  0x1e   : > { %s1054_s8 = scalar_lea.vmem (!%p208_p8), [#allocation3], %s867_s30 }
  0x22   : > { %s1123_s29 = smov (!%p245_p9, %s244_s29), 143  ;;  %260 = sbr.rel (%p751_p10) target bundleno = 41 (0x29), region = 62 }
  0x23   : > { %s750_s4 = sshll.u32 %s1123_s29, 2  ;;  %v981_v8 = vmov (!%p751_p10), 0.0  }
  0x24   : > { %s1052_s7 = scalar_lea.vmem %s1113_s1, %s750_s4  ;;  %261 = vst [vmem:[#allocation2] sm:$0xff] (!%p751_p10), %v981_v8  ;;  %262 = vst [vmem:[#allocation2 + $0x8] sm:$0xff] (!%p751_p10), %v981_v8 }
  0x25   : > { %263 = vst [vmem:[#allocation2 + $0x10] sm:$0xff] (!%p751_p10), %v981_v8  ;;  %264 = vst [vmem:[#allocation2 + $0x18] sm:$0xff] (!%p751_p10), %v981_v8 }
  0x29 PF: > { %v909_v9 = vld [vmem:[%s1052_s7 + $0x40] sm:$0xff]   ;;  %v912_v12 = vld [vmem:[%s1052_s7 + $0x48] sm:$0xff]   ;;  %v915_v15 = vld [vmem:[%s1052_s7 + $0x50] sm:$0xff]   ;;  %p782_p11 = scmp.ne.s32.totalorder %s971_s14, 2 }
  0x2a   : > { %v910_v10 = vld [vmem:[%s1052_s7] sm:$0xff]   ;;  %808 = vmatprep.subr.bf16.mxu0 %v909_v9  ;;  %v913_v13 = vld [vmem:[%s1052_s7 + $0x8] sm:$0xff]   ;;  %v916_v16 = vld [vmem:[%s1052_s7 + $0x10] sm:$0xff]  }
  0x2b   : > { %v911_v11 = vld [vmem:[%s1052_s7 + $0x80] sm:$0xff]   ;;  %809 = vmatpush3.bf16.msra.mxu0 %v910_v10  ;;  %v914_v14 = vld [vmem:[%s1052_s7 + $0x88] sm:$0xff]   ;;  %v917_v17 = vld [vmem:[%s1052_s7 + $0x90] sm:$0xff]  }
  0x2c   : > { %846 = vmatprep.subr.bf16.mxu1 %v911_v11  ;;  %810 = vmatprep.subr.bf16.mxu0 %v912_v12  ;;  %v918_v18 = vld [vmem:[%s1052_s7 + $0x58] sm:$0xff]   ;;  %v921_v21 = vld [vmem:[%s1052_s7 + $0x60] sm:$0xff]   ;;  %v924_v24 = vld [vmem:[%s1052_s7 + $0x68] sm:$0xff]  }
  0x2d   : > { %847 = vmatpush3.bf16.msra.mxu1 %v911_v11  ;;  %v919_v19 = vld [vmem:[%s1052_s7 + $0x18] sm:$0xff]   ;;  %v923_v22 = vld [vmem:[%s1052_s7 + $0xa0] sm:$0xff]   ;;  %v926_v25 = vld [vmem:[%s1052_s7 + $0xa8] sm:$0xff]  }
  0x2e   : > { %848 = vmatprep.subr.bf16.mxu1 %v914_v14  ;;  %v920_v20 = vld [vmem:[%s1052_s7 + $0x98] sm:$0xff]   ;;  %v922_v23 = vld [vmem:[%s1052_s7 + $0x20] sm:$0xff]   ;;  %v925_v26 = vld [vmem:[%s1052_s7 + $0x28] sm:$0xff]  }
  0x2f   : > { %811 = vmatpush3.bf16.msra.mxu0 %v913_v13  ;;  %v927_v27 = vld [vmem:[%s1052_s7 + $0x70] sm:$0xff]   ;;  %v930_v30 = vld [vmem:[%s1052_s7 + $0x78] sm:$0xff]   ;;  %v265_v45 = vld [vmem:[#allocation2] sm:$0xff] }
  0x30   : > { %812 = vmatprep.subr.bf16.mxu0 %v915_v15  ;;  %v928_v28 = vld [vmem:[%s1052_s7 + $0x30] sm:$0xff]   ;;  %v932_v31 = vld [vmem:[%s1052_s7 + $0xb8] sm:$0xff]   ;;  %v266_v50 = vld [vmem:[#allocation2 + $0x8] sm:$0xff] }
  0x31   : > { %849 = vmatpush3.bf16.msra.mxu1 %v914_v14  ;;  %v929_v29 = vld [vmem:[%s1052_s7 + $0xb0] sm:$0xff]   ;;  %v931_v34 = vld [vmem:[%s1052_s7 + $0x38] sm:$0xff]   ;;  %v783_v5 = vld [vmem:[%s1114_s2] ss:$0 sm:$0xff] (!%p782_p11) }
  0x32   : > { %850 = vmatprep.subr.bf16.mxu1 %v917_v17  ;;  %v935_v32 = vld [vmem:[%s1054_s8 + $0x4] ss:$12 sps:$4 sm:$0xff]   ;;  %v936_v33 = vld [vmem:[%s1054_s8 + $0x8] ss:$12 sps:$4 sm:$0xff]   ;;  %v933_v35 = vld [vmem:[%s1054_s8] ss:$12 sps:$4 sm:$0xff]  }
  0x33   : > { %813 = vmatpush3.bf16.msra.mxu0 %v916_v16  ;;  %533 = vmatprep.mubr.bf16.mxu0 %v935_v32  ;;  %v938_v36 = vld [vmem:[%s1054_s8 + $0x1c] ss:$12 sps:$4 sm:$0xff]   ;;  %v937_v37 = vld [vmem:[%s1054_s8 + $0x20] ss:$12 sps:$4 sm:$0xff]   ;;  %v940_v38 = vld [vmem:[%s1054_s8 + $0x18] ss:$12 sps:$4 sm:$0xff]  }
  0x34   : > { %814 = vmatprep.subr.bf16.mxu0 %v918_v18  ;;  %862 = vmatprep.mubr.bf16.mxu1 %v936_v33  ;;  %v267_v59 = vld [vmem:[#allocation2 + $0x10] sm:$0xff]  ;;  %v268_v63 = vld [vmem:[#allocation2 + $0x18] sm:$0xff] }
  0x35   : > { %851 = vmatpush3.bf16.msra.mxu1 %v917_v17 }
  0x36   : > { %852 = vmatprep.subr.bf16.mxu1 %v920_v20 }
  0x37   : > { %815 = vmatpush3.bf16.msra.mxu0 %v919_v19 }
  0x38   : > { %816 = vmatprep.subr.bf16.mxu0 %v921_v21 }
  0x39   : > { %853 = vmatpush3.bf16.msra.mxu1 %v920_v20 }
  0x3a   : > { %854 = vmatprep.subr.bf16.mxu1 %v923_v22 }
  0x3b   : > { %817 = vmatpush3.bf16.msra.mxu0 %v922_v23 }
  0x3c   : > { %818 = vmatprep.subr.bf16.mxu0 %v924_v24 }
  0x3d   : > { %855 = vmatpush3.bf16.msra.mxu1 %v923_v22 }
  0x3e   : > { %856 = vmatprep.subr.bf16.mxu1 %v926_v25 }
  0x3f   : > { %819 = vmatpush3.bf16.msra.mxu0 %v925_v26 }
  0x40   : > { %820 = vmatprep.subr.bf16.mxu0 %v927_v27 }
  0x41   : > { %857 = vmatpush3.bf16.msra.mxu1 %v926_v25 }
  0x42   : > { %858 = vmatprep.subr.bf16.mxu1 %v929_v29 }
  0x43   : > { %821 = vmatpush3.bf16.msra.mxu0 %v928_v28 }
  0x44   : > { %822 = vmatprep.subr.bf16.mxu0 %v930_v30 }
  0x45   : > { %859 = vmatpush3.bf16.msra.mxu1 %v929_v29 }
  0x46   : > { %860 = vmatprep.subr.bf16.mxu1 %v932_v31 }
  0x47   : > { %823 = vmatpush3.bf16.msra.mxu0 %v931_v34 }
  0x49   : > { %861 = vmatpush3.bf16.msra.mxu1 %v932_v31 }
  0x4a   : > { %534 = vmatmul.mubr.bf16.vlgmr.msra.gmra.mrb[0].mxu0 %v933_v35 }
  0x4b   : > { %541 = vmatprep.mubr.bf16.mxu0 %v938_v36 }
  0x4c   : > { %863 = vmatmul.mubr.bf16.vlgmr.msra.gmra.mrb[0].mxu1 %v937_v37 }
  0x52   : > { %542 = vmatmul.mubr.bf16.gmra.mrb[4].mxu0 %v940_v38 }
 0x11d   : > { %v824_v39 = vpop.f32.mrb[0].mxu0 }
 0x11e   : > { %v825_v40 = vpop.f32.mrb[1].mxu0 }
 0x11f   : > { %v826_v41 = vadd.f32 %v825_v40, %v824_v39  ;;  %v827_v42 = vpop.f32.mrb[2].mxu0  ;;  %v864_v43 = vpop.f32.mrb[0].mxu1 }
 0x120   : > { %v828_v44 = vpop.f32.mrb[3].mxu0  ;;  %v584_v46 = vpop.f32.mrb[1].mxu1 }
 0x121   : > { %v829_v47 = vadd.f32 %v828_v44, %v827_v42  ;;  %v585_v48 = vadd.f32 %v826_v41, %v584_v46  ;;  %v865_v49 = vpop.f32.mrb[2].mxu1 }
 0x122   : > { %v587_v51 = vpop.f32.mrb[3].mxu1 }
 0x123   : > { %v599_v52 = vadd.f32 %v585_v48, %v265_v45  ;;  %v588_v53 = vadd.f32 %v829_v47, %v587_v51 }
 0x125   : > { %603 = vst [vmem:[#allocation2] sm:$0xff] %v599_v52  ;;  %v600_v54 = vadd.f32 %v588_v53, %v266_v50  ;;  %v830_v55 = vpop.f32.mrb[4].mxu0 }
 0x126   : > { %v831_v56 = vpop.f32.mrb[5].mxu0 }
 0x127   : > { %604 = vst [vmem:[#allocation2 + $0x8] sm:$0xff] %v600_v54  ;;  %v832_v57 = vadd.f32 %v831_v56, %v830_v55  ;;  %v833_v58 = vpop.f32.mrb[6].mxu0 }
 0x128   : > { %v834_v60 = vpop.f32.mrb[7].mxu0 }
 0x129   : > { %v593_v61 = vadd.f32 %v864_v43, %v832_v57  ;;  %v835_v62 = vadd.f32 %v834_v60, %v833_v58  ;;  %610 = sbr.rel (%p782_p11) target bundleno = 318 (0x13e), region = 66 }
 0x12b   : > { %v601_v0 = vadd.f32 %v593_v61, %v267_v59  ;;  %v596_v1 = vadd.f32 %v865_v49, %v835_v62 }
 0x12c   : > { %v611_v3 = vld [vmem:[#allocation2] sm:$0xff] (!%p782_p11) }
 0x12d   : > { %605 = vst [vmem:[#allocation2 + $0x10] sm:$0xff] %v601_v0  ;;  %v602_v2 = vadd.f32 %v596_v1, %v268_v63  ;;  %v622_v6 = vadd.f32 (!%p782_p11), %v783_v5, %v611_v3 }
 0x12e   : > { %v612_v4 = vld [vmem:[#allocation2 + $0x8] sm:$0xff] (!%p782_p11) }
 0x12f   : > { %606 = vst [vmem:[#allocation2 + $0x18] sm:$0xff] %v602_v2  ;;  %v623_v7 = vadd.f32 (!%p782_p11), %v783_v5, %v612_v4  ;;  %v626_v12 = vmax.f32 (!%p782_p11), %v622_v6, 0.0 }
 0x131   : > { %v627_v13 = vmax.f32 %v623_v7, 0.0 }
 0x133   : > { %v800_v16 = vpack.c.bf16 %v627_v13, %v626_v12 }
 0x134   : > { %v613_v8 = vld [vmem:[#allocation2 + $0x10] sm:$0xff] }
 0x135   : > { %v624_v10 = vadd.f32 %v783_v5, %v613_v8  ;;  %801 = vst [vmem:[%s1115_s3] sm:$0xff] %v800_v16  }
 0x136   : > { %v614_v9 = vld [vmem:[#allocation2 + $0x18] sm:$0xff] }
 0x137   : > { %v625_v11 = vadd.f32 %v783_v5, %v614_v9  ;;  %v628_v14 = vmax.f32 %v624_v10, 0.0 }
 0x139   : > { %v629_v15 = vmax.f32 %v625_v11, 0.0 }
 0x13b   : > { %v805_v17 = vpack.c.bf16 %v629_v15, %v628_v14 }
 0x13d   : > { %807 = vst [vmem:[%s1115_s3 + $0x8] sm:$0xff] %v805_v17  }
 0x13e PF: > { %s13_s16 = sadd.s32 1, %s979_s16   ;;  %s1116_s12 = smov %s967_s13 }
 0x13f   : > { %p10_p12 = scmp.ge.s32.totalorder %s13_s16, 5   ;;  %s1117_s13 = smov %s1037_s20 }
 0x140   : > { %s1118_s14 = smov %s975_s15  ;;  %s1119_s15 = smov %s1121_s17 }
 0x141   :  { %12 = sbr.rel (!%p10_p12) target bundleno = 3 (0x3), region = 110 }

// kernel: resnet4channel_forward.56
= control target key start
LH: loop header
LB: loop body
LE: loop exit
PB: predicated region body
PF: predicated region fallthrough
CT: control target
= control target key end

     0   :  { %s943_s12 = smov 0   ;;  %s945_s13 = smov 0   ;;  %s1042_s0 = inlined_call_operand.vmem [shape: bf16[8,1152], index: 0, kind: input, shape index: {}]   ;;  %s1043_s1 = inlined_call_operand.vmem [shape: bf16[1152,256], index: 1, kind: input, shape index: {}]   ;;  %s1044_s2 = inlined_call_operand.vmem [shape: f32[1,256], index: 2, kind: input, shape index: {}]   ;;  %s1045_s3 = inlined_call_operand.vmem [shape: bf16[8,256], index: 3, kind: output, shape index: {}]  }
   0x1   :  { %s947_s14 = smov 0  }
   0x2 LB: > { %s22_s15 = sadd.s32 1, %s915_s13  ;;  %p733_p0 = scmp.ge.s32.totalorder %s919_s14, 1  ;;  %s919_s14 = sphi %s947_s14, %s13_s14   ;;  %s915_s13 = sphi %s945_s13, %s1047_s13   ;;  %s911_s12 = sphi %s943_s12, %s1046_s12  }
   0x3   : > { %p23_p1 = scmp.ge.s32.totalorder %s22_s15, 3  ;;  %p168_p2 = scmp.lt.s32.totalorder %s919_s14, 4 }
   0x5   : > { %s1049_s15 = smov (%p23_p1, %s22_s15), 0  ;;  %p169_p3 = pnand %p733_p0, %p168_p2 }
   0x6   : > { %s202_s16 = smul.u32 (!%p169_p3), 3, %s911_s12  ;;  %p737_p6 = scmp.ne.s32.totalorder (!%p169_p3), %s911_s12, 0 }
   0x7   : > { %172 = sbr.rel (%p169_p3) target bundleno = 321 (0x141), region = 32 }
   0x8   : > { %s212_s17 = smul.u32 (!%p169_p3), 48, %s911_s12  ;;  %p205_p4 = scmp.lt.s32.totalorder (!%p169_p3), %s202_s16, 8 }
   0xa   : > { %p213_p5 = scmp.lt.s32.totalorder (!%p169_p3), %s212_s17, 143 }
   0xe   : > { %s1051_s16 = smov (!%p205_p4, %s202_s16), 8  ;;  %s1053_s17 = smov (!%p213_p5, %s212_s17), 143 }
   0xf   : > { %s734_s18 = sshll.u32 %s1051_s16, 2  ;;  %s794_s22 = sshll.u32 %s1053_s17, 3  ;;  %v921_v0 = vmov (!%p737_p6), 0.0  }
  0x10   : > { %s968_s21 = scalar_lea.vmem %s1042_s0, %s734_s18  ;;  %s973_s25 = scalar_lea.vmem %s1043_s1, %s794_s22  ;;  %229 = vst [vmem:[#allocation2] sm:$0xff] (!%p737_p6), %v921_v0  ;;  %230 = vst [vmem:[#allocation2 + $0x8] sm:$0xff] (!%p737_p6), %v921_v0 }
  0x11   : > { %228 = sbr.rel (%p737_p6) target bundleno = 24 (0x18), region = 36 }
  0x18 PF: > { %v822_v1 = vld [vmem:[%s973_s25 + $0x4] ss:$8 sps:$4 sm:$0xff]   ;;  %v824_v2 = vld [vmem:[%s973_s25] ss:$8 sps:$4 sm:$0xff]   ;;  %v922_v3 = vmov 0   ;;  %p789_p7 = scmp.ne.s32.totalorder %s911_s12, 2 }
  0x19   : > { %607 = vmatprep.mubr.bf16.mxu1 %v922_v3  ;;  %534 = vmatprep.subr.bf16.mxu0 %v822_v1  ;;  %v825_v4 = vld [vmem:[%s973_s25 + $0x14] ss:$8 sps:$4 sm:$0xff]   ;;  %v827_v5 = vld [vmem:[%s973_s25 + $0x10] ss:$8 sps:$4 sm:$0xff]   ;;  %v828_v6 = vld [vmem:[%s973_s25 + $0x24] ss:$8 sps:$4 sm:$0xff]  }
  0x1a   : > { %535 = vmatpush1.bf16.msra.mxu0 %v824_v2  ;;  %v830_v7 = vld [vmem:[%s973_s25 + $0x20] ss:$8 sps:$4 sm:$0xff]   ;;  %v831_v8 = vld [vmem:[%s973_s25 + $0x34] ss:$8 sps:$4 sm:$0xff]   ;;  %v833_v9 = vld [vmem:[%s973_s25 + $0x30] ss:$8 sps:$4 sm:$0xff]  }
  0x1b   : > { %536 = vmatprep.subr.bf16.mxu0 %v825_v4  ;;  %v846_v10 = vld [vmem:[%s973_s25 + $0x104] ss:$8 sps:$4 sm:$0xff]   ;;  %v848_v11 = vld [vmem:[%s973_s25 + $0x100] ss:$8 sps:$4 sm:$0xff]   ;;  %v852_v13 = vld [vmem:[%s973_s25 + $0x114] ss:$8 sps:$4 sm:$0xff]   ;;  %v628_v4 = vlaneseq (!%p789_p7) }
  0x1c   : > { %v834_v12 = vld [vmem:[%s973_s25 + $0x44] ss:$8 sps:$4 sm:$0xff]   ;;  %575 = vmatprep.subr.bf16.mxu1 %v846_v10  ;;  %v854_v14 = vld [vmem:[%s973_s25 + $0x110] ss:$8 sps:$4 sm:$0xff]   ;;  %v836_v15 = vld [vmem:[%s973_s25 + $0x40] ss:$8 sps:$4 sm:$0xff]  }
  0x1d   : > { %576 = vmatpush1.bf16.msra.mxu1 %v848_v11  ;;  %v837_v16 = vld [vmem:[%s973_s25 + $0x54] ss:$8 sps:$4 sm:$0xff]   ;;  %v858_v17 = vld [vmem:[%s973_s25 + $0x124] ss:$8 sps:$4 sm:$0xff]   ;;  %v860_v18 = vld [vmem:[%s973_s25 + $0x120] ss:$8 sps:$4 sm:$0xff]  }
  0x1e   : > { %537 = vmatpush1.bf16.msra.mxu0 %v827_v5  ;;  %577 = vmatprep.subr.bf16.mxu1 %v852_v13  ;;  %v839_v19 = vld [vmem:[%s973_s25 + $0x50] ss:$8 sps:$4 sm:$0xff]   ;;  %v864_v20 = vld [vmem:[%s973_s25 + $0x134] ss:$8 sps:$4 sm:$0xff]   ;;  %v840_v21 = vld [vmem:[%s973_s25 + $0x64] ss:$8 sps:$4 sm:$0xff]  }
  0x1f   : > { %538 = vmatprep.subr.bf16.mxu0 %v828_v6  ;;  %v866_v22 = vld [vmem:[%s973_s25 + $0x130] ss:$8 sps:$4 sm:$0xff]   ;;  %v842_v23 = vld [vmem:[%s973_s25 + $0x60] ss:$8 sps:$4 sm:$0xff]   ;;  %v870_v24 = vld [vmem:[%s973_s25 + $0x144] ss:$8 sps:$4 sm:$0xff]  }
  0x20   : > { %v843_v25 = vld [vmem:[%s973_s25 + $0x74] ss:$8 sps:$4 sm:$0xff]   ;;  %v872_v26 = vld [vmem:[%s973_s25 + $0x140] ss:$8 sps:$4 sm:$0xff]   ;;  %v845_v27 = vld [vmem:[%s973_s25 + $0x70] ss:$8 sps:$4 sm:$0xff]  }
  0x21   : > { %578 = vmatpush1.bf16.msra.mxu1 %v854_v14  ;;  %v876_v28 = vld [vmem:[%s973_s25 + $0x154] ss:$8 sps:$4 sm:$0xff]   ;;  %v849_v29 = vld [vmem:[%s973_s25 + $0x84] ss:$8 sps:$4 sm:$0xff]   ;;  %v878_v30 = vld [vmem:[%s973_s25 + $0x150] ss:$8 sps:$4 sm:$0xff]  }
  0x22   : > { %539 = vmatpush1.bf16.msra.mxu0 %v830_v7  ;;  %579 = vmatprep.subr.bf16.mxu1 %v858_v17  ;;  %v851_v31 = vld [vmem:[%s973_s25 + $0x80] ss:$8 sps:$4 sm:$0xff]   ;;  %v882_v32 = vld [vmem:[%s973_s25 + $0x164] ss:$8 sps:$4 sm:$0xff]   ;;  %v855_v33 = vld [vmem:[%s973_s25 + $0x94] ss:$8 sps:$4 sm:$0xff]  }
  0x23   : > { %540 = vmatprep.subr.bf16.mxu0 %v831_v8  ;;  %v233_v34 = vld [vmem:[%s968_s21] sm:$0xff]  ;;  %v857_v37 = vld [vmem:[%s973_s25 + $0x90] ss:$8 sps:$4 sm:$0xff]   ;;  %v888_v38 = vld [vmem:[%s973_s25 + $0x174] ss:$8 sps:$4 sm:$0xff]   ;;  %v629_v5 = vshrl.u32 (!%p789_p7), %v628_v4, 7 }
  0x24   : > { %v739_v35 = vcombine.high %v233_v34, %v233_v34  ;;  %v884_v36 = vld [vmem:[%s973_s25 + $0x160] ss:$8 sps:$4 sm:$0xff]   ;;  %v861_v39 = vld [vmem:[%s973_s25 + $0xa4] ss:$8 sps:$4 sm:$0xff]   ;;  %v890_v40 = vld [vmem:[%s973_s25 + $0x170] ss:$8 sps:$4 sm:$0xff]   ;;  %v738_v53 = vcombine.low %v233_v34, %v233_v34 }
  0x25   : > { %580 = vmatpush1.bf16.msra.mxu1 %v860_v18  ;;  %v863_v41 = vld [vmem:[%s973_s25 + $0xa0] ss:$8 sps:$4 sm:$0xff]   ;;  %v867_v42 = vld [vmem:[%s973_s25 + $0xb4] ss:$8 sps:$4 sm:$0xff]   ;;  %v869_v44 = vld [vmem:[%s973_s25 + $0xb0] ss:$8 sps:$4 sm:$0xff]  }
  0x26   : > { %541 = vmatpush1.bf16.msra.mxu0 %v833_v9  ;;  %581 = vmatprep.subr.bf16.mxu1 %v864_v20  ;;  %v894_v43 = vld [vmem:[%s968_s21 + $0x8] ss:$0 sps:$4 sm:$0xff]   ;;  %v873_v45 = vld [vmem:[%s973_s25 + $0xc4] ss:$8 sps:$4 sm:$0xff]   ;;  %v879_v47 = vld [vmem:[%s973_s25 + $0xd4] ss:$8 sps:$4 sm:$0xff]  }
  0x27   : > { %542 = vmatprep.subr.bf16.mxu0 %v834_v12  ;;  %566 = vmatprep.mubr.bf16.mxu0 %v739_v35  ;;  %v875_v46 = vld [vmem:[%s973_s25 + $0xc0] ss:$8 sps:$4 sm:$0xff]   ;;  %v881_v48 = vld [vmem:[%s973_s25 + $0xd0] ss:$8 sps:$4 sm:$0xff]   ;;  %v885_v49 = vld [vmem:[%s973_s25 + $0xe4] ss:$8 sps:$4 sm:$0xff]  }
  0x28   : > { %v887_v50 = vld [vmem:[%s973_s25 + $0xe0] ss:$8 sps:$4 sm:$0xff]   ;;  %v891_v51 = vld [vmem:[%s973_s25 + $0xf4] ss:$8 sps:$4 sm:$0xff]   ;;  %v893_v52 = vld [vmem:[%s973_s25 + $0xf0] ss:$8 sps:$4 sm:$0xff]  }
  0x29   : > { %582 = vmatpush1.bf16.msra.mxu1 %v866_v22  ;;  %v231_v58 = vld [vmem:[#allocation2] sm:$0xff]  ;;  %v232_v61 = vld [vmem:[#allocation2 + $0x8] sm:$0xff]  ;;  %v630_v7 = vsub.s32 (!%p789_p7), 0, %v629_v5  ;;  %v634_v8 = vsub.s32 (!%p789_p7), 1, %v629_v5 }
  0x2a   : > { %543 = vmatpush1.bf16.msra.mxu0 %v836_v15  ;;  %583 = vmatprep.subr.bf16.mxu1 %v870_v24  ;;  %v626_v6 = vld [vmem:[%s1044_s2] sm:$0x3] (!%p789_p7) }
  0x2b   : > { %544 = vmatprep.subr.bf16.mxu0 %v837_v16  ;;  %v631_v11 = vrot.slane (!%p789_p7), %v626_v6, %v630_v7  ;;  %v635_v12 = vrot.slane (!%p789_p7), %v626_v6, %v634_v8 }
  0x2d   : > { %584 = vmatpush1.bf16.msra.mxu1 %v872_v26 }
  0x2e   : > { %545 = vmatpush1.bf16.msra.mxu0 %v839_v19  ;;  %585 = vmatprep.subr.bf16.mxu1 %v876_v28 }
  0x2f   : > { %546 = vmatprep.subr.bf16.mxu0 %v840_v21 }
  0x31   : > { %586 = vmatpush1.bf16.msra.mxu1 %v878_v30 }
  0x32   : > { %547 = vmatpush1.bf16.msra.mxu0 %v842_v23  ;;  %587 = vmatprep.subr.bf16.mxu1 %v882_v32 }
  0x33   : > { %548 = vmatprep.subr.bf16.mxu0 %v843_v25 }
  0x35   : > { %588 = vmatpush1.bf16.msra.mxu1 %v884_v36 }
  0x36   : > { %549 = vmatpush1.bf16.msra.mxu0 %v845_v27  ;;  %589 = vmatprep.subr.bf16.mxu1 %v888_v38 }
  0x37   : > { %550 = vmatprep.subr.bf16.mxu0 %v849_v29 }
  0x39   : > { %590 = vmatpush1.bf16.msra.mxu1 %v890_v40 }
  0x3a   : > { %551 = vmatpush1.bf16.msra.mxu0 %v851_v31 }
  0x3b   : > { %552 = vmatprep.subr.bf16.mxu0 %v855_v33 }
  0x3c   : > { %608 = vmatmul.mubr.bf16.vlgmr.msra.gmra.mrb[0].mxu1 %v894_v43 }
  0x3e   : > { %553 = vmatpush1.bf16.msra.mxu0 %v857_v37 }
  0x3f   : > { %554 = vmatprep.subr.bf16.mxu0 %v861_v39 }
  0x42   : > { %555 = vmatpush1.bf16.msra.mxu0 %v863_v41 }
  0x43   : > { %556 = vmatprep.subr.bf16.mxu0 %v867_v42 }
  0x46   : > { %557 = vmatpush1.bf16.msra.mxu0 %v869_v44 }
  0x47   : > { %558 = vmatprep.subr.bf16.mxu0 %v873_v45 }
  0x4a   : > { %559 = vmatpush1.bf16.msra.mxu0 %v875_v46 }
  0x4b   : > { %560 = vmatprep.subr.bf16.mxu0 %v879_v47 }
  0x4e   : > { %561 = vmatpush1.bf16.msra.mxu0 %v881_v48 }
  0x4f   : > { %562 = vmatprep.subr.bf16.mxu0 %v885_v49 }
  0x52   : > { %563 = vmatpush1.bf16.msra.mxu0 %v887_v50 }
  0x53   : > { %564 = vmatprep.subr.bf16.mxu0 %v891_v51 }
  0x56   : > { %565 = vmatpush1.bf16.msra.mxu0 %v893_v52 }
  0x59   : > { %567 = vmatmul.mubr.bf16.vlgmr.msra.gmra.mrb[0].mxu0 %v738_v53 }
 0x10f   : > { %v609_v54 = vpop.f32.mrb[0].mxu1 }
 0x110   : > { %v611_v55 = vpop.f32.mrb[1].mxu1 }
 0x111   : > { %v613_v56 = vpop.f32.mrb[2].mxu1 }
 0x112   : > { %v614_v57 = vpop.f32.mrb[3].mxu1 }
 0x12c   : > { %v568_v59 = vpop.f32.mrb[0].mxu0  ;;  %623 = sbr.rel (%p789_p7) target bundleno = 321 (0x141), region = 40 }
 0x12d   : > { %v610_v60 = vadd.f32 %v609_v54, %v568_v59  ;;  %v570_v62 = vpop.f32.mrb[1].mxu0 }
 0x12e   : > { %v612_v63 = vadd.f32 %v611_v55, %v570_v62  ;;  %v572_v0 = vpop.f32.mrb[2].mxu0 }
 0x12f   : > { %v616_v1 = vadd.f32 %v610_v60, %v231_v58  ;;  %v573_v2 = vpop.f32.mrb[3].mxu0 }
 0x130   : > { %v617_v3 = vadd.f32 %v612_v63, %v232_v61 }
 0x131   : > { %618 = vst [vmem:[#allocation2] sm:$0xff] %v616_v1 }
 0x132   : > { %619 = vst [vmem:[#allocation2 + $0x8] sm:$0xff] %v617_v3 }
 0x138   : > { %v624_v9 = vld [vmem:[#allocation2] sm:$0xff] }
 0x139   : > { %v625_v10 = vld [vmem:[#allocation2 + $0x8] sm:$0xff]  ;;  %v638_v13 = vadd.f32 %v631_v11, %v624_v9 }
 0x13a   : > { %v639_v14 = vadd.f32 %v635_v12, %v625_v10 }
 0x13b   : > { %v640_v15 = vmax.f32 %v638_v13, 0.0 }
 0x13c   : > { %v641_v16 = vmax.f32 %v639_v14, 0.0 }
 0x13e   : > { %v795_v17 = vpack.c.bf16 %v641_v16, %v640_v15 }
 0x140   : > { %650 = vst [vmem:[%s1045_s3] sm:$0xff] %v795_v17 }
 0x141 PF: > { %s13_s14 = sadd.s32 1, %s919_s14   ;;  %s1046_s12 = smov %s915_s13 }
 0x142   : > { %p10_p8 = scmp.ge.s32.totalorder %s13_s14, 5   ;;  %s1047_s13 = smov %s1049_s15 }
 0x144   :  { %12 = sbr.rel (!%p10_p8) target bundleno = 2 (0x2), region = 73 }

// kernel: resnet4channel_forward.57
= control target key start
LH: loop header
LB: loop body
LE: loop exit
PB: predicated region body
PF: predicated region fallthrough
CT: control target
= control target key end

     0   :  { %v240_v1 = vmov 0   ;;  %v172_v18 = vlaneseq  ;;  %s318_s1 = inlined_call_operand.vmem [shape: bf16[128,256], index: 1, kind: input, shape index: {}]   ;;  %s319_s0 = inlined_call_operand.vmem [shape: bf16[8,128], index: 0, kind: input, shape index: {}]   ;;  %s320_s2 = inlined_call_operand.vmem [shape: f32[1,256], index: 2, kind: input, shape index: {}]   ;;  %s321_s3 = inlined_call_operand.vmem [shape: bf16[8,256], index: 3, kind: output, shape index: {}]  }
   0x1   :  { %v216_v0 = vld [vmem:[%s318_s1 + $0x4] ss:$8 sps:$4 sm:$0xff]   ;;  %152 = vmatprep.mubr.bf16.mxu0 %v240_v1  ;;  %v218_v2 = vld [vmem:[%s318_s1] ss:$8 sps:$4 sm:$0xff]   ;;  %v219_v3 = vld [vmem:[%s318_s1 + $0x14] ss:$8 sps:$4 sm:$0xff]  }
   0x2   :  { %120 = vmatprep.subr.bf16.mxu0 %v216_v0  ;;  %v221_v4 = vld [vmem:[%s318_s1 + $0x10] ss:$8 sps:$4 sm:$0xff]   ;;  %v222_v5 = vld [vmem:[%s318_s1 + $0x24] ss:$8 sps:$4 sm:$0xff]   ;;  %v224_v6 = vld [vmem:[%s318_s1 + $0x20] ss:$8 sps:$4 sm:$0xff]  }
   0x3   :  { %121 = vmatpush1.bf16.msra.mxu0 %v218_v2  ;;  %v225_v7 = vld [vmem:[%s318_s1 + $0x34] ss:$8 sps:$4 sm:$0xff]   ;;  %v227_v8 = vld [vmem:[%s318_s1 + $0x30] ss:$8 sps:$4 sm:$0xff]   ;;  %v228_v9 = vld [vmem:[%s318_s1 + $0x44] ss:$8 sps:$4 sm:$0xff]  }
   0x4   :  { %122 = vmatprep.subr.bf16.mxu0 %v219_v3  ;;  %v230_v10 = vld [vmem:[%s318_s1 + $0x40] ss:$8 sps:$4 sm:$0xff]   ;;  %v231_v11 = vld [vmem:[%s318_s1 + $0x54] ss:$8 sps:$4 sm:$0xff]   ;;  %v233_v12 = vld [vmem:[%s318_s1 + $0x50] ss:$8 sps:$4 sm:$0xff]  }
   0x5   :  { %v234_v13 = vld [vmem:[%s318_s1 + $0x64] ss:$8 sps:$4 sm:$0xff]   ;;  %v236_v14 = vld [vmem:[%s318_s1 + $0x60] ss:$8 sps:$4 sm:$0xff]   ;;  %v237_v15 = vld [vmem:[%s318_s1 + $0x74] ss:$8 sps:$4 sm:$0xff]  }
   0x6   :  { %v239_v16 = vld [vmem:[%s318_s1 + $0x70] ss:$8 sps:$4 sm:$0xff]   ;;  %v23_v17 = vld [vmem:[%s319_s0] sm:$0xf]  ;;  %v173_v19 = vshrl.u32 %v172_v18, 7 }
   0x7   :  { %123 = vmatpush1.bf16.msra.mxu0 %v221_v4  ;;  %v170_v21 = vld [vmem:[%s320_s2] sm:$0x3] }
   0x8   :  { %124 = vmatprep.subr.bf16.mxu0 %v222_v5  ;;  %v174_v20 = vsub.s32 0, %v173_v19  ;;  %v178_v22 = vsub.s32 1, %v173_v19 }
   0xa   :  { %v175_v23 = vrot.slane %v170_v21, %v174_v20  ;;  %v179_v24 = vrot.slane %v170_v21, %v178_v22 }
   0xb   :  { %125 = vmatpush1.bf16.msra.mxu0 %v224_v6 }
   0xc   :  { %126 = vmatprep.subr.bf16.mxu0 %v225_v7 }
   0xf   :  { %127 = vmatpush1.bf16.msra.mxu0 %v227_v8 }
  0x10   :  { %128 = vmatprep.subr.bf16.mxu0 %v228_v9 }
  0x13   :  { %129 = vmatpush1.bf16.msra.mxu0 %v230_v10 }
  0x14   :  { %130 = vmatprep.subr.bf16.mxu0 %v231_v11 }
  0x17   :  { %131 = vmatpush1.bf16.msra.mxu0 %v233_v12 }
  0x18   :  { %132 = vmatprep.subr.bf16.mxu0 %v234_v13 }
  0x1b   :  { %133 = vmatpush1.bf16.msra.mxu0 %v236_v14 }
  0x1c   :  { %134 = vmatprep.subr.bf16.mxu0 %v237_v15 }
  0x1f   :  { %135 = vmatpush1.bf16.msra.mxu0 %v239_v16 }
  0x22   :  { %153 = vmatmul.mubr.bf16.vlgmr.msra.gmra.mrb[0].mxu0 %v23_v17 }
  0xf5   :  { %v154_v25 = vpop.f32.mrb[0].mxu0 }
  0xf6   :  { %v182_v26 = vadd.f32 %v175_v23, %v154_v25  ;;  %v156_v27 = vpop.f32.mrb[1].mxu0 }
  0xf7   :  { %v183_v28 = vadd.f32 %v179_v24, %v156_v27  ;;  %v158_v29 = vpop.f32.mrb[2].mxu0 }
  0xf8   :  { %v159_v30 = vpop.f32.mrb[3].mxu0 }
  0xf9   :  { %v214_v31 = vpack.c.bf16 %v183_v28, %v182_v26 }
  0xfb   :  { %192 = vst [vmem:[%s321_s3] sm:$0xff] %v214_v31 }

// kernel: resnet4channel_forward.58
= control target key start
LH: loop header
LB: loop body
LE: loop exit
PB: predicated region body
PF: predicated region fallthrough
CT: control target
= control target key end

     0   :  { %s1016_s15 = smov 0   ;;  %s1018_s16 = smov 0   ;;  %s1118_s0 = inlined_call_operand.vmem [shape: bf16[8,2304], index: 0, kind: input, shape index: {}]   ;;  %s1119_s1 = inlined_call_operand.vmem [shape: bf16[2304,256], index: 1, kind: input, shape index: {}]   ;;  %s1120_s2 = inlined_call_operand.vmem [shape: f32[1,256], index: 2, kind: input, shape index: {}]   ;;  %s1121_s3 = inlined_call_operand.vmem [shape: bf16[8,256], index: 3, kind: input, shape index: {}]   ;;  %s1122_s4 = inlined_call_operand.vmem [shape: bf16[8,256], index: 4, kind: output, shape index: {}]  }
   0x1   :  { %s1020_s17 = smov 0  }
   0x2 LB: > { %s23_s18 = sadd.s32 1, %s983_s16  ;;  %p801_p0 = scmp.ge.s32.totalorder %s987_s17, 1  ;;  %s987_s17 = sphi %s1020_s17, %s14_s17   ;;  %s983_s16 = sphi %s1018_s16, %s1124_s16   ;;  %s979_s15 = sphi %s1016_s15, %s1123_s15  }
   0x3   : > { %p24_p1 = scmp.ge.s32.totalorder %s23_s18, 6  ;;  %p203_p2 = scmp.lt.s32.totalorder %s987_s17, 7 }
   0x5   : > { %s1126_s18 = smov (%p24_p1, %s23_s18), 0  ;;  %p204_p3 = pnand %p801_p0, %p203_p2 }
   0x6   : > { %s244_s19 = smul.u32 (!%p204_p3), 3, %s979_s15  ;;  %p805_p6 = scmp.ne.s32.totalorder (!%p204_p3), %s979_s15, 0 }
   0x7   : > { %207 = sbr.rel (%p204_p3) target bundleno = 323 (0x143), region = 36 }
   0x8   : > { %s254_s20 = smul.u32 (!%p204_p3), 48, %s979_s15  ;;  %p247_p4 = scmp.lt.s32.totalorder (!%p204_p3), %s244_s19, 17 }
   0xa   : > { %p255_p5 = scmp.lt.s32.totalorder (!%p204_p3), %s254_s20, 287 }
   0xe   : > { %s1128_s19 = smov (!%p247_p4, %s244_s19), 17  ;;  %s1130_s20 = smov (!%p255_p5, %s254_s20), 287 }
   0xf   : > { %s802_s21 = sshll.u32 %s1128_s19, 2  ;;  %s862_s25 = sshll.u32 %s1130_s20, 3  ;;  %v989_v0 = vmov (!%p805_p6), 0.0  }
  0x10   : > { %s1041_s24 = scalar_lea.vmem %s1118_s0, %s802_s21  ;;  %s1046_s28 = scalar_lea.vmem %s1119_s1, %s862_s25  ;;  %276 = vst [vmem:[#allocation2] sm:$0xff] (!%p805_p6), %v989_v0  ;;  %277 = vst [vmem:[#allocation2 + $0x8] sm:$0xff] (!%p805_p6), %v989_v0 }
  0x11   : > { %275 = sbr.rel (%p805_p6) target bundleno = 24 (0x18), region = 40 }
  0x18 PF: > { %v890_v1 = vld [vmem:[%s1046_s28 + $0x4] ss:$8 sps:$4 sm:$0xff]   ;;  %v892_v2 = vld [vmem:[%s1046_s28] ss:$8 sps:$4 sm:$0xff]   ;;  %v990_v3 = vmov 0   ;;  %p857_p7 = scmp.ne.s32.totalorder %s979_s15, 5 }
  0x19   : > { %654 = vmatprep.mubr.bf16.mxu1 %v990_v3  ;;  %581 = vmatprep.subr.bf16.mxu0 %v890_v1  ;;  %v893_v4 = vld [vmem:[%s1046_s28 + $0x14] ss:$8 sps:$4 sm:$0xff]   ;;  %v895_v5 = vld [vmem:[%s1046_s28 + $0x10] ss:$8 sps:$4 sm:$0xff]   ;;  %v896_v6 = vld [vmem:[%s1046_s28 + $0x24] ss:$8 sps:$4 sm:$0xff]  }
  0x1a   : > { %582 = vmatpush1.bf16.msra.mxu0 %v892_v2  ;;  %v898_v7 = vld [vmem:[%s1046_s28 + $0x20] ss:$8 sps:$4 sm:$0xff]   ;;  %v899_v8 = vld [vmem:[%s1046_s28 + $0x34] ss:$8 sps:$4 sm:$0xff]   ;;  %v901_v9 = vld [vmem:[%s1046_s28 + $0x30] ss:$8 sps:$4 sm:$0xff]  }
  0x1b   : > { %583 = vmatprep.subr.bf16.mxu0 %v893_v4  ;;  %v914_v10 = vld [vmem:[%s1046_s28 + $0x104] ss:$8 sps:$4 sm:$0xff]   ;;  %v916_v11 = vld [vmem:[%s1046_s28 + $0x100] ss:$8 sps:$4 sm:$0xff]   ;;  %v920_v13 = vld [vmem:[%s1046_s28 + $0x114] ss:$8 sps:$4 sm:$0xff]   ;;  %v675_v4 = vlaneseq (!%p857_p7) }
  0x1c   : > { %v902_v12 = vld [vmem:[%s1046_s28 + $0x44] ss:$8 sps:$4 sm:$0xff]   ;;  %622 = vmatprep.subr.bf16.mxu1 %v914_v10  ;;  %v922_v14 = vld [vmem:[%s1046_s28 + $0x110] ss:$8 sps:$4 sm:$0xff]   ;;  %v904_v15 = vld [vmem:[%s1046_s28 + $0x40] ss:$8 sps:$4 sm:$0xff]  }
  0x1d   : > { %623 = vmatpush1.bf16.msra.mxu1 %v916_v11  ;;  %v905_v16 = vld [vmem:[%s1046_s28 + $0x54] ss:$8 sps:$4 sm:$0xff]   ;;  %v926_v17 = vld [vmem:[%s1046_s28 + $0x124] ss:$8 sps:$4 sm:$0xff]   ;;  %v928_v18 = vld [vmem:[%s1046_s28 + $0x120] ss:$8 sps:$4 sm:$0xff]  }
  0x1e   : > { %584 = vmatpush1.bf16.msra.mxu0 %v895_v5  ;;  %624 = vmatprep.subr.bf16.mxu1 %v920_v13  ;;  %v907_v19 = vld [vmem:[%s1046_s28 + $0x50] ss:$8 sps:$4 sm:$0xff]   ;;  %v932_v20 = vld [vmem:[%s1046_s28 + $0x134] ss:$8 sps:$4 sm:$0xff]   ;;  %v908_v21 = vld [vmem:[%s1046_s28 + $0x64] ss:$8 sps:$4 sm:$0xff]  }
  0x1f   : > { %585 = vmatprep.subr.bf16.mxu0 %v896_v6  ;;  %v934_v22 = vld [vmem:[%s1046_s28 + $0x130] ss:$8 sps:$4 sm:$0xff]   ;;  %v910_v23 = vld [vmem:[%s1046_s28 + $0x60] ss:$8 sps:$4 sm:$0xff]   ;;  %v938_v24 = vld [vmem:[%s1046_s28 + $0x144] ss:$8 sps:$4 sm:$0xff]  }
  0x20   : > { %v911_v25 = vld [vmem:[%s1046_s28 + $0x74] ss:$8 sps:$4 sm:$0xff]   ;;  %v940_v26 = vld [vmem:[%s1046_s28 + $0x140] ss:$8 sps:$4 sm:$0xff]   ;;  %v913_v27 = vld [vmem:[%s1046_s28 + $0x70] ss:$8 sps:$4 sm:$0xff]  }
  0x21   : > { %625 = vmatpush1.bf16.msra.mxu1 %v922_v14  ;;  %v944_v28 = vld [vmem:[%s1046_s28 + $0x154] ss:$8 sps:$4 sm:$0xff]   ;;  %v917_v29 = vld [vmem:[%s1046_s28 + $0x84] ss:$8 sps:$4 sm:$0xff]   ;;  %v946_v30 = vld [vmem:[%s1046_s28 + $0x150] ss:$8 sps:$4 sm:$0xff]  }
  0x22   : > { %586 = vmatpush1.bf16.msra.mxu0 %v898_v7  ;;  %626 = vmatprep.subr.bf16.mxu1 %v926_v17  ;;  %v919_v31 = vld [vmem:[%s1046_s28 + $0x80] ss:$8 sps:$4 sm:$0xff]   ;;  %v950_v32 = vld [vmem:[%s1046_s28 + $0x164] ss:$8 sps:$4 sm:$0xff]   ;;  %v923_v33 = vld [vmem:[%s1046_s28 + $0x94] ss:$8 sps:$4 sm:$0xff]  }
  0x23   : > { %587 = vmatprep.subr.bf16.mxu0 %v899_v8  ;;  %v280_v34 = vld [vmem:[%s1041_s24] sm:$0xff]  ;;  %v925_v37 = vld [vmem:[%s1046_s28 + $0x90] ss:$8 sps:$4 sm:$0xff]   ;;  %v956_v38 = vld [vmem:[%s1046_s28 + $0x174] ss:$8 sps:$4 sm:$0xff]   ;;  %v676_v5 = vshrl.u32 (!%p857_p7), %v675_v4, 7 }
  0x24   : > { %v807_v35 = vcombine.high %v280_v34, %v280_v34  ;;  %v952_v36 = vld [vmem:[%s1046_s28 + $0x160] ss:$8 sps:$4 sm:$0xff]   ;;  %v929_v39 = vld [vmem:[%s1046_s28 + $0xa4] ss:$8 sps:$4 sm:$0xff]   ;;  %v958_v40 = vld [vmem:[%s1046_s28 + $0x170] ss:$8 sps:$4 sm:$0xff]   ;;  %v806_v53 = vcombine.low %v280_v34, %v280_v34 }
  0x25   : > { %627 = vmatpush1.bf16.msra.mxu1 %v928_v18  ;;  %v931_v41 = vld [vmem:[%s1046_s28 + $0xa0] ss:$8 sps:$4 sm:$0xff]   ;;  %v935_v42 = vld [vmem:[%s1046_s28 + $0xb4] ss:$8 sps:$4 sm:$0xff]   ;;  %v937_v44 = vld [vmem:[%s1046_s28 + $0xb0] ss:$8 sps:$4 sm:$0xff]  }
  0x26   : > { %588 = vmatpush1.bf16.msra.mxu0 %v901_v9  ;;  %628 = vmatprep.subr.bf16.mxu1 %v932_v20  ;;  %v962_v43 = vld [vmem:[%s1041_s24 + $0x8] ss:$0 sps:$4 sm:$0xff]   ;;  %v941_v45 = vld [vmem:[%s1046_s28 + $0xc4] ss:$8 sps:$4 sm:$0xff]   ;;  %v947_v47 = vld [vmem:[%s1046_s28 + $0xd4] ss:$8 sps:$4 sm:$0xff]  }
  0x27   : > { %589 = vmatprep.subr.bf16.mxu0 %v902_v12  ;;  %613 = vmatprep.mubr.bf16.mxu0 %v807_v35  ;;  %v943_v46 = vld [vmem:[%s1046_s28 + $0xc0] ss:$8 sps:$4 sm:$0xff]   ;;  %v949_v48 = vld [vmem:[%s1046_s28 + $0xd0] ss:$8 sps:$4 sm:$0xff]   ;;  %v953_v49 = vld [vmem:[%s1046_s28 + $0xe4] ss:$8 sps:$4 sm:$0xff]  }
  0x28   : > { %v955_v50 = vld [vmem:[%s1046_s28 + $0xe0] ss:$8 sps:$4 sm:$0xff]   ;;  %v959_v51 = vld [vmem:[%s1046_s28 + $0xf4] ss:$8 sps:$4 sm:$0xff]   ;;  %v961_v52 = vld [vmem:[%s1046_s28 + $0xf0] ss:$8 sps:$4 sm:$0xff]  }
  0x29   : > { %629 = vmatpush1.bf16.msra.mxu1 %v934_v22  ;;  %v278_v58 = vld [vmem:[#allocation2] sm:$0xff]  ;;  %v279_v61 = vld [vmem:[#allocation2 + $0x8] sm:$0xff]  ;;  %v677_v8 = vsub.s32 (!%p857_p7), 0, %v676_v5  ;;  %v681_v9 = vsub.s32 (!%p857_p7), 1, %v676_v5 }
  0x2a   : > { %590 = vmatpush1.bf16.msra.mxu0 %v904_v15  ;;  %630 = vmatprep.subr.bf16.mxu1 %v938_v24  ;;  %v673_v6 = vld [vmem:[%s1120_s2] sm:$0x3] (!%p857_p7) }
  0x2b   : > { %591 = vmatprep.subr.bf16.mxu0 %v905_v16  ;;  %v687_v7 = vld [vmem:[%s1121_s3] sm:$0xff] (!%p857_p7)  ;;  %v678_v12 = vrot.slane (!%p857_p7), %v673_v6, %v677_v8  ;;  %v682_v13 = vrot.slane (!%p857_p7), %v673_v6, %v681_v9 }
  0x2c   : > { %v688_v14 = vunpack.c.l.bf16 (!%p857_p7), %v687_v7  ;;  %v689_v15 = vunpack.c.h.bf16 (!%p857_p7), %v687_v7 }
  0x2d   : > { %631 = vmatpush1.bf16.msra.mxu1 %v940_v26 }
  0x2e   : > { %592 = vmatpush1.bf16.msra.mxu0 %v907_v19  ;;  %632 = vmatprep.subr.bf16.mxu1 %v944_v28 }
  0x2f   : > { %593 = vmatprep.subr.bf16.mxu0 %v908_v21 }
  0x31   : > { %633 = vmatpush1.bf16.msra.mxu1 %v946_v30 }
  0x32   : > { %594 = vmatpush1.bf16.msra.mxu0 %v910_v23  ;;  %634 = vmatprep.subr.bf16.mxu1 %v950_v32 }
  0x33   : > { %595 = vmatprep.subr.bf16.mxu0 %v911_v25 }
  0x35   : > { %635 = vmatpush1.bf16.msra.mxu1 %v952_v36 }
  0x36   : > { %596 = vmatpush1.bf16.msra.mxu0 %v913_v27  ;;  %636 = vmatprep.subr.bf16.mxu1 %v956_v38 }
  0x37   : > { %597 = vmatprep.subr.bf16.mxu0 %v917_v29 }
  0x39   : > { %637 = vmatpush1.bf16.msra.mxu1 %v958_v40 }
  0x3a   : > { %598 = vmatpush1.bf16.msra.mxu0 %v919_v31 }
  0x3b   : > { %599 = vmatprep.subr.bf16.mxu0 %v923_v33 }
  0x3c   : > { %655 = vmatmul.mubr.bf16.vlgmr.msra.gmra.mrb[0].mxu1 %v962_v43 }
  0x3e   : > { %600 = vmatpush1.bf16.msra.mxu0 %v925_v37 }
  0x3f   : > { %601 = vmatprep.subr.bf16.mxu0 %v929_v39 }
  0x42   : > { %602 = vmatpush1.bf16.msra.mxu0 %v931_v41 }
  0x43   : > { %603 = vmatprep.subr.bf16.mxu0 %v935_v42 }
  0x46   : > { %604 = vmatpush1.bf16.msra.mxu0 %v937_v44 }
  0x47   : > { %605 = vmatprep.subr.bf16.mxu0 %v941_v45 }
  0x4a   : > { %606 = vmatpush1.bf16.msra.mxu0 %v943_v46 }
  0x4b   : > { %607 = vmatprep.subr.bf16.mxu0 %v947_v47 }
  0x4e   : > { %608 = vmatpush1.bf16.msra.mxu0 %v949_v48 }
  0x4f   : > { %609 = vmatprep.subr.bf16.mxu0 %v953_v49 }
  0x52   : > { %610 = vmatpush1.bf16.msra.mxu0 %v955_v50 }
  0x53   : > { %611 = vmatprep.subr.bf16.mxu0 %v959_v51 }
  0x56   : > { %612 = vmatpush1.bf16.msra.mxu0 %v961_v52 }
  0x59   : > { %614 = vmatmul.mubr.bf16.vlgmr.msra.gmra.mrb[0].mxu0 %v806_v53 }
 0x10f   : > { %v656_v54 = vpop.f32.mrb[0].mxu1 }
 0x110   : > { %v658_v55 = vpop.f32.mrb[1].mxu1 }
 0x111   : > { %v660_v56 = vpop.f32.mrb[2].mxu1 }
 0x112   : > { %v661_v57 = vpop.f32.mrb[3].mxu1 }
 0x12c   : > { %v615_v59 = vpop.f32.mrb[0].mxu0  ;;  %670 = sbr.rel (%p857_p7) target bundleno = 323 (0x143), region = 44 }
 0x12d   : > { %v657_v60 = vadd.f32 %v656_v54, %v615_v59  ;;  %v617_v62 = vpop.f32.mrb[1].mxu0 }
 0x12e   : > { %v659_v63 = vadd.f32 %v658_v55, %v617_v62  ;;  %v619_v0 = vpop.f32.mrb[2].mxu0 }
 0x12f   : > { %v663_v1 = vadd.f32 %v657_v60, %v278_v58  ;;  %v620_v2 = vpop.f32.mrb[3].mxu0 }
 0x130   : > { %v664_v3 = vadd.f32 %v659_v63, %v279_v61 }
 0x131   : > { %665 = vst [vmem:[#allocation2] sm:$0xff] %v663_v1 }
 0x132   : > { %666 = vst [vmem:[#allocation2 + $0x8] sm:$0xff] %v664_v3 }
 0x138   : > { %v671_v10 = vld [vmem:[#allocation2] sm:$0xff] }
 0x139   : > { %v672_v11 = vld [vmem:[#allocation2 + $0x8] sm:$0xff]  ;;  %v685_v16 = vadd.f32 %v678_v12, %v671_v10 }
 0x13a   : > { %v686_v17 = vadd.f32 %v682_v13, %v672_v11 }
 0x13b   : > { %v690_v18 = vadd.f32 %v688_v14, %v685_v16 }
 0x13c   : > { %v691_v19 = vadd.f32 %v689_v15, %v686_v17 }
 0x13d   : > { %v692_v20 = vmax.f32 %v690_v18, 0.0 }
 0x13e   : > { %v693_v21 = vmax.f32 %v691_v19, 0.0 }
 0x140   : > { %v863_v22 = vpack.c.bf16 %v693_v21, %v692_v20 }
 0x142   : > { %702 = vst [vmem:[%s1122_s4] sm:$0xff] %v863_v22 }
 0x143 PF: > { %s14_s17 = sadd.s32 1, %s987_s17   ;;  %s1123_s15 = smov %s983_s16 }
 0x144   : > { %p11_p8 = scmp.ge.s32.totalorder %s14_s17, 8   ;;  %s1124_s16 = smov %s1126_s18 }
 0x146   :  { %13 = sbr.rel (!%p11_p8) target bundleno = 2 (0x2), region = 80 }

// kernel: resnet4channel_forward.59
= control target key start
LH: loop header
LB: loop body
LE: loop exit
PB: predicated region body
PF: predicated region fallthrough
CT: control target
= control target key end

     0   :  { %s943_s12 = smov 0   ;;  %s945_s13 = smov 0   ;;  %s1042_s0 = inlined_call_operand.vmem [shape: bf16[8,2304], index: 0, kind: input, shape index: {}]   ;;  %s1043_s1 = inlined_call_operand.vmem [shape: bf16[2304,256], index: 1, kind: input, shape index: {}]   ;;  %s1044_s2 = inlined_call_operand.vmem [shape: f32[1,256], index: 2, kind: input, shape index: {}]   ;;  %s1045_s3 = inlined_call_operand.vmem [shape: bf16[8,256], index: 3, kind: output, shape index: {}]  }
   0x1   :  { %s947_s14 = smov 0  }
   0x2 LB: > { %s22_s15 = sadd.s32 1, %s915_s13  ;;  %p733_p0 = scmp.ge.s32.totalorder %s919_s14, 1  ;;  %s919_s14 = sphi %s947_s14, %s13_s14   ;;  %s915_s13 = sphi %s945_s13, %s1047_s13   ;;  %s911_s12 = sphi %s943_s12, %s1046_s12  }
   0x3   : > { %p23_p1 = scmp.ge.s32.totalorder %s22_s15, 6  ;;  %p168_p2 = scmp.lt.s32.totalorder %s919_s14, 7 }
   0x5   : > { %s1049_s15 = smov (%p23_p1, %s22_s15), 0  ;;  %p169_p3 = pnand %p733_p0, %p168_p2 }
   0x6   : > { %s202_s16 = smul.u32 (!%p169_p3), 3, %s911_s12  ;;  %p737_p6 = scmp.ne.s32.totalorder (!%p169_p3), %s911_s12, 0 }
   0x7   : > { %172 = sbr.rel (%p169_p3) target bundleno = 321 (0x141), region = 32 }
   0x8   : > { %s212_s17 = smul.u32 (!%p169_p3), 48, %s911_s12  ;;  %p205_p4 = scmp.lt.s32.totalorder (!%p169_p3), %s202_s16, 17 }
   0xa   : > { %p213_p5 = scmp.lt.s32.totalorder (!%p169_p3), %s212_s17, 287 }
   0xe   : > { %s1051_s16 = smov (!%p205_p4, %s202_s16), 17  ;;  %s1053_s17 = smov (!%p213_p5, %s212_s17), 287 }
   0xf   : > { %s734_s18 = sshll.u32 %s1051_s16, 2  ;;  %s794_s22 = sshll.u32 %s1053_s17, 3  ;;  %v921_v0 = vmov (!%p737_p6), 0.0  }
  0x10   : > { %s968_s21 = scalar_lea.vmem %s1042_s0, %s734_s18  ;;  %s973_s25 = scalar_lea.vmem %s1043_s1, %s794_s22  ;;  %229 = vst [vmem:[#allocation2] sm:$0xff] (!%p737_p6), %v921_v0  ;;  %230 = vst [vmem:[#allocation2 + $0x8] sm:$0xff] (!%p737_p6), %v921_v0 }
  0x11   : > { %228 = sbr.rel (%p737_p6) target bundleno = 24 (0x18), region = 36 }
  0x18 PF: > { %v822_v1 = vld [vmem:[%s973_s25 + $0x4] ss:$8 sps:$4 sm:$0xff]   ;;  %v824_v2 = vld [vmem:[%s973_s25] ss:$8 sps:$4 sm:$0xff]   ;;  %v922_v3 = vmov 0   ;;  %p789_p7 = scmp.ne.s32.totalorder %s911_s12, 5 }
  0x19   : > { %607 = vmatprep.mubr.bf16.mxu1 %v922_v3  ;;  %534 = vmatprep.subr.bf16.mxu0 %v822_v1  ;;  %v825_v4 = vld [vmem:[%s973_s25 + $0x14] ss:$8 sps:$4 sm:$0xff]   ;;  %v827_v5 = vld [vmem:[%s973_s25 + $0x10] ss:$8 sps:$4 sm:$0xff]   ;;  %v828_v6 = vld [vmem:[%s973_s25 + $0x24] ss:$8 sps:$4 sm:$0xff]  }
  0x1a   : > { %535 = vmatpush1.bf16.msra.mxu0 %v824_v2  ;;  %v830_v7 = vld [vmem:[%s973_s25 + $0x20] ss:$8 sps:$4 sm:$0xff]   ;;  %v831_v8 = vld [vmem:[%s973_s25 + $0x34] ss:$8 sps:$4 sm:$0xff]   ;;  %v833_v9 = vld [vmem:[%s973_s25 + $0x30] ss:$8 sps:$4 sm:$0xff]  }
  0x1b   : > { %536 = vmatprep.subr.bf16.mxu0 %v825_v4  ;;  %v846_v10 = vld [vmem:[%s973_s25 + $0x104] ss:$8 sps:$4 sm:$0xff]   ;;  %v848_v11 = vld [vmem:[%s973_s25 + $0x100] ss:$8 sps:$4 sm:$0xff]   ;;  %v852_v13 = vld [vmem:[%s973_s25 + $0x114] ss:$8 sps:$4 sm:$0xff]   ;;  %v628_v4 = vlaneseq (!%p789_p7) }
  0x1c   : > { %v834_v12 = vld [vmem:[%s973_s25 + $0x44] ss:$8 sps:$4 sm:$0xff]   ;;  %575 = vmatprep.subr.bf16.mxu1 %v846_v10  ;;  %v854_v14 = vld [vmem:[%s973_s25 + $0x110] ss:$8 sps:$4 sm:$0xff]   ;;  %v836_v15 = vld [vmem:[%s973_s25 + $0x40] ss:$8 sps:$4 sm:$0xff]  }
  0x1d   : > { %576 = vmatpush1.bf16.msra.mxu1 %v848_v11  ;;  %v837_v16 = vld [vmem:[%s973_s25 + $0x54] ss:$8 sps:$4 sm:$0xff]   ;;  %v858_v17 = vld [vmem:[%s973_s25 + $0x124] ss:$8 sps:$4 sm:$0xff]   ;;  %v860_v18 = vld [vmem:[%s973_s25 + $0x120] ss:$8 sps:$4 sm:$0xff]  }
  0x1e   : > { %537 = vmatpush1.bf16.msra.mxu0 %v827_v5  ;;  %577 = vmatprep.subr.bf16.mxu1 %v852_v13  ;;  %v839_v19 = vld [vmem:[%s973_s25 + $0x50] ss:$8 sps:$4 sm:$0xff]   ;;  %v864_v20 = vld [vmem:[%s973_s25 + $0x134] ss:$8 sps:$4 sm:$0xff]   ;;  %v840_v21 = vld [vmem:[%s973_s25 + $0x64] ss:$8 sps:$4 sm:$0xff]  }
  0x1f   : > { %538 = vmatprep.subr.bf16.mxu0 %v828_v6  ;;  %v866_v22 = vld [vmem:[%s973_s25 + $0x130] ss:$8 sps:$4 sm:$0xff]   ;;  %v842_v23 = vld [vmem:[%s973_s25 + $0x60] ss:$8 sps:$4 sm:$0xff]   ;;  %v870_v24 = vld [vmem:[%s973_s25 + $0x144] ss:$8 sps:$4 sm:$0xff]  }
  0x20   : > { %v843_v25 = vld [vmem:[%s973_s25 + $0x74] ss:$8 sps:$4 sm:$0xff]   ;;  %v872_v26 = vld [vmem:[%s973_s25 + $0x140] ss:$8 sps:$4 sm:$0xff]   ;;  %v845_v27 = vld [vmem:[%s973_s25 + $0x70] ss:$8 sps:$4 sm:$0xff]  }
  0x21   : > { %578 = vmatpush1.bf16.msra.mxu1 %v854_v14  ;;  %v876_v28 = vld [vmem:[%s973_s25 + $0x154] ss:$8 sps:$4 sm:$0xff]   ;;  %v849_v29 = vld [vmem:[%s973_s25 + $0x84] ss:$8 sps:$4 sm:$0xff]   ;;  %v878_v30 = vld [vmem:[%s973_s25 + $0x150] ss:$8 sps:$4 sm:$0xff]  }
  0x22   : > { %539 = vmatpush1.bf16.msra.mxu0 %v830_v7  ;;  %579 = vmatprep.subr.bf16.mxu1 %v858_v17  ;;  %v851_v31 = vld [vmem:[%s973_s25 + $0x80] ss:$8 sps:$4 sm:$0xff]   ;;  %v882_v32 = vld [vmem:[%s973_s25 + $0x164] ss:$8 sps:$4 sm:$0xff]   ;;  %v855_v33 = vld [vmem:[%s973_s25 + $0x94] ss:$8 sps:$4 sm:$0xff]  }
  0x23   : > { %540 = vmatprep.subr.bf16.mxu0 %v831_v8  ;;  %v233_v34 = vld [vmem:[%s968_s21] sm:$0xff]  ;;  %v857_v37 = vld [vmem:[%s973_s25 + $0x90] ss:$8 sps:$4 sm:$0xff]   ;;  %v888_v38 = vld [vmem:[%s973_s25 + $0x174] ss:$8 sps:$4 sm:$0xff]   ;;  %v629_v5 = vshrl.u32 (!%p789_p7), %v628_v4, 7 }
  0x24   : > { %v739_v35 = vcombine.high %v233_v34, %v233_v34  ;;  %v884_v36 = vld [vmem:[%s973_s25 + $0x160] ss:$8 sps:$4 sm:$0xff]   ;;  %v861_v39 = vld [vmem:[%s973_s25 + $0xa4] ss:$8 sps:$4 sm:$0xff]   ;;  %v890_v40 = vld [vmem:[%s973_s25 + $0x170] ss:$8 sps:$4 sm:$0xff]   ;;  %v738_v53 = vcombine.low %v233_v34, %v233_v34 }
  0x25   : > { %580 = vmatpush1.bf16.msra.mxu1 %v860_v18  ;;  %v863_v41 = vld [vmem:[%s973_s25 + $0xa0] ss:$8 sps:$4 sm:$0xff]   ;;  %v867_v42 = vld [vmem:[%s973_s25 + $0xb4] ss:$8 sps:$4 sm:$0xff]   ;;  %v869_v44 = vld [vmem:[%s973_s25 + $0xb0] ss:$8 sps:$4 sm:$0xff]  }
  0x26   : > { %541 = vmatpush1.bf16.msra.mxu0 %v833_v9  ;;  %581 = vmatprep.subr.bf16.mxu1 %v864_v20  ;;  %v894_v43 = vld [vmem:[%s968_s21 + $0x8] ss:$0 sps:$4 sm:$0xff]   ;;  %v873_v45 = vld [vmem:[%s973_s25 + $0xc4] ss:$8 sps:$4 sm:$0xff]   ;;  %v879_v47 = vld [vmem:[%s973_s25 + $0xd4] ss:$8 sps:$4 sm:$0xff]  }
  0x27   : > { %542 = vmatprep.subr.bf16.mxu0 %v834_v12  ;;  %566 = vmatprep.mubr.bf16.mxu0 %v739_v35  ;;  %v875_v46 = vld [vmem:[%s973_s25 + $0xc0] ss:$8 sps:$4 sm:$0xff]   ;;  %v881_v48 = vld [vmem:[%s973_s25 + $0xd0] ss:$8 sps:$4 sm:$0xff]   ;;  %v885_v49 = vld [vmem:[%s973_s25 + $0xe4] ss:$8 sps:$4 sm:$0xff]  }
  0x28   : > { %v887_v50 = vld [vmem:[%s973_s25 + $0xe0] ss:$8 sps:$4 sm:$0xff]   ;;  %v891_v51 = vld [vmem:[%s973_s25 + $0xf4] ss:$8 sps:$4 sm:$0xff]   ;;  %v893_v52 = vld [vmem:[%s973_s25 + $0xf0] ss:$8 sps:$4 sm:$0xff]  }
  0x29   : > { %582 = vmatpush1.bf16.msra.mxu1 %v866_v22  ;;  %v231_v58 = vld [vmem:[#allocation2] sm:$0xff]  ;;  %v232_v61 = vld [vmem:[#allocation2 + $0x8] sm:$0xff]  ;;  %v630_v7 = vsub.s32 (!%p789_p7), 0, %v629_v5  ;;  %v634_v8 = vsub.s32 (!%p789_p7), 1, %v629_v5 }
  0x2a   : > { %543 = vmatpush1.bf16.msra.mxu0 %v836_v15  ;;  %583 = vmatprep.subr.bf16.mxu1 %v870_v24  ;;  %v626_v6 = vld [vmem:[%s1044_s2] sm:$0x3] (!%p789_p7) }
  0x2b   : > { %544 = vmatprep.subr.bf16.mxu0 %v837_v16  ;;  %v631_v11 = vrot.slane (!%p789_p7), %v626_v6, %v630_v7  ;;  %v635_v12 = vrot.slane (!%p789_p7), %v626_v6, %v634_v8 }
  0x2d   : > { %584 = vmatpush1.bf16.msra.mxu1 %v872_v26 }
  0x2e   : > { %545 = vmatpush1.bf16.msra.mxu0 %v839_v19  ;;  %585 = vmatprep.subr.bf16.mxu1 %v876_v28 }
  0x2f   : > { %546 = vmatprep.subr.bf16.mxu0 %v840_v21 }
  0x31   : > { %586 = vmatpush1.bf16.msra.mxu1 %v878_v30 }
  0x32   : > { %547 = vmatpush1.bf16.msra.mxu0 %v842_v23  ;;  %587 = vmatprep.subr.bf16.mxu1 %v882_v32 }
  0x33   : > { %548 = vmatprep.subr.bf16.mxu0 %v843_v25 }
  0x35   : > { %588 = vmatpush1.bf16.msra.mxu1 %v884_v36 }
  0x36   : > { %549 = vmatpush1.bf16.msra.mxu0 %v845_v27  ;;  %589 = vmatprep.subr.bf16.mxu1 %v888_v38 }
  0x37   : > { %550 = vmatprep.subr.bf16.mxu0 %v849_v29 }
  0x39   : > { %590 = vmatpush1.bf16.msra.mxu1 %v890_v40 }
  0x3a   : > { %551 = vmatpush1.bf16.msra.mxu0 %v851_v31 }
  0x3b   : > { %552 = vmatprep.subr.bf16.mxu0 %v855_v33 }
  0x3c   : > { %608 = vmatmul.mubr.bf16.vlgmr.msra.gmra.mrb[0].mxu1 %v894_v43 }
  0x3e   : > { %553 = vmatpush1.bf16.msra.mxu0 %v857_v37 }
  0x3f   : > { %554 = vmatprep.subr.bf16.mxu0 %v861_v39 }
  0x42   : > { %555 = vmatpush1.bf16.msra.mxu0 %v863_v41 }
  0x43   : > { %556 = vmatprep.subr.bf16.mxu0 %v867_v42 }
  0x46   : > { %557 = vmatpush1.bf16.msra.mxu0 %v869_v44 }
  0x47   : > { %558 = vmatprep.subr.bf16.mxu0 %v873_v45 }
  0x4a   : > { %559 = vmatpush1.bf16.msra.mxu0 %v875_v46 }
  0x4b   : > { %560 = vmatprep.subr.bf16.mxu0 %v879_v47 }
  0x4e   : > { %561 = vmatpush1.bf16.msra.mxu0 %v881_v48 }
  0x4f   : > { %562 = vmatprep.subr.bf16.mxu0 %v885_v49 }
  0x52   : > { %563 = vmatpush1.bf16.msra.mxu0 %v887_v50 }
  0x53   : > { %564 = vmatprep.subr.bf16.mxu0 %v891_v51 }
  0x56   : > { %565 = vmatpush1.bf16.msra.mxu0 %v893_v52 }
  0x59   : > { %567 = vmatmul.mubr.bf16.vlgmr.msra.gmra.mrb[0].mxu0 %v738_v53 }
 0x10f   : > { %v609_v54 = vpop.f32.mrb[0].mxu1 }
 0x110   : > { %v611_v55 = vpop.f32.mrb[1].mxu1 }
 0x111   : > { %v613_v56 = vpop.f32.mrb[2].mxu1 }
 0x112   : > { %v614_v57 = vpop.f32.mrb[3].mxu1 }
 0x12c   : > { %v568_v59 = vpop.f32.mrb[0].mxu0  ;;  %623 = sbr.rel (%p789_p7) target bundleno = 321 (0x141), region = 40 }
 0x12d   : > { %v610_v60 = vadd.f32 %v609_v54, %v568_v59  ;;  %v570_v62 = vpop.f32.mrb[1].mxu0 }
 0x12e   : > { %v612_v63 = vadd.f32 %v611_v55, %v570_v62  ;;  %v572_v0 = vpop.f32.mrb[2].mxu0 }
 0x12f   : > { %v616_v1 = vadd.f32 %v610_v60, %v231_v58  ;;  %v573_v2 = vpop.f32.mrb[3].mxu0 }
 0x130   : > { %v617_v3 = vadd.f32 %v612_v63, %v232_v61 }
 0x131   : > { %618 = vst [vmem:[#allocation2] sm:$0xff] %v616_v1 }
 0x132   : > { %619 = vst [vmem:[#allocation2 + $0x8] sm:$0xff] %v617_v3 }
 0x138   : > { %v624_v9 = vld [vmem:[#allocation2] sm:$0xff] }
 0x139   : > { %v625_v10 = vld [vmem:[#allocation2 + $0x8] sm:$0xff]  ;;  %v638_v13 = vadd.f32 %v631_v11, %v624_v9 }
 0x13a   : > { %v639_v14 = vadd.f32 %v635_v12, %v625_v10 }
 0x13b   : > { %v640_v15 = vmax.f32 %v638_v13, 0.0 }
 0x13c   : > { %v641_v16 = vmax.f32 %v639_v14, 0.0 }
 0x13e   : > { %v795_v17 = vpack.c.bf16 %v641_v16, %v640_v15 }
 0x140   : > { %650 = vst [vmem:[%s1045_s3] sm:$0xff] %v795_v17 }
 0x141 PF: > { %s13_s14 = sadd.s32 1, %s919_s14   ;;  %s1046_s12 = smov %s915_s13 }
 0x142   : > { %p10_p8 = scmp.ge.s32.totalorder %s13_s14, 8   ;;  %s1047_s13 = smov %s1049_s15 }
 0x144   :  { %12 = sbr.rel (!%p10_p8) target bundleno = 2 (0x2), region = 73 }

// kernel: resnet4channel_forward.69
= control target key start
LH: loop header
LB: loop body
LE: loop exit
PB: predicated region body
PF: predicated region fallthrough
CT: control target
= control target key end

     0   :  { %s1468_s12 = smov 0   ;;  %s1470_s13 = smov 0   ;;  %s1628_s0 = inlined_call_operand.vmem [shape: bf16[8,2304], index: 0, kind: input, shape index: {}]   ;;  %s1629_s1 = inlined_call_operand.vmem [shape: bf16[2304,512], index: 1, kind: input, shape index: {}]   ;;  %s1630_s2 = inlined_call_operand.vmem [shape: f32[1,512], index: 2, kind: input, shape index: {}]   ;;  %s1631_s3 = inlined_call_operand.vmem [shape: bf16[8,512], index: 3, kind: output, shape index: {}]  }
   0x1   :  { %s1472_s14 = smov 0  }
   0x2 LB: > { %s22_s15 = sadd.s32 1, %s1440_s13  ;;  %p1136_p0 = scmp.ge.s32.totalorder %s1444_s14, 1  ;;  %s1444_s14 = sphi %s1472_s14, %s13_s14   ;;  %s1440_s13 = sphi %s1470_s13, %s1633_s13   ;;  %s1436_s12 = sphi %s1468_s12, %s1632_s12  }
   0x3   : > { %p23_p1 = scmp.ge.s32.totalorder %s22_s15, 6  ;;  %p168_p2 = scmp.lt.s32.totalorder %s1444_s14, 7 }
   0x5   : > { %s1635_s15 = smov (%p23_p1, %s22_s15), 0  ;;  %p169_p3 = pnand %p1136_p0, %p168_p2 }
   0x6   : > { %s202_s16 = smul.u32 (!%p169_p3), 3, %s1436_s12  ;;  %p1140_p6 = scmp.ne.s32.totalorder (!%p169_p3), %s1436_s12, 0 }
   0x7   : > { %172 = sbr.rel (%p169_p3) target bundleno = 354 (0x162), region = 32 }
   0x8   : > { %s212_s17 = smul.u32 (!%p169_p3), 48, %s1436_s12  ;;  %p205_p4 = scmp.lt.s32.totalorder (!%p169_p3), %s202_s16, 17 }
   0xa   : > { %p213_p5 = scmp.lt.s32.totalorder (!%p169_p3), %s212_s17, 287 }
   0xe   : > { %s1637_s16 = smov (!%p205_p4, %s202_s16), 17  ;;  %s1639_s17 = smov (!%p213_p5, %s212_s17), 287 }
   0xf   : > { %s1137_s18 = sshll.u32 %s1637_s16, 2  ;;  %s1246_s22 = sshll.u32 %s1639_s17, 4  ;;  %v1446_v0 = vmov (!%p1140_p6), 0.0  }
  0x10   : > { %s1493_s21 = scalar_lea.vmem %s1628_s0, %s1137_s18  ;;  %s1498_s25 = scalar_lea.vmem %s1629_s1, %s1246_s22  ;;  %229 = vst [vmem:[#allocation2] sm:$0xff] (!%p1140_p6), %v1446_v0  ;;  %230 = vst [vmem:[#allocation2 + $0x8] sm:$0xff] (!%p1140_p6), %v1446_v0 }
  0x11   : > { %228 = sbr.rel (%p1140_p6) target bundleno = 24 (0x18), region = 36  ;;  %231 = vst [vmem:[#allocation2 + $0x10] sm:$0xff] (!%p1140_p6), %v1446_v0  ;;  %232 = vst [vmem:[#allocation2 + $0x18] sm:$0xff] (!%p1140_p6), %v1446_v0 }
  0x18 PF: > { %v1275_v1 = vld [vmem:[%s1498_s25 + $0x4] ss:$16 sps:$4 sm:$0xff]   ;;  %v1447_v3 = vmov 0   ;;  %v1279_v4 = vld [vmem:[%s1498_s25] ss:$16 sps:$4 sm:$0xff]   ;;  %p1240_p7 = scmp.ne.s32.totalorder %s1436_s12, 5 }
  0x19   : > { %v1277_v2 = vld [vmem:[%s1498_s25 + $0x204] ss:$16 sps:$4 sm:$0xff]   ;;  %899 = vmatprep.mubr.bf16.mxu1 %v1447_v3  ;;  %826 = vmatprep.subr.bf16.mxu0 %v1275_v1  ;;  %v1280_v5 = vld [vmem:[%s1498_s25 + $0x200] ss:$16 sps:$4 sm:$0xff]   ;;  %v1328_v35 = vld [vmem:[%s1498_s25 + $0xc] ss:$16 sps:$4 sm:$0xff]  }
  0x1a   : > { %867 = vmatprep.subr.bf16.mxu1 %v1277_v2  ;;  %v1281_v6 = vld [vmem:[%s1498_s25 + $0x24] ss:$16 sps:$4 sm:$0xff]   ;;  %827 = vmatpush1.bf16.msra.mxu0 %v1279_v4  ;;  %v1285_v8 = vld [vmem:[%s1498_s25 + $0x20] ss:$16 sps:$4 sm:$0xff]   ;;  %v1537_v36 = vld [vmem:[%s1493_s21 + $0x8] ss:$0 sps:$4 sm:$0xff]  }
  0x1b   : > { %868 = vmatpush1.bf16.msra.mxu1 %v1280_v5  ;;  %v1283_v7 = vld [vmem:[%s1498_s25 + $0x224] ss:$16 sps:$4 sm:$0xff]   ;;  %828 = vmatprep.subr.bf16.mxu0 %v1281_v6  ;;  %v1286_v9 = vld [vmem:[%s1498_s25 + $0x220] ss:$16 sps:$4 sm:$0xff]   ;;  %v1326_v37 = vld [vmem:[%s1498_s25 + $0x8] ss:$16 sps:$4 sm:$0xff]  }
  0x1c   : > { %869 = vmatprep.subr.bf16.mxu1 %v1283_v7  ;;  %v1287_v10 = vld [vmem:[%s1498_s25 + $0x44] ss:$16 sps:$4 sm:$0xff]   ;;  %v1291_v12 = vld [vmem:[%s1498_s25 + $0x40] ss:$16 sps:$4 sm:$0xff]   ;;  %v1334_v40 = vld [vmem:[%s1498_s25 + $0x2c] ss:$16 sps:$4 sm:$0xff]  }
  0x1d   : > { %v1289_v11 = vld [vmem:[%s1498_s25 + $0x244] ss:$16 sps:$4 sm:$0xff]   ;;  %v1292_v13 = vld [vmem:[%s1498_s25 + $0x240] ss:$16 sps:$4 sm:$0xff]   ;;  %v1332_v41 = vld [vmem:[%s1498_s25 + $0x28] ss:$16 sps:$4 sm:$0xff]  }
  0x1e   : > { %829 = vmatpush1.bf16.msra.mxu0 %v1285_v8  ;;  %v1293_v14 = vld [vmem:[%s1498_s25 + $0x64] ss:$16 sps:$4 sm:$0xff]   ;;  %v1297_v16 = vld [vmem:[%s1498_s25 + $0x60] ss:$16 sps:$4 sm:$0xff]   ;;  %v1340_v44 = vld [vmem:[%s1498_s25 + $0x4c] ss:$16 sps:$4 sm:$0xff]  }
  0x1f   : > { %870 = vmatpush1.bf16.msra.mxu1 %v1286_v9  ;;  %830 = vmatprep.subr.bf16.mxu0 %v1287_v10  ;;  %v1295_v15 = vld [vmem:[%s1498_s25 + $0x264] ss:$16 sps:$4 sm:$0xff]   ;;  %v1298_v17 = vld [vmem:[%s1498_s25 + $0x260] ss:$16 sps:$4 sm:$0xff]   ;;  %v1338_v45 = vld [vmem:[%s1498_s25 + $0x48] ss:$16 sps:$4 sm:$0xff]  }
  0x20   : > { %871 = vmatprep.subr.bf16.mxu1 %v1289_v11  ;;  %v1299_v18 = vld [vmem:[%s1498_s25 + $0x84] ss:$16 sps:$4 sm:$0xff]   ;;  %v1303_v20 = vld [vmem:[%s1498_s25 + $0x80] ss:$16 sps:$4 sm:$0xff]   ;;  %v1346_v48 = vld [vmem:[%s1498_s25 + $0x6c] ss:$16 sps:$4 sm:$0xff]  }
  0x21   : > { %v1301_v19 = vld [vmem:[%s1498_s25 + $0x284] ss:$16 sps:$4 sm:$0xff]   ;;  %v1304_v21 = vld [vmem:[%s1498_s25 + $0x280] ss:$16 sps:$4 sm:$0xff]   ;;  %v1344_v49 = vld [vmem:[%s1498_s25 + $0x68] ss:$16 sps:$4 sm:$0xff]  }
  0x22   : > { %831 = vmatpush1.bf16.msra.mxu0 %v1291_v12  ;;  %v1305_v22 = vld [vmem:[%s1498_s25 + $0xa4] ss:$16 sps:$4 sm:$0xff]   ;;  %v1309_v24 = vld [vmem:[%s1498_s25 + $0xa0] ss:$16 sps:$4 sm:$0xff]   ;;  %v1352_v54 = vld [vmem:[%s1498_s25 + $0x8c] ss:$16 sps:$4 sm:$0xff]  }
  0x23   : > { %872 = vmatpush1.bf16.msra.mxu1 %v1292_v13  ;;  %832 = vmatprep.subr.bf16.mxu0 %v1293_v14  ;;  %v1307_v23 = vld [vmem:[%s1498_s25 + $0x2a4] ss:$16 sps:$4 sm:$0xff]   ;;  %v1310_v25 = vld [vmem:[%s1498_s25 + $0x2a0] ss:$16 sps:$4 sm:$0xff]   ;;  %v1350_v55 = vld [vmem:[%s1498_s25 + $0x88] ss:$16 sps:$4 sm:$0xff]  }
  0x24   : > { %873 = vmatprep.subr.bf16.mxu1 %v1295_v15  ;;  %v1311_v26 = vld [vmem:[%s1498_s25 + $0xc4] ss:$16 sps:$4 sm:$0xff]   ;;  %v1315_v28 = vld [vmem:[%s1498_s25 + $0xc0] ss:$16 sps:$4 sm:$0xff]   ;;  %v1358_v58 = vld [vmem:[%s1498_s25 + $0xac] ss:$16 sps:$4 sm:$0xff]  }
  0x25   : > { %v1313_v27 = vld [vmem:[%s1498_s25 + $0x2c4] ss:$16 sps:$4 sm:$0xff]   ;;  %v1316_v29 = vld [vmem:[%s1498_s25 + $0x2c0] ss:$16 sps:$4 sm:$0xff]   ;;  %v1356_v59 = vld [vmem:[%s1498_s25 + $0xa8] ss:$16 sps:$4 sm:$0xff]  }
  0x26   : > { %833 = vmatpush1.bf16.msra.mxu0 %v1297_v16  ;;  %v1317_v30 = vld [vmem:[%s1498_s25 + $0xe4] ss:$16 sps:$4 sm:$0xff]   ;;  %v1321_v32 = vld [vmem:[%s1498_s25 + $0xe0] ss:$16 sps:$4 sm:$0xff]   ;;  %v1364_v62 = vld [vmem:[%s1498_s25 + $0xcc] ss:$16 sps:$4 sm:$0xff]  }
  0x27   : > { %874 = vmatpush1.bf16.msra.mxu1 %v1298_v17  ;;  %834 = vmatprep.subr.bf16.mxu0 %v1299_v18  ;;  %v1319_v31 = vld [vmem:[%s1498_s25 + $0x2e4] ss:$16 sps:$4 sm:$0xff]   ;;  %v1322_v33 = vld [vmem:[%s1498_s25 + $0x2e0] ss:$16 sps:$4 sm:$0xff]   ;;  %v1362_v63 = vld [vmem:[%s1498_s25 + $0xc8] ss:$16 sps:$4 sm:$0xff]  }
  0x28   : > { %875 = vmatprep.subr.bf16.mxu1 %v1301_v19  ;;  %v1323_v34 = vld [vmem:[%s1498_s25 + $0x104] ss:$16 sps:$4 sm:$0xff]   ;;  %v1329_v38 = vld [vmem:[%s1498_s25 + $0x100] ss:$16 sps:$4 sm:$0xff]   ;;  %v1370_v2 = vld [vmem:[%s1498_s25 + $0xec] ss:$16 sps:$4 sm:$0xff]  }
  0x29   : > { %v1330_v39 = vld [vmem:[%s1498_s25 + $0x124] ss:$16 sps:$4 sm:$0xff]   ;;  %v1335_v42 = vld [vmem:[%s1498_s25 + $0x120] ss:$16 sps:$4 sm:$0xff]   ;;  %v1368_v4 = vld [vmem:[%s1498_s25 + $0xe8] ss:$16 sps:$4 sm:$0xff]  }
  0x2a   : > { %835 = vmatpush1.bf16.msra.mxu0 %v1303_v20  ;;  %v1336_v43 = vld [vmem:[%s1498_s25 + $0x144] ss:$16 sps:$4 sm:$0xff]   ;;  %v1341_v46 = vld [vmem:[%s1498_s25 + $0x140] ss:$16 sps:$4 sm:$0xff]   ;;  %v1376_v6 = vld [vmem:[%s1498_s25 + $0x10c] ss:$16 sps:$4 sm:$0xff]  }
  0x2b   : > { %876 = vmatpush1.bf16.msra.mxu1 %v1304_v21  ;;  %836 = vmatprep.subr.bf16.mxu0 %v1305_v22  ;;  %v1342_v47 = vld [vmem:[%s1498_s25 + $0x164] ss:$16 sps:$4 sm:$0xff]   ;;  %v1347_v51 = vld [vmem:[%s1498_s25 + $0x160] ss:$16 sps:$4 sm:$0xff]   ;;  %v1379_v7 = vld [vmem:[%s1498_s25 + $0x20c] ss:$16 sps:$4 sm:$0xff]  }
  0x2c   : > { %877 = vmatprep.subr.bf16.mxu1 %v1307_v23  ;;  %v237_v50 = vld [vmem:[%s1493_s21] sm:$0xff]  ;;  %v1374_v9 = vld [vmem:[%s1498_s25 + $0x108] ss:$16 sps:$4 sm:$0xff]   ;;  %v1382_v11 = vld [vmem:[%s1498_s25 + $0x12c] ss:$16 sps:$4 sm:$0xff]  }
  0x2d   : > { %v1348_v52 = vld [vmem:[%s1498_s25 + $0x184] ss:$16 sps:$4 sm:$0xff]   ;;  %v1142_v53 = vcombine.high %v237_v50, %v237_v50  ;;  %v1353_v56 = vld [vmem:[%s1498_s25 + $0x180] ss:$16 sps:$4 sm:$0xff]   ;;  %v1573_v8 = vcombine.low %v237_v50, %v237_v50  ;;  %v1377_v10 = vld [vmem:[%s1498_s25 + $0x208] ss:$16 sps:$4 sm:$0xff]  }
  0x2e   : > { %837 = vmatpush1.bf16.msra.mxu0 %v1309_v24  ;;  %v1354_v57 = vld [vmem:[%s1498_s25 + $0x1a4] ss:$16 sps:$4 sm:$0xff]   ;;  %v1359_v60 = vld [vmem:[%s1498_s25 + $0x1a0] ss:$16 sps:$4 sm:$0xff]   ;;  %v1385_v12 = vld [vmem:[%s1498_s25 + $0x22c] ss:$16 sps:$4 sm:$0xff]  }
  0x2f   : > { %878 = vmatpush1.bf16.msra.mxu1 %v1310_v25  ;;  %838 = vmatprep.subr.bf16.mxu0 %v1311_v26  ;;  %v1360_v61 = vld [vmem:[%s1498_s25 + $0x1c4] ss:$16 sps:$4 sm:$0xff]   ;;  %v1365_v0 = vld [vmem:[%s1498_s25 + $0x1c0] ss:$16 sps:$4 sm:$0xff]   ;;  %v1380_v13 = vld [vmem:[%s1498_s25 + $0x128] ss:$16 sps:$4 sm:$0xff]  }
  0x30   : > { %879 = vmatprep.subr.bf16.mxu1 %v1313_v27  ;;  %858 = vmatprep.mubr.bf16.mxu0 %v1142_v53  ;;  %v1366_v1 = vld [vmem:[%s1498_s25 + $0x1e4] ss:$16 sps:$4 sm:$0xff]   ;;  %v1371_v5 = vld [vmem:[%s1498_s25 + $0x1e0] ss:$16 sps:$4 sm:$0xff]   ;;  %v1383_v14 = vld [vmem:[%s1498_s25 + $0x228] ss:$16 sps:$4 sm:$0xff]  }
  0x31   : > { %v1388_v15 = vld [vmem:[%s1498_s25 + $0x14c] ss:$16 sps:$4 sm:$0xff]   ;;  %v1386_v17 = vld [vmem:[%s1498_s25 + $0x148] ss:$16 sps:$4 sm:$0xff]  }
  0x32   : > { %839 = vmatpush1.bf16.msra.mxu0 %v1315_v28  ;;  %v1391_v16 = vld [vmem:[%s1498_s25 + $0x24c] ss:$16 sps:$4 sm:$0xff]   ;;  %v1389_v18 = vld [vmem:[%s1498_s25 + $0x248] ss:$16 sps:$4 sm:$0xff]  }
  0x33   : > { %880 = vmatpush1.bf16.msra.mxu1 %v1316_v29  ;;  %840 = vmatprep.subr.bf16.mxu0 %v1317_v30  ;;  %v1394_v19 = vld [vmem:[%s1498_s25 + $0x16c] ss:$16 sps:$4 sm:$0xff]   ;;  %v1392_v21 = vld [vmem:[%s1498_s25 + $0x168] ss:$16 sps:$4 sm:$0xff]  }
  0x34   : > { %881 = vmatprep.subr.bf16.mxu1 %v1319_v31  ;;  %v1397_v20 = vld [vmem:[%s1498_s25 + $0x26c] ss:$16 sps:$4 sm:$0xff]   ;;  %v1395_v22 = vld [vmem:[%s1498_s25 + $0x268] ss:$16 sps:$4 sm:$0xff]  }
  0x35   : > { %v1403_v23 = vld [vmem:[%s1498_s25 + $0x28c] ss:$16 sps:$4 sm:$0xff]   ;;  %v1398_v24 = vld [vmem:[%s1498_s25 + $0x188] ss:$16 sps:$4 sm:$0xff]  }
  0x36   : > { %841 = vmatpush1.bf16.msra.mxu0 %v1321_v32  ;;  %v1401_v25 = vld [vmem:[%s1498_s25 + $0x288] ss:$16 sps:$4 sm:$0xff]   ;;  %v1406_v26 = vld [vmem:[%s1498_s25 + $0x1ac] ss:$16 sps:$4 sm:$0xff]  }
  0x37   : > { %882 = vmatpush1.bf16.msra.mxu1 %v1322_v33  ;;  %842 = vmatprep.subr.bf16.mxu0 %v1323_v34  ;;  %v1409_v27 = vld [vmem:[%s1498_s25 + $0x2ac] ss:$16 sps:$4 sm:$0xff]   ;;  %v1404_v28 = vld [vmem:[%s1498_s25 + $0x1a8] ss:$16 sps:$4 sm:$0xff]  }
  0x38   : > { %908 = vmatprep.subr.bf16.mxu1 %v1328_v35  ;;  %v1407_v29 = vld [vmem:[%s1498_s25 + $0x2a8] ss:$16 sps:$4 sm:$0xff]   ;;  %v1412_v30 = vld [vmem:[%s1498_s25 + $0x1cc] ss:$16 sps:$4 sm:$0xff]  }
  0x39   : > { %v1415_v31 = vld [vmem:[%s1498_s25 + $0x2cc] ss:$16 sps:$4 sm:$0xff]   ;;  %v1410_v32 = vld [vmem:[%s1498_s25 + $0x1c8] ss:$16 sps:$4 sm:$0xff]  }
  0x3a   : > { %900 = vmatmul.mubr.bf16.vlgmr.msra.gmra.mrb[0].mxu1 %v1537_v36  ;;  %843 = vmatpush1.bf16.msra.mxu0 %v1329_v38  ;;  %v1413_v33 = vld [vmem:[%s1498_s25 + $0x2c8] ss:$16 sps:$4 sm:$0xff]   ;;  %v1418_v34 = vld [vmem:[%s1498_s25 + $0x1ec] ss:$16 sps:$4 sm:$0xff]  }
  0x3b   : > { %909 = vmatpush1.bf16.msra.mxu1 %v1326_v37  ;;  %844 = vmatprep.subr.bf16.mxu0 %v1330_v39  ;;  %v1421_v35 = vld [vmem:[%s1498_s25 + $0x2ec] ss:$16 sps:$4 sm:$0xff]   ;;  %v1416_v37 = vld [vmem:[%s1498_s25 + $0x1e8] ss:$16 sps:$4 sm:$0xff]  }
  0x3c   : > { %910 = vmatprep.subr.bf16.mxu1 %v1334_v40  ;;  %940 = vmatprep.mubr.bf16.mxu1 %v1142_v53  ;;  %v1419_v38 = vld [vmem:[%s1498_s25 + $0x2e8] ss:$16 sps:$4 sm:$0xff]  }
  0x3e   : > { %845 = vmatpush1.bf16.msra.mxu0 %v1335_v42 }
  0x3f   : > { %911 = vmatpush1.bf16.msra.mxu1 %v1332_v41  ;;  %846 = vmatprep.subr.bf16.mxu0 %v1336_v43  ;;  %v233_v43 = vld [vmem:[#allocation2] sm:$0xff] }
  0x40   : > { %912 = vmatprep.subr.bf16.mxu1 %v1340_v44 }
  0x42   : > { %847 = vmatpush1.bf16.msra.mxu0 %v1341_v46  ;;  %v234_v46 = vld [vmem:[#allocation2 + $0x8] sm:$0xff] }
  0x43   : > { %913 = vmatpush1.bf16.msra.mxu1 %v1338_v45  ;;  %848 = vmatprep.subr.bf16.mxu0 %v1342_v47 }
  0x44   : > { %914 = vmatprep.subr.bf16.mxu1 %v1346_v48 }
  0x46   : > { %849 = vmatpush1.bf16.msra.mxu0 %v1347_v51 }
  0x47   : > { %915 = vmatpush1.bf16.msra.mxu1 %v1344_v49  ;;  %850 = vmatprep.subr.bf16.mxu0 %v1348_v52 }
  0x48   : > { %916 = vmatprep.subr.bf16.mxu1 %v1352_v54  ;;  %v235_v54 = vld [vmem:[#allocation2 + $0x10] sm:$0xff] }
  0x4a   : > { %851 = vmatpush1.bf16.msra.mxu0 %v1353_v56 }
  0x4b   : > { %917 = vmatpush1.bf16.msra.mxu1 %v1350_v55  ;;  %852 = vmatprep.subr.bf16.mxu0 %v1354_v57  ;;  %v236_v57 = vld [vmem:[#allocation2 + $0x18] sm:$0xff] }
  0x4c   : > { %918 = vmatprep.subr.bf16.mxu1 %v1358_v58 }
  0x4e   : > { %853 = vmatpush1.bf16.msra.mxu0 %v1359_v60 }
  0x4f   : > { %919 = vmatpush1.bf16.msra.mxu1 %v1356_v59  ;;  %854 = vmatprep.subr.bf16.mxu0 %v1360_v61 }
  0x50   : > { %920 = vmatprep.subr.bf16.mxu1 %v1364_v62 }
  0x52   : > { %855 = vmatpush1.bf16.msra.mxu0 %v1365_v0 }
  0x53   : > { %921 = vmatpush1.bf16.msra.mxu1 %v1362_v63  ;;  %856 = vmatprep.subr.bf16.mxu0 %v1366_v1 }
  0x54   : > { %922 = vmatprep.subr.bf16.mxu1 %v1370_v2  ;;  %v1008_v2 = vlaneseq (!%p1240_p7) }
  0x56   : > { %857 = vmatpush1.bf16.msra.mxu0 %v1371_v5  ;;  %v1006_v5 = vld [vmem:[%s1630_s2] sm:$0xf] (!%p1240_p7) }
  0x57   : > { %923 = vmatpush1.bf16.msra.mxu1 %v1368_v4  ;;  %949 = vmatprep.subr.bf16.mxu0 %v1379_v7  ;;  %v1009_v4 = vshrl.u32 (!%p1240_p7), %v1008_v2, 7 }
  0x58   : > { %924 = vmatprep.subr.bf16.mxu1 %v1376_v6 }
  0x59   : > { %859 = vmatmul.mubr.bf16.vlgmr.msra.gmra.mrb[0].mxu0 %v1573_v8  ;;  %v1010_v7 = vsub.s32 (!%p1240_p7), 0, %v1009_v4 }
  0x5a   : > { %950 = vmatpush1.bf16.msra.mxu0 %v1377_v10  ;;  %981 = vmatprep.mubr.bf16.mxu0 %v1447_v3  ;;  %v1400_v3 = vld [vmem:[%s1498_s25 + $0x18c] ss:$16 sps:$4 sm:$0xff]   ;;  %v1022_v10 = vsub.s32 (!%p1240_p7), 3, %v1009_v4 }
  0x5b   : > { %925 = vmatpush1.bf16.msra.mxu1 %v1374_v9  ;;  %951 = vmatprep.subr.bf16.mxu0 %v1385_v12  ;;  %v1018_v9 = vsub.s32 (!%p1240_p7), 2, %v1009_v4 }
  0x5c   : > { %926 = vmatprep.subr.bf16.mxu1 %v1382_v11 }
  0x5e   : > { %952 = vmatpush1.bf16.msra.mxu0 %v1383_v14  ;;  %v1011_v14 = vrot.slane (!%p1240_p7), %v1006_v5, %v1010_v7 }
  0x5f   : > { %927 = vmatpush1.bf16.msra.mxu1 %v1380_v13  ;;  %953 = vmatprep.subr.bf16.mxu0 %v1391_v16  ;;  %v1019_v16 = vrot.slane (!%p1240_p7), %v1006_v5, %v1018_v9 }
  0x60   : > { %928 = vmatprep.subr.bf16.mxu1 %v1388_v15 }
  0x62   : > { %954 = vmatpush1.bf16.msra.mxu0 %v1389_v18 }
  0x63   : > { %929 = vmatpush1.bf16.msra.mxu1 %v1386_v17  ;;  %955 = vmatprep.subr.bf16.mxu0 %v1397_v20  ;;  %v1023_v17 = vrot.slane (!%p1240_p7), %v1006_v5, %v1022_v10 }
  0x64   : > { %930 = vmatprep.subr.bf16.mxu1 %v1394_v19 }
  0x66   : > { %956 = vmatpush1.bf16.msra.mxu0 %v1395_v22 }
  0x67   : > { %931 = vmatpush1.bf16.msra.mxu1 %v1392_v21  ;;  %957 = vmatprep.subr.bf16.mxu0 %v1403_v23 }
  0x68   : > { %932 = vmatprep.subr.bf16.mxu1 %v1400_v3 }
  0x6a   : > { %958 = vmatpush1.bf16.msra.mxu0 %v1401_v25 }
  0x6b   : > { %933 = vmatpush1.bf16.msra.mxu1 %v1398_v24  ;;  %959 = vmatprep.subr.bf16.mxu0 %v1409_v27 }
  0x6c   : > { %934 = vmatprep.subr.bf16.mxu1 %v1406_v26 }
  0x6e   : > { %960 = vmatpush1.bf16.msra.mxu0 %v1407_v29 }
  0x6f   : > { %935 = vmatpush1.bf16.msra.mxu1 %v1404_v28  ;;  %961 = vmatprep.subr.bf16.mxu0 %v1415_v31 }
  0x70   : > { %936 = vmatprep.subr.bf16.mxu1 %v1412_v30 }
  0x72   : > { %962 = vmatpush1.bf16.msra.mxu0 %v1413_v33 }
  0x73   : > { %937 = vmatpush1.bf16.msra.mxu1 %v1410_v32  ;;  %963 = vmatprep.subr.bf16.mxu0 %v1421_v35 }
  0x74   : > { %938 = vmatprep.subr.bf16.mxu1 %v1418_v34 }
  0x76   : > { %964 = vmatpush1.bf16.msra.mxu0 %v1419_v38 }
  0x77   : > { %939 = vmatpush1.bf16.msra.mxu1 %v1416_v37 }
  0x79   : > { %982 = vmatmul.mubr.bf16.vlgmr.msra.gmra.mrb[4].mxu0 %v1537_v36 }
  0x7a   : > { %941 = vmatmul.mubr.bf16.vlgmr.msra.gmra.mrb[4].mxu1 %v1573_v8  ;;  %v1014_v8 = vsub.s32 (!%p1240_p7), 1, %v1009_v4 }
  0x7c   : > { %v1015_v15 = vrot.slane (!%p1240_p7), %v1006_v5, %v1014_v8 }
 0x10d   : > { %v901_v39 = vpop.f32.mrb[0].mxu1 }
 0x10e   : > { %v903_v40 = vpop.f32.mrb[1].mxu1 }
 0x10f   : > { %v905_v41 = vpop.f32.mrb[2].mxu1 }
 0x110   : > { %v906_v42 = vpop.f32.mrb[3].mxu1 }
 0x12c   : > { %v860_v44 = vpop.f32.mrb[0].mxu0 }
 0x12d   : > { %v902_v45 = vadd.f32 %v901_v39, %v860_v44  ;;  %v862_v47 = vpop.f32.mrb[1].mxu0 }
 0x12e   : > { %v904_v48 = vadd.f32 %v903_v40, %v862_v47  ;;  %v864_v49 = vpop.f32.mrb[2].mxu0 }
 0x12f   : > { %v990_v50 = vadd.f32 %v902_v45, %v233_v43  ;;  %v865_v51 = vpop.f32.mrb[3].mxu0 }
 0x130   : > { %v991_v52 = vadd.f32 %v904_v48, %v234_v46 }
 0x131   : > { %994 = vst [vmem:[#allocation2] sm:$0xff] %v990_v50 }
 0x132   : > { %995 = vst [vmem:[#allocation2 + $0x8] sm:$0xff] %v991_v52 }
 0x138   : > { %v1002_v6 = vld [vmem:[#allocation2] sm:$0xff] (!%p1240_p7) }
 0x139   : > { %v1003_v11 = vld [vmem:[#allocation2 + $0x8] sm:$0xff] (!%p1240_p7)  ;;  %v1028_v18 = vadd.f32 (!%p1240_p7), %v1011_v14, %v1002_v6 }
 0x13a   : > { %v1029_v19 = vadd.f32 (!%p1240_p7), %v1015_v15, %v1003_v11 }
 0x13b   : > { %v1032_v22 = vmax.f32 (!%p1240_p7), %v1028_v18, 0.0 }
 0x13c   : > { %v1033_v3 = vmax.f32 (!%p1240_p7), %v1029_v19, 0.0 }
 0x13e   : > { %v1247_v25 = vpack.c.bf16 (!%p1240_p7), %v1033_v3, %v1032_v22 }
 0x140   : > { %1052 = vst [vmem:[%s1631_s3] sm:$0xff] (!%p1240_p7), %v1247_v25 }
 0x14c   : > { %v983_v55 = vpop.f32.mrb[4].mxu0 }
 0x14d   : > { %v942_v53 = vpop.f32.mrb[4].mxu1  ;;  %v985_v58 = vpop.f32.mrb[5].mxu0  ;;  %1001 = sbr.rel (%p1240_p7) target bundleno = 354 (0x162), region = 40 }
 0x14e   : > { %v984_v36 = vadd.f32 %v983_v55, %v942_v53  ;;  %v944_v56 = vpop.f32.mrb[5].mxu1  ;;  %v987_v61 = vpop.f32.mrb[6].mxu0 }
 0x14f   : > { %v986_v59 = vadd.f32 %v985_v58, %v944_v56  ;;  %v946_v60 = vpop.f32.mrb[6].mxu1  ;;  %v988_v0 = vpop.f32.mrb[7].mxu0 }
 0x150   : > { %v992_v62 = vadd.f32 %v984_v36, %v235_v54  ;;  %v947_v63 = vpop.f32.mrb[7].mxu1 }
 0x151   : > { %v993_v1 = vadd.f32 %v986_v59, %v236_v57 }
 0x152   : > { %996 = vst [vmem:[#allocation2 + $0x10] sm:$0xff] %v992_v62 }
 0x153   : > { %997 = vst [vmem:[#allocation2 + $0x18] sm:$0xff] %v993_v1 }
 0x159   : > { %v1004_v12 = vld [vmem:[#allocation2 + $0x10] sm:$0xff] }
 0x15a   : > { %v1005_v13 = vld [vmem:[#allocation2 + $0x18] sm:$0xff]  ;;  %v1030_v20 = vadd.f32 %v1019_v16, %v1004_v12 }
 0x15b   : > { %v1031_v21 = vadd.f32 %v1023_v17, %v1005_v13 }
 0x15c   : > { %v1034_v23 = vmax.f32 %v1030_v20, 0.0 }
 0x15d   : > { %v1035_v24 = vmax.f32 %v1031_v21, 0.0 }
 0x15f   : > { %v1248_v26 = vpack.c.bf16 %v1035_v24, %v1034_v23 }
 0x161   : > { %1053 = vst [vmem:[%s1631_s3 + $0x8] sm:$0xff] %v1248_v26 }
 0x162 PF: > { %s13_s14 = sadd.s32 1, %s1444_s14   ;;  %s1632_s12 = smov %s1440_s13 }
 0x163   : > { %p10_p8 = scmp.ge.s32.totalorder %s13_s14, 8   ;;  %s1633_s13 = smov %s1635_s15 }
 0x165   :  { %12 = sbr.rel (!%p10_p8) target bundleno = 2 (0x2), region = 73 }

// kernel: resnet4channel_forward.70
= control target key start
LH: loop header
LB: loop body
LE: loop exit
PB: predicated region body
PF: predicated region fallthrough
CT: control target
= control target key end

     0   :  { %s955_s1 = inlined_call_operand.vmem [shape: bf16[256,512], index: 1, kind: input, shape index: {}]   ;;  %s956_s0 = inlined_call_operand.vmem [shape: bf16[8,256], index: 0, kind: input, shape index: {}]   ;;  %s957_s2 = inlined_call_operand.vmem [shape: f32[1,512], index: 2, kind: input, shape index: {}]   ;;  %s958_s3 = inlined_call_operand.vmem [shape: bf16[8,512], index: 3, kind: output, shape index: {}]  }
   0x1   :  { %v633_v0 = vld [vmem:[%s955_s1 + $0x4] ss:$16 sps:$4 sm:$0xff]   ;;  %v635_v1 = vld [vmem:[%s955_s1 + $0xc] ss:$16 sps:$4 sm:$0xff]   ;;  %v637_v2 = vld [vmem:[%s955_s1] ss:$16 sps:$4 sm:$0xff]  }
   0x2   :  { %418 = vmatprep.subr.bf16.mxu0 %v633_v0  ;;  %v638_v3 = vld [vmem:[%s955_s1 + $0x8] ss:$16 sps:$4 sm:$0xff]   ;;  %459 = vmatprep.subr.bf16.mxu1 %v635_v1  ;;  %v639_v4 = vld [vmem:[%s955_s1 + $0x24] ss:$16 sps:$4 sm:$0xff]   ;;  %v641_v5 = vld [vmem:[%s955_s1 + $0x2c] ss:$16 sps:$4 sm:$0xff]  }
   0x3   :  { %419 = vmatpush1.bf16.msra.mxu0 %v637_v2  ;;  %460 = vmatpush1.bf16.msra.mxu1 %v638_v3  ;;  %v643_v6 = vld [vmem:[%s955_s1 + $0x20] ss:$16 sps:$4 sm:$0xff]   ;;  %v644_v7 = vld [vmem:[%s955_s1 + $0x28] ss:$16 sps:$4 sm:$0xff]   ;;  %v645_v8 = vld [vmem:[%s955_s1 + $0x44] ss:$16 sps:$4 sm:$0xff]   ;;  %v517_v3 = vlaneseq }
   0x4   :  { %420 = vmatprep.subr.bf16.mxu0 %v639_v4  ;;  %461 = vmatprep.subr.bf16.mxu1 %v641_v5  ;;  %v647_v9 = vld [vmem:[%s955_s1 + $0x4c] ss:$16 sps:$4 sm:$0xff]   ;;  %v649_v10 = vld [vmem:[%s955_s1 + $0x40] ss:$16 sps:$4 sm:$0xff]   ;;  %v650_v11 = vld [vmem:[%s955_s1 + $0x48] ss:$16 sps:$4 sm:$0xff]  }
   0x5   :  { %v651_v12 = vld [vmem:[%s955_s1 + $0x64] ss:$16 sps:$4 sm:$0xff]   ;;  %v653_v13 = vld [vmem:[%s955_s1 + $0x6c] ss:$16 sps:$4 sm:$0xff]   ;;  %v655_v14 = vld [vmem:[%s955_s1 + $0x60] ss:$16 sps:$4 sm:$0xff]  }
   0x6   :  { %v656_v15 = vld [vmem:[%s955_s1 + $0x68] ss:$16 sps:$4 sm:$0xff]   ;;  %v657_v16 = vld [vmem:[%s955_s1 + $0x84] ss:$16 sps:$4 sm:$0xff]   ;;  %v659_v17 = vld [vmem:[%s955_s1 + $0x8c] ss:$16 sps:$4 sm:$0xff]  }
   0x7   :  { %421 = vmatpush1.bf16.msra.mxu0 %v643_v6  ;;  %462 = vmatpush1.bf16.msra.mxu1 %v644_v7  ;;  %v661_v18 = vld [vmem:[%s955_s1 + $0x80] ss:$16 sps:$4 sm:$0xff]   ;;  %v662_v19 = vld [vmem:[%s955_s1 + $0x88] ss:$16 sps:$4 sm:$0xff]   ;;  %v663_v20 = vld [vmem:[%s955_s1 + $0xa4] ss:$16 sps:$4 sm:$0xff]  }
   0x8   :  { %422 = vmatprep.subr.bf16.mxu0 %v645_v8  ;;  %463 = vmatprep.subr.bf16.mxu1 %v647_v9  ;;  %v665_v21 = vld [vmem:[%s955_s1 + $0xac] ss:$16 sps:$4 sm:$0xff]   ;;  %v667_v22 = vld [vmem:[%s955_s1 + $0xa0] ss:$16 sps:$4 sm:$0xff]   ;;  %v668_v23 = vld [vmem:[%s955_s1 + $0xa8] ss:$16 sps:$4 sm:$0xff]  }
   0x9   :  { %v669_v24 = vld [vmem:[%s955_s1 + $0xc4] ss:$16 sps:$4 sm:$0xff]   ;;  %v671_v25 = vld [vmem:[%s955_s1 + $0xcc] ss:$16 sps:$4 sm:$0xff]   ;;  %v673_v26 = vld [vmem:[%s955_s1 + $0xc0] ss:$16 sps:$4 sm:$0xff]  }
   0xa   :  { %v674_v27 = vld [vmem:[%s955_s1 + $0xc8] ss:$16 sps:$4 sm:$0xff]   ;;  %v675_v28 = vld [vmem:[%s955_s1 + $0xe4] ss:$16 sps:$4 sm:$0xff]   ;;  %v677_v29 = vld [vmem:[%s955_s1 + $0xec] ss:$16 sps:$4 sm:$0xff]  }
   0xb   :  { %423 = vmatpush1.bf16.msra.mxu0 %v649_v10  ;;  %464 = vmatpush1.bf16.msra.mxu1 %v650_v11  ;;  %v679_v30 = vld [vmem:[%s955_s1 + $0xe0] ss:$16 sps:$4 sm:$0xff]   ;;  %v680_v31 = vld [vmem:[%s955_s1 + $0xe8] ss:$16 sps:$4 sm:$0xff]   ;;  %v681_v32 = vld [vmem:[%s955_s1 + $0x104] ss:$16 sps:$4 sm:$0xff]  }
   0xc   :  { %424 = vmatprep.subr.bf16.mxu0 %v651_v12  ;;  %465 = vmatprep.subr.bf16.mxu1 %v653_v13  ;;  %v683_v33 = vld [vmem:[%s955_s1 + $0x10c] ss:$16 sps:$4 sm:$0xff]   ;;  %v685_v34 = vld [vmem:[%s955_s1 + $0x100] ss:$16 sps:$4 sm:$0xff]   ;;  %v686_v35 = vld [vmem:[%s955_s1 + $0x108] ss:$16 sps:$4 sm:$0xff]  }
   0xd   :  { %v687_v36 = vld [vmem:[%s955_s1 + $0x124] ss:$16 sps:$4 sm:$0xff]   ;;  %v689_v37 = vld [vmem:[%s955_s1 + $0x12c] ss:$16 sps:$4 sm:$0xff]   ;;  %v691_v38 = vld [vmem:[%s955_s1 + $0x120] ss:$16 sps:$4 sm:$0xff]  }
   0xe   :  { %v692_v39 = vld [vmem:[%s955_s1 + $0x128] ss:$16 sps:$4 sm:$0xff]   ;;  %v693_v40 = vld [vmem:[%s955_s1 + $0x144] ss:$16 sps:$4 sm:$0xff]   ;;  %v695_v41 = vld [vmem:[%s955_s1 + $0x14c] ss:$16 sps:$4 sm:$0xff]  }
   0xf   :  { %425 = vmatpush1.bf16.msra.mxu0 %v655_v14  ;;  %466 = vmatpush1.bf16.msra.mxu1 %v656_v15  ;;  %v697_v42 = vld [vmem:[%s955_s1 + $0x140] ss:$16 sps:$4 sm:$0xff]   ;;  %v698_v43 = vld [vmem:[%s955_s1 + $0x148] ss:$16 sps:$4 sm:$0xff]   ;;  %v699_v44 = vld [vmem:[%s955_s1 + $0x164] ss:$16 sps:$4 sm:$0xff]  }
  0x10   :  { %426 = vmatprep.subr.bf16.mxu0 %v657_v16  ;;  %467 = vmatprep.subr.bf16.mxu1 %v659_v17  ;;  %v701_v45 = vld [vmem:[%s955_s1 + $0x16c] ss:$16 sps:$4 sm:$0xff]   ;;  %v26_v46 = vld [vmem:[%s956_s0] sm:$0xff]  ;;  %v704_v49 = vld [vmem:[%s955_s1 + $0x168] ss:$16 sps:$4 sm:$0xff]   ;;  %v518_v4 = vshrl.u32 %v517_v3, 7 }
  0x11   :  { %v564_v47 = vcombine.high %v26_v46, %v26_v46  ;;  %v703_v48 = vld [vmem:[%s955_s1 + $0x160] ss:$16 sps:$4 sm:$0xff]   ;;  %v705_v50 = vld [vmem:[%s955_s1 + $0x184] ss:$16 sps:$4 sm:$0xff]   ;;  %v707_v51 = vld [vmem:[%s955_s1 + $0x18c] ss:$16 sps:$4 sm:$0xff]   ;;  %v563_v2 = vcombine.low %v26_v46, %v26_v46 }
  0x12   :  { %v709_v52 = vld [vmem:[%s955_s1 + $0x180] ss:$16 sps:$4 sm:$0xff]   ;;  %v710_v53 = vld [vmem:[%s955_s1 + $0x188] ss:$16 sps:$4 sm:$0xff]   ;;  %v711_v54 = vld [vmem:[%s955_s1 + $0x1a4] ss:$16 sps:$4 sm:$0xff]  }
  0x13   :  { %427 = vmatpush1.bf16.msra.mxu0 %v661_v18  ;;  %468 = vmatpush1.bf16.msra.mxu1 %v662_v19  ;;  %v713_v55 = vld [vmem:[%s955_s1 + $0x1ac] ss:$16 sps:$4 sm:$0xff]   ;;  %v715_v56 = vld [vmem:[%s955_s1 + $0x1a0] ss:$16 sps:$4 sm:$0xff]   ;;  %v716_v57 = vld [vmem:[%s955_s1 + $0x1a8] ss:$16 sps:$4 sm:$0xff]  }
  0x14   :  { %428 = vmatprep.subr.bf16.mxu0 %v663_v20  ;;  %469 = vmatprep.subr.bf16.mxu1 %v665_v21  ;;  %v717_v58 = vld [vmem:[%s955_s1 + $0x1c4] ss:$16 sps:$4 sm:$0xff]   ;;  %v719_v59 = vld [vmem:[%s955_s1 + $0x1cc] ss:$16 sps:$4 sm:$0xff]   ;;  %v721_v60 = vld [vmem:[%s955_s1 + $0x1c0] ss:$16 sps:$4 sm:$0xff]  }
  0x15   :  { %450 = vmatprep.mubr.bf16.mxu0 %v564_v47  ;;  %491 = vmatprep.mubr.bf16.mxu1 %v564_v47  ;;  %v722_v61 = vld [vmem:[%s955_s1 + $0x1c8] ss:$16 sps:$4 sm:$0xff]   ;;  %v723_v62 = vld [vmem:[%s955_s1 + $0x1e4] ss:$16 sps:$4 sm:$0xff]   ;;  %v725_v63 = vld [vmem:[%s955_s1 + $0x1ec] ss:$16 sps:$4 sm:$0xff]  }
  0x16   :  { %v727_v0 = vld [vmem:[%s955_s1 + $0x1e0] ss:$16 sps:$4 sm:$0xff]   ;;  %v728_v1 = vld [vmem:[%s955_s1 + $0x1e8] ss:$16 sps:$4 sm:$0xff]   ;;  %v519_v5 = vsub.s32 0, %v518_v4  ;;  %v527_v6 = vsub.s32 2, %v518_v4 }
  0x17   :  { %429 = vmatpush1.bf16.msra.mxu0 %v667_v22  ;;  %470 = vmatpush1.bf16.msra.mxu1 %v668_v23  ;;  %v515_v7 = vld [vmem:[%s957_s2] sm:$0xf]  ;;  %v523_v8 = vsub.s32 1, %v518_v4  ;;  %v531_v9 = vsub.s32 3, %v518_v4 }
  0x18   :  { %430 = vmatprep.subr.bf16.mxu0 %v669_v24  ;;  %471 = vmatprep.subr.bf16.mxu1 %v671_v25  ;;  %v520_v10 = vrot.slane %v515_v7, %v519_v5  ;;  %v528_v11 = vrot.slane %v515_v7, %v527_v6 }
  0x19   :  { %v524_v12 = vrot.slane %v515_v7, %v523_v8  ;;  %v532_v13 = vrot.slane %v515_v7, %v531_v9 }
  0x1b   :  { %431 = vmatpush1.bf16.msra.mxu0 %v673_v26  ;;  %472 = vmatpush1.bf16.msra.mxu1 %v674_v27 }
  0x1c   :  { %432 = vmatprep.subr.bf16.mxu0 %v675_v28  ;;  %473 = vmatprep.subr.bf16.mxu1 %v677_v29 }
  0x1f   :  { %433 = vmatpush1.bf16.msra.mxu0 %v679_v30  ;;  %474 = vmatpush1.bf16.msra.mxu1 %v680_v31 }
  0x20   :  { %434 = vmatprep.subr.bf16.mxu0 %v681_v32  ;;  %475 = vmatprep.subr.bf16.mxu1 %v683_v33 }
  0x23   :  { %435 = vmatpush1.bf16.msra.mxu0 %v685_v34  ;;  %476 = vmatpush1.bf16.msra.mxu1 %v686_v35 }
  0x24   :  { %436 = vmatprep.subr.bf16.mxu0 %v687_v36  ;;  %477 = vmatprep.subr.bf16.mxu1 %v689_v37 }
  0x27   :  { %437 = vmatpush1.bf16.msra.mxu0 %v691_v38  ;;  %478 = vmatpush1.bf16.msra.mxu1 %v692_v39 }
  0x28   :  { %438 = vmatprep.subr.bf16.mxu0 %v693_v40  ;;  %479 = vmatprep.subr.bf16.mxu1 %v695_v41 }
  0x2b   :  { %439 = vmatpush1.bf16.msra.mxu0 %v697_v42  ;;  %480 = vmatpush1.bf16.msra.mxu1 %v698_v43 }
  0x2c   :  { %440 = vmatprep.subr.bf16.mxu0 %v699_v44  ;;  %481 = vmatprep.subr.bf16.mxu1 %v701_v45 }
  0x2f   :  { %441 = vmatpush1.bf16.msra.mxu0 %v703_v48  ;;  %482 = vmatpush1.bf16.msra.mxu1 %v704_v49 }
  0x30   :  { %442 = vmatprep.subr.bf16.mxu0 %v705_v50  ;;  %483 = vmatprep.subr.bf16.mxu1 %v707_v51 }
  0x33   :  { %443 = vmatpush1.bf16.msra.mxu0 %v709_v52  ;;  %484 = vmatpush1.bf16.msra.mxu1 %v710_v53 }
  0x34   :  { %444 = vmatprep.subr.bf16.mxu0 %v711_v54  ;;  %485 = vmatprep.subr.bf16.mxu1 %v713_v55 }
  0x37   :  { %445 = vmatpush1.bf16.msra.mxu0 %v715_v56  ;;  %486 = vmatpush1.bf16.msra.mxu1 %v716_v57 }
  0x38   :  { %446 = vmatprep.subr.bf16.mxu0 %v717_v58  ;;  %487 = vmatprep.subr.bf16.mxu1 %v719_v59 }
  0x3b   :  { %447 = vmatpush1.bf16.msra.mxu0 %v721_v60  ;;  %488 = vmatpush1.bf16.msra.mxu1 %v722_v61 }
  0x3c   :  { %448 = vmatprep.subr.bf16.mxu0 %v723_v62  ;;  %489 = vmatprep.subr.bf16.mxu1 %v725_v63 }
  0x3f   :  { %449 = vmatpush1.bf16.msra.mxu0 %v727_v0  ;;  %490 = vmatpush1.bf16.msra.mxu1 %v728_v1 }
  0x42   :  { %451 = vmatmul.mubr.bf16.vlgmr.msra.gmra.mrb[0].mxu0 %v563_v2  ;;  %492 = vmatmul.mubr.bf16.vlgmr.msra.gmra.mrb[0].mxu1 %v563_v2 }
 0x115   :  { %v452_v14 = vpop.f32.mrb[0].mxu0  ;;  %v493_v15 = vpop.f32.mrb[0].mxu1 }
 0x116   :  { %v537_v16 = vadd.f32 %v520_v10, %v452_v14  ;;  %v539_v17 = vadd.f32 %v528_v11, %v493_v15  ;;  %v454_v18 = vpop.f32.mrb[1].mxu0  ;;  %v495_v19 = vpop.f32.mrb[1].mxu1 }
 0x117   :  { %v538_v20 = vadd.f32 %v524_v12, %v454_v18  ;;  %v540_v21 = vadd.f32 %v532_v13, %v495_v19  ;;  %v456_v22 = vpop.f32.mrb[2].mxu0  ;;  %v497_v23 = vpop.f32.mrb[2].mxu1 }
 0x118   :  { %v457_v24 = vpop.f32.mrb[3].mxu0  ;;  %v498_v25 = vpop.f32.mrb[3].mxu1 }
 0x119   :  { %v631_v26 = vpack.c.bf16 %v538_v20, %v537_v16  ;;  %v632_v27 = vpack.c.bf16 %v540_v21, %v539_v17 }
 0x11b   :  { %557 = vst [vmem:[%s958_s3] sm:$0xff] %v631_v26  ;;  %558 = vst [vmem:[%s958_s3 + $0x8] sm:$0xff] %v632_v27 }

// kernel: resnet4channel_forward.71
= control target key start
LH: loop header
LB: loop body
LE: loop exit
PB: predicated region body
PF: predicated region fallthrough
CT: control target
= control target key end

     0   :  { %s1822_s15 = smov 0   ;;  %s1824_s16 = smov 0   ;;  %s2022_s0 = inlined_call_operand.vmem [shape: bf16[8,4608], index: 0, kind: input, shape index: {}]   ;;  %s2023_s1 = inlined_call_operand.vmem [shape: bf16[4608,512], index: 1, kind: input, shape index: {}]   ;;  %s2024_s2 = inlined_call_operand.vmem [shape: f32[1,512], index: 2, kind: input, shape index: {}]   ;;  %s2025_s3 = inlined_call_operand.vmem [shape: bf16[8,512], index: 3, kind: input, shape index: {}]   ;;  %s2026_s4 = inlined_call_operand.vmem [shape: bf16[8,512], index: 4, kind: output, shape index: {}]  }
   0x1   :  { %s1826_s17 = smov 0  }
   0x2 LB: > { %s23_s18 = sadd.s32 1, %s1790_s16  ;;  %p1403_p0 = scmp.ge.s32.totalorder %s1794_s17, 1  ;;  %s1794_s17 = sphi %s1826_s17, %s14_s17   ;;  %s1790_s16 = sphi %s1824_s16, %s2028_s16   ;;  %s1786_s15 = sphi %s1822_s15, %s2027_s15  }
   0x3   : > { %p24_p1 = scmp.ge.s32.totalorder %s23_s18, 9  ;;  %p203_p2 = scmp.lt.s32.totalorder %s1794_s17, 10 }
   0x5   : > { %s2030_s18 = smov (%p24_p1, %s23_s18), 0  ;;  %p204_p3 = pnand %p1403_p0, %p203_p2 }
   0x6   : > { %s1404_s19 = sshll.u32 (!%p204_p3), %s1786_s15, 2  ;;  %s1406_s20 = sshll.u32 (!%p204_p3), %s1786_s15, 6 }
   0x7   : > { %207 = sbr.rel (%p204_p3) target bundleno = 388 (0x184), region = 36  ;;  %p247_p4 = scmp.lt.s32.totalorder (!%p204_p3), %s1404_s19, 35 }
   0x8   : > { %p255_p5 = scmp.lt.s32.totalorder (!%p204_p3), %s1406_s20, 575  ;;  %p1409_p6 = scmp.ne.s32.totalorder (!%p204_p3), %s1786_s15, 0 }
   0xe   : > { %s2032_s19 = smov (!%p247_p4, %s1404_s19), 35  ;;  %s2034_s20 = smov (!%p255_p5, %s1406_s20), 575 }
   0xf   : > { %s1405_s21 = sshll.u32 %s2032_s19, 2  ;;  %s1548_s25 = sshll.u32 %s2034_s20, 4  ;;  %v1796_v0 = vmov (!%p1409_p6), 0.0  }
  0x10   : > { %s1847_s24 = scalar_lea.vmem %s2022_s0, %s1405_s21  ;;  %s1852_s28 = scalar_lea.vmem %s2023_s1, %s1548_s25  ;;  %275 = vst [vmem:[#allocation2] sm:$0xff] (!%p1409_p6), %v1796_v0  ;;  %276 = vst [vmem:[#allocation2 + $0x8] sm:$0xff] (!%p1409_p6), %v1796_v0 }
  0x11   : > { %274 = sbr.rel (%p1409_p6) target bundleno = 24 (0x18), region = 40  ;;  %277 = vst [vmem:[#allocation2 + $0x10] sm:$0xff] (!%p1409_p6), %v1796_v0  ;;  %278 = vst [vmem:[#allocation2 + $0x18] sm:$0xff] (!%p1409_p6), %v1796_v0 }
  0x18 PF: > { %v1576_v1 = vld [vmem:[%s1852_s28 + $0x4] ss:$16 sps:$4 sm:$0xff]   ;;  %v1580_v3 = vld [vmem:[%s1852_s28] ss:$16 sps:$4 sm:$0xff]   ;;  %v284_v49 = vld [vmem:[%s1847_s24 + $0x8] sm:$0xff]  ;;  %p1542_p7 = scmp.ne.s32.totalorder %s1786_s15, 8 }
  0x19   : > { %v1578_v2 = vld [vmem:[%s1852_s28 + $0x204] ss:$16 sps:$4 sm:$0xff]   ;;  %1067 = vmatprep.subr.bf16.mxu0 %v1576_v1  ;;  %v1581_v4 = vld [vmem:[%s1852_s28 + $0x200] ss:$16 sps:$4 sm:$0xff]   ;;  %v1413_v52 = vcombine.high %v284_v49, %v284_v49 }
  0x1a   : > { %1108 = vmatprep.subr.bf16.mxu1 %v1578_v2  ;;  %v1582_v5 = vld [vmem:[%s1852_s28 + $0x24] ss:$16 sps:$4 sm:$0xff]   ;;  %1068 = vmatpush1.bf16.msra.mxu0 %v1580_v3  ;;  %v1586_v7 = vld [vmem:[%s1852_s28 + $0x20] ss:$16 sps:$4 sm:$0xff]  }
  0x1b   : > { %1109 = vmatpush1.bf16.msra.mxu1 %v1581_v4  ;;  %v1584_v6 = vld [vmem:[%s1852_s28 + $0x224] ss:$16 sps:$4 sm:$0xff]   ;;  %1069 = vmatprep.subr.bf16.mxu0 %v1582_v5  ;;  %v1587_v8 = vld [vmem:[%s1852_s28 + $0x220] ss:$16 sps:$4 sm:$0xff]   ;;  %v1678_v5 = vld [vmem:[%s1852_s28 + $0xc] ss:$16 sps:$4 sm:$0xff]  }
  0x1c   : > { %1110 = vmatprep.subr.bf16.mxu1 %v1584_v6  ;;  %v1588_v9 = vld [vmem:[%s1852_s28 + $0x44] ss:$16 sps:$4 sm:$0xff]   ;;  %v1592_v11 = vld [vmem:[%s1852_s28 + $0x40] ss:$16 sps:$4 sm:$0xff]   ;;  %1140 = vmatprep.mubr.bf16.mxu1 %v1413_v52  ;;  %v1681_v6 = vld [vmem:[%s1852_s28 + $0x20c] ss:$16 sps:$4 sm:$0xff]  }
  0x1d   : > { %v1590_v10 = vld [vmem:[%s1852_s28 + $0x244] ss:$16 sps:$4 sm:$0xff]   ;;  %v1593_v12 = vld [vmem:[%s1852_s28 + $0x240] ss:$16 sps:$4 sm:$0xff]  }
  0x1e   : > { %1070 = vmatpush1.bf16.msra.mxu0 %v1586_v7  ;;  %v1594_v13 = vld [vmem:[%s1852_s28 + $0x64] ss:$16 sps:$4 sm:$0xff]   ;;  %v1598_v15 = vld [vmem:[%s1852_s28 + $0x60] ss:$16 sps:$4 sm:$0xff]  }
  0x1f   : > { %1111 = vmatpush1.bf16.msra.mxu1 %v1587_v8  ;;  %1071 = vmatprep.subr.bf16.mxu0 %v1588_v9  ;;  %v1596_v14 = vld [vmem:[%s1852_s28 + $0x264] ss:$16 sps:$4 sm:$0xff]   ;;  %v1599_v16 = vld [vmem:[%s1852_s28 + $0x260] ss:$16 sps:$4 sm:$0xff]   ;;  %v1928_v8 = vcombine.low %v284_v49, %v284_v49  ;;  %v1676_v9 = vld [vmem:[%s1852_s28 + $0x8] ss:$16 sps:$4 sm:$0xff]  }
  0x20   : > { %1112 = vmatprep.subr.bf16.mxu1 %v1590_v10  ;;  %v1600_v17 = vld [vmem:[%s1852_s28 + $0x84] ss:$16 sps:$4 sm:$0xff]   ;;  %v1604_v19 = vld [vmem:[%s1852_s28 + $0x80] ss:$16 sps:$4 sm:$0xff]   ;;  %v1679_v10 = vld [vmem:[%s1852_s28 + $0x208] ss:$16 sps:$4 sm:$0xff]  }
  0x21   : > { %v1602_v18 = vld [vmem:[%s1852_s28 + $0x284] ss:$16 sps:$4 sm:$0xff]   ;;  %v1605_v20 = vld [vmem:[%s1852_s28 + $0x280] ss:$16 sps:$4 sm:$0xff]   ;;  %v1736_v49 = vld [vmem:[%s1852_s28 + $0x148] ss:$16 sps:$4 sm:$0xff]  }
  0x22   : > { %1072 = vmatpush1.bf16.msra.mxu0 %v1592_v11  ;;  %v1606_v21 = vld [vmem:[%s1852_s28 + $0xa4] ss:$16 sps:$4 sm:$0xff]   ;;  %v1610_v23 = vld [vmem:[%s1852_s28 + $0xa0] ss:$16 sps:$4 sm:$0xff]   ;;  %v1684_v11 = vld [vmem:[%s1852_s28 + $0x2c] ss:$16 sps:$4 sm:$0xff]  }
  0x23   : > { %1113 = vmatpush1.bf16.msra.mxu1 %v1593_v12  ;;  %1073 = vmatprep.subr.bf16.mxu0 %v1594_v13  ;;  %v1608_v22 = vld [vmem:[%s1852_s28 + $0x2a4] ss:$16 sps:$4 sm:$0xff]   ;;  %v1611_v24 = vld [vmem:[%s1852_s28 + $0x2a0] ss:$16 sps:$4 sm:$0xff]   ;;  %v1687_v12 = vld [vmem:[%s1852_s28 + $0x22c] ss:$16 sps:$4 sm:$0xff]  }
  0x24   : > { %1114 = vmatprep.subr.bf16.mxu1 %v1596_v14  ;;  %v1612_v25 = vld [vmem:[%s1852_s28 + $0xc4] ss:$16 sps:$4 sm:$0xff]   ;;  %v1616_v27 = vld [vmem:[%s1852_s28 + $0xc0] ss:$16 sps:$4 sm:$0xff]   ;;  %v1682_v13 = vld [vmem:[%s1852_s28 + $0x28] ss:$16 sps:$4 sm:$0xff]  }
  0x25   : > { %v1614_v26 = vld [vmem:[%s1852_s28 + $0x2c4] ss:$16 sps:$4 sm:$0xff]   ;;  %v1617_v28 = vld [vmem:[%s1852_s28 + $0x2c0] ss:$16 sps:$4 sm:$0xff]   ;;  %v1685_v14 = vld [vmem:[%s1852_s28 + $0x228] ss:$16 sps:$4 sm:$0xff]  }
  0x26   : > { %1074 = vmatpush1.bf16.msra.mxu0 %v1598_v15  ;;  %v1618_v29 = vld [vmem:[%s1852_s28 + $0xe4] ss:$16 sps:$4 sm:$0xff]   ;;  %v1622_v31 = vld [vmem:[%s1852_s28 + $0xe0] ss:$16 sps:$4 sm:$0xff]   ;;  %v1690_v15 = vld [vmem:[%s1852_s28 + $0x4c] ss:$16 sps:$4 sm:$0xff]  }
  0x27   : > { %1115 = vmatpush1.bf16.msra.mxu1 %v1599_v16  ;;  %1075 = vmatprep.subr.bf16.mxu0 %v1600_v17  ;;  %v1620_v30 = vld [vmem:[%s1852_s28 + $0x2e4] ss:$16 sps:$4 sm:$0xff]   ;;  %v1623_v32 = vld [vmem:[%s1852_s28 + $0x2e0] ss:$16 sps:$4 sm:$0xff]   ;;  %v1693_v16 = vld [vmem:[%s1852_s28 + $0x24c] ss:$16 sps:$4 sm:$0xff]  }
  0x28   : > { %1116 = vmatprep.subr.bf16.mxu1 %v1602_v18  ;;  %v1624_v33 = vld [vmem:[%s1852_s28 + $0x104] ss:$16 sps:$4 sm:$0xff]   ;;  %v1628_v35 = vld [vmem:[%s1852_s28 + $0x100] ss:$16 sps:$4 sm:$0xff]   ;;  %v1688_v17 = vld [vmem:[%s1852_s28 + $0x48] ss:$16 sps:$4 sm:$0xff]  }
  0x29   : > { %v1626_v34 = vld [vmem:[%s1852_s28 + $0x304] ss:$16 sps:$4 sm:$0xff]   ;;  %v1629_v36 = vld [vmem:[%s1852_s28 + $0x300] ss:$16 sps:$4 sm:$0xff]   ;;  %v1691_v18 = vld [vmem:[%s1852_s28 + $0x248] ss:$16 sps:$4 sm:$0xff]  }
  0x2a   : > { %1076 = vmatpush1.bf16.msra.mxu0 %v1604_v19  ;;  %v1630_v37 = vld [vmem:[%s1852_s28 + $0x124] ss:$16 sps:$4 sm:$0xff]   ;;  %v1634_v39 = vld [vmem:[%s1852_s28 + $0x120] ss:$16 sps:$4 sm:$0xff]   ;;  %v1696_v19 = vld [vmem:[%s1852_s28 + $0x6c] ss:$16 sps:$4 sm:$0xff]  }
  0x2b   : > { %1117 = vmatpush1.bf16.msra.mxu1 %v1605_v20  ;;  %1077 = vmatprep.subr.bf16.mxu0 %v1606_v21  ;;  %v1632_v38 = vld [vmem:[%s1852_s28 + $0x324] ss:$16 sps:$4 sm:$0xff]   ;;  %v1635_v40 = vld [vmem:[%s1852_s28 + $0x320] ss:$16 sps:$4 sm:$0xff]   ;;  %v1699_v20 = vld [vmem:[%s1852_s28 + $0x26c] ss:$16 sps:$4 sm:$0xff]  }
  0x2c   : > { %1118 = vmatprep.subr.bf16.mxu1 %v1608_v22  ;;  %v1636_v41 = vld [vmem:[%s1852_s28 + $0x144] ss:$16 sps:$4 sm:$0xff]   ;;  %v1640_v43 = vld [vmem:[%s1852_s28 + $0x140] ss:$16 sps:$4 sm:$0xff]   ;;  %v1694_v21 = vld [vmem:[%s1852_s28 + $0x68] ss:$16 sps:$4 sm:$0xff]  }
  0x2d   : > { %v1638_v42 = vld [vmem:[%s1852_s28 + $0x344] ss:$16 sps:$4 sm:$0xff]   ;;  %v1641_v44 = vld [vmem:[%s1852_s28 + $0x340] ss:$16 sps:$4 sm:$0xff]   ;;  %v1697_v22 = vld [vmem:[%s1852_s28 + $0x268] ss:$16 sps:$4 sm:$0xff]  }
  0x2e   : > { %1078 = vmatpush1.bf16.msra.mxu0 %v1610_v23  ;;  %v1642_v45 = vld [vmem:[%s1852_s28 + $0x164] ss:$16 sps:$4 sm:$0xff]   ;;  %v1646_v50 = vld [vmem:[%s1852_s28 + $0x160] ss:$16 sps:$4 sm:$0xff]   ;;  %v1702_v23 = vld [vmem:[%s1852_s28 + $0x8c] ss:$16 sps:$4 sm:$0xff]  }
  0x2f   : > { %1119 = vmatpush1.bf16.msra.mxu1 %v1611_v24  ;;  %1079 = vmatprep.subr.bf16.mxu0 %v1612_v25  ;;  %v1644_v46 = vld [vmem:[%s1852_s28 + $0x364] ss:$16 sps:$4 sm:$0xff]   ;;  %v1647_v51 = vld [vmem:[%s1852_s28 + $0x360] ss:$16 sps:$4 sm:$0xff]   ;;  %v1705_v24 = vld [vmem:[%s1852_s28 + $0x28c] ss:$16 sps:$4 sm:$0xff]  }
  0x30   : > { %1120 = vmatprep.subr.bf16.mxu1 %v1614_v26  ;;  %v283_v47 = vld [vmem:[%s1847_s24] sm:$0xff]  ;;  %v1700_v25 = vld [vmem:[%s1852_s28 + $0x88] ss:$16 sps:$4 sm:$0xff]  }
  0x31   : > { %v1902_v48 = vcombine.high %v283_v47, %v283_v47  ;;  %v1648_v53 = vld [vmem:[%s1852_s28 + $0x184] ss:$16 sps:$4 sm:$0xff]   ;;  %v1652_v55 = vld [vmem:[%s1852_s28 + $0x180] ss:$16 sps:$4 sm:$0xff]   ;;  %v1926_v7 = vcombine.low %v283_v47, %v283_v47  ;;  %v1703_v26 = vld [vmem:[%s1852_s28 + $0x288] ss:$16 sps:$4 sm:$0xff]  }
  0x32   : > { %1080 = vmatpush1.bf16.msra.mxu0 %v1616_v27  ;;  %v1650_v54 = vld [vmem:[%s1852_s28 + $0x384] ss:$16 sps:$4 sm:$0xff]   ;;  %v1653_v56 = vld [vmem:[%s1852_s28 + $0x380] ss:$16 sps:$4 sm:$0xff]   ;;  %v1708_v27 = vld [vmem:[%s1852_s28 + $0xac] ss:$16 sps:$4 sm:$0xff]  }
  0x33   : > { %1121 = vmatpush1.bf16.msra.mxu1 %v1617_v28  ;;  %1081 = vmatprep.subr.bf16.mxu0 %v1618_v29  ;;  %v1654_v57 = vld [vmem:[%s1852_s28 + $0x1a4] ss:$16 sps:$4 sm:$0xff]   ;;  %v1658_v59 = vld [vmem:[%s1852_s28 + $0x1a0] ss:$16 sps:$4 sm:$0xff]   ;;  %v1711_v28 = vld [vmem:[%s1852_s28 + $0x2ac] ss:$16 sps:$4 sm:$0xff]  }
  0x34   : > { %1122 = vmatprep.subr.bf16.mxu1 %v1620_v30  ;;  %1099 = vmatprep.mubr.bf16.mxu0 %v1902_v48  ;;  %v1656_v58 = vld [vmem:[%s1852_s28 + $0x3a4] ss:$16 sps:$4 sm:$0xff]   ;;  %v1659_v60 = vld [vmem:[%s1852_s28 + $0x3a0] ss:$16 sps:$4 sm:$0xff]   ;;  %v1706_v29 = vld [vmem:[%s1852_s28 + $0xa8] ss:$16 sps:$4 sm:$0xff]  }
  0x35   : > { %v1660_v61 = vld [vmem:[%s1852_s28 + $0x1c4] ss:$16 sps:$4 sm:$0xff]   ;;  %v1664_v63 = vld [vmem:[%s1852_s28 + $0x1c0] ss:$16 sps:$4 sm:$0xff]   ;;  %v1709_v30 = vld [vmem:[%s1852_s28 + $0x2a8] ss:$16 sps:$4 sm:$0xff]  }
  0x36   : > { %1082 = vmatpush1.bf16.msra.mxu0 %v1622_v31  ;;  %v1662_v62 = vld [vmem:[%s1852_s28 + $0x3c4] ss:$16 sps:$4 sm:$0xff]   ;;  %v1665_v0 = vld [vmem:[%s1852_s28 + $0x3c0] ss:$16 sps:$4 sm:$0xff]   ;;  %v1714_v31 = vld [vmem:[%s1852_s28 + $0xcc] ss:$16 sps:$4 sm:$0xff]  }
  0x37   : > { %1123 = vmatpush1.bf16.msra.mxu1 %v1623_v32  ;;  %1083 = vmatprep.subr.bf16.mxu0 %v1624_v33  ;;  %v1666_v1 = vld [vmem:[%s1852_s28 + $0x1e4] ss:$16 sps:$4 sm:$0xff]   ;;  %v1670_v3 = vld [vmem:[%s1852_s28 + $0x1e0] ss:$16 sps:$4 sm:$0xff]   ;;  %v1717_v32 = vld [vmem:[%s1852_s28 + $0x2cc] ss:$16 sps:$4 sm:$0xff]  }
  0x38   : > { %1124 = vmatprep.subr.bf16.mxu1 %v1626_v34  ;;  %v1668_v2 = vld [vmem:[%s1852_s28 + $0x3e4] ss:$16 sps:$4 sm:$0xff]   ;;  %v1671_v4 = vld [vmem:[%s1852_s28 + $0x3e0] ss:$16 sps:$4 sm:$0xff]   ;;  %v1712_v33 = vld [vmem:[%s1852_s28 + $0xc8] ss:$16 sps:$4 sm:$0xff]  }
  0x39   : > { %v1715_v34 = vld [vmem:[%s1852_s28 + $0x2c8] ss:$16 sps:$4 sm:$0xff]   ;;  %v1738_v47 = vld [vmem:[%s1852_s28 + $0x14c] ss:$16 sps:$4 sm:$0xff]  }
  0x3a   : > { %1084 = vmatpush1.bf16.msra.mxu0 %v1628_v35  ;;  %v1720_v35 = vld [vmem:[%s1852_s28 + $0xec] ss:$16 sps:$4 sm:$0xff]  }
  0x3b   : > { %1125 = vmatpush1.bf16.msra.mxu1 %v1629_v36  ;;  %1085 = vmatprep.subr.bf16.mxu0 %v1630_v37  ;;  %v1723_v36 = vld [vmem:[%s1852_s28 + $0x2ec] ss:$16 sps:$4 sm:$0xff]   ;;  %v1718_v37 = vld [vmem:[%s1852_s28 + $0xe8] ss:$16 sps:$4 sm:$0xff]  }
  0x3c   : > { %1126 = vmatprep.subr.bf16.mxu1 %v1632_v38  ;;  %v1721_v38 = vld [vmem:[%s1852_s28 + $0x2e8] ss:$16 sps:$4 sm:$0xff]  }
  0x3e   : > { %1086 = vmatpush1.bf16.msra.mxu0 %v1634_v39  ;;  %v1726_v39 = vld [vmem:[%s1852_s28 + $0x10c] ss:$16 sps:$4 sm:$0xff]  }
  0x3f   : > { %1127 = vmatpush1.bf16.msra.mxu1 %v1635_v40  ;;  %1087 = vmatprep.subr.bf16.mxu0 %v1636_v41  ;;  %v1729_v40 = vld [vmem:[%s1852_s28 + $0x30c] ss:$16 sps:$4 sm:$0xff]   ;;  %v1724_v41 = vld [vmem:[%s1852_s28 + $0x108] ss:$16 sps:$4 sm:$0xff]  }
  0x40   : > { %1128 = vmatprep.subr.bf16.mxu1 %v1638_v42  ;;  %v1727_v42 = vld [vmem:[%s1852_s28 + $0x308] ss:$16 sps:$4 sm:$0xff]  }
  0x42   : > { %1088 = vmatpush1.bf16.msra.mxu0 %v1640_v43  ;;  %v1732_v43 = vld [vmem:[%s1852_s28 + $0x12c] ss:$16 sps:$4 sm:$0xff]  }
  0x43   : > { %1129 = vmatpush1.bf16.msra.mxu1 %v1641_v44  ;;  %1089 = vmatprep.subr.bf16.mxu0 %v1642_v45  ;;  %v1735_v44 = vld [vmem:[%s1852_s28 + $0x32c] ss:$16 sps:$4 sm:$0xff]   ;;  %v1730_v45 = vld [vmem:[%s1852_s28 + $0x128] ss:$16 sps:$4 sm:$0xff]  }
  0x44   : > { %1130 = vmatprep.subr.bf16.mxu1 %v1644_v46  ;;  %v1733_v46 = vld [vmem:[%s1852_s28 + $0x328] ss:$16 sps:$4 sm:$0xff]  }
  0x46   : > { %1090 = vmatpush1.bf16.msra.mxu0 %v1646_v50  ;;  %v1739_v50 = vld [vmem:[%s1852_s28 + $0x348] ss:$16 sps:$4 sm:$0xff]  }
  0x47   : > { %1131 = vmatpush1.bf16.msra.mxu1 %v1647_v51  ;;  %1091 = vmatprep.subr.bf16.mxu0 %v1648_v53  ;;  %v1744_v51 = vld [vmem:[%s1852_s28 + $0x16c] ss:$16 sps:$4 sm:$0xff]   ;;  %v1742_v53 = vld [vmem:[%s1852_s28 + $0x168] ss:$16 sps:$4 sm:$0xff]  }
  0x48   : > { %1132 = vmatprep.subr.bf16.mxu1 %v1650_v54  ;;  %v1745_v54 = vld [vmem:[%s1852_s28 + $0x368] ss:$16 sps:$4 sm:$0xff]  }
  0x4a   : > { %1092 = vmatpush1.bf16.msra.mxu0 %v1652_v55  ;;  %v1750_v55 = vld [vmem:[%s1852_s28 + $0x18c] ss:$16 sps:$4 sm:$0xff]  }
  0x4b   : > { %1133 = vmatpush1.bf16.msra.mxu1 %v1653_v56  ;;  %1093 = vmatprep.subr.bf16.mxu0 %v1654_v57  ;;  %v1753_v56 = vld [vmem:[%s1852_s28 + $0x38c] ss:$16 sps:$4 sm:$0xff]   ;;  %v1748_v57 = vld [vmem:[%s1852_s28 + $0x188] ss:$16 sps:$4 sm:$0xff]  }
  0x4c   : > { %1134 = vmatprep.subr.bf16.mxu1 %v1656_v58  ;;  %v1751_v58 = vld [vmem:[%s1852_s28 + $0x388] ss:$16 sps:$4 sm:$0xff]  }
  0x4e   : > { %1094 = vmatpush1.bf16.msra.mxu0 %v1658_v59  ;;  %v1756_v59 = vld [vmem:[%s1852_s28 + $0x1ac] ss:$16 sps:$4 sm:$0xff]  }
  0x4f   : > { %1135 = vmatpush1.bf16.msra.mxu1 %v1659_v60  ;;  %1095 = vmatprep.subr.bf16.mxu0 %v1660_v61  ;;  %v1759_v60 = vld [vmem:[%s1852_s28 + $0x3ac] ss:$16 sps:$4 sm:$0xff]   ;;  %v1754_v61 = vld [vmem:[%s1852_s28 + $0x1a8] ss:$16 sps:$4 sm:$0xff]  }
  0x50   : > { %1136 = vmatprep.subr.bf16.mxu1 %v1662_v62  ;;  %v1757_v62 = vld [vmem:[%s1852_s28 + $0x3a8] ss:$16 sps:$4 sm:$0xff]  }
  0x52   : > { %1096 = vmatpush1.bf16.msra.mxu0 %v1664_v63  ;;  %v1762_v63 = vld [vmem:[%s1852_s28 + $0x1cc] ss:$16 sps:$4 sm:$0xff]  }
  0x53   : > { %1137 = vmatpush1.bf16.msra.mxu1 %v1665_v0  ;;  %1097 = vmatprep.subr.bf16.mxu0 %v1666_v1  ;;  %v1765_v0 = vld [vmem:[%s1852_s28 + $0x3cc] ss:$16 sps:$4 sm:$0xff]   ;;  %v1760_v1 = vld [vmem:[%s1852_s28 + $0x1c8] ss:$16 sps:$4 sm:$0xff]  }
  0x54   : > { %1138 = vmatprep.subr.bf16.mxu1 %v1668_v2  ;;  %v1763_v2 = vld [vmem:[%s1852_s28 + $0x3c8] ss:$16 sps:$4 sm:$0xff]  }
  0x56   : > { %1098 = vmatpush1.bf16.msra.mxu0 %v1670_v3  ;;  %v1768_v3 = vld [vmem:[%s1852_s28 + $0x1ec] ss:$16 sps:$4 sm:$0xff]  }
  0x57   : > { %1139 = vmatpush1.bf16.msra.mxu1 %v1671_v4  ;;  %1149 = vmatprep.subr.bf16.mxu0 %v1678_v5  ;;  %v1771_v4 = vld [vmem:[%s1852_s28 + $0x3ec] ss:$16 sps:$4 sm:$0xff]   ;;  %v1766_v5 = vld [vmem:[%s1852_s28 + $0x1e8] ss:$16 sps:$4 sm:$0xff]  }
  0x58   : > { %1190 = vmatprep.subr.bf16.mxu1 %v1681_v6  ;;  %v1769_v6 = vld [vmem:[%s1852_s28 + $0x3e8] ss:$16 sps:$4 sm:$0xff]  }
  0x59   : > { %1100 = vmatmul.mubr.bf16.vlgmr.msra.gmra.mrb[0].mxu0 %v1926_v7 }
  0x5a   : > { %1141 = vmatmul.mubr.bf16.vlgmr.msra.gmra.mrb[0].mxu1 %v1928_v8  ;;  %1150 = vmatpush1.bf16.msra.mxu0 %v1676_v9 }
  0x5b   : > { %1191 = vmatpush1.bf16.msra.mxu1 %v1679_v10  ;;  %1151 = vmatprep.subr.bf16.mxu0 %v1684_v11  ;;  %v279_v10 = vld [vmem:[#allocation2] sm:$0xff] }
  0x5c   : > { %1192 = vmatprep.subr.bf16.mxu1 %v1687_v12  ;;  %1181 = vmatprep.mubr.bf16.mxu0 %v1902_v48  ;;  %v1741_v48 = vld [vmem:[%s1852_s28 + $0x34c] ss:$16 sps:$4 sm:$0xff]  }
  0x5d   : > { %1222 = vmatprep.mubr.bf16.mxu1 %v1413_v52  ;;  %v1747_v52 = vld [vmem:[%s1852_s28 + $0x36c] ss:$16 sps:$4 sm:$0xff]  }
  0x5e   : > { %1152 = vmatpush1.bf16.msra.mxu0 %v1682_v13 }
  0x5f   : > { %1193 = vmatpush1.bf16.msra.mxu1 %v1685_v14  ;;  %1153 = vmatprep.subr.bf16.mxu0 %v1690_v15  ;;  %v280_v14 = vld [vmem:[#allocation2 + $0x8] sm:$0xff] }
  0x60   : > { %1194 = vmatprep.subr.bf16.mxu1 %v1693_v16 }
  0x62   : > { %1154 = vmatpush1.bf16.msra.mxu0 %v1688_v17 }
  0x63   : > { %1195 = vmatpush1.bf16.msra.mxu1 %v1691_v18  ;;  %1155 = vmatprep.subr.bf16.mxu0 %v1696_v19 }
  0x64   : > { %1196 = vmatprep.subr.bf16.mxu1 %v1699_v20 }
  0x66   : > { %1156 = vmatpush1.bf16.msra.mxu0 %v1694_v21 }
  0x67   : > { %1197 = vmatpush1.bf16.msra.mxu1 %v1697_v22  ;;  %1157 = vmatprep.subr.bf16.mxu0 %v1702_v23 }
  0x68   : > { %1198 = vmatprep.subr.bf16.mxu1 %v1705_v24 }
  0x6a   : > { %1158 = vmatpush1.bf16.msra.mxu0 %v1700_v25 }
  0x6b   : > { %1199 = vmatpush1.bf16.msra.mxu1 %v1703_v26  ;;  %1159 = vmatprep.subr.bf16.mxu0 %v1708_v27  ;;  %v282_v26 = vld [vmem:[#allocation2 + $0x18] sm:$0xff] }
  0x6c   : > { %1200 = vmatprep.subr.bf16.mxu1 %v1711_v28 }
  0x6e   : > { %1160 = vmatpush1.bf16.msra.mxu0 %v1706_v29 }
  0x6f   : > { %1201 = vmatpush1.bf16.msra.mxu1 %v1709_v30  ;;  %1161 = vmatprep.subr.bf16.mxu0 %v1714_v31 }
  0x70   : > { %1202 = vmatprep.subr.bf16.mxu1 %v1717_v32 }
  0x72   : > { %1162 = vmatpush1.bf16.msra.mxu0 %v1712_v33 }
  0x73   : > { %1203 = vmatpush1.bf16.msra.mxu1 %v1715_v34  ;;  %1163 = vmatprep.subr.bf16.mxu0 %v1720_v35  ;;  %v1249_v35 = vlaneseq (!%p1542_p7) }
  0x74   : > { %1204 = vmatprep.subr.bf16.mxu1 %v1723_v36 }
  0x75   : > { %v1250_v36 = vshrl.u32 (!%p1542_p7), %v1249_v35, 7 }
  0x76   : > { %1164 = vmatpush1.bf16.msra.mxu0 %v1718_v37  ;;  %v1273_v37 = vld [vmem:[%s2025_s3] sm:$0xff] (!%p1542_p7) }
  0x77   : > { %1205 = vmatpush1.bf16.msra.mxu1 %v1721_v38  ;;  %1165 = vmatprep.subr.bf16.mxu0 %v1726_v39  ;;  %v1274_v38 = vld [vmem:[%s2025_s3 + $0x8] sm:$0xff] (!%p1542_p7)  ;;  %v1247_v39 = vld [vmem:[%s2024_s2] sm:$0xf] (!%p1542_p7) }
  0x78   : > { %1206 = vmatprep.subr.bf16.mxu1 %v1729_v40 }
  0x7a   : > { %1166 = vmatpush1.bf16.msra.mxu0 %v1724_v41  ;;  %v1251_v41 = vsub.s32 (!%p1542_p7), 0, %v1250_v36 }
  0x7b   : > { %1207 = vmatpush1.bf16.msra.mxu1 %v1727_v42  ;;  %1167 = vmatprep.subr.bf16.mxu0 %v1732_v43  ;;  %v1255_v42 = vsub.s32 (!%p1542_p7), 1, %v1250_v36  ;;  %v1259_v43 = vsub.s32 (!%p1542_p7), 2, %v1250_v36 }
  0x7c   : > { %1208 = vmatprep.subr.bf16.mxu1 %v1735_v44  ;;  %v1263_v44 = vsub.s32 (!%p1542_p7), 3, %v1250_v36 }
  0x7e   : > { %1168 = vmatpush1.bf16.msra.mxu0 %v1730_v45 }
  0x7f   : > { %1209 = vmatpush1.bf16.msra.mxu1 %v1733_v46  ;;  %1169 = vmatprep.subr.bf16.mxu0 %v1738_v47  ;;  %v1275_v46 = vunpack.c.l.bf16 (!%p1542_p7), %v1273_v37  ;;  %v1276_v47 = vunpack.c.h.bf16 (!%p1542_p7), %v1273_v37 }
  0x80   : > { %1210 = vmatprep.subr.bf16.mxu1 %v1741_v48 }
  0x82   : > { %1170 = vmatpush1.bf16.msra.mxu0 %v1736_v49 }
  0x83   : > { %1211 = vmatpush1.bf16.msra.mxu1 %v1739_v50  ;;  %1171 = vmatprep.subr.bf16.mxu0 %v1744_v51  ;;  %v1277_v50 = vunpack.c.l.bf16 (!%p1542_p7), %v1274_v38  ;;  %v1278_v51 = vunpack.c.h.bf16 (!%p1542_p7), %v1274_v38 }
  0x84   : > { %1212 = vmatprep.subr.bf16.mxu1 %v1747_v52  ;;  %v1252_v52 = vrot.slane (!%p1542_p7), %v1247_v39, %v1251_v41 }
  0x86   : > { %1172 = vmatpush1.bf16.msra.mxu0 %v1742_v53  ;;  %v1256_v53 = vrot.slane (!%p1542_p7), %v1247_v39, %v1255_v42 }
  0x87   : > { %1213 = vmatpush1.bf16.msra.mxu1 %v1745_v54  ;;  %1173 = vmatprep.subr.bf16.mxu0 %v1750_v55  ;;  %v1260_v54 = vrot.slane (!%p1542_p7), %v1247_v39, %v1259_v43  ;;  %v1264_v55 = vrot.slane (!%p1542_p7), %v1247_v39, %v1263_v44 }
  0x88   : > { %1214 = vmatprep.subr.bf16.mxu1 %v1753_v56 }
  0x8a   : > { %1174 = vmatpush1.bf16.msra.mxu0 %v1748_v57 }
  0x8b   : > { %1215 = vmatpush1.bf16.msra.mxu1 %v1751_v58  ;;  %1175 = vmatprep.subr.bf16.mxu0 %v1756_v59 }
  0x8c   : > { %1216 = vmatprep.subr.bf16.mxu1 %v1759_v60 }
  0x8e   : > { %1176 = vmatpush1.bf16.msra.mxu0 %v1754_v61 }
  0x8f   : > { %1217 = vmatpush1.bf16.msra.mxu1 %v1757_v62  ;;  %1177 = vmatprep.subr.bf16.mxu0 %v1762_v63 }
  0x90   : > { %1218 = vmatprep.subr.bf16.mxu1 %v1765_v0 }
  0x92   : > { %1178 = vmatpush1.bf16.msra.mxu0 %v1760_v1 }
  0x93   : > { %1219 = vmatpush1.bf16.msra.mxu1 %v1763_v2  ;;  %1179 = vmatprep.subr.bf16.mxu0 %v1768_v3 }
  0x94   : > { %1220 = vmatprep.subr.bf16.mxu1 %v1771_v4 }
  0x96   : > { %1180 = vmatpush1.bf16.msra.mxu0 %v1766_v5 }
  0x97   : > { %1221 = vmatpush1.bf16.msra.mxu1 %v1769_v6 }
  0x99   : > { %1182 = vmatmul.mubr.bf16.vlgmr.msra.gmra.mrb[4].mxu0 %v1926_v7  ;;  %v281_v7 = vld [vmem:[#allocation2 + $0x10] sm:$0xff] }
  0x9a   : > { %1223 = vmatmul.mubr.bf16.vlgmr.msra.gmra.mrb[4].mxu1 %v1928_v8 }
 0x12c   : > { %v1101_v9 = vpop.f32.mrb[0].mxu0 }
 0x12d   : > { %v1142_v11 = vpop.f32.mrb[0].mxu1  ;;  %v1103_v13 = vpop.f32.mrb[1].mxu0 }
 0x12e   : > { %v1143_v12 = vadd.f32 %v1142_v11, %v1101_v9  ;;  %v1144_v15 = vpop.f32.mrb[1].mxu1  ;;  %v1105_v17 = vpop.f32.mrb[2].mxu0 }
 0x12f   : > { %v1145_v16 = vadd.f32 %v1144_v15, %v1103_v13  ;;  %v1146_v18 = vpop.f32.mrb[2].mxu1  ;;  %v1106_v20 = vpop.f32.mrb[3].mxu0 }
 0x130   : > { %v1231_v19 = vadd.f32 %v1143_v12, %v279_v10  ;;  %v1147_v21 = vpop.f32.mrb[3].mxu1 }
 0x131   : > { %v1232_v22 = vadd.f32 %v1145_v16, %v280_v14 }
 0x132   : > { %1235 = vst [vmem:[#allocation2] sm:$0xff] %v1231_v19 }
 0x133   : > { %1236 = vst [vmem:[#allocation2 + $0x8] sm:$0xff] %v1232_v22 }
 0x139   : > { %v1243_v40 = vld [vmem:[#allocation2] sm:$0xff] (!%p1542_p7) }
 0x13a   : > { %v1244_v45 = vld [vmem:[#allocation2 + $0x8] sm:$0xff] (!%p1542_p7)  ;;  %v1269_v56 = vadd.f32 (!%p1542_p7), %v1252_v52, %v1243_v40 }
 0x13b   : > { %v1270_v57 = vadd.f32 (!%p1542_p7), %v1256_v53, %v1244_v45 }
 0x13c   : > { %v1279_v60 = vadd.f32 (!%p1542_p7), %v1275_v46, %v1269_v56 }
 0x13d   : > { %v1280_v61 = vadd.f32 (!%p1542_p7), %v1276_v47, %v1270_v57 }
 0x13e   : > { %v1283_v0 = vmax.f32 (!%p1542_p7), %v1279_v60, 0.0 }
 0x13f   : > { %v1284_v1 = vmax.f32 (!%p1542_p7), %v1280_v61, 0.0 }
 0x141   : > { %v1549_v4 = vpack.c.bf16 (!%p1542_p7), %v1284_v1, %v1283_v0 }
 0x143   : > { %1303 = vst [vmem:[%s2026_s4] sm:$0xff] (!%p1542_p7), %v1549_v4 }
 0x16c   : > { %v1183_v23 = vpop.f32.mrb[4].mxu0 }
 0x16d   : > { %v1224_v24 = vpop.f32.mrb[4].mxu1  ;;  %v1185_v25 = vpop.f32.mrb[5].mxu0  ;;  %1242 = sbr.rel (%p1542_p7) target bundleno = 388 (0x184), region = 44 }
 0x16e   : > { %v1225_v8 = vadd.f32 %v1224_v24, %v1183_v23  ;;  %v1226_v27 = vpop.f32.mrb[5].mxu1  ;;  %v1187_v29 = vpop.f32.mrb[6].mxu0 }
 0x16f   : > { %v1227_v28 = vadd.f32 %v1226_v27, %v1185_v25  ;;  %v1228_v30 = vpop.f32.mrb[6].mxu1  ;;  %v1188_v32 = vpop.f32.mrb[7].mxu0 }
 0x170   : > { %v1233_v31 = vadd.f32 %v1225_v8, %v281_v7  ;;  %v1229_v33 = vpop.f32.mrb[7].mxu1 }
 0x171   : > { %v1234_v34 = vadd.f32 %v1227_v28, %v282_v26 }
 0x172   : > { %1237 = vst [vmem:[#allocation2 + $0x10] sm:$0xff] %v1233_v31 }
 0x173   : > { %1238 = vst [vmem:[#allocation2 + $0x18] sm:$0xff] %v1234_v34 }
 0x179   : > { %v1245_v48 = vld [vmem:[#allocation2 + $0x10] sm:$0xff] }
 0x17a   : > { %v1246_v49 = vld [vmem:[#allocation2 + $0x18] sm:$0xff]  ;;  %v1271_v58 = vadd.f32 %v1260_v54, %v1245_v48 }
 0x17b   : > { %v1272_v59 = vadd.f32 %v1264_v55, %v1246_v49 }
 0x17c   : > { %v1281_v62 = vadd.f32 %v1277_v50, %v1271_v58 }
 0x17d   : > { %v1282_v63 = vadd.f32 %v1278_v51, %v1272_v59 }
 0x17e   : > { %v1285_v2 = vmax.f32 %v1281_v62, 0.0 }
 0x17f   : > { %v1286_v3 = vmax.f32 %v1282_v63, 0.0 }
 0x181   : > { %v1550_v5 = vpack.c.bf16 %v1286_v3, %v1285_v2 }
 0x183   : > { %1304 = vst [vmem:[%s2026_s4 + $0x8] sm:$0xff] %v1550_v5 }
 0x184 PF: > { %s14_s17 = sadd.s32 1, %s1794_s17   ;;  %s2027_s15 = smov %s1790_s16 }
 0x185   : > { %p11_p8 = scmp.ge.s32.totalorder %s14_s17, 11   ;;  %s2028_s16 = smov %s2030_s18 }
 0x187   :  { %13 = sbr.rel (!%p11_p8) target bundleno = 2 (0x2), region = 80 }

// kernel: resnet4channel_forward.76
= control target key start
LH: loop header
LB: loop body
LE: loop exit
PB: predicated region body
PF: predicated region fallthrough
CT: control target
= control target key end

     0   :  { %s204_s6 = smov 0   ;;  %s225_s0 = inlined_call_operand.vmem [shape: bf16[2,1,512], index: 0, kind: input, shape index: {}]   ;;  %s226_s1 = inlined_call_operand.vmem [shape: f32[2,1,512], index: 1, kind: output, shape index: {}]  }
   0x1 LB: > { %s182_s7 = sadd.s32 4294967295, %s206_s6   ;;  %p186_p0 = scmp.ge.s32.totalorder %s206_s6, 1  ;;  %s206_s6 = sphi %s204_s6, %s11_s6  }
   0x2   : > { %p86_p1 = scmp.lt.s32.totalorder %s206_s6, 3 }
   0x4   : > { %p87_p2 = pnand %p186_p0, %p86_p1 }
   0x5   : > { %p104_p3 = scmp.lt.s32.totalorder (!%p87_p2), %s182_s7, 1  ;;  %v119_v0 = vlaneseq (!%p87_p2)  ;;  %v208_v1 = vmov (!%p87_p2), 1966171168  }
   0x6   : > { %90 = sbr.rel (%p87_p2) target bundleno = 22 (0x16), region = 24  ;;  %v117_v2 = vunpack.c.l.s4 (!%p87_p2), %v208_v1 }
   0x7   : > { %v120_v3 = vshrl.u32 (!%p87_p2), %v119_v0, 7  ;;  %vm126_vm0 = vcmp.lt.s32.totalorder (!%p87_p2), %v119_v0, 512 }
   0x8   : > { %v118_v4 = vunpack.c.0.s8 (!%p87_p2), %v117_v2 }
   0xa   : > { %v121_v5 = vsub.s32 (!%p87_p2), %v118_v4, %v120_v3 }
   0xd   : > { %s228_s7 = smov (!%p104_p3, %s182_s7), 1 }
   0xe   : > { %s187_s8 = sshll.u32 %s228_s7, 2 }
   0xf   : > { %s107_s11 = scalar_lea.vmem %s225_s0, %s187_s8  ;;  %s111_s14 = scalar_lea.vmem %s226_s1, %s187_s8 }
  0x10   : > { %v112_v6 = vld [vmem:[%s107_s11] sm:$0xf] }
  0x11   : > { %v113_v7 = vunpack.c.l.bf16 %v112_v6 }
  0x13   : > { %v122_v8 = vrot.slane %v113_v7, %v121_v5 }
  0x15   : > { %128 = vst.msk [vmem:[%s111_s14] sm:$0xf] %vm126_vm0, %v122_v8 }
  0x16 PF: > { %s11_s6 = sadd.s32 1, %s206_s6  }
  0x17   : > { %p8_p4 = scmp.ge.s32.totalorder %s11_s6, 4  }
  0x19   :  { %10 = sbr.rel (!%p8_p4) target bundleno = 1 (0x1), region = 54 }

// kernel: resnet4channel_forward.72
= control target key start
LH: loop header
LB: loop body
LE: loop exit
PB: predicated region body
PF: predicated region fallthrough
CT: control target
= control target key end

     0   :  { %s1744_s12 = smov 0   ;;  %s1746_s13 = smov 0   ;;  %s1938_s0 = inlined_call_operand.vmem [shape: bf16[8,4608], index: 0, kind: input, shape index: {}]   ;;  %s1939_s1 = inlined_call_operand.vmem [shape: bf16[4608,512], index: 1, kind: input, shape index: {}]   ;;  %s1940_s2 = inlined_call_operand.vmem [shape: f32[1,512], index: 2, kind: input, shape index: {}]   ;;  %s1941_s3 = inlined_call_operand.vmem [shape: bf16[8,512], index: 3, kind: output, shape index: {}]  }
   0x1   :  { %s1748_s14 = smov 0  }
   0x2 LB: > { %s22_s15 = sadd.s32 1, %s1717_s13  ;;  %p1330_p0 = scmp.ge.s32.totalorder %s1721_s14, 1  ;;  %s1721_s14 = sphi %s1748_s14, %s13_s14   ;;  %s1717_s13 = sphi %s1746_s13, %s1943_s13   ;;  %s1713_s12 = sphi %s1744_s12, %s1942_s12  }
   0x3   : > { %p23_p1 = scmp.ge.s32.totalorder %s22_s15, 9  ;;  %p168_p2 = scmp.lt.s32.totalorder %s1721_s14, 10 }
   0x5   : > { %s1945_s15 = smov (%p23_p1, %s22_s15), 0  ;;  %p169_p3 = pnand %p1330_p0, %p168_p2 }
   0x6   : > { %s1331_s16 = sshll.u32 (!%p169_p3), %s1713_s12, 2  ;;  %s1333_s17 = sshll.u32 (!%p169_p3), %s1713_s12, 6 }
   0x7   : > { %172 = sbr.rel (%p169_p3) target bundleno = 386 (0x182), region = 32  ;;  %p205_p4 = scmp.lt.s32.totalorder (!%p169_p3), %s1331_s16, 35 }
   0x8   : > { %p213_p5 = scmp.lt.s32.totalorder (!%p169_p3), %s1333_s17, 575  ;;  %p1336_p6 = scmp.ne.s32.totalorder (!%p169_p3), %s1713_s12, 0 }
   0xe   : > { %s1947_s16 = smov (!%p205_p4, %s1331_s16), 35  ;;  %s1949_s17 = smov (!%p213_p5, %s1333_s17), 575 }
   0xf   : > { %s1332_s18 = sshll.u32 %s1947_s16, 2  ;;  %s1475_s22 = sshll.u32 %s1949_s17, 4  ;;  %v1723_v0 = vmov (!%p1336_p6), 0.0  }
  0x10   : > { %s1769_s21 = scalar_lea.vmem %s1938_s0, %s1332_s18  ;;  %s1774_s25 = scalar_lea.vmem %s1939_s1, %s1475_s22  ;;  %228 = vst [vmem:[#allocation2] sm:$0xff] (!%p1336_p6), %v1723_v0  ;;  %229 = vst [vmem:[#allocation2 + $0x8] sm:$0xff] (!%p1336_p6), %v1723_v0 }
  0x11   : > { %227 = sbr.rel (%p1336_p6) target bundleno = 24 (0x18), region = 36  ;;  %230 = vst [vmem:[#allocation2 + $0x10] sm:$0xff] (!%p1336_p6), %v1723_v0  ;;  %231 = vst [vmem:[#allocation2 + $0x18] sm:$0xff] (!%p1336_p6), %v1723_v0 }
  0x18 PF: > { %v1503_v1 = vld [vmem:[%s1774_s25 + $0x4] ss:$16 sps:$4 sm:$0xff]   ;;  %v1507_v3 = vld [vmem:[%s1774_s25] ss:$16 sps:$4 sm:$0xff]   ;;  %v237_v49 = vld [vmem:[%s1769_s21 + $0x8] sm:$0xff]  ;;  %p1469_p7 = scmp.ne.s32.totalorder %s1713_s12, 8 }
  0x19   : > { %v1505_v2 = vld [vmem:[%s1774_s25 + $0x204] ss:$16 sps:$4 sm:$0xff]   ;;  %1020 = vmatprep.subr.bf16.mxu0 %v1503_v1  ;;  %v1508_v4 = vld [vmem:[%s1774_s25 + $0x200] ss:$16 sps:$4 sm:$0xff]   ;;  %v1340_v52 = vcombine.high %v237_v49, %v237_v49 }
  0x1a   : > { %1061 = vmatprep.subr.bf16.mxu1 %v1505_v2  ;;  %v1509_v5 = vld [vmem:[%s1774_s25 + $0x24] ss:$16 sps:$4 sm:$0xff]   ;;  %1021 = vmatpush1.bf16.msra.mxu0 %v1507_v3  ;;  %v1513_v7 = vld [vmem:[%s1774_s25 + $0x20] ss:$16 sps:$4 sm:$0xff]  }
  0x1b   : > { %1062 = vmatpush1.bf16.msra.mxu1 %v1508_v4  ;;  %v1511_v6 = vld [vmem:[%s1774_s25 + $0x224] ss:$16 sps:$4 sm:$0xff]   ;;  %1022 = vmatprep.subr.bf16.mxu0 %v1509_v5  ;;  %v1514_v8 = vld [vmem:[%s1774_s25 + $0x220] ss:$16 sps:$4 sm:$0xff]   ;;  %v1605_v5 = vld [vmem:[%s1774_s25 + $0xc] ss:$16 sps:$4 sm:$0xff]  }
  0x1c   : > { %1063 = vmatprep.subr.bf16.mxu1 %v1511_v6  ;;  %v1515_v9 = vld [vmem:[%s1774_s25 + $0x44] ss:$16 sps:$4 sm:$0xff]   ;;  %v1519_v11 = vld [vmem:[%s1774_s25 + $0x40] ss:$16 sps:$4 sm:$0xff]   ;;  %1093 = vmatprep.mubr.bf16.mxu1 %v1340_v52  ;;  %v1608_v6 = vld [vmem:[%s1774_s25 + $0x20c] ss:$16 sps:$4 sm:$0xff]  }
  0x1d   : > { %v1517_v10 = vld [vmem:[%s1774_s25 + $0x244] ss:$16 sps:$4 sm:$0xff]   ;;  %v1520_v12 = vld [vmem:[%s1774_s25 + $0x240] ss:$16 sps:$4 sm:$0xff]  }
  0x1e   : > { %1023 = vmatpush1.bf16.msra.mxu0 %v1513_v7  ;;  %v1521_v13 = vld [vmem:[%s1774_s25 + $0x64] ss:$16 sps:$4 sm:$0xff]   ;;  %v1525_v15 = vld [vmem:[%s1774_s25 + $0x60] ss:$16 sps:$4 sm:$0xff]  }
  0x1f   : > { %1064 = vmatpush1.bf16.msra.mxu1 %v1514_v8  ;;  %1024 = vmatprep.subr.bf16.mxu0 %v1515_v9  ;;  %v1523_v14 = vld [vmem:[%s1774_s25 + $0x264] ss:$16 sps:$4 sm:$0xff]   ;;  %v1526_v16 = vld [vmem:[%s1774_s25 + $0x260] ss:$16 sps:$4 sm:$0xff]   ;;  %v1850_v8 = vcombine.low %v237_v49, %v237_v49  ;;  %v1603_v9 = vld [vmem:[%s1774_s25 + $0x8] ss:$16 sps:$4 sm:$0xff]  }
  0x20   : > { %1065 = vmatprep.subr.bf16.mxu1 %v1517_v10  ;;  %v1527_v17 = vld [vmem:[%s1774_s25 + $0x84] ss:$16 sps:$4 sm:$0xff]   ;;  %v1531_v19 = vld [vmem:[%s1774_s25 + $0x80] ss:$16 sps:$4 sm:$0xff]   ;;  %v1606_v10 = vld [vmem:[%s1774_s25 + $0x208] ss:$16 sps:$4 sm:$0xff]  }
  0x21   : > { %v1529_v18 = vld [vmem:[%s1774_s25 + $0x284] ss:$16 sps:$4 sm:$0xff]   ;;  %v1532_v20 = vld [vmem:[%s1774_s25 + $0x280] ss:$16 sps:$4 sm:$0xff]   ;;  %v1663_v49 = vld [vmem:[%s1774_s25 + $0x148] ss:$16 sps:$4 sm:$0xff]  }
  0x22   : > { %1025 = vmatpush1.bf16.msra.mxu0 %v1519_v11  ;;  %v1533_v21 = vld [vmem:[%s1774_s25 + $0xa4] ss:$16 sps:$4 sm:$0xff]   ;;  %v1537_v23 = vld [vmem:[%s1774_s25 + $0xa0] ss:$16 sps:$4 sm:$0xff]   ;;  %v1611_v11 = vld [vmem:[%s1774_s25 + $0x2c] ss:$16 sps:$4 sm:$0xff]  }
  0x23   : > { %1066 = vmatpush1.bf16.msra.mxu1 %v1520_v12  ;;  %1026 = vmatprep.subr.bf16.mxu0 %v1521_v13  ;;  %v1535_v22 = vld [vmem:[%s1774_s25 + $0x2a4] ss:$16 sps:$4 sm:$0xff]   ;;  %v1538_v24 = vld [vmem:[%s1774_s25 + $0x2a0] ss:$16 sps:$4 sm:$0xff]   ;;  %v1614_v12 = vld [vmem:[%s1774_s25 + $0x22c] ss:$16 sps:$4 sm:$0xff]  }
  0x24   : > { %1067 = vmatprep.subr.bf16.mxu1 %v1523_v14  ;;  %v1539_v25 = vld [vmem:[%s1774_s25 + $0xc4] ss:$16 sps:$4 sm:$0xff]   ;;  %v1543_v27 = vld [vmem:[%s1774_s25 + $0xc0] ss:$16 sps:$4 sm:$0xff]   ;;  %v1609_v13 = vld [vmem:[%s1774_s25 + $0x28] ss:$16 sps:$4 sm:$0xff]  }
  0x25   : > { %v1541_v26 = vld [vmem:[%s1774_s25 + $0x2c4] ss:$16 sps:$4 sm:$0xff]   ;;  %v1544_v28 = vld [vmem:[%s1774_s25 + $0x2c0] ss:$16 sps:$4 sm:$0xff]   ;;  %v1612_v14 = vld [vmem:[%s1774_s25 + $0x228] ss:$16 sps:$4 sm:$0xff]  }
  0x26   : > { %1027 = vmatpush1.bf16.msra.mxu0 %v1525_v15  ;;  %v1545_v29 = vld [vmem:[%s1774_s25 + $0xe4] ss:$16 sps:$4 sm:$0xff]   ;;  %v1549_v31 = vld [vmem:[%s1774_s25 + $0xe0] ss:$16 sps:$4 sm:$0xff]   ;;  %v1617_v15 = vld [vmem:[%s1774_s25 + $0x4c] ss:$16 sps:$4 sm:$0xff]  }
  0x27   : > { %1068 = vmatpush1.bf16.msra.mxu1 %v1526_v16  ;;  %1028 = vmatprep.subr.bf16.mxu0 %v1527_v17  ;;  %v1547_v30 = vld [vmem:[%s1774_s25 + $0x2e4] ss:$16 sps:$4 sm:$0xff]   ;;  %v1550_v32 = vld [vmem:[%s1774_s25 + $0x2e0] ss:$16 sps:$4 sm:$0xff]   ;;  %v1620_v16 = vld [vmem:[%s1774_s25 + $0x24c] ss:$16 sps:$4 sm:$0xff]  }
  0x28   : > { %1069 = vmatprep.subr.bf16.mxu1 %v1529_v18  ;;  %v1551_v33 = vld [vmem:[%s1774_s25 + $0x104] ss:$16 sps:$4 sm:$0xff]   ;;  %v1555_v35 = vld [vmem:[%s1774_s25 + $0x100] ss:$16 sps:$4 sm:$0xff]   ;;  %v1615_v17 = vld [vmem:[%s1774_s25 + $0x48] ss:$16 sps:$4 sm:$0xff]  }
  0x29   : > { %v1553_v34 = vld [vmem:[%s1774_s25 + $0x304] ss:$16 sps:$4 sm:$0xff]   ;;  %v1556_v36 = vld [vmem:[%s1774_s25 + $0x300] ss:$16 sps:$4 sm:$0xff]   ;;  %v1618_v18 = vld [vmem:[%s1774_s25 + $0x248] ss:$16 sps:$4 sm:$0xff]  }
  0x2a   : > { %1029 = vmatpush1.bf16.msra.mxu0 %v1531_v19  ;;  %v1557_v37 = vld [vmem:[%s1774_s25 + $0x124] ss:$16 sps:$4 sm:$0xff]   ;;  %v1561_v39 = vld [vmem:[%s1774_s25 + $0x120] ss:$16 sps:$4 sm:$0xff]   ;;  %v1623_v19 = vld [vmem:[%s1774_s25 + $0x6c] ss:$16 sps:$4 sm:$0xff]  }
  0x2b   : > { %1070 = vmatpush1.bf16.msra.mxu1 %v1532_v20  ;;  %1030 = vmatprep.subr.bf16.mxu0 %v1533_v21  ;;  %v1559_v38 = vld [vmem:[%s1774_s25 + $0x324] ss:$16 sps:$4 sm:$0xff]   ;;  %v1562_v40 = vld [vmem:[%s1774_s25 + $0x320] ss:$16 sps:$4 sm:$0xff]   ;;  %v1626_v20 = vld [vmem:[%s1774_s25 + $0x26c] ss:$16 sps:$4 sm:$0xff]  }
  0x2c   : > { %1071 = vmatprep.subr.bf16.mxu1 %v1535_v22  ;;  %v1563_v41 = vld [vmem:[%s1774_s25 + $0x144] ss:$16 sps:$4 sm:$0xff]   ;;  %v1567_v43 = vld [vmem:[%s1774_s25 + $0x140] ss:$16 sps:$4 sm:$0xff]   ;;  %v1621_v21 = vld [vmem:[%s1774_s25 + $0x68] ss:$16 sps:$4 sm:$0xff]  }
  0x2d   : > { %v1565_v42 = vld [vmem:[%s1774_s25 + $0x344] ss:$16 sps:$4 sm:$0xff]   ;;  %v1568_v44 = vld [vmem:[%s1774_s25 + $0x340] ss:$16 sps:$4 sm:$0xff]   ;;  %v1624_v22 = vld [vmem:[%s1774_s25 + $0x268] ss:$16 sps:$4 sm:$0xff]  }
  0x2e   : > { %1031 = vmatpush1.bf16.msra.mxu0 %v1537_v23  ;;  %v1569_v45 = vld [vmem:[%s1774_s25 + $0x164] ss:$16 sps:$4 sm:$0xff]   ;;  %v1573_v50 = vld [vmem:[%s1774_s25 + $0x160] ss:$16 sps:$4 sm:$0xff]   ;;  %v1629_v23 = vld [vmem:[%s1774_s25 + $0x8c] ss:$16 sps:$4 sm:$0xff]  }
  0x2f   : > { %1072 = vmatpush1.bf16.msra.mxu1 %v1538_v24  ;;  %1032 = vmatprep.subr.bf16.mxu0 %v1539_v25  ;;  %v1571_v46 = vld [vmem:[%s1774_s25 + $0x364] ss:$16 sps:$4 sm:$0xff]   ;;  %v1574_v51 = vld [vmem:[%s1774_s25 + $0x360] ss:$16 sps:$4 sm:$0xff]   ;;  %v1632_v24 = vld [vmem:[%s1774_s25 + $0x28c] ss:$16 sps:$4 sm:$0xff]  }
  0x30   : > { %1073 = vmatprep.subr.bf16.mxu1 %v1541_v26  ;;  %v236_v47 = vld [vmem:[%s1769_s21] sm:$0xff]  ;;  %v1627_v25 = vld [vmem:[%s1774_s25 + $0x88] ss:$16 sps:$4 sm:$0xff]  }
  0x31   : > { %v1824_v48 = vcombine.high %v236_v47, %v236_v47  ;;  %v1575_v53 = vld [vmem:[%s1774_s25 + $0x184] ss:$16 sps:$4 sm:$0xff]   ;;  %v1579_v55 = vld [vmem:[%s1774_s25 + $0x180] ss:$16 sps:$4 sm:$0xff]   ;;  %v1848_v7 = vcombine.low %v236_v47, %v236_v47  ;;  %v1630_v26 = vld [vmem:[%s1774_s25 + $0x288] ss:$16 sps:$4 sm:$0xff]  }
  0x32   : > { %1033 = vmatpush1.bf16.msra.mxu0 %v1543_v27  ;;  %v1577_v54 = vld [vmem:[%s1774_s25 + $0x384] ss:$16 sps:$4 sm:$0xff]   ;;  %v1580_v56 = vld [vmem:[%s1774_s25 + $0x380] ss:$16 sps:$4 sm:$0xff]   ;;  %v1635_v27 = vld [vmem:[%s1774_s25 + $0xac] ss:$16 sps:$4 sm:$0xff]  }
  0x33   : > { %1074 = vmatpush1.bf16.msra.mxu1 %v1544_v28  ;;  %1034 = vmatprep.subr.bf16.mxu0 %v1545_v29  ;;  %v1581_v57 = vld [vmem:[%s1774_s25 + $0x1a4] ss:$16 sps:$4 sm:$0xff]   ;;  %v1585_v59 = vld [vmem:[%s1774_s25 + $0x1a0] ss:$16 sps:$4 sm:$0xff]   ;;  %v1638_v28 = vld [vmem:[%s1774_s25 + $0x2ac] ss:$16 sps:$4 sm:$0xff]  }
  0x34   : > { %1075 = vmatprep.subr.bf16.mxu1 %v1547_v30  ;;  %1052 = vmatprep.mubr.bf16.mxu0 %v1824_v48  ;;  %v1583_v58 = vld [vmem:[%s1774_s25 + $0x3a4] ss:$16 sps:$4 sm:$0xff]   ;;  %v1586_v60 = vld [vmem:[%s1774_s25 + $0x3a0] ss:$16 sps:$4 sm:$0xff]   ;;  %v1633_v29 = vld [vmem:[%s1774_s25 + $0xa8] ss:$16 sps:$4 sm:$0xff]  }
  0x35   : > { %v1587_v61 = vld [vmem:[%s1774_s25 + $0x1c4] ss:$16 sps:$4 sm:$0xff]   ;;  %v1591_v63 = vld [vmem:[%s1774_s25 + $0x1c0] ss:$16 sps:$4 sm:$0xff]   ;;  %v1636_v30 = vld [vmem:[%s1774_s25 + $0x2a8] ss:$16 sps:$4 sm:$0xff]  }
  0x36   : > { %1035 = vmatpush1.bf16.msra.mxu0 %v1549_v31  ;;  %v1589_v62 = vld [vmem:[%s1774_s25 + $0x3c4] ss:$16 sps:$4 sm:$0xff]   ;;  %v1592_v0 = vld [vmem:[%s1774_s25 + $0x3c0] ss:$16 sps:$4 sm:$0xff]   ;;  %v1641_v31 = vld [vmem:[%s1774_s25 + $0xcc] ss:$16 sps:$4 sm:$0xff]  }
  0x37   : > { %1076 = vmatpush1.bf16.msra.mxu1 %v1550_v32  ;;  %1036 = vmatprep.subr.bf16.mxu0 %v1551_v33  ;;  %v1593_v1 = vld [vmem:[%s1774_s25 + $0x1e4] ss:$16 sps:$4 sm:$0xff]   ;;  %v1597_v3 = vld [vmem:[%s1774_s25 + $0x1e0] ss:$16 sps:$4 sm:$0xff]   ;;  %v1644_v32 = vld [vmem:[%s1774_s25 + $0x2cc] ss:$16 sps:$4 sm:$0xff]  }
  0x38   : > { %1077 = vmatprep.subr.bf16.mxu1 %v1553_v34  ;;  %v1595_v2 = vld [vmem:[%s1774_s25 + $0x3e4] ss:$16 sps:$4 sm:$0xff]   ;;  %v1598_v4 = vld [vmem:[%s1774_s25 + $0x3e0] ss:$16 sps:$4 sm:$0xff]   ;;  %v1639_v33 = vld [vmem:[%s1774_s25 + $0xc8] ss:$16 sps:$4 sm:$0xff]  }
  0x39   : > { %v1642_v34 = vld [vmem:[%s1774_s25 + $0x2c8] ss:$16 sps:$4 sm:$0xff]   ;;  %v1665_v47 = vld [vmem:[%s1774_s25 + $0x14c] ss:$16 sps:$4 sm:$0xff]  }
  0x3a   : > { %1037 = vmatpush1.bf16.msra.mxu0 %v1555_v35  ;;  %v1647_v35 = vld [vmem:[%s1774_s25 + $0xec] ss:$16 sps:$4 sm:$0xff]  }
  0x3b   : > { %1078 = vmatpush1.bf16.msra.mxu1 %v1556_v36  ;;  %1038 = vmatprep.subr.bf16.mxu0 %v1557_v37  ;;  %v1650_v36 = vld [vmem:[%s1774_s25 + $0x2ec] ss:$16 sps:$4 sm:$0xff]   ;;  %v1645_v37 = vld [vmem:[%s1774_s25 + $0xe8] ss:$16 sps:$4 sm:$0xff]  }
  0x3c   : > { %1079 = vmatprep.subr.bf16.mxu1 %v1559_v38  ;;  %v1648_v38 = vld [vmem:[%s1774_s25 + $0x2e8] ss:$16 sps:$4 sm:$0xff]  }
  0x3e   : > { %1039 = vmatpush1.bf16.msra.mxu0 %v1561_v39  ;;  %v1653_v39 = vld [vmem:[%s1774_s25 + $0x10c] ss:$16 sps:$4 sm:$0xff]  }
  0x3f   : > { %1080 = vmatpush1.bf16.msra.mxu1 %v1562_v40  ;;  %1040 = vmatprep.subr.bf16.mxu0 %v1563_v41  ;;  %v1656_v40 = vld [vmem:[%s1774_s25 + $0x30c] ss:$16 sps:$4 sm:$0xff]   ;;  %v1651_v41 = vld [vmem:[%s1774_s25 + $0x108] ss:$16 sps:$4 sm:$0xff]  }
  0x40   : > { %1081 = vmatprep.subr.bf16.mxu1 %v1565_v42  ;;  %v1654_v42 = vld [vmem:[%s1774_s25 + $0x308] ss:$16 sps:$4 sm:$0xff]  }
  0x42   : > { %1041 = vmatpush1.bf16.msra.mxu0 %v1567_v43  ;;  %v1659_v43 = vld [vmem:[%s1774_s25 + $0x12c] ss:$16 sps:$4 sm:$0xff]  }
  0x43   : > { %1082 = vmatpush1.bf16.msra.mxu1 %v1568_v44  ;;  %1042 = vmatprep.subr.bf16.mxu0 %v1569_v45  ;;  %v1662_v44 = vld [vmem:[%s1774_s25 + $0x32c] ss:$16 sps:$4 sm:$0xff]   ;;  %v1657_v45 = vld [vmem:[%s1774_s25 + $0x128] ss:$16 sps:$4 sm:$0xff]  }
  0x44   : > { %1083 = vmatprep.subr.bf16.mxu1 %v1571_v46  ;;  %v1660_v46 = vld [vmem:[%s1774_s25 + $0x328] ss:$16 sps:$4 sm:$0xff]  }
  0x46   : > { %1043 = vmatpush1.bf16.msra.mxu0 %v1573_v50  ;;  %v1666_v50 = vld [vmem:[%s1774_s25 + $0x348] ss:$16 sps:$4 sm:$0xff]  }
  0x47   : > { %1084 = vmatpush1.bf16.msra.mxu1 %v1574_v51  ;;  %1044 = vmatprep.subr.bf16.mxu0 %v1575_v53  ;;  %v1671_v51 = vld [vmem:[%s1774_s25 + $0x16c] ss:$16 sps:$4 sm:$0xff]   ;;  %v1669_v53 = vld [vmem:[%s1774_s25 + $0x168] ss:$16 sps:$4 sm:$0xff]  }
  0x48   : > { %1085 = vmatprep.subr.bf16.mxu1 %v1577_v54  ;;  %v1672_v54 = vld [vmem:[%s1774_s25 + $0x368] ss:$16 sps:$4 sm:$0xff]  }
  0x4a   : > { %1045 = vmatpush1.bf16.msra.mxu0 %v1579_v55  ;;  %v1677_v55 = vld [vmem:[%s1774_s25 + $0x18c] ss:$16 sps:$4 sm:$0xff]  }
  0x4b   : > { %1086 = vmatpush1.bf16.msra.mxu1 %v1580_v56  ;;  %1046 = vmatprep.subr.bf16.mxu0 %v1581_v57  ;;  %v1680_v56 = vld [vmem:[%s1774_s25 + $0x38c] ss:$16 sps:$4 sm:$0xff]   ;;  %v1675_v57 = vld [vmem:[%s1774_s25 + $0x188] ss:$16 sps:$4 sm:$0xff]  }
  0x4c   : > { %1087 = vmatprep.subr.bf16.mxu1 %v1583_v58  ;;  %v1678_v58 = vld [vmem:[%s1774_s25 + $0x388] ss:$16 sps:$4 sm:$0xff]  }
  0x4e   : > { %1047 = vmatpush1.bf16.msra.mxu0 %v1585_v59  ;;  %v1683_v59 = vld [vmem:[%s1774_s25 + $0x1ac] ss:$16 sps:$4 sm:$0xff]  }
  0x4f   : > { %1088 = vmatpush1.bf16.msra.mxu1 %v1586_v60  ;;  %1048 = vmatprep.subr.bf16.mxu0 %v1587_v61  ;;  %v1686_v60 = vld [vmem:[%s1774_s25 + $0x3ac] ss:$16 sps:$4 sm:$0xff]   ;;  %v1681_v61 = vld [vmem:[%s1774_s25 + $0x1a8] ss:$16 sps:$4 sm:$0xff]  }
  0x50   : > { %1089 = vmatprep.subr.bf16.mxu1 %v1589_v62  ;;  %v1684_v62 = vld [vmem:[%s1774_s25 + $0x3a8] ss:$16 sps:$4 sm:$0xff]  }
  0x52   : > { %1049 = vmatpush1.bf16.msra.mxu0 %v1591_v63  ;;  %v1689_v63 = vld [vmem:[%s1774_s25 + $0x1cc] ss:$16 sps:$4 sm:$0xff]  }
  0x53   : > { %1090 = vmatpush1.bf16.msra.mxu1 %v1592_v0  ;;  %1050 = vmatprep.subr.bf16.mxu0 %v1593_v1  ;;  %v1692_v0 = vld [vmem:[%s1774_s25 + $0x3cc] ss:$16 sps:$4 sm:$0xff]   ;;  %v1687_v1 = vld [vmem:[%s1774_s25 + $0x1c8] ss:$16 sps:$4 sm:$0xff]  }
  0x54   : > { %1091 = vmatprep.subr.bf16.mxu1 %v1595_v2  ;;  %v1690_v2 = vld [vmem:[%s1774_s25 + $0x3c8] ss:$16 sps:$4 sm:$0xff]  }
  0x56   : > { %1051 = vmatpush1.bf16.msra.mxu0 %v1597_v3  ;;  %v1695_v3 = vld [vmem:[%s1774_s25 + $0x1ec] ss:$16 sps:$4 sm:$0xff]  }
  0x57   : > { %1092 = vmatpush1.bf16.msra.mxu1 %v1598_v4  ;;  %1102 = vmatprep.subr.bf16.mxu0 %v1605_v5  ;;  %v1698_v4 = vld [vmem:[%s1774_s25 + $0x3ec] ss:$16 sps:$4 sm:$0xff]   ;;  %v1693_v5 = vld [vmem:[%s1774_s25 + $0x1e8] ss:$16 sps:$4 sm:$0xff]  }
  0x58   : > { %1143 = vmatprep.subr.bf16.mxu1 %v1608_v6  ;;  %v1696_v6 = vld [vmem:[%s1774_s25 + $0x3e8] ss:$16 sps:$4 sm:$0xff]  }
  0x59   : > { %1053 = vmatmul.mubr.bf16.vlgmr.msra.gmra.mrb[0].mxu0 %v1848_v7 }
  0x5a   : > { %1094 = vmatmul.mubr.bf16.vlgmr.msra.gmra.mrb[0].mxu1 %v1850_v8  ;;  %1103 = vmatpush1.bf16.msra.mxu0 %v1603_v9 }
  0x5b   : > { %1144 = vmatpush1.bf16.msra.mxu1 %v1606_v10  ;;  %1104 = vmatprep.subr.bf16.mxu0 %v1611_v11  ;;  %v232_v10 = vld [vmem:[#allocation2] sm:$0xff] }
  0x5c   : > { %1145 = vmatprep.subr.bf16.mxu1 %v1614_v12  ;;  %1134 = vmatprep.mubr.bf16.mxu0 %v1824_v48  ;;  %v1668_v48 = vld [vmem:[%s1774_s25 + $0x34c] ss:$16 sps:$4 sm:$0xff]  }
  0x5d   : > { %1175 = vmatprep.mubr.bf16.mxu1 %v1340_v52  ;;  %v1674_v52 = vld [vmem:[%s1774_s25 + $0x36c] ss:$16 sps:$4 sm:$0xff]  }
  0x5e   : > { %1105 = vmatpush1.bf16.msra.mxu0 %v1609_v13 }
  0x5f   : > { %1146 = vmatpush1.bf16.msra.mxu1 %v1612_v14  ;;  %1106 = vmatprep.subr.bf16.mxu0 %v1617_v15  ;;  %v233_v14 = vld [vmem:[#allocation2 + $0x8] sm:$0xff] }
  0x60   : > { %1147 = vmatprep.subr.bf16.mxu1 %v1620_v16 }
  0x62   : > { %1107 = vmatpush1.bf16.msra.mxu0 %v1615_v17 }
  0x63   : > { %1148 = vmatpush1.bf16.msra.mxu1 %v1618_v18  ;;  %1108 = vmatprep.subr.bf16.mxu0 %v1623_v19 }
  0x64   : > { %1149 = vmatprep.subr.bf16.mxu1 %v1626_v20 }
  0x66   : > { %1109 = vmatpush1.bf16.msra.mxu0 %v1621_v21 }
  0x67   : > { %1150 = vmatpush1.bf16.msra.mxu1 %v1624_v22  ;;  %1110 = vmatprep.subr.bf16.mxu0 %v1629_v23 }
  0x68   : > { %1151 = vmatprep.subr.bf16.mxu1 %v1632_v24 }
  0x6a   : > { %1111 = vmatpush1.bf16.msra.mxu0 %v1627_v25 }
  0x6b   : > { %1152 = vmatpush1.bf16.msra.mxu1 %v1630_v26  ;;  %1112 = vmatprep.subr.bf16.mxu0 %v1635_v27  ;;  %v235_v26 = vld [vmem:[#allocation2 + $0x18] sm:$0xff] }
  0x6c   : > { %1153 = vmatprep.subr.bf16.mxu1 %v1638_v28 }
  0x6e   : > { %1113 = vmatpush1.bf16.msra.mxu0 %v1633_v29 }
  0x6f   : > { %1154 = vmatpush1.bf16.msra.mxu1 %v1636_v30  ;;  %1114 = vmatprep.subr.bf16.mxu0 %v1641_v31 }
  0x70   : > { %1155 = vmatprep.subr.bf16.mxu1 %v1644_v32 }
  0x72   : > { %1115 = vmatpush1.bf16.msra.mxu0 %v1639_v33 }
  0x73   : > { %1156 = vmatpush1.bf16.msra.mxu1 %v1642_v34  ;;  %1116 = vmatprep.subr.bf16.mxu0 %v1647_v35  ;;  %v1202_v35 = vlaneseq (!%p1469_p7) }
  0x74   : > { %1157 = vmatprep.subr.bf16.mxu1 %v1650_v36 }
  0x75   : > { %v1203_v36 = vshrl.u32 (!%p1469_p7), %v1202_v35, 7 }
  0x76   : > { %1117 = vmatpush1.bf16.msra.mxu0 %v1645_v37  ;;  %v1200_v37 = vld [vmem:[%s1940_s2] sm:$0xf] (!%p1469_p7) }
  0x77   : > { %1158 = vmatpush1.bf16.msra.mxu1 %v1648_v38  ;;  %1118 = vmatprep.subr.bf16.mxu0 %v1653_v39  ;;  %v1204_v39 = vsub.s32 (!%p1469_p7), 0, %v1203_v36 }
  0x78   : > { %1159 = vmatprep.subr.bf16.mxu1 %v1656_v40  ;;  %v1208_v40 = vsub.s32 (!%p1469_p7), 1, %v1203_v36 }
  0x7a   : > { %1119 = vmatpush1.bf16.msra.mxu0 %v1651_v41  ;;  %v1212_v41 = vsub.s32 (!%p1469_p7), 2, %v1203_v36 }
  0x7b   : > { %1160 = vmatpush1.bf16.msra.mxu1 %v1654_v42  ;;  %1120 = vmatprep.subr.bf16.mxu0 %v1659_v43  ;;  %v1216_v42 = vsub.s32 (!%p1469_p7), 3, %v1203_v36 }
  0x7c   : > { %1161 = vmatprep.subr.bf16.mxu1 %v1662_v44 }
  0x7e   : > { %1121 = vmatpush1.bf16.msra.mxu0 %v1657_v45 }
  0x7f   : > { %1162 = vmatpush1.bf16.msra.mxu1 %v1660_v46  ;;  %1122 = vmatprep.subr.bf16.mxu0 %v1665_v47  ;;  %v1205_v46 = vrot.slane (!%p1469_p7), %v1200_v37, %v1204_v39  ;;  %v1209_v47 = vrot.slane (!%p1469_p7), %v1200_v37, %v1208_v40 }
  0x80   : > { %1163 = vmatprep.subr.bf16.mxu1 %v1668_v48  ;;  %v1213_v48 = vrot.slane (!%p1469_p7), %v1200_v37, %v1212_v41 }
  0x82   : > { %1123 = vmatpush1.bf16.msra.mxu0 %v1663_v49  ;;  %v1217_v49 = vrot.slane (!%p1469_p7), %v1200_v37, %v1216_v42 }
  0x83   : > { %1164 = vmatpush1.bf16.msra.mxu1 %v1666_v50  ;;  %1124 = vmatprep.subr.bf16.mxu0 %v1671_v51 }
  0x84   : > { %1165 = vmatprep.subr.bf16.mxu1 %v1674_v52 }
  0x86   : > { %1125 = vmatpush1.bf16.msra.mxu0 %v1669_v53 }
  0x87   : > { %1166 = vmatpush1.bf16.msra.mxu1 %v1672_v54  ;;  %1126 = vmatprep.subr.bf16.mxu0 %v1677_v55 }
  0x88   : > { %1167 = vmatprep.subr.bf16.mxu1 %v1680_v56 }
  0x8a   : > { %1127 = vmatpush1.bf16.msra.mxu0 %v1675_v57 }
  0x8b   : > { %1168 = vmatpush1.bf16.msra.mxu1 %v1678_v58  ;;  %1128 = vmatprep.subr.bf16.mxu0 %v1683_v59 }
  0x8c   : > { %1169 = vmatprep.subr.bf16.mxu1 %v1686_v60 }
  0x8e   : > { %1129 = vmatpush1.bf16.msra.mxu0 %v1681_v61 }
  0x8f   : > { %1170 = vmatpush1.bf16.msra.mxu1 %v1684_v62  ;;  %1130 = vmatprep.subr.bf16.mxu0 %v1689_v63 }
  0x90   : > { %1171 = vmatprep.subr.bf16.mxu1 %v1692_v0 }
  0x92   : > { %1131 = vmatpush1.bf16.msra.mxu0 %v1687_v1 }
  0x93   : > { %1172 = vmatpush1.bf16.msra.mxu1 %v1690_v2  ;;  %1132 = vmatprep.subr.bf16.mxu0 %v1695_v3 }
  0x94   : > { %1173 = vmatprep.subr.bf16.mxu1 %v1698_v4 }
  0x96   : > { %1133 = vmatpush1.bf16.msra.mxu0 %v1693_v5 }
  0x97   : > { %1174 = vmatpush1.bf16.msra.mxu1 %v1696_v6 }
  0x99   : > { %1135 = vmatmul.mubr.bf16.vlgmr.msra.gmra.mrb[4].mxu0 %v1848_v7  ;;  %v234_v7 = vld [vmem:[#allocation2 + $0x10] sm:$0xff] }
  0x9a   : > { %1176 = vmatmul.mubr.bf16.vlgmr.msra.gmra.mrb[4].mxu1 %v1850_v8 }
 0x12c   : > { %v1054_v9 = vpop.f32.mrb[0].mxu0 }
 0x12d   : > { %v1095_v11 = vpop.f32.mrb[0].mxu1  ;;  %v1056_v13 = vpop.f32.mrb[1].mxu0 }
 0x12e   : > { %v1096_v12 = vadd.f32 %v1095_v11, %v1054_v9  ;;  %v1097_v15 = vpop.f32.mrb[1].mxu1  ;;  %v1058_v17 = vpop.f32.mrb[2].mxu0 }
 0x12f   : > { %v1098_v16 = vadd.f32 %v1097_v15, %v1056_v13  ;;  %v1099_v18 = vpop.f32.mrb[2].mxu1  ;;  %v1059_v20 = vpop.f32.mrb[3].mxu0 }
 0x130   : > { %v1184_v19 = vadd.f32 %v1096_v12, %v232_v10  ;;  %v1100_v21 = vpop.f32.mrb[3].mxu1 }
 0x131   : > { %v1185_v22 = vadd.f32 %v1098_v16, %v233_v14 }
 0x132   : > { %1188 = vst [vmem:[#allocation2] sm:$0xff] %v1184_v19 }
 0x133   : > { %1189 = vst [vmem:[#allocation2 + $0x8] sm:$0xff] %v1185_v22 }
 0x139   : > { %v1196_v38 = vld [vmem:[#allocation2] sm:$0xff] (!%p1469_p7) }
 0x13a   : > { %v1197_v43 = vld [vmem:[#allocation2 + $0x8] sm:$0xff] (!%p1469_p7)  ;;  %v1222_v50 = vadd.f32 (!%p1469_p7), %v1205_v46, %v1196_v38 }
 0x13b   : > { %v1223_v51 = vadd.f32 (!%p1469_p7), %v1209_v47, %v1197_v43 }
 0x13c   : > { %v1226_v54 = vmax.f32 (!%p1469_p7), %v1222_v50, 0.0 }
 0x13d   : > { %v1227_v55 = vmax.f32 (!%p1469_p7), %v1223_v51, 0.0 }
 0x13f   : > { %v1476_v58 = vpack.c.bf16 (!%p1469_p7), %v1227_v55, %v1226_v54 }
 0x141   : > { %1246 = vst [vmem:[%s1941_s3] sm:$0xff] (!%p1469_p7), %v1476_v58 }
 0x16c   : > { %v1136_v23 = vpop.f32.mrb[4].mxu0 }
 0x16d   : > { %v1177_v24 = vpop.f32.mrb[4].mxu1  ;;  %v1138_v25 = vpop.f32.mrb[5].mxu0  ;;  %1195 = sbr.rel (%p1469_p7) target bundleno = 386 (0x182), region = 40 }
 0x16e   : > { %v1178_v8 = vadd.f32 %v1177_v24, %v1136_v23  ;;  %v1179_v27 = vpop.f32.mrb[5].mxu1  ;;  %v1140_v29 = vpop.f32.mrb[6].mxu0 }
 0x16f   : > { %v1180_v28 = vadd.f32 %v1179_v27, %v1138_v25  ;;  %v1181_v30 = vpop.f32.mrb[6].mxu1  ;;  %v1141_v32 = vpop.f32.mrb[7].mxu0 }
 0x170   : > { %v1186_v31 = vadd.f32 %v1178_v8, %v234_v7  ;;  %v1182_v33 = vpop.f32.mrb[7].mxu1 }
 0x171   : > { %v1187_v34 = vadd.f32 %v1180_v28, %v235_v26 }
 0x172   : > { %1190 = vst [vmem:[#allocation2 + $0x10] sm:$0xff] %v1186_v31 }
 0x173   : > { %1191 = vst [vmem:[#allocation2 + $0x18] sm:$0xff] %v1187_v34 }
 0x179   : > { %v1198_v44 = vld [vmem:[#allocation2 + $0x10] sm:$0xff] }
 0x17a   : > { %v1199_v45 = vld [vmem:[#allocation2 + $0x18] sm:$0xff]  ;;  %v1224_v52 = vadd.f32 %v1213_v48, %v1198_v44 }
 0x17b   : > { %v1225_v53 = vadd.f32 %v1217_v49, %v1199_v45 }
 0x17c   : > { %v1228_v56 = vmax.f32 %v1224_v52, 0.0 }
 0x17d   : > { %v1229_v57 = vmax.f32 %v1225_v53, 0.0 }
 0x17f   : > { %v1477_v59 = vpack.c.bf16 %v1229_v57, %v1228_v56 }
 0x181   : > { %1247 = vst [vmem:[%s1941_s3 + $0x8] sm:$0xff] %v1477_v59 }
 0x182 PF: > { %s13_s14 = sadd.s32 1, %s1721_s14   ;;  %s1942_s12 = smov %s1717_s13 }
 0x183   : > { %p10_p8 = scmp.ge.s32.totalorder %s13_s14, 11   ;;  %s1943_s13 = smov %s1945_s15 }
 0x185   :  { %12 = sbr.rel (!%p10_p8) target bundleno = 2 (0x2), region = 73 }

// kernel: resnet4channel_forward.77
= control target key start
LH: loop header
LB: loop body
LE: loop exit
PB: predicated region body
PF: predicated region fallthrough
CT: control target
= control target key end

     0   :  { %s637_s1 = inlined_call_operand.vmem [shape: bf16[512,128], index: 1, kind: input, shape index: {}]   ;;  %s638_s0 = inlined_call_operand.vmem [shape: bf16[8,512], index: 0, kind: input, shape index: {}]   ;;  %s639_s2 = inlined_call_operand.vmem [shape: f32[1,128], index: 2, kind: input, shape index: {}]   ;;  %s640_s3 = inlined_call_operand.vmem [shape: f32[8,128], index: 3, kind: output, shape index: {}]  }
   0x1   :  { %v473_v0 = vld [vmem:[%s637_s1 + $0x40] sm:$0xff]   ;;  %v477_v4 = vld [vmem:[%s637_s1 + $0x48] sm:$0xff]   ;;  %v481_v8 = vld [vmem:[%s637_s1 + $0x50] sm:$0xff]  }
   0x2   :  { %v474_v1 = vld [vmem:[%s637_s1 + $0xc0] sm:$0xff]   ;;  %429 = vmatprep.subr.bf16.mxu0 %v473_v0  ;;  %v478_v5 = vld [vmem:[%s637_s1 + $0xc8] sm:$0xff]   ;;  %v482_v9 = vld [vmem:[%s637_s1 + $0xd0] sm:$0xff]  }
   0x3   :  { %v475_v2 = vld [vmem:[%s637_s1] sm:$0xff]   ;;  %451 = vmatprep.subr.bf16.mxu1 %v474_v1  ;;  %v479_v6 = vld [vmem:[%s637_s1 + $0x8] sm:$0xff]   ;;  %v483_v10 = vld [vmem:[%s637_s1 + $0x10] sm:$0xff]  }
   0x4   :  { %v476_v3 = vld [vmem:[%s637_s1 + $0x80] sm:$0xff]   ;;  %430 = vmatpush3.bf16.msra.mxu0 %v475_v2  ;;  %v480_v7 = vld [vmem:[%s637_s1 + $0x88] sm:$0xff]   ;;  %v484_v11 = vld [vmem:[%s637_s1 + $0x90] sm:$0xff]  }
   0x5   :  { %452 = vmatpush3.bf16.msra.mxu1 %v476_v3  ;;  %431 = vmatprep.subr.bf16.mxu0 %v477_v4  ;;  %v485_v12 = vld [vmem:[%s637_s1 + $0x58] sm:$0xff]   ;;  %v489_v16 = vld [vmem:[%s637_s1 + $0x60] sm:$0xff]   ;;  %v493_v20 = vld [vmem:[%s637_s1 + $0x68] sm:$0xff]  }
   0x6   :  { %453 = vmatprep.subr.bf16.mxu1 %v478_v5  ;;  %v486_v13 = vld [vmem:[%s637_s1 + $0xd8] sm:$0xff]   ;;  %v490_v17 = vld [vmem:[%s637_s1 + $0xe0] sm:$0xff]   ;;  %v494_v21 = vld [vmem:[%s637_s1 + $0xe8] sm:$0xff]  }
   0x7   :  { %v487_v14 = vld [vmem:[%s637_s1 + $0x18] sm:$0xff]   ;;  %v491_v18 = vld [vmem:[%s637_s1 + $0x20] sm:$0xff]   ;;  %v495_v22 = vld [vmem:[%s637_s1 + $0x28] sm:$0xff]  }
   0x8   :  { %432 = vmatpush3.bf16.msra.mxu0 %v479_v6  ;;  %v488_v15 = vld [vmem:[%s637_s1 + $0x98] sm:$0xff]   ;;  %v492_v19 = vld [vmem:[%s637_s1 + $0xa0] sm:$0xff]   ;;  %v496_v23 = vld [vmem:[%s637_s1 + $0xa8] sm:$0xff]  }
   0x9   :  { %454 = vmatpush3.bf16.msra.mxu1 %v480_v7  ;;  %433 = vmatprep.subr.bf16.mxu0 %v481_v8  ;;  %v497_v24 = vld [vmem:[%s637_s1 + $0x70] sm:$0xff]   ;;  %v501_v28 = vld [vmem:[%s637_s1 + $0x78] sm:$0xff]   ;;  %v21_v32 = vld [vmem:[%s638_s0] sm:$0xff] }
   0xa   :  { %455 = vmatprep.subr.bf16.mxu1 %v482_v9  ;;  %v498_v25 = vld [vmem:[%s637_s1 + $0xf0] sm:$0xff]   ;;  %v502_v29 = vld [vmem:[%s637_s1 + $0xf8] sm:$0xff]   ;;  %v22_v33 = vld [vmem:[%s638_s0 + $0x8] sm:$0xff]  ;;  %v392_v34 = vcombine.low %v21_v32, %v21_v32  ;;  %v393_v35 = vcombine.high %v21_v32, %v21_v32 }
   0xb   :  { %v499_v26 = vld [vmem:[%s637_s1 + $0x30] sm:$0xff]   ;;  %v503_v30 = vld [vmem:[%s637_s1 + $0x38] sm:$0xff]   ;;  %v394_v36 = vcombine.low %v22_v33, %v22_v33  ;;  %v395_v37 = vcombine.high %v22_v33, %v22_v33  ;;  %v428_v46 = vld [vmem:[%s639_s2] ss:$0 sm:$0xff] }
   0xc   :  { %434 = vmatpush3.bf16.msra.mxu0 %v483_v10  ;;  %v500_v27 = vld [vmem:[%s637_s1 + $0xb0] sm:$0xff]   ;;  %v504_v31 = vld [vmem:[%s637_s1 + $0xb8] sm:$0xff]   ;;  %325 = vmatprep.mubr.bf16.mxu0 %v393_v35 }
   0xd   :  { %456 = vmatpush3.bf16.msra.mxu1 %v484_v11  ;;  %435 = vmatprep.subr.bf16.mxu0 %v485_v12 }
   0xe   :  { %457 = vmatprep.subr.bf16.mxu1 %v486_v13  ;;  %365 = vmatprep.mubr.bf16.mxu1 %v395_v37 }
  0x10   :  { %436 = vmatpush3.bf16.msra.mxu0 %v487_v14 }
  0x11   :  { %458 = vmatpush3.bf16.msra.mxu1 %v488_v15  ;;  %437 = vmatprep.subr.bf16.mxu0 %v489_v16 }
  0x12   :  { %459 = vmatprep.subr.bf16.mxu1 %v490_v17 }
  0x14   :  { %438 = vmatpush3.bf16.msra.mxu0 %v491_v18 }
  0x15   :  { %460 = vmatpush3.bf16.msra.mxu1 %v492_v19  ;;  %439 = vmatprep.subr.bf16.mxu0 %v493_v20 }
  0x16   :  { %461 = vmatprep.subr.bf16.mxu1 %v494_v21 }
  0x18   :  { %440 = vmatpush3.bf16.msra.mxu0 %v495_v22 }
  0x19   :  { %462 = vmatpush3.bf16.msra.mxu1 %v496_v23  ;;  %441 = vmatprep.subr.bf16.mxu0 %v497_v24 }
  0x1a   :  { %463 = vmatprep.subr.bf16.mxu1 %v498_v25 }
  0x1c   :  { %442 = vmatpush3.bf16.msra.mxu0 %v499_v26 }
  0x1d   :  { %464 = vmatpush3.bf16.msra.mxu1 %v500_v27  ;;  %443 = vmatprep.subr.bf16.mxu0 %v501_v28 }
  0x1e   :  { %465 = vmatprep.subr.bf16.mxu1 %v502_v29 }
  0x20   :  { %444 = vmatpush3.bf16.msra.mxu0 %v503_v30 }
  0x21   :  { %466 = vmatpush3.bf16.msra.mxu1 %v504_v31 }
  0x23   :  { %326 = vmatmul.mubr.bf16.vlgmr.msra.gmra.mrb[0].mxu0 %v392_v34 }
  0x24   :  { %366 = vmatmul.mubr.bf16.vlgmr.msra.gmra.mrb[0].mxu1 %v394_v36 }
  0xf6   :  { %v445_v38 = vpop.f32.mrb[0].mxu0 }
  0xf7   :  { %v467_v39 = vpop.f32.mrb[0].mxu1  ;;  %v446_v40 = vpop.f32.mrb[1].mxu0 }
  0xf8   :  { %v468_v41 = vpop.f32.mrb[1].mxu1  ;;  %v447_v42 = vadd.f32 %v446_v40, %v445_v38  ;;  %v448_v44 = vpop.f32.mrb[2].mxu0 }
  0xf9   :  { %v469_v43 = vadd.f32 %v468_v41, %v467_v39  ;;  %v470_v45 = vpop.f32.mrb[2].mxu1  ;;  %v449_v47 = vpop.f32.mrb[3].mxu0 }
  0xfa   :  { %v471_v48 = vpop.f32.mrb[3].mxu1 }
  0xfb   :  { %v368_v49 = vadd.f32 %v469_v43, %v447_v42 }
  0xfd   :  { %v386_v50 = vadd.f32 %v428_v46, %v368_v49 }
  0xff   :  { %387 = vst [vmem:[%s640_s3] sm:$0xff] %v386_v50 }

</bundles_post_ra>
